<compile_context>
chip_gen: v5e
topology: v5e:2x2
jax: 0.10.0
libtpu: 0.0.40
codegen_flags: <defaults>
</compile_context>

<pallas_src>
import functools

import jax
import jax.numpy as jnp
from jax import lax
from jax.experimental import pallas as pl
from jax.experimental.pallas import tpu as pltpu


# ----------------------------- Pallas kernel --------------------------------

def _aligned_kernel(H, W, H2, W2, R, PAD,
                    low_ref, hi_ref, hicm_ref, a_l_ref, a_h_ref,
                    upr_ref, cxc_ref, grid_ref, mask_ref, out_ref):
    """One (image, row-block) grid step.

    low_ref  : (HP, Cin)      halo'd low-level tile (R rows + 1-row halo + PAD)
    hi_ref   : (H2, W2*Cin)   high-level feature, row-slab layout (warp stage)
    hicm_ref : (W2*H2, Cin)   high-level feature, coarse-column-major (taps)
    a_l_ref  : (Cin, 18)      down_l (1x1) fused with the 9 flow_make taps
    a_h_ref  : (Cin, 18)      down_h (1x1) fused with the 9 flow_make taps
    upr_ref  : (HP, H2)       bilinear row-interp weights for the halo'd tile
    cxc_ref  : (HP, W2)       bilinear col-interp weights (f32)
    grid_ref : (RW, 2)        base sampling grid, pre-converted to texel units
    mask_ref : (RW, 9)        3x3 zero-padding validity masks
    out_ref  : (RW, Cin)
    """
    f32 = jnp.float32
    RW = R * W
    Cin = low_ref.shape[-1]

    # ---- tap field over the halo'd tile (18 = 9 taps x 2 flow channels) ----
    # low path: down_l fused with the 9 taps -> ONE lane-fused MXU matmul.
    taps = jnp.dot(low_ref[...], a_l_ref[...],
                   preferred_element_type=f32)                     # (HP, 18)

    # high path: down_h fused with the taps as ONE (W2*H2, Cin)@(Cin, 18)
    # matmul (full MXU row utilisation, no per-column concatenates), then the
    # separable bilinear upsample is consumed coarse-column by coarse-column
    # so no (HP, W2*18) slab is ever materialised.
    taps_h = jnp.dot(hicm_ref[...], a_h_ref[...],
                     preferred_element_type=f32)                   # (W2*H2, 18)
    upr = upr_ref[...]                                             # (HP, H2)
    cxc = cxc_ref[...]                                             # (HP, W2) f32
    # TODO(synk): at production W2 (>=32) turn this into lax.fori_loop with
    # pl.ds(pl.multiple_of(c2 * H2, 8), H2) starts to avoid full unrolling.
    for c2 in range(W2):
        th_c = taps_h[c2 * H2:(c2 + 1) * H2, :].astype(upr.dtype)  # (H2, 18)
        up_c = jnp.dot(upr, th_c, preferred_element_type=f32)      # (HP, 18)
        taps = taps + cxc[:, c2:c2 + 1] * up_c

    # ---- flow_make: 3x3 conv (padding=1) as 9 static shifted slices of the
    # halo'd tap field; the mask multiply implements the zero padding exactly
    # (and zeroes any junk read from the guard/halo region). -------------------
    tmask = mask_ref[...]                                          # (RW, 9)
    flow = jnp.zeros((RW, 2), f32)
    for t in range(9):
        dy, dx = t // 3 - 1, t % 3 - 1
        start = PAD + W + dy * W + dx          # always in [PAD-1, PAD+2W+1]
        sh = taps[start:start + RW, 2 * t:2 * t + 2]               # (RW, 2)
        flow = flow + tmask[:, t:t + 1] * sh

    # ---- flow_warp: grid_sample(high, base + flow/[W,H]) --------------------
    # The 1/[W,H] and *[W2,H2]/2 normalisations are folded into the tap
    # weights / base grid in the wrapper, so the coordinate chain is just:
    # idx = base_tex + flow, one floor, one cast, one frac, on (RW, 2).
    idx = grid_ref[...] + flow                                     # texel coords
    i0f = jnp.floor(idx)
    i0 = i0f.astype(jnp.int32)
    frac = idx - i0f

    x0 = i0[:, 0:1]
    y0 = i0[:, 1:2]
    wx1 = frac[:, 0:1]
    wy1 = frac[:, 1:2]

    # row-interp weights: out-of-range rows never match an iota value, which
    # implements grid_sample's zeros padding for free.
    h2_ids = lax.broadcasted_iota(jnp.int32, (1, H2), 1)
    rw_w = (jnp.where(h2_ids == y0, 1.0 - wy1, 0.0) +
            jnp.where(h2_ids == y0 + 1, wy1, 0.0))                 # (RW, H2)
    # column weights hoisted out of the loop as one lane-dense (RW, W2) array.
    w2_ids = lax.broadcasted_iota(jnp.int32, (1, W2), 1)
    cw = (jnp.where(w2_ids == x0, 1.0 - wx1, 0.0) +
          jnp.where(w2_ids == x0 + 1, wx1, 0.0))                   # (RW, W2)

    # separable gather: per coarse column, one (RW,H2)@(H2,Cin) matmul FMA'd
    # straight into the accumulator -> peak live intermediate is (RW, Cin),
    # never (RW, W2*Cin).
    rw_m = rw_w.astype(hi_ref.dtype)
    acc = jnp.zeros((RW, Cin), f32)
    # TODO(synk): lax.fori_loop at production W2; Python loop is fine at W2=8.
    for j in range(W2):
        col = jnp.dot(rw_m, hi_ref[:, j * Cin:(j + 1) * Cin],
                      preferred_element_type=f32)                  # (RW, Cin)
        acc = acc + cw[:, j:j + 1] * col

    # TODO(synk): emit bf16 output here if the consumer tolerates it.
    out_ref[...] = acc.astype(out_ref.dtype)


# ----------------------------- wrapper helpers -------------------------------

def _interp_matrix(out_size, in_size):
    """1-D bilinear interpolation matrix, align_corners=True."""
    if out_size == 1:
        coords = jnp.zeros((1,), jnp.float32)
    else:
        coords = jnp.arange(out_size, dtype=jnp.float32) * (
            (in_size - 1) / (out_size - 1))
    i0 = jnp.clip(jnp.floor(coords), 0, in_size - 1).astype(jnp.int32)
    i1 = jnp.clip(i0 + 1, 0, in_size - 1)
    frac = coords - i0.astype(jnp.float32)
    rows = jnp.arange(out_size)
    m = jnp.zeros((out_size, in_size), jnp.float32)
    m = m.at[rows, i0].add(1.0 - frac)
    m = m.at[rows, i1].add(frac)
    return m


def _base_grid(H, W):
    """Base sampling grid, last dim = [x, y], matching the PyTorch code."""
    xs = jnp.linspace(-1.0, 1.0, W, dtype=jnp.float32)
    ys = jnp.linspace(-1.0, 1.0, H, dtype=jnp.float32)
    gx = jnp.tile(xs[None, :], (H, 1))
    gy = jnp.tile(ys[:, None], (1, W))
    return jnp.stack([gx, gy], axis=-1).reshape(H * W, 2)


def _tap_masks(H, W):
    """Zero-padding validity masks for the 9 taps of a 3x3 conv, (HW, 9)."""
    ys, xs = jnp.meshgrid(jnp.arange(H), jnp.arange(W), indexing="ij")
    ys = ys.reshape(-1)
    xs = xs.reshape(-1)
    masks = []
    for ky in range(3):
        for kx in range(3):
            dy, dx = ky - 1, kx - 1
            ok = ((ys + dy >= 0) & (ys + dy < H) &
                  (xs + dx >= 0) & (xs + dx < W))
            masks.append(ok.astype(jnp.float32))
    return jnp.stack(masks, axis=1)


# ----------------------------- JAX glue --------------------------------------

def aligned_module_forward(low_nchw, high_nchw, w_down_l, w_down_h, w_flow,
                           *, rows_per_block=None, mxu_dtype=jnp.float32,
                           vmem_limit_bytes=64 * 1024 * 1024):
    """Pallas implementation of AlignedModule.forward.

    low_nchw : (N, C_in, H, W)    low-level (high resolution) feature
    high_nchw: (N, C_in, H2, W2)  high-level (low resolution) feature
    w_down_l, w_down_h : (C_out, C_in, 1, 1)  Conv2d weights (no bias)
    w_flow   : (2, 2*C_out, 3, 3)             flow_make weight ([h, low] order)
    rows_per_block : image rows per grid tile (must divide H).  The 3x3 flow
        conv needs a 1-row halo, which is baked into the per-block inputs.
        Shrink together with vmem_limit_bytes on v7x (64 MiB physical VMEM),
        grow on v6e / v5e (128 MiB).
    mxu_dtype : dtype of the MXU matmul operands (f32 or bf16).  Coordinate,
        interpolation-weight and accumulator math always stays in f32.
    returns  : (N, C_in, H, W) float32
    """
    f32 = jnp.float32
    N, Cin, H, W = low_nchw.shape
    _, _, H2, W2 = high_nchw.shape
    Cout = w_down_l.shape[0]
    HW = H * W
    NT = 18                               # 9 taps * 2 flow channels
    PAD = 8                               # guard pixels so every 3x3 shift is a
                                          # plain, in-bounds static slice

    if rows_per_block is None:
        rows_per_block = H
        for r in range(H, 0, -1):         # largest divisor of H giving a
            if H % r == 0 and r * W <= 2048:   # ~<=2048-pixel tile
                rows_per_block = r
                break
    R = rows_per_block
    assert H % R == 0, "rows_per_block must divide H"
    NB = H // R
    RW = R * W
    HP = RW + 2 * W + 2 * PAD             # halo'd tile length in pixels

    # ---- channels-last data layouts -----------------------------------------
    low_cl = jnp.transpose(low_nchw, (0, 2, 3, 1)).reshape(N, HW, Cin)
    # one zero image-row of halo top & bottom + PAD zero guard pixels each side,
    # then per-row-block overlapping windows (the halo).
    low_pad = jnp.pad(low_cl, ((0, 0), (W + PAD, W + PAD), (0, 0)))
    low_halo = jnp.stack(
        [lax.dynamic_slice_in_dim(low_pad, b * RW, HP, axis=1)
         for b in range(NB)], axis=1).astype(mxu_dtype)       # (N, NB, HP, Cin)

    hi_nhwc = jnp.transpose(high_nchw, (0, 2, 3, 1))          # (N, H2, W2, Cin)
    hi_slab = hi_nhwc.reshape(N, H2, W2 * Cin).astype(mxu_dtype)
    hi_cm = jnp.transpose(hi_nhwc, (0, 2, 1, 3)).reshape(
        N, W2 * H2, Cin).astype(mxu_dtype)                    # coarse-col-major

    # ---- weight prep: fold the two 1x1 convs into the 9 flow-conv taps and
    # fold the grid_sample normalisation (1/[W,H] then *[W2,H2]/2) into them.
    wl_mat = jnp.transpose(w_down_l[:, :, 0, 0], (1, 0)).astype(f32)  # (Cin, Cout)
    wh_mat = jnp.transpose(w_down_h[:, :, 0, 0], (1, 0)).astype(f32)
    wf = jnp.transpose(w_flow, (2, 3, 1, 0)).reshape(9, 2 * Cout, 2).astype(f32)
    scale_xy = jnp.asarray([W2 / (2.0 * W), H2 / (2.0 * H)], f32)
    a_h = jnp.einsum("ik,tko->ito", wh_mat, wf[:, :Cout, :]) * scale_xy
    a_l = jnp.einsum("ik,tko->ito", wl_mat, wf[:, Cout:, :]) * scale_xy
    a_h = a_h.reshape(Cin, NT).astype(mxu_dtype)
    a_l = a_l.reshape(Cin, NT).astype(mxu_dtype)

    # ---- separable bilinear-upsample constants (align_corners=True), halo'd --
    ry = _interp_matrix(H, H2)                  # (H, H2)
    cx = _interp_matrix(W, W2)                  # (W, W2)
    upr_pix = jnp.repeat(ry, W, axis=0)         # (HW, H2) row weights per pixel
    upr_pad = jnp.pad(upr_pix, ((W + PAD, W + PAD), (0, 0)))
    upr_halo = jnp.stack(
        [lax.dynamic_slice_in_dim(upr_pad, b * RW, HP, axis=0)
         for b in range(NB)], axis=0).astype(mxu_dtype)       # (NB, HP, H2)
    cxc_halo = jnp.pad(jnp.tile(cx, (R + 2, 1)), ((PAD, PAD), (0, 0)))  # (HP, W2)

    # ---- base grid in texel units, and 3x3 zero-padding validity masks ------
    base = _base_grid(H, W)                     # (HW, 2), last dim [x, y]
    half_sz = jnp.asarray([0.5 * W2, 0.5 * H2], f32)
    base_tex = ((base + 1.0) * half_sz - 0.5).reshape(NB, RW, 2)
    tmask = _tap_masks(H, W).reshape(NB, RW, 9)

    kernel = functools.partial(_aligned_kernel, H, W, H2, W2, R, PAD)
    out_blocks = pl.pallas_call(
        kernel,
        out_shape=jax.ShapeDtypeStruct((N, NB, RW, Cin), f32),
        grid_spec=pltpu.PrefetchScalarGridSpec(
            num_scalar_prefetch=0,
            grid=(N, NB),
            in_specs=[
                pl.BlockSpec((None, None, HP, Cin), lambda n, b: (n, b, 0, 0)),
                pl.BlockSpec((None, H2, W2 * Cin), lambda n, b: (n, 0, 0)),
                pl.BlockSpec((None, W2 * H2, Cin), lambda n, b: (n, 0, 0)),
                pl.BlockSpec((Cin, NT), lambda n, b: (0, 0)),
                pl.BlockSpec((Cin, NT), lambda n, b: (0, 0)),
                pl.BlockSpec((None, HP, H2), lambda n, b: (b, 0, 0)),
                pl.BlockSpec((HP, W2), lambda n, b: (0, 0)),
                pl.BlockSpec((None, RW, 2), lambda n, b: (b, 0, 0)),
                pl.BlockSpec((None, RW, 9), lambda n, b: (b, 0, 0)),
            ],
            out_specs=pl.BlockSpec((None, None, RW, Cin),
                                   lambda n, b: (n, b, 0, 0)),
        ),
        compiler_params=pltpu.CompilerParams(
            dimension_semantics=("parallel", "parallel"),
            vmem_limit_bytes=vmem_limit_bytes),
    )(low_halo, hi_slab, hi_cm, a_l, a_h, upr_halo, cxc_halo, base_tex, tmask)

    out = out_blocks.reshape(N, H, W, Cin)
    return jnp.transpose(out, (0, 3, 1, 2))


# ----------------------------- pure-JAX reference ----------------------------

def _reference_forward(low, high, w_down_l, w_down_h, w_flow):
    """Independent reference (XLA ops only) matching the PyTorch module."""
    N, Cin, H, W = low.shape
    H2, W2 = high.shape[2], high.shape[3]
    dn = ("NCHW", "OIHW", "NCHW")
    prec = lax.Precision.HIGHEST

    low_d = lax.conv_general_dilated(low, w_down_l, (1, 1), "VALID",
                                     dimension_numbers=dn, precision=prec)
    h_d = lax.conv_general_dilated(high, w_down_h, (1, 1), "VALID",
                                   dimension_numbers=dn, precision=prec)

    # bilinear upsample, align_corners=True
    def coords(out_n, in_n):
        if out_n == 1:
            return jnp.zeros((1,), jnp.float32)
        return jnp.arange(out_n, dtype=jnp.float32) * ((in_n - 1) / (out_n - 1))
    ys, xs = coords(H, H2), coords(W, W2)
    y0 = jnp.floor(ys).astype(jnp.int32)
    y1 = jnp.minimum(y0 + 1, H2 - 1)
    fy = ys - y0
    x0 = jnp.floor(xs).astype(jnp.int32)
    x1 = jnp.minimum(x0 + 1, W2 - 1)
    fx = xs - x0
    hr = (h_d[:, :, y0, :] * (1.0 - fy)[None, None, :, None]
          + h_d[:, :, y1, :] * fy[None, None, :, None])
    h_up = (hr[:, :, :, x0] * (1.0 - fx)[None, None, None, :]
            + hr[:, :, :, x1] * fx[None, None, None, :])

    flow = lax.conv_general_dilated(
        jnp.concatenate([h_up, low_d], axis=1), w_flow, (1, 1),
        ((1, 1), (1, 1)), dimension_numbers=dn, precision=prec)

    # grid_sample(high, base + flow/[W, H]): bilinear, zeros, align_corners=False
    gx = jnp.linspace(-1.0, 1.0, W)[None, None, :] + flow[:, 0] / W
    gy = jnp.linspace(-1.0, 1.0, H)[None, :, None] + flow[:, 1] / H
    ix = ((gx + 1.0) * W2 - 1.0) * 0.5
    iy = ((gy + 1.0) * H2 - 1.0) * 0.5
    ix0f = jnp.floor(ix)
    iy0f = jnp.floor(iy)
    ix0 = ix0f.astype(jnp.int32)
    iy0 = iy0f.astype(jnp.int32)
    ix1 = ix0 + 1
    iy1 = iy0 + 1
    wx1 = ix - ix0f
    wx0 = 1.0 - wx1
    wy1 = iy - iy0f
    wy0 = 1.0 - wy1

    hi = jnp.transpose(high, (0, 2, 3, 1))      # (N, H2, W2, Cin)
    b = jnp.arange(N)[:, None, None]

    def corner(yc, xc, wgt):
        ok = ((yc >= 0) & (yc < H2) & (xc >= 0) & (xc < W2)).astype(jnp.float32)
        v = hi[b, jnp.clip(yc, 0, H2 - 1), jnp.clip(xc, 0, W2 - 1)]
        return v * (wgt * ok)[..., None]

    out = (corner(iy0, ix0, wy0 * wx0) + corner(iy0, ix1, wy0 * wx1)
           + corner(iy1, ix0, wy1 * wx0) + corner(iy1, ix1, wy1 * wx1))
    return jnp.transpose(out, (0, 3, 1, 2))


# ----------------------------- demo / check ----------------------------------

if __name__ == "__main__":
    N, Cin, Cout = 2, 4, 4
    H, W = 16, 16      # low-level (fine) feature resolution
    H2, W2 = 8, 8      # high-level (coarse) feature resolution

    key = jax.random.PRNGKey(0)
    k1, k2, k3, k4, k5 = jax.random.split(key, 5)
    low_feature = jax.random.normal(k1, (N, Cin, H, W), jnp.float32)
    h_feature = jax.random.normal(k2, (N, Cin, H2, W2), jnp.float32)
    w_down_l = jax.random.normal(k3, (Cout, Cin, 1, 1), jnp.float32) * 0.5
    w_down_h = jax.random.normal(k4, (Cout, Cin, 1, 1), jnp.float32) * 0.5
    w_flow = jax.random.normal(k5, (2, 2 * Cout, 3, 3), jnp.float32) * 0.1

    ref = jax.block_until_ready(
        _reference_forward(low_feature, h_feature, w_down_l, w_down_h, w_flow))
    ref_scale = max(float(jnp.max(jnp.abs(ref))), 1e-6)

    # f32 MXU operands, 2 row-blocks -> exercises the halo across a block edge.
    out = aligned_module_forward(low_feature, h_feature, w_down_l, w_down_h,
                                 w_flow, rows_per_block=8,
                                 mxu_dtype=jnp.float32)
    out = jax.block_until_ready(out)
    assert out.shape == (N, Cin, H, W)
    assert bool(jnp.all(jnp.isfinite(out)))
    err = float(jnp.max(jnp.abs(out - ref))) / ref_scale
    assert err < 1e-2, f"f32 kernel/reference mismatch, max rel err {err}"

    # bf16 MXU operands (coordinate math stays f32), default single row-block.
    out_bf = aligned_module_forward(low_feature, h_feature, w_down_l, w_down_h,
                                    w_flow, mxu_dtype=jnp.bfloat16)
    out_bf = jax.block_until_ready(out_bf)
    assert bool(jnp.all(jnp.isfinite(out_bf)))
    err_bf = float(jnp.max(jnp.abs(out_bf - ref))) / ref_scale
    assert err_bf < 3e-2, f"bf16 kernel/reference mismatch, max rel err {err_bf}"

    print("KERNEL_OK")
</pallas_src>

<mosaic_0001>
module attributes {stable_mosaic.version = 11 : i64} {
  func.func @_aligned_kernel(%arg0: i32, %arg1: i32, %arg2: memref<1x1x176x4xf32, #tpu.memory_space<vmem>>, %arg3: memref<1x8x32xf32, #tpu.memory_space<vmem>>, %arg4: memref<1x64x4xf32, #tpu.memory_space<vmem>>, %arg5: memref<4x18xf32, #tpu.memory_space<vmem>>, %arg6: memref<4x18xf32, #tpu.memory_space<vmem>>, %arg7: memref<1x176x8xf32, #tpu.memory_space<vmem>>, %arg8: memref<176x8xf32, #tpu.memory_space<vmem>>, %arg9: memref<1x128x2xf32, #tpu.memory_space<vmem>>, %arg10: memref<1x128x9xf32, #tpu.memory_space<vmem>>, %arg11: memref<1x1x128x4xf32, #tpu.memory_space<vmem>>) attributes {dimension_semantics = [#tpu.dimension_semantics<parallel>, #tpu.dimension_semantics<parallel>], iteration_bounds = array<i64: 2, 2>, scalar_prefetch = 0 : i64, scratch_operands = 0 : i64, tpu.core_type = #tpu.core_type<tc>, window_params = [{transform_indices = @transform_0, window_bounds = array<i64: 1, 1, 176, 4>}, {transform_indices = @transform_1, window_bounds = array<i64: 1, 8, 32>}, {transform_indices = @transform_2, window_bounds = array<i64: 1, 64, 4>}, {pipeline_mode = #tpu.pipeline_mode<synchronous>, transform_indices = @transform_3, window_bounds = array<i64: 4, 18>}, {pipeline_mode = #tpu.pipeline_mode<synchronous>, transform_indices = @transform_4, window_bounds = array<i64: 4, 18>}, {transform_indices = @transform_5, window_bounds = array<i64: 1, 176, 8>}, {pipeline_mode = #tpu.pipeline_mode<synchronous>, transform_indices = @transform_6, window_bounds = array<i64: 176, 8>}, {transform_indices = @transform_7, window_bounds = array<i64: 1, 128, 2>}, {transform_indices = @transform_8, window_bounds = array<i64: 1, 128, 9>}, {transform_indices = @transform_9, window_bounds = array<i64: 1, 1, 128, 4>}]} {
    %c0 = arith.constant 0 : index
    %c0_0 = arith.constant 0 : index
    %c0_1 = arith.constant 0 : index
    %c0_2 = arith.constant 0 : index
    %0 = vector.load %arg2[%c0, %c0_0, %c0_1, %c0_2] : memref<1x1x176x4xf32, #tpu.memory_space<vmem>>, vector<1x1x176x4xf32>
    %1 = vector.shape_cast %0 : vector<1x1x176x4xf32> to vector<176x4xf32>
    %c0_3 = arith.constant 0 : index
    %c0_4 = arith.constant 0 : index
    %2 = vector.load %arg5[%c0_3, %c0_4] : memref<4x18xf32, #tpu.memory_space<vmem>>, vector<4x18xf32>
    %cst = arith.constant dense<0.000000e+00> : vector<176x18xf32>
    %3 = tpu.matmul %1, %2, %cst {dimension_numbers = #tpu.dot_dimension_numbers<[1], [0], [0], [1], [0, 0, 1, 1], [], []>} : vector<176x4xf32>, vector<4x18xf32>, vector<176x18xf32> -> vector<176x18xf32>
    %c0_5 = arith.constant 0 : index
    %c0_6 = arith.constant 0 : index
    %c0_7 = arith.constant 0 : index
    %4 = vector.load %arg4[%c0_5, %c0_6, %c0_7] : memref<1x64x4xf32, #tpu.memory_space<vmem>>, vector<1x64x4xf32>
    %5 = vector.shape_cast %4 : vector<1x64x4xf32> to vector<64x4xf32>
    %c0_8 = arith.constant 0 : index
    %c0_9 = arith.constant 0 : index
    %6 = vector.load %arg6[%c0_8, %c0_9] : memref<4x18xf32, #tpu.memory_space<vmem>>, vector<4x18xf32>
    %cst_10 = arith.constant dense<0.000000e+00> : vector<64x18xf32>
    %7 = tpu.matmul %5, %6, %cst_10 {dimension_numbers = #tpu.dot_dimension_numbers<[1], [0], [0], [1], [0, 0, 1, 1], [], []>} : vector<64x4xf32>, vector<4x18xf32>, vector<64x18xf32> -> vector<64x18xf32>
    %c0_11 = arith.constant 0 : index
    %c0_12 = arith.constant 0 : index
    %c0_13 = arith.constant 0 : index
    %8 = vector.load %arg7[%c0_11, %c0_12, %c0_13] : memref<1x176x8xf32, #tpu.memory_space<vmem>>, vector<1x176x8xf32>
    %9 = vector.shape_cast %8 : vector<1x176x8xf32> to vector<176x8xf32>
    %c0_14 = arith.constant 0 : index
    %c0_15 = arith.constant 0 : index
    %10 = vector.load %arg8[%c0_14, %c0_15] : memref<176x8xf32, #tpu.memory_space<vmem>>, vector<176x8xf32>
    %11 = vector.extract_strided_slice %7 {offsets = [0, 0], sizes = [8, 18], strides = [1, 1]} : vector<64x18xf32> to vector<8x18xf32>
    %cst_16 = arith.constant dense<0.000000e+00> : vector<176x18xf32>
    %12 = tpu.matmul %9, %11, %cst_16 {dimension_numbers = #tpu.dot_dimension_numbers<[1], [0], [0], [1], [0, 0, 1, 1], [], []>} : vector<176x8xf32>, vector<8x18xf32>, vector<176x18xf32> -> vector<176x18xf32>
    %13 = vector.extract_strided_slice %10 {offsets = [0, 0], sizes = [176, 1], strides = [1, 1]} : vector<176x8xf32> to vector<176x1xf32>
    %14 = vector.broadcast %13 : vector<176x1xf32> to vector<176x18xf32>
    %15 = arith.mulf %14, %12 : vector<176x18xf32>
    %16 = arith.addf %3, %15 : vector<176x18xf32>
    %17 = vector.extract_strided_slice %7 {offsets = [8, 0], sizes = [8, 18], strides = [1, 1]} : vector<64x18xf32> to vector<8x18xf32>
    %cst_17 = arith.constant dense<0.000000e+00> : vector<176x18xf32>
    %18 = tpu.matmul %9, %17, %cst_17 {dimension_numbers = #tpu.dot_dimension_numbers<[1], [0], [0], [1], [0, 0, 1, 1], [], []>} : vector<176x8xf32>, vector<8x18xf32>, vector<176x18xf32> -> vector<176x18xf32>
    %19 = vector.extract_strided_slice %10 {offsets = [0, 1], sizes = [176, 1], strides = [1, 1]} : vector<176x8xf32> to vector<176x1xf32>
    %20 = vector.broadcast %19 : vector<176x1xf32> to vector<176x18xf32>
    %21 = arith.mulf %20, %18 : vector<176x18xf32>
    %22 = arith.addf %16, %21 : vector<176x18xf32>
    %23 = vector.extract_strided_slice %7 {offsets = [16, 0], sizes = [8, 18], strides = [1, 1]} : vector<64x18xf32> to vector<8x18xf32>
    %cst_18 = arith.constant dense<0.000000e+00> : vector<176x18xf32>
    %24 = tpu.matmul %9, %23, %cst_18 {dimension_numbers = #tpu.dot_dimension_numbers<[1], [0], [0], [1], [0, 0, 1, 1], [], []>} : vector<176x8xf32>, vector<8x18xf32>, vector<176x18xf32> -> vector<176x18xf32>
    %25 = vector.extract_strided_slice %10 {offsets = [0, 2], sizes = [176, 1], strides = [1, 1]} : vector<176x8xf32> to vector<176x1xf32>
    %26 = vector.broadcast %25 : vector<176x1xf32> to vector<176x18xf32>
    %27 = arith.mulf %26, %24 : vector<176x18xf32>
    %28 = arith.addf %22, %27 : vector<176x18xf32>
    %29 = vector.extract_strided_slice %7 {offsets = [24, 0], sizes = [8, 18], strides = [1, 1]} : vector<64x18xf32> to vector<8x18xf32>
    %cst_19 = arith.constant dense<0.000000e+00> : vector<176x18xf32>
    %30 = tpu.matmul %9, %29, %cst_19 {dimension_numbers = #tpu.dot_dimension_numbers<[1], [0], [0], [1], [0, 0, 1, 1], [], []>} : vector<176x8xf32>, vector<8x18xf32>, vector<176x18xf32> -> vector<176x18xf32>
    %31 = vector.extract_strided_slice %10 {offsets = [0, 3], sizes = [176, 1], strides = [1, 1]} : vector<176x8xf32> to vector<176x1xf32>
    %32 = vector.broadcast %31 : vector<176x1xf32> to vector<176x18xf32>
    %33 = arith.mulf %32, %30 : vector<176x18xf32>
    %34 = arith.addf %28, %33 : vector<176x18xf32>
    %35 = vector.extract_strided_slice %7 {offsets = [32, 0], sizes = [8, 18], strides = [1, 1]} : vector<64x18xf32> to vector<8x18xf32>
    %cst_20 = arith.constant dense<0.000000e+00> : vector<176x18xf32>
    %36 = tpu.matmul %9, %35, %cst_20 {dimension_numbers = #tpu.dot_dimension_numbers<[1], [0], [0], [1], [0, 0, 1, 1], [], []>} : vector<176x8xf32>, vector<8x18xf32>, vector<176x18xf32> -> vector<176x18xf32>
    %37 = vector.extract_strided_slice %10 {offsets = [0, 4], sizes = [176, 1], strides = [1, 1]} : vector<176x8xf32> to vector<176x1xf32>
    %38 = vector.broadcast %37 : vector<176x1xf32> to vector<176x18xf32>
    %39 = arith.mulf %38, %36 : vector<176x18xf32>
    %40 = arith.addf %34, %39 : vector<176x18xf32>
    %41 = vector.extract_strided_slice %7 {offsets = [40, 0], sizes = [8, 18], strides = [1, 1]} : vector<64x18xf32> to vector<8x18xf32>
    %cst_21 = arith.constant dense<0.000000e+00> : vector<176x18xf32>
    %42 = tpu.matmul %9, %41, %cst_21 {dimension_numbers = #tpu.dot_dimension_numbers<[1], [0], [0], [1], [0, 0, 1, 1], [], []>} : vector<176x8xf32>, vector<8x18xf32>, vector<176x18xf32> -> vector<176x18xf32>
    %43 = vector.extract_strided_slice %10 {offsets = [0, 5], sizes = [176, 1], strides = [1, 1]} : vector<176x8xf32> to vector<176x1xf32>
    %44 = vector.broadcast %43 : vector<176x1xf32> to vector<176x18xf32>
    %45 = arith.mulf %44, %42 : vector<176x18xf32>
    %46 = arith.addf %40, %45 : vector<176x18xf32>
    %47 = vector.extract_strided_slice %7 {offsets = [48, 0], sizes = [8, 18], strides = [1, 1]} : vector<64x18xf32> to vector<8x18xf32>
    %cst_22 = arith.constant dense<0.000000e+00> : vector<176x18xf32>
    %48 = tpu.matmul %9, %47, %cst_22 {dimension_numbers = #tpu.dot_dimension_numbers<[1], [0], [0], [1], [0, 0, 1, 1], [], []>} : vector<176x8xf32>, vector<8x18xf32>, vector<176x18xf32> -> vector<176x18xf32>
    %49 = vector.extract_strided_slice %10 {offsets = [0, 6], sizes = [176, 1], strides = [1, 1]} : vector<176x8xf32> to vector<176x1xf32>
    %50 = vector.broadcast %49 : vector<176x1xf32> to vector<176x18xf32>
    %51 = arith.mulf %50, %48 : vector<176x18xf32>
    %52 = arith.addf %46, %51 : vector<176x18xf32>
    %53 = vector.extract_strided_slice %7 {offsets = [56, 0], sizes = [8, 18], strides = [1, 1]} : vector<64x18xf32> to vector<8x18xf32>
    %cst_23 = arith.constant dense<0.000000e+00> : vector<176x18xf32>
    %54 = tpu.matmul %9, %53, %cst_23 {dimension_numbers = #tpu.dot_dimension_numbers<[1], [0], [0], [1], [0, 0, 1, 1], [], []>} : vector<176x8xf32>, vector<8x18xf32>, vector<176x18xf32> -> vector<176x18xf32>
    %55 = vector.extract_strided_slice %10 {offsets = [0, 7], sizes = [176, 1], strides = [1, 1]} : vector<176x8xf32> to vector<176x1xf32>
    %56 = vector.broadcast %55 : vector<176x1xf32> to vector<176x18xf32>
    %57 = arith.mulf %56, %54 : vector<176x18xf32>
    %58 = arith.addf %52, %57 : vector<176x18xf32>
    %c0_24 = arith.constant 0 : index
    %c0_25 = arith.constant 0 : index
    %c0_26 = arith.constant 0 : index
    %59 = vector.load %arg10[%c0_24, %c0_25, %c0_26] : memref<1x128x9xf32, #tpu.memory_space<vmem>>, vector<1x128x9xf32>
    %60 = vector.shape_cast %59 : vector<1x128x9xf32> to vector<128x9xf32>
    %cst_27 = arith.constant 0.000000e+00 : f32
    %61 = vector.broadcast %cst_27 : f32 to vector<128x2xf32>
    %62 = vector.extract_strided_slice %58 {offsets = [7, 0], sizes = [128, 2], strides = [1, 1]} : vector<176x18xf32> to vector<128x2xf32>
    %63 = vector.extract_strided_slice %60 {offsets = [0, 0], sizes = [128, 1], strides = [1, 1]} : vector<128x9xf32> to vector<128x1xf32>
    %64 = vector.broadcast %63 : vector<128x1xf32> to vector<128x2xf32>
    %65 = arith.mulf %64, %62 : vector<128x2xf32>
    %66 = arith.addf %61, %65 : vector<128x2xf32>
    %67 = vector.extract_strided_slice %58 {offsets = [8, 2], sizes = [128, 2], strides = [1, 1]} : vector<176x18xf32> to vector<128x2xf32>
    %68 = vector.extract_strided_slice %60 {offsets = [0, 1], sizes = [128, 1], strides = [1, 1]} : vector<128x9xf32> to vector<128x1xf32>
    %69 = vector.broadcast %68 : vector<128x1xf32> to vector<128x2xf32>
    %70 = arith.mulf %69, %67 : vector<128x2xf32>
    %71 = arith.addf %66, %70 : vector<128x2xf32>
    %72 = vector.extract_strided_slice %58 {offsets = [9, 4], sizes = [128, 2], strides = [1, 1]} : vector<176x18xf32> to vector<128x2xf32>
    %73 = vector.extract_strided_slice %60 {offsets = [0, 2], sizes = [128, 1], strides = [1, 1]} : vector<128x9xf32> to vector<128x1xf32>
    %74 = vector.broadcast %73 : vector<128x1xf32> to vector<128x2xf32>
    %75 = arith.mulf %74, %72 : vector<128x2xf32>
    %76 = arith.addf %71, %75 : vector<128x2xf32>
    %77 = vector.extract_strided_slice %58 {offsets = [23, 6], sizes = [128, 2], strides = [1, 1]} : vector<176x18xf32> to vector<128x2xf32>
    %78 = vector.extract_strided_slice %60 {offsets = [0, 3], sizes = [128, 1], strides = [1, 1]} : vector<128x9xf32> to vector<128x1xf32>
    %79 = vector.broadcast %78 : vector<128x1xf32> to vector<128x2xf32>
    %80 = arith.mulf %79, %77 : vector<128x2xf32>
    %81 = arith.addf %76, %80 : vector<128x2xf32>
    %82 = vector.extract_strided_slice %58 {offsets = [24, 8], sizes = [128, 2], strides = [1, 1]} : vector<176x18xf32> to vector<128x2xf32>
    %83 = vector.extract_strided_slice %60 {offsets = [0, 4], sizes = [128, 1], strides = [1, 1]} : vector<128x9xf32> to vector<128x1xf32>
    %84 = vector.broadcast %83 : vector<128x1xf32> to vector<128x2xf32>
    %85 = arith.mulf %84, %82 : vector<128x2xf32>
    %86 = arith.addf %81, %85 : vector<128x2xf32>
    %87 = vector.extract_strided_slice %58 {offsets = [25, 10], sizes = [128, 2], strides = [1, 1]} : vector<176x18xf32> to vector<128x2xf32>
    %88 = vector.extract_strided_slice %60 {offsets = [0, 5], sizes = [128, 1], strides = [1, 1]} : vector<128x9xf32> to vector<128x1xf32>
    %89 = vector.broadcast %88 : vector<128x1xf32> to vector<128x2xf32>
    %90 = arith.mulf %89, %87 : vector<128x2xf32>
    %91 = arith.addf %86, %90 : vector<128x2xf32>
    %92 = vector.extract_strided_slice %58 {offsets = [39, 12], sizes = [128, 2], strides = [1, 1]} : vector<176x18xf32> to vector<128x2xf32>
    %93 = vector.extract_strided_slice %60 {offsets = [0, 6], sizes = [128, 1], strides = [1, 1]} : vector<128x9xf32> to vector<128x1xf32>
    %94 = vector.broadcast %93 : vector<128x1xf32> to vector<128x2xf32>
    %95 = arith.mulf %94, %92 : vector<128x2xf32>
    %96 = arith.addf %91, %95 : vector<128x2xf32>
    %97 = vector.extract_strided_slice %58 {offsets = [40, 14], sizes = [128, 2], strides = [1, 1]} : vector<176x18xf32> to vector<128x2xf32>
    %98 = vector.extract_strided_slice %60 {offsets = [0, 7], sizes = [128, 1], strides = [1, 1]} : vector<128x9xf32> to vector<128x1xf32>
    %99 = vector.broadcast %98 : vector<128x1xf32> to vector<128x2xf32>
    %100 = arith.mulf %99, %97 : vector<128x2xf32>
    %101 = arith.addf %96, %100 : vector<128x2xf32>
    %102 = vector.extract_strided_slice %58 {offsets = [41, 16], sizes = [128, 2], strides = [1, 1]} : vector<176x18xf32> to vector<128x2xf32>
    %103 = vector.extract_strided_slice %60 {offsets = [0, 8], sizes = [128, 1], strides = [1, 1]} : vector<128x9xf32> to vector<128x1xf32>
    %104 = vector.broadcast %103 : vector<128x1xf32> to vector<128x2xf32>
    %105 = arith.mulf %104, %102 : vector<128x2xf32>
    %106 = arith.addf %101, %105 : vector<128x2xf32>
    %c0_28 = arith.constant 0 : index
    %c0_29 = arith.constant 0 : index
    %c0_30 = arith.constant 0 : index
    %107 = vector.load %arg9[%c0_28, %c0_29, %c0_30] : memref<1x128x2xf32, #tpu.memory_space<vmem>>, vector<1x128x2xf32>
    %108 = vector.shape_cast %107 : vector<1x128x2xf32> to vector<128x2xf32>
    %109 = arith.addf %108, %106 : vector<128x2xf32>
    %110 = math.floor %109 : vector<128x2xf32>
    %111 = arith.fptosi %110 : vector<128x2xf32> to vector<128x2xi32>
    %112 = arith.subf %109, %110 : vector<128x2xf32>
    %113 = vector.extract_strided_slice %111 {offsets = [0, 0], sizes = [128, 1], strides = [1, 1]} : vector<128x2xi32> to vector<128x1xi32>
    %114 = vector.extract_strided_slice %111 {offsets = [0, 1], sizes = [128, 1], strides = [1, 1]} : vector<128x2xi32> to vector<128x1xi32>
    %115 = vector.extract_strided_slice %112 {offsets = [0, 0], sizes = [128, 1], strides = [1, 1]} : vector<128x2xf32> to vector<128x1xf32>
    %116 = vector.extract_strided_slice %112 {offsets = [0, 1], sizes = [128, 1], strides = [1, 1]} : vector<128x2xf32> to vector<128x1xf32>
    %117 = tpu.iota {dimensions = array<i32: 1>} : vector<1x8xi32>
    %118 = vector.broadcast %117 : vector<1x8xi32> to vector<128x8xi32>
    %119 = vector.broadcast %114 : vector<128x1xi32> to vector<128x8xi32>
    %120 = arith.cmpi eq, %118, %119 : vector<128x8xi32>
    %cst_31 = arith.constant 1.000000e+00 : f32
    %121 = vector.broadcast %cst_31 : f32 to vector<128x1xf32>
    %122 = arith.subf %121, %116 : vector<128x1xf32>
    %cst_32 = arith.constant 0.000000e+00 : f32
    %123 = vector.shape_cast %122 : vector<128x1xf32> to vector<128x1xf32>
    %124 = vector.broadcast %123 : vector<128x1xf32> to vector<128x8xf32>
    %125 = vector.broadcast %cst_32 : f32 to vector<128x8xf32>
    %126 = arith.select %120, %124, %125 : vector<128x8xi1>, vector<128x8xf32>
    %c1_i32 = arith.constant 1 : i32
    %127 = vector.broadcast %c1_i32 : i32 to vector<128x1xi32>
    %128 = arith.addi %114, %127 : vector<128x1xi32>
    %129 = vector.broadcast %117 : vector<1x8xi32> to vector<128x8xi32>
    %130 = vector.broadcast %128 : vector<128x1xi32> to vector<128x8xi32>
    %131 = arith.cmpi eq, %129, %130 : vector<128x8xi32>
    %cst_33 = arith.constant 0.000000e+00 : f32
    %132 = vector.shape_cast %116 : vector<128x1xf32> to vector<128x1xf32>
    %133 = vector.broadcast %132 : vector<128x1xf32> to vector<128x8xf32>
    %134 = vector.broadcast %cst_33 : f32 to vector<128x8xf32>
    %135 = arith.select %131, %133, %134 : vector<128x8xi1>, vector<128x8xf32>
    %136 = arith.addf %126, %135 : vector<128x8xf32>
    %137 = tpu.iota {dimensions = array<i32: 1>} : vector<1x8xi32>
    %138 = vector.broadcast %137 : vector<1x8xi32> to vector<128x8xi32>
    %139 = vector.broadcast %113 : vector<128x1xi32> to vector<128x8xi32>
    %140 = arith.cmpi eq, %138, %139 : vector<128x8xi32>
    %cst_34 = arith.constant 1.000000e+00 : f32
    %141 = vector.broadcast %cst_34 : f32 to vector<128x1xf32>
    %142 = arith.subf %141, %115 : vector<128x1xf32>
    %cst_35 = arith.constant 0.000000e+00 : f32
    %143 = vector.shape_cast %142 : vector<128x1xf32> to vector<128x1xf32>
    %144 = vector.broadcast %143 : vector<128x1xf32> to vector<128x8xf32>
    %145 = vector.broadcast %cst_35 : f32 to vector<128x8xf32>
    %146 = arith.select %140, %144, %145 : vector<128x8xi1>, vector<128x8xf32>
    %c1_i32_36 = arith.constant 1 : i32
    %147 = vector.broadcast %c1_i32_36 : i32 to vector<128x1xi32>
    %148 = arith.addi %113, %147 : vector<128x1xi32>
    %149 = vector.broadcast %137 : vector<1x8xi32> to vector<128x8xi32>
    %150 = vector.broadcast %148 : vector<128x1xi32> to vector<128x8xi32>
    %151 = arith.cmpi eq, %149, %150 : vector<128x8xi32>
    %cst_37 = arith.constant 0.000000e+00 : f32
    %152 = vector.shape_cast %115 : vector<128x1xf32> to vector<128x1xf32>
    %153 = vector.broadcast %152 : vector<128x1xf32> to vector<128x8xf32>
    %154 = vector.broadcast %cst_37 : f32 to vector<128x8xf32>
    %155 = arith.select %151, %153, %154 : vector<128x8xi1>, vector<128x8xf32>
    %156 = arith.addf %146, %155 : vector<128x8xf32>
    %cst_38 = arith.constant 0.000000e+00 : f32
    %157 = vector.broadcast %cst_38 : f32 to vector<128x4xf32>
    %c0_39 = arith.constant 0 : index
    %c0_40 = arith.constant 0 : index
    %c0_41 = arith.constant 0 : index
    %158 = vector.load %arg3[%c0_39, %c0_40, %c0_41] : memref<1x8x32xf32, #tpu.memory_space<vmem>>, vector<1x8x4xf32>
    %159 = vector.shape_cast %158 : vector<1x8x4xf32> to vector<8x4xf32>
    %cst_42 = arith.constant dense<0.000000e+00> : vector<128x4xf32>
    %160 = tpu.matmul %136, %159, %cst_42 {dimension_numbers = #tpu.dot_dimension_numbers<[1], [0], [0], [1], [0, 0, 1, 1], [], []>} : vector<128x8xf32>, vector<8x4xf32>, vector<128x4xf32> -> vector<128x4xf32>
    %161 = vector.extract_strided_slice %156 {offsets = [0, 0], sizes = [128, 1], strides = [1, 1]} : vector<128x8xf32> to vector<128x1xf32>
    %162 = vector.broadcast %161 : vector<128x1xf32> to vector<128x4xf32>
    %163 = arith.mulf %162, %160 : vector<128x4xf32>
    %164 = arith.addf %157, %163 : vector<128x4xf32>
    %c0_43 = arith.constant 0 : index
    %c0_44 = arith.constant 0 : index
    %c4 = arith.constant 4 : index
    %165 = vector.load %arg3[%c0_43, %c0_44, %c4] : memref<1x8x32xf32, #tpu.memory_space<vmem>>, vector<1x8x4xf32>
    %166 = vector.shape_cast %165 : vector<1x8x4xf32> to vector<8x4xf32>
    %cst_45 = arith.constant dense<0.000000e+00> : vector<128x4xf32>
    %167 = tpu.matmul %136, %166, %cst_45 {dimension_numbers = #tpu.dot_dimension_numbers<[1], [0], [0], [1], [0, 0, 1, 1], [], []>} : vector<128x8xf32>, vector<8x4xf32>, vector<128x4xf32> -> vector<128x4xf32>
    %168 = vector.extract_strided_slice %156 {offsets = [0, 1], sizes = [128, 1], strides = [1, 1]} : vector<128x8xf32> to vector<128x1xf32>
    %169 = vector.broadcast %168 : vector<128x1xf32> to vector<128x4xf32>
    %170 = arith.mulf %169, %167 : vector<128x4xf32>
    %171 = arith.addf %164, %170 : vector<128x4xf32>
    %c0_46 = arith.constant 0 : index
    %c0_47 = arith.constant 0 : index
    %c8 = arith.constant 8 : index
    %172 = vector.load %arg3[%c0_46, %c0_47, %c8] : memref<1x8x32xf32, #tpu.memory_space<vmem>>, vector<1x8x4xf32>
    %173 = vector.shape_cast %172 : vector<1x8x4xf32> to vector<8x4xf32>
    %cst_48 = arith.constant dense<0.000000e+00> : vector<128x4xf32>
    %174 = tpu.matmul %136, %173, %cst_48 {dimension_numbers = #tpu.dot_dimension_numbers<[1], [0], [0], [1], [0, 0, 1, 1], [], []>} : vector<128x8xf32>, vector<8x4xf32>, vector<128x4xf32> -> vector<128x4xf32>
    %175 = vector.extract_strided_slice %156 {offsets = [0, 2], sizes = [128, 1], strides = [1, 1]} : vector<128x8xf32> to vector<128x1xf32>
    %176 = vector.broadcast %175 : vector<128x1xf32> to vector<128x4xf32>
    %177 = arith.mulf %176, %174 : vector<128x4xf32>
    %178 = arith.addf %171, %177 : vector<128x4xf32>
    %c0_49 = arith.constant 0 : index
    %c0_50 = arith.constant 0 : index
    %c12 = arith.constant 12 : index
    %179 = vector.load %arg3[%c0_49, %c0_50, %c12] : memref<1x8x32xf32, #tpu.memory_space<vmem>>, vector<1x8x4xf32>
    %180 = vector.shape_cast %179 : vector<1x8x4xf32> to vector<8x4xf32>
    %cst_51 = arith.constant dense<0.000000e+00> : vector<128x4xf32>
    %181 = tpu.matmul %136, %180, %cst_51 {dimension_numbers = #tpu.dot_dimension_numbers<[1], [0], [0], [1], [0, 0, 1, 1], [], []>} : vector<128x8xf32>, vector<8x4xf32>, vector<128x4xf32> -> vector<128x4xf32>
    %182 = vector.extract_strided_slice %156 {offsets = [0, 3], sizes = [128, 1], strides = [1, 1]} : vector<128x8xf32> to vector<128x1xf32>
    %183 = vector.broadcast %182 : vector<128x1xf32> to vector<128x4xf32>
    %184 = arith.mulf %183, %181 : vector<128x4xf32>
    %185 = arith.addf %178, %184 : vector<128x4xf32>
    %c0_52 = arith.constant 0 : index
    %c0_53 = arith.constant 0 : index
    %c16 = arith.constant 16 : index
    %186 = vector.load %arg3[%c0_52, %c0_53, %c16] : memref<1x8x32xf32, #tpu.memory_space<vmem>>, vector<1x8x4xf32>
    %187 = vector.shape_cast %186 : vector<1x8x4xf32> to vector<8x4xf32>
    %cst_54 = arith.constant dense<0.000000e+00> : vector<128x4xf32>
    %188 = tpu.matmul %136, %187, %cst_54 {dimension_numbers = #tpu.dot_dimension_numbers<[1], [0], [0], [1], [0, 0, 1, 1], [], []>} : vector<128x8xf32>, vector<8x4xf32>, vector<128x4xf32> -> vector<128x4xf32>
    %189 = vector.extract_strided_slice %156 {offsets = [0, 4], sizes = [128, 1], strides = [1, 1]} : vector<128x8xf32> to vector<128x1xf32>
    %190 = vector.broadcast %189 : vector<128x1xf32> to vector<128x4xf32>
    %191 = arith.mulf %190, %188 : vector<128x4xf32>
    %192 = arith.addf %185, %191 : vector<128x4xf32>
    %c0_55 = arith.constant 0 : index
    %c0_56 = arith.constant 0 : index
    %c20 = arith.constant 20 : index
    %193 = vector.load %arg3[%c0_55, %c0_56, %c20] : memref<1x8x32xf32, #tpu.memory_space<vmem>>, vector<1x8x4xf32>
    %194 = vector.shape_cast %193 : vector<1x8x4xf32> to vector<8x4xf32>
    %cst_57 = arith.constant dense<0.000000e+00> : vector<128x4xf32>
    %195 = tpu.matmul %136, %194, %cst_57 {dimension_numbers = #tpu.dot_dimension_numbers<[1], [0], [0], [1], [0, 0, 1, 1], [], []>} : vector<128x8xf32>, vector<8x4xf32>, vector<128x4xf32> -> vector<128x4xf32>
    %196 = vector.extract_strided_slice %156 {offsets = [0, 5], sizes = [128, 1], strides = [1, 1]} : vector<128x8xf32> to vector<128x1xf32>
    %197 = vector.broadcast %196 : vector<128x1xf32> to vector<128x4xf32>
    %198 = arith.mulf %197, %195 : vector<128x4xf32>
    %199 = arith.addf %192, %198 : vector<128x4xf32>
    %c0_58 = arith.constant 0 : index
    %c0_59 = arith.constant 0 : index
    %c24 = arith.constant 24 : index
    %200 = vector.load %arg3[%c0_58, %c0_59, %c24] : memref<1x8x32xf32, #tpu.memory_space<vmem>>, vector<1x8x4xf32>
    %201 = vector.shape_cast %200 : vector<1x8x4xf32> to vector<8x4xf32>
    %cst_60 = arith.constant dense<0.000000e+00> : vector<128x4xf32>
    %202 = tpu.matmul %136, %201, %cst_60 {dimension_numbers = #tpu.dot_dimension_numbers<[1], [0], [0], [1], [0, 0, 1, 1], [], []>} : vector<128x8xf32>, vector<8x4xf32>, vector<128x4xf32> -> vector<128x4xf32>
    %203 = vector.extract_strided_slice %156 {offsets = [0, 6], sizes = [128, 1], strides = [1, 1]} : vector<128x8xf32> to vector<128x1xf32>
    %204 = vector.broadcast %203 : vector<128x1xf32> to vector<128x4xf32>
    %205 = arith.mulf %204, %202 : vector<128x4xf32>
    %206 = arith.addf %199, %205 : vector<128x4xf32>
    %c0_61 = arith.constant 0 : index
    %c0_62 = arith.constant 0 : index
    %c28 = arith.constant 28 : index
    %207 = vector.load %arg3[%c0_61, %c0_62, %c28] : memref<1x8x32xf32, #tpu.memory_space<vmem>>, vector<1x8x4xf32>
    %208 = vector.shape_cast %207 : vector<1x8x4xf32> to vector<8x4xf32>
    %cst_63 = arith.constant dense<0.000000e+00> : vector<128x4xf32>
    %209 = tpu.matmul %136, %208, %cst_63 {dimension_numbers = #tpu.dot_dimension_numbers<[1], [0], [0], [1], [0, 0, 1, 1], [], []>} : vector<128x8xf32>, vector<8x4xf32>, vector<128x4xf32> -> vector<128x4xf32>
    %210 = vector.extract_strided_slice %156 {offsets = [0, 7], sizes = [128, 1], strides = [1, 1]} : vector<128x8xf32> to vector<128x1xf32>
    %211 = vector.broadcast %210 : vector<128x1xf32> to vector<128x4xf32>
    %212 = arith.mulf %211, %209 : vector<128x4xf32>
    %213 = arith.addf %206, %212 : vector<128x4xf32>
    %c0_64 = arith.constant 0 : index
    %c0_65 = arith.constant 0 : index
    %c0_66 = arith.constant 0 : index
    %c0_67 = arith.constant 0 : index
    %214 = vector.load %arg11[%c0_64, %c0_65, %c0_66, %c0_67] : memref<1x1x128x4xf32, #tpu.memory_space<vmem>>, vector<1x1x128x4xf32>
    %215 = vector.shape_cast %214 : vector<1x1x128x4xf32> to vector<128x4xf32>
    %216 = vector.shape_cast %213 : vector<128x4xf32> to vector<1x1x128x4xf32>
    tpu.vector_store %arg11[%c0_64, %c0_65, %c0_66, %c0_67], %216 {strides = array<i32>} : memref<1x1x128x4xf32, #tpu.memory_space<vmem>>, vector<1x1x128x4xf32>,
    return
  }
  func.func @transform_0(%arg0: i32, %arg1: i32) -> (i32, i32, i32, i32) {
    %c0_i32 = arith.constant 0 : i32
    %c0_i32_0 = arith.constant 0 : i32
    %c0_i32_1 = arith.constant 0 : i32
    return %arg0, %arg1, %c0_i32, %c0_i32_0 : i32, i32, i32, i32
  }
  func.func @transform_1(%arg0: i32, %arg1: i32) -> (i32, i32, i32) {
    %c0_i32 = arith.constant 0 : i32
    %c0_i32_0 = arith.constant 0 : i32
    %c0_i32_1 = arith.constant 0 : i32
    return %arg0, %c0_i32, %c0_i32_0 : i32, i32, i32
  }
  func.func @transform_2(%arg0: i32, %arg1: i32) -> (i32, i32, i32) {
    %c0_i32 = arith.constant 0 : i32
    %c0_i32_0 = arith.constant 0 : i32
    %c0_i32_1 = arith.constant 0 : i32
    return %arg0, %c0_i32, %c0_i32_0 : i32, i32, i32
  }
  func.func @transform_3(%arg0: i32, %arg1: i32) -> (i32, i32) {
    %c0_i32 = arith.constant 0 : i32
    %c0_i32_0 = arith.constant 0 : i32
    %c0_i32_1 = arith.constant 0 : i32
    return %c0_i32, %c0_i32_0 : i32, i32
  }
  func.func @transform_4(%arg0: i32, %arg1: i32) -> (i32, i32) {
    %c0_i32 = arith.constant 0 : i32
    %c0_i32_0 = arith.constant 0 : i32
    %c0_i32_1 = arith.constant 0 : i32
    return %c0_i32, %c0_i32_0 : i32, i32
  }
  func.func @transform_5(%arg0: i32, %arg1: i32) -> (i32, i32, i32) {
    %c0_i32 = arith.constant 0 : i32
    %c0_i32_0 = arith.constant 0 : i32
    %c0_i32_1 = arith.constant 0 : i32
    return %arg1, %c0_i32, %c0_i32_0 : i32, i32, i32
  }
  func.func @transform_6(%arg0: i32, %arg1: i32) -> (i32, i32) {
    %c0_i32 = arith.constant 0 : i32
    %c0_i32_0 = arith.constant 0 : i32
    %c0_i32_1 = arith.constant 0 : i32
    return %c0_i32, %c0_i32_0 : i32, i32
  }
  func.func @transform_7(%arg0: i32, %arg1: i32) -> (i32, i32, i32) {
    %c0_i32 = arith.constant 0 : i32
    %c0_i32_0 = arith.constant 0 : i32
    %c0_i32_1 = arith.constant 0 : i32
    return %arg1, %c0_i32, %c0_i32_0 : i32, i32, i32
  }
  func.func @transform_8(%arg0: i32, %arg1: i32) -> (i32, i32, i32) {
    %c0_i32 = arith.constant 0 : i32
    %c0_i32_0 = arith.constant 0 : i32
    %c0_i32_1 = arith.constant 0 : i32
    return %arg1, %c0_i32, %c0_i32_0 : i32, i32, i32
  }
  func.func @transform_9(%arg0: i32, %arg1: i32) -> (i32, i32, i32, i32) {
    %c0_i32 = arith.constant 0 : i32
    %c0_i32_0 = arith.constant 0 : i32
    %c0_i32_1 = arith.constant 0 : i32
    return %arg0, %arg1, %c0_i32, %c0_i32_0 : i32, i32, i32, i32
  }
}

</mosaic_0001>

<bundles_post_ra>
// kernel: tpu_custom_call.1
= control target key start
LH: loop header
LB: loop body
LE: loop exit
PB: predicated region body
PF: predicated region fallthrough
CT: control target
= control target key end

     0   :  { %s7012_s30 = smov 0   ;;  %s7014_s10 = smov 0   ;;  %s12108_s0 = inlined_call_operand.vmem [shape: f32[2,2,176,4], index: 0, kind: input, shape index: {}]   ;;  %s12109_s1 = inlined_call_operand.vmem [shape: f32[2,8,32], index: 1, kind: input, shape index: {}]   ;;  %s12110_s2 = inlined_call_operand.vmem [shape: f32[2,64,4], index: 2, kind: input, shape index: {}]   ;;  %s12111_s3 = inlined_call_operand.vmem [shape: f32[4,18], index: 3, kind: input, shape index: {}]   ;;  %s12112_s4 = inlined_call_operand.vmem [shape: f32[4,18], index: 4, kind: input, shape index: {}]   ;;  %s12113_s5 = inlined_call_operand.vmem [shape: f32[2,176,8], index: 5, kind: input, shape index: {}]   ;;  %s12114_s6 = inlined_call_operand.vmem [shape: f32[176,8], index: 6, kind: input, shape index: {}]   ;;  %s12115_s7 = inlined_call_operand.vmem [shape: f32[2,128,2], index: 7, kind: input, shape index: {}]   ;;  %s12116_s8 = inlined_call_operand.vmem [shape: f32[2,128,9], index: 8, kind: input, shape index: {}]   ;;  %s12117_s9 = inlined_call_operand.vmem [shape: f32[2,2,128,4], index: 9, kind: output, shape index: {}]  }
   0x1   :  { %s7016_s11 = smov 0   ;;  %s7018_s12 = smov 0  }
   0x2   :  { %s7020_s13 = smov 0  }
   0x3 LB: > { %s28_s14 = sadd.s32 1, %s6932_s11  ;;  %s31_s15 = sadd.s32 1, %s6936_s12  ;;  %s6940_s13 = sphi %s7020_s13, %s19_s13   ;;  %s6936_s12 = sphi %s7018_s12, %s13361_s12   ;;  %s6932_s11 = sphi %s7016_s11, %s13360_s11   ;;  %s6928_s10 = sphi %s7014_s10, %s13359_s10   ;;  %s6924_s30 = sphi %s7012_s30, %s13358_s30  }
   0x4   : > { %p29_p0 = scmp.ge.s32.totalorder %s28_s14, 2  ;;  %p6305_p1 = scmp.ge.s32.totalorder %s6940_s13, 1 }
   0x5   : > { %p356_p2 = scmp.lt.s32.totalorder %s6940_s13, 5 }
   0x6   : > { %s13363_s14 = smov (%p29_p0, %s28_s14), 0  ;;  %s13365_s15 = smov (!%p29_p0, %s31_s15), %s6936_s12 }
   0x7   : > { %p357_p3 = pnand %p6305_p1, %p356_p2  ;;  %p33_p4 = scmp.ge.s32.totalorder %s13365_s15, 2 }
   0x9   : > { %s13367_s15 = smov (%p33_p4, %s13365_s15), 0  ;;  %360 = sbr.rel (%p357_p3) target bundleno = 2649 (0xa59), region = 56 }
   0xe   : > { %v7047_v0 = vld [vmem:[%s12114_s6 + $0x20] sm:$0xff]  ;;  %v7052_v1 = vld [vmem:[%s12114_s6 + $0x10] sm:$0xff]  ;;  %v12130_v2 = vmov 4   ;;  %v12124_v3 = vmov 0   ;;  %vm523_vm0 = vcmask 1043456   ;;  %p424_p5 = scmp.lt.s32.totalorder %s6928_s10, 1 }
   0xf   : > { %6765 = vset.pattern.permute.xlu0 %v12130_v2  ;;  %6756 = vset.pattern.permute.xlu2 %v12124_v3  ;;  %v497_v4 = vld [vmem:[%s12112_s4] sm:$0xf]  ;;  %p426_p6 = scmp.lt.s32.totalorder %s6924_s30, 1  ;;  %vm498_vm1 = vcmask 31744   ;;  %v7082_v6 = vld [vmem:[%s12114_s6 + $0x28] sm:$0xff]  ;;  %v7088_v7 = vld [vmem:[%s12114_s6 + $0x38] sm:$0xff] }
  0x10   : > { %6755 = vset.pattern.permute.xlu1 %v12124_v3  ;;  %784 = vperm.xlu2 %6756, %v7047_v0   ;;  %s13369_s10 = smov (!%p424_p5, %s6928_s10), 1  ;;  %v7093_v8 = vld [vmem:[%s12114_s6 + $0x18] sm:$0xff]  ;;  %v7102_v10 = vld [vmem:[%s12114_s6 + $0x40] sm:$0xff]  ;;  %v7108_v11 = vld [vmem:[%s12114_s6 + $0x50] sm:$0xff]  ;;  %v12126_v21 = vmov 5   ;;  %v12128_v33 = vmov 1  }
  0x11   : > { %1783 = vperm.xlu0 %6765, %v7052_v1   ;;  %774 = vperm.xlu1 %6755, %v7052_v1   ;;  %s13371_s30 = smov (!%p426_p6, %s6924_s30), 1  ;;  %s6656_s22 = sshll.u32 %s13369_s10, 6  ;;  %v488_v12 = vld [vmem:[%s12111_s3] sm:$0xf]  ;;  %v7129_v15 = vld [vmem:[%s12114_s6 + $0x58] sm:$0xff]  ;;  %v7135_v16 = vld [vmem:[%s12114_s6 + $0x68] sm:$0xff] }
  0x12   : > { %6318 = vmatpush.msk.msra.mxu0 %vm523_vm0, %v497_v4  ;;  %s6661_s23 = smul.u32 44, %s13369_s10  ;;  %s7075_s26 = scalar_lea.vmem %s12110_s2, %s6656_s22  ;;  %6349 = vmatpush.msk.msra.mxu2 %vm523_vm0, %v488_v12  ;;  %v7146_v19 = vld [vmem:[%s12114_s6 + $0x70] sm:$0xff]  ;;  %v7152_v20 = vld [vmem:[%s12114_s6] sm:$0xff]  ;;  %v7164_v24 = vld [vmem:[%s12114_s6 + $0x88] sm:$0xff]  ;;  %v12122_v42 = vmov 6   ;;  %v12120_v4 = vmov 2  }
  0x13   : > { %s6660_s27 = smul.u32 22, %s13371_s30  ;;  %v489_v5 = vld [vmem:[%s7075_s26] sm:$0xff]  ;;  %v490_v9 = vld [vmem:[%s7075_s26 + $0x8] sm:$0xff]  ;;  %v491_v14 = vld [vmem:[%s7075_s26 + $0x10] sm:$0xff]  ;;  %6659 = vmatpush.msk.msra.mxu3 %vm523_vm0, %v488_v12  ;;  %vm612_vm2 = vcmask 64512   ;;  %vm2664_vm3 = vcmask 1040384  }
  0x14   : > { %6319 = vmatmul.msk.f32.vlgmr.msra.gmra.mxu0 %vm498_vm1, %v489_v5  ;;  %v492_v18 = vld [vmem:[%s7075_s26 + $0x18] sm:$0xff]  ;;  %v493_v23 = vld [vmem:[%s7075_s26 + $0x20] sm:$0xff]  ;;  %v7199_v32 = vld [vmem:[%s12114_s6 + $0x8] sm:$0xff]  ;;  %s6950_s18 = smov 126   ;;  %vm2971_vm4 = vcmask 1046528   ;;  %s6951_s19 = smov 124  }
  0x15   : > { %s430_s20 = sadd.s32 %s6661_s23, %s6660_s27  ;;  %v7170_v25 = vld [vmem:[%s12114_s6 + $0x80] sm:$0xff]  ;;  %v7187_v29 = vld [vmem:[%s12114_s6 + $0x98] sm:$0xff]  ;;  %v7220_v38 = vld [vmem:[%s12114_s6 + $0x30] sm:$0xff]  ;;  %s6953_s28 = smov 120  }
  0x16   : > { %s6306_s21 = sshll.u32 %s430_s20, 3  ;;  %v7182_v28 = vld [vmem:[%s12114_s6 + $0xa0] sm:$0xff]  ;;  %v7232_v41 = vld [vmem:[%s12114_s6 + $0x48] sm:$0xff]  ;;  %v7261_v50 = vld [vmem:[%s12114_s6 + $0x78] sm:$0xff]  ;;  %s6954_s23 = smov 118  }
  0x17   : > { %s7113_s27 = scalar_lea.vmem %s12108_s0, %s6306_s21  ;;  %v7245_v45 = vld [vmem:[%s12114_s6 + $0x60] sm:$0xff]  ;;  %v494_v47 = vld [vmem:[%s7075_s26 + $0x28] sm:$0xff]  ;;  %v495_v52 = vld [vmem:[%s7075_s26 + $0x30] sm:$0xff]  ;;  %s6956_s20 = smov 114  }
  0x18   : > { %789 = vperm.xlu2 %6756, %v7082_v6   ;;  %v466_v13 = vld [vmem:[%s7113_s27] sm:$0xff]  ;;  %v467_v17 = vld [vmem:[%s7113_s27 + $0x8] sm:$0xff]  ;;  %v468_v22 = vld [vmem:[%s7113_s27 + $0x10] sm:$0xff]  ;;  %s6958_s21 = smov 112   ;;  %s6961_s16 = smov 100  }
  0x19   : > { %1803 = vperm.xlu0 %6765, %v7088_v7   ;;  %779 = vperm.xlu1 %6755, %v7093_v8   ;;  %v469_v26 = vld [vmem:[%s7113_s27 + $0x18] sm:$0xff]  ;;  %v480_v27 = vld [vmem:[%s7113_s27 + $0x70] sm:$0xff]  ;;  %v470_v30 = vld [vmem:[%s7113_s27 + $0x20] sm:$0xff] }
  0x1a   : > { %6350 = vmatmul.msk.f32.vlgmr.msra.gmra.mxu2 %vm498_vm1, %v466_v13  ;;  %6364 = vmatmul.msk.f32.vlgmr.msra.gmra.mxu3 %vm498_vm1, %v480_v27  ;;  %v481_v31 = vld [vmem:[%s7113_s27 + $0x78] sm:$0xff]  ;;  %v471_v34 = vld [vmem:[%s7113_s27 + $0x28] sm:$0xff]  ;;  %v482_v35 = vld [vmem:[%s7113_s27 + $0x80] sm:$0xff] }
  0x1b   : > { %v472_v36 = vld [vmem:[%s7113_s27 + $0x30] sm:$0xff]  ;;  %v483_v37 = vld [vmem:[%s7113_s27 + $0x88] sm:$0xff]  ;;  %v473_v39 = vld [vmem:[%s7113_s27 + $0x38] sm:$0xff] }
  0x1c   : > { %6320 = vmatmul.msk.f32.gmra.mxu0 %vm498_vm1, %v490_v9  ;;  %v484_v40 = vld [vmem:[%s7113_s27 + $0x90] sm:$0xff]  ;;  %v474_v43 = vld [vmem:[%s7113_s27 + $0x40] sm:$0xff]  ;;  %v485_v44 = vld [vmem:[%s7113_s27 + $0x98] sm:$0xff] }
  0x1d   : > { %v475_v48 = vld [vmem:[%s7113_s27 + $0x48] sm:$0xff]  ;;  %v486_v49 = vld [vmem:[%s7113_s27 + $0xa0] sm:$0xff]  ;;  %v476_v53 = vld [vmem:[%s7113_s27 + $0x50] sm:$0xff] }
  0x1e   : > { %v487_v54 = vld [vmem:[%s7113_s27 + $0xa8] sm:$0xff]  ;;  %v7276_v55 = vld [vmem:[%s12114_s6 + $0x90] sm:$0xff]  ;;  %v496_v57 = vld [vmem:[%s7075_s26 + $0x38] sm:$0xff]  ;;  %s6662_s26 = smul.u32 176, %s13371_s30 }
  0x1f   : > { %v477_v58 = vld [vmem:[%s7113_s27 + $0x58] sm:$0xff]  ;;  %v7291_v59 = vld [vmem:[%s12114_s6 + $0xa8] sm:$0xff]  ;;  %v478_v63 = vld [vmem:[%s7113_s27 + $0x60] sm:$0xff] }
  0x20   : > { %804 = vperm.xlu2 %6756, %v7102_v10   ;;  %v479_v13 = vld [vmem:[%s7113_s27 + $0x68] sm:$0xff]  ;;  %s7321_s29 = scalar_lea.vmem %s12113_s5, %s6662_s26  ;;  %s6657_s27 = sshll.u32 %s13371_s30, 7 }
  0x21   : > { %1815 = vperm.xlu0 %6765, %v7108_v11   ;;  %799 = vperm.xlu1 %6755, %v7088_v7   ;;  %s7611_s17 = scalar_lea.vmem %s12116_s8, %s6657_s27  ;;  %s10137_s24 = scalar_lea.vmem %s12115_s7, %s6657_s27 }
  0x22   : > { %6351 = vmatmul.msk.f32.gmra.mxu2 %vm498_vm1, %v467_v17  ;;  %6365 = vmatmul.msk.f32.gmra.mxu3 %vm498_vm1, %v481_v31  ;;  %v7327_v17 = vld [vmem:[%s7321_s29] sm:$0xff]  ;;  %s6307_s27 = sshll.u32 %s13369_s10, 3 }
  0x24   : > { %6321 = vmatmul.msk.f32.gmra.mxu0 %vm498_vm1, %v491_v14 }
  0x28   : > { %819 = vperm.xlu2 %6756, %v7129_v15  }
  0x29   : > { %1827 = vperm.xlu0 %6765, %v7135_v16   ;;  %814 = vperm.xlu1 %6755, %v7108_v11  }
  0x2a   : > { %6352 = vmatmul.msk.f32.gmra.mxu2 %vm498_vm1, %v468_v22  ;;  %6366 = vmatmul.msk.f32.gmra.mxu3 %vm498_vm1, %v482_v35  ;;  %v12118_v22 = vmov 7  }
  0x2c   : > { %6322 = vmatmul.msk.f32.gmra.mxu0 %vm498_vm1, %v492_v18 }
  0x30   : > { %834 = vperm.xlu2 %6756, %v7146_v19  }
  0x31   : > { %6766 = vset.pattern.permute.xlu0 %v12126_v21  ;;  %829 = vperm.xlu1 %6755, %v7135_v16  }
  0x32   : > { %1990 = vperm.xlu0 %6766, %v7152_v20   ;;  %6353 = vmatmul.msk.f32.gmra.mxu2 %vm498_vm1, %v469_v26 }
  0x33   : > { %6367 = vmatmul.msk.f32.gmra.mxu3 %vm498_vm1, %v483_v37 }
  0x34   : > { %6323 = vmatmul.msk.f32.gmra.mxu0 %vm498_vm1, %v493_v23 }
  0x38   : > { %849 = vperm.xlu2 %6756, %v7164_v24  }
  0x39   : > { %844 = vperm.xlu1 %6755, %v7170_v25  }
  0x3a   : > { %2010 = vperm.xlu0 %6766, %v7082_v6   ;;  %6354 = vmatmul.msk.f32.gmra.mxu2 %vm498_vm1, %v470_v30  ;;  %v7342_v30 = vld [vmem:[%s7321_s29 + $0x8] sm:$0xff] }
  0x3b   : > { %6368 = vmatmul.msk.f32.gmra.mxu3 %vm498_vm1, %v484_v40 }
  0x3c   : > { %6324 = vmatmul.msk.f32.gmra.mxu0 %vm498_vm1, %v494_v47 }
  0x40   : > { %864 = vperm.xlu2 %6756, %v7182_v28  }
  0x41   : > { %859 = vperm.xlu1 %6755, %v7187_v29  }
  0x42   : > { %2022 = vperm.xlu0 %6766, %v7102_v10   ;;  %6355 = vmatmul.msk.f32.gmra.mxu2 %vm498_vm1, %v471_v34 }
  0x43   : > { %6369 = vmatmul.msk.f32.gmra.mxu3 %vm498_vm1, %v485_v44  ;;  %v7374_v44 = vld [vmem:[%s7321_s29 + $0x18] sm:$0xff] }
  0x44   : > { %6325 = vmatmul.msk.f32.gmra.mxu0 %vm498_vm1, %v495_v52 }
  0x48   : > { %6758 = vset.pattern.permute.xlu2 %v12128_v33 }
  0x49   : > { %6757 = vset.pattern.permute.xlu1 %v12128_v33  ;;  %1134 = vperm.xlu2 %6758, %v7199_v32  }
  0x4a   : > { %2034 = vperm.xlu0 %6766, %v7129_v15   ;;  %1130 = vperm.xlu1 %6757, %v7152_v20  }
  0x4b   : > { %6356 = vmatmul.msk.f32.gmra.mxu2 %vm498_vm1, %v472_v36  ;;  %6370 = vmatmul.msk.f32.gmra.mxu3 %vm498_vm1, %v486_v49  ;;  %v7356_v36 = vld [vmem:[%s7321_s29 + $0x10] sm:$0xff] }
  0x4c   : > { %6326 = vmatmul.msk.f32.gmra.mxu0 %vm498_vm1, %v496_v57 }
  0x51   : > { %1146 = vperm.xlu2 %6758, %v7047_v0  }
  0x52   : > { %2046 = vperm.xlu0 %6766, %v7146_v19   ;;  %1142 = vperm.xlu1 %6757, %v7093_v8  }
  0x53   : > { %6357 = vmatmul.msk.f32.gmra.mxu2 %vm498_vm1, %v473_v39  ;;  %6371 = vmatmul.msk.f32.gmra.mxu3 %vm498_vm1, %v487_v54 }
  0x59   : > { %1154 = vperm.xlu2 %6758, %v7220_v38  }
  0x5a   : > { %2058 = vperm.xlu0 %6766, %v7164_v24   ;;  %1150 = vperm.xlu1 %6757, %v7082_v6  }
  0x5b   : > { %6358 = vmatmul.msk.f32.gmra.mxu2 %vm498_vm1, %v474_v43 }
  0x61   : > { %1166 = vperm.xlu2 %6758, %v7232_v41  }
  0x62   : > { %6770 = vset.pattern.permute.xlu0 %v12122_v42  ;;  %1162 = vperm.xlu1 %6757, %v7102_v10  }
  0x63   : > { %2209 = vperm.xlu0 %6770, %v7199_v32   ;;  %6359 = vmatmul.msk.f32.gmra.mxu2 %vm498_vm1, %v475_v48 }
  0x69   : > { %1178 = vperm.xlu2 %6758, %v7245_v45  }
  0x6a   : > { %1174 = vperm.xlu1 %6757, %v7129_v15   ;;  %v7249_v46 = vpop.permute.xlu2 %784 }
  0x6b   : > { %12208 = vst [vmem:[#allocation2_spill] sm:$0xff] %v7249_v46  ;;  %2229 = vperm.xlu0 %6770, %v7220_v38   ;;  %6360 = vmatmul.msk.f32.gmra.mxu2 %vm498_vm1, %v476_v53  ;;  %v7392_v53 = vld [vmem:[%s7321_s29 + $0x20] sm:$0xff] }
  0x71   : > { %1190 = vperm.xlu2 %6758, %v7261_v50  }
  0x72   : > { %1186 = vperm.xlu1 %6757, %v7146_v19   ;;  %v7265_v51 = vpop.permute.xlu2 %789 }
  0x73   : > { %12209 = vst [vmem:[#allocation3_spill] sm:$0xff] %v7265_v51  ;;  %2241 = vperm.xlu0 %6770, %v7232_v41   ;;  %6361 = vmatmul.msk.f32.gmra.mxu2 %vm498_vm1, %v477_v58 }
  0x79   : > { %1202 = vperm.xlu2 %6758, %v7276_v55  }
  0x7a   : > { %1198 = vperm.xlu1 %6757, %v7164_v24   ;;  %v7281_v56 = vpop.permute.xlu2 %804 }
  0x7b   : > { %12210 = vst [vmem:[#allocation4_spill] sm:$0xff] %v7281_v56  ;;  %2253 = vperm.xlu0 %6770, %v7245_v45   ;;  %6362 = vmatmul.msk.f32.gmra.mxu2 %vm498_vm1, %v478_v63 }
  0x81   : > { %1214 = vperm.xlu2 %6758, %v7291_v59  }
  0x82   : > { %1210 = vperm.xlu1 %6757, %v7182_v28   ;;  %v7295_v60 = vpop.permute.xlu2 %819 }
  0x83   : > { %12211 = vst [vmem:[#allocation5_spill] sm:$0xff] %v7295_v60  ;;  %v7297_v61 = vpop.permute.xlu1 %774  ;;  %2265 = vperm.xlu0 %6770, %v7261_v50   ;;  %v7300_v62 = vpop.permute.xlu0 %1783  ;;  %6363 = vmatmul.msk.f32.gmra.mxu2 %vm498_vm1, %v479_v13  ;;  %v7412_v13 = vld [vmem:[%s7321_s29 + $0x28] sm:$0xff] }
  0x84   : > { %12212 = vst [vmem:[#allocation6_spill] sm:$0xff] %v7297_v61 }
  0x85   : > { %12213 = vst [vmem:[#allocation7_spill] sm:$0xff] %v7300_v62 }
  0x89   : > { %6760 = vset.pattern.permute.xlu2 %v12120_v4 }
  0x8a   : > { %6759 = vset.pattern.permute.xlu1 %v12120_v4  ;;  %v7306_v5 = vpop.permute.xlu2 %834  ;;  %1353 = vperm.xlu2 %6760, %v7052_v1  }
  0x8b   : > { %12214 = vst [vmem:[#allocation8_spill] sm:$0xff] %v7306_v5  ;;  %v7310_v9 = vpop.permute.xlu1 %779  ;;  %2277 = vperm.xlu0 %6770, %v7276_v55   ;;  %1349 = vperm.xlu1 %6759, %v7199_v32   ;;  %v7314_v12 = vpop.permute.xlu0 %1803 }
  0x8c   : > { %12215 = vst [vmem:[#allocation9_spill] sm:$0xff] %v7310_v9  ;;  %v7733_v9 = vld [vmem:[%s7321_s29 + $0x90] sm:$0xff] }
  0x8d   : > { %12216 = vst [vmem:[#allocation10_spill] sm:$0xff] %v7314_v12 }
  0x91   : > { %v544_v23 = vpop.f32.mrf.mxu0 }
  0x92   : > { %v7323_v14 = vpop.permute.xlu2 %849  ;;  %1361 = vperm.xlu2 %6760, %v7047_v0   ;;  %694 = vmatpush.msra.mxu1 %v544_v23 }
  0x93   : > { %12217 = vst [vmem:[#allocation11_spill] sm:$0xff] %v7323_v14  ;;  %v7329_v18 = vpop.permute.xlu1 %799  ;;  %6774 = vset.pattern.permute.xlu0 %v12118_v22  ;;  %1357 = vperm.xlu1 %6759, %v7093_v8   ;;  %v7334_v26 = vpop.permute.xlu0 %1815 }
  0x94   : > { %12218 = vst [vmem:[#allocation12_spill] sm:$0xff] %v7329_v18  ;;  %2428 = vperm.xlu0 %6774, %v7052_v1   ;;  %6327 = vmatmul.msk.f32.vlgmr.msra.gmra.mxu1 %vm612_vm2, %v7327_v17  ;;  %v7622_v18 = vld [vmem:[%s7321_s29 + $0x70] sm:$0xff] }
  0x95   : > { %12219 = vst [vmem:[#allocation13_spill] sm:$0xff] %v7334_v26 }
  0x99   : > { %v547_v34 = vpop.f32.mrf.mxu0 }
  0x9a   : > { %v7338_v27 = vpop.permute.xlu2 %864  ;;  %1373 = vperm.xlu2 %6760, %v7088_v7   ;;  %1061 = vmatpush.msrb.mxu3 %v547_v34 }
  0x9b   : > { %12220 = vst [vmem:[#allocation14_spill] sm:$0xff] %v7338_v27  ;;  %v7344_v31 = vpop.permute.xlu1 %814  ;;  %1369 = vperm.xlu1 %6759, %v7220_v38   ;;  %v7348_v35 = vpop.permute.xlu0 %1827  ;;  %6372 = vmatmul.msk.f32.vlgmr.msrb.gmra.mxu3 %vm612_vm2, %v7327_v17  ;;  %v7476_v27 = vld [vmem:[%s7321_s29 + $0x40] sm:$0xff] }
  0x9c   : > { %12221 = vst [vmem:[#allocation15_spill] sm:$0xff] %v7344_v31  ;;  %2448 = vperm.xlu0 %6774, %v7088_v7   ;;  %6328 = vmatmul.msk.f32.gmra.mxu1 %vm612_vm2, %v7342_v30 }
  0x9d   : > { %12222 = vst [vmem:[#allocation16_spill] sm:$0xff] %v7348_v35  ;;  %v7498_v35 = vld [vmem:[%s7321_s29 + $0x48] sm:$0xff] }
  0xa1   : > { %v550_v39 = vpop.f32.mrf.mxu0 }
  0xa2   : > { %1385 = vperm.xlu2 %6760, %v7108_v11   ;;  %1276 = vmatpush.msrb.mxu0 %v550_v39 }
  0xa3   : > { %v7358_v37 = vpop.permute.xlu1 %829  ;;  %1381 = vperm.xlu1 %6759, %v7232_v41   ;;  %v7361_v40 = vpop.permute.xlu2 %1134  ;;  %6373 = vmatmul.msk.f32.gmra.mxu3 %vm612_vm2, %v7342_v30 }
  0xa4   : > { %12223 = vst [vmem:[#allocation17_spill] sm:$0xff] %v7358_v37  ;;  %2460 = vperm.xlu0 %6774, %v7108_v11   ;;  %v7364_v43 = vpop.permute.xlu0 %1990  ;;  %6329 = vmatmul.msk.f32.gmra.mxu1 %vm612_vm2, %v7356_v36 }
  0xa5   : > { %12224 = vst [vmem:[#allocation18_spill] sm:$0xff] %v7364_v43  ;;  %6394 = vmatmul.msk.f32.vlgmr.msrb.gmra.mxu0 %vm612_vm2, %v7327_v17  ;;  %v7755_v43 = vld [vmem:[%s7321_s29 + $0x98] sm:$0xff] }
  0xa9   : > { %v553_v48 = vpop.f32.mrf.mxu0 }
  0xaa   : > { %1397 = vperm.xlu2 %6760, %v7135_v16   ;;  %1491 = vmatpush.msrb.mxu1 %v553_v48  ;;  %v12132_v48 = vmov 3  }
  0xab   : > { %v7376_v47 = vpop.permute.xlu1 %844  ;;  %1393 = vperm.xlu1 %6759, %v7245_v45   ;;  %v7379_v49 = vpop.permute.xlu2 %1146  ;;  %6374 = vmatmul.msk.f32.gmra.mxu3 %vm612_vm2, %v7356_v36 }
  0xac   : > { %12225 = vst [vmem:[#allocation19_spill] sm:$0xff] %v7376_v47  ;;  %2472 = vperm.xlu0 %6774, %v7135_v16   ;;  %v7382_v52 = vpop.permute.xlu0 %2010  ;;  %6330 = vmatmul.msk.f32.gmra.mxu1 %vm612_vm2, %v7374_v44 }
  0xad   : > { %12226 = vst [vmem:[#allocation20_spill] sm:$0xff] %v7379_v49  ;;  %6395 = vmatmul.msk.f32.gmra.mxu0 %vm612_vm2, %v7342_v30 }
  0xae   : > { %12227 = vst [vmem:[#allocation21_spill] sm:$0xff] %v7382_v52 }
  0xb1   : > { %v556_v57 = vpop.f32.mrf.mxu0 }
  0xb2   : > { %1409 = vperm.xlu2 %6760, %v7170_v25   ;;  %1706 = vmatpush.msrb.mxu2 %v556_v57  ;;  %v7432_v57 = vld [vmem:[%s7321_s29 + $0x30] sm:$0xff] }
  0xb3   : > { %v7394_v54 = vpop.permute.xlu1 %859  ;;  %1405 = vperm.xlu1 %6759, %v7261_v50   ;;  %v7397_v58 = vpop.permute.xlu2 %1154  ;;  %6375 = vmatmul.msk.f32.gmra.mxu3 %vm612_vm2, %v7374_v44 }
  0xb4   : > { %2484 = vperm.xlu0 %6774, %v7170_v25   ;;  %v7400_v63 = vpop.permute.xlu0 %2022  ;;  %6331 = vmatmul.msk.f32.gmra.mxu1 %vm612_vm2, %v7392_v53 }
  0xb5   : > { %12228 = vst [vmem:[#allocation22_spill] sm:$0xff] %v7400_v63  ;;  %6396 = vmatmul.msk.f32.gmra.mxu0 %vm612_vm2, %v7356_v36  ;;  %6438 = vmatmul.msk.f32.vlgmr.msrb.gmra.mxu2 %vm612_vm2, %v7327_v17  ;;  %v7564_v63 = vld [vmem:[%s7321_s29 + $0x60] sm:$0xff] }
  0xba   : > { %1421 = vperm.xlu2 %6760, %v7187_v29  }
  0xbb   : > { %1417 = vperm.xlu1 %6759, %v7276_v55   ;;  %v7415_v23 = vpop.permute.xlu2 %1166  ;;  %6376 = vmatmul.msk.f32.gmra.mxu3 %vm612_vm2, %v7392_v53 }
  0xbc   : > { %12229 = vst [vmem:[#allocation23_spill] sm:$0xff] %v7415_v23  ;;  %2496 = vperm.xlu0 %6774, %v7187_v29   ;;  %v7418_v34 = vpop.permute.xlu1 %1130  ;;  %6332 = vmatmul.msk.f32.gmra.mxu1 %vm612_vm2, %v7412_v13  ;;  %v7424_v39 = vpop.permute.xlu0 %2034 }
  0xbd   : > { %12230 = vst [vmem:[#allocation24_spill] sm:$0xff] %v7424_v39  ;;  %6397 = vmatmul.msk.f32.gmra.mxu0 %vm612_vm2, %v7374_v44  ;;  %6439 = vmatmul.msk.f32.gmra.mxu2 %vm612_vm2, %v7342_v30 }
  0xc2   : > { %6761 = vset.pattern.permute.xlu2 %v12132_v48 }
  0xc3   : > { %1429 = vperm.xlu1 %6759, %v7291_v59   ;;  %1560 = vperm.xlu2 %6761, %v7152_v20   ;;  %v7436_v22 = vpop.permute.xlu2 %1178 }
  0xc4   : > { %12231 = vst [vmem:[#allocation25_spill] sm:$0xff] %v7436_v22  ;;  %6775 = vset.pattern.permute.xlu0 %v12124_v3  ;;  %v7439_v4 = vpop.permute.xlu1 %1142  ;;  %6333 = vmatmul.msk.f32.gmra.mxu1 %vm612_vm2, %v7432_v57  ;;  %v7444_v42 = vpop.permute.xlu0 %2046  ;;  %v7453_v3 = vld [vmem:[%s7321_s29 + $0x38] sm:$0xff] }
  0xc5   : > { %12232 = vst [vmem:[#allocation26_spill] sm:$0xff] %v7439_v4  ;;  %764 = vperm.xlu0 %6775, %v7152_v20   ;;  %6377 = vmatmul.msk.f32.gmra.mxu3 %vm612_vm2, %v7412_v13 }
  0xc6   : > { %12233 = vst [vmem:[#allocation27_spill] sm:$0xff] %v7444_v42  ;;  %6398 = vmatmul.msk.f32.gmra.mxu0 %vm612_vm2, %v7392_v53  ;;  %6440 = vmatmul.msk.f32.gmra.mxu2 %vm612_vm2, %v7356_v36 }
  0xcb   : > { %6762 = vset.pattern.permute.xlu1 %v12132_v48  ;;  %1572 = vperm.xlu2 %6761, %v7093_v8   ;;  %v7457_v21 = vpop.permute.xlu2 %1190  ;;  %v7473_v48 = vpop.f32.mrf.mxu3 }
  0xcc   : > { %12234 = vst [vmem:[#allocation28_spill] sm:$0xff] %v7457_v21  ;;  %1568 = vperm.xlu1 %6762, %v7052_v1   ;;  %v7460_v33 = vpop.permute.xlu1 %1150  ;;  %6334 = vmatmul.msk.f32.gmra.mxu1 %vm612_vm2, %v7453_v3  ;;  %v7465_v2 = vpop.permute.xlu0 %2058 }
  0xcd   : > { %12235 = vst [vmem:[#allocation29_spill] sm:$0xff] %v7460_v33  ;;  %769 = vperm.xlu0 %6775, %v7199_v32   ;;  %6378 = vmatmul.msk.f32.gmra.mxu3 %vm612_vm2, %v7432_v57 }
  0xce   : > { %12236 = vst [vmem:[#allocation30_spill] sm:$0xff] %v7465_v2  ;;  %6399 = vmatmul.msk.f32.gmra.mxu0 %vm612_vm2, %v7412_v13  ;;  %6441 = vmatmul.msk.f32.gmra.mxu2 %vm612_vm2, %v7374_v44 }
  0xcf   : > { %12237 = vst [vmem:[#allocation31_spill] sm:$0xff] %v7473_v48 }
  0xd3   : > { %1580 = vperm.xlu2 %6761, %v7082_v6   ;;  %v7479_v14 = vpop.permute.xlu2 %1202  ;;  %v7495_v42 = vpop.f32.mrf.mxu3 }
  0xd4   : > { %12238 = vst [vmem:[#allocation32_spill] sm:$0xff] %v7479_v14  ;;  %1576 = vperm.xlu1 %6762, %v7047_v0   ;;  %v7482_v2 = vpop.permute.xlu1 %1162  ;;  %6335 = vmatmul.msk.f32.gmra.mxu1 %vm612_vm2, %v7476_v27 }
  0xd5   : > { %12239 = vst [vmem:[#allocation33_spill] sm:$0xff] %v7482_v2  ;;  %794 = vperm.xlu0 %6775, %v7220_v38   ;;  %v7487_v47 = vpop.permute.xlu0 %2209  ;;  %6379 = vmatmul.msk.f32.gmra.mxu3 %vm612_vm2, %v7453_v3 }
  0xd6   : > { %12240 = vst [vmem:[#allocation34_spill] sm:$0xff] %v7487_v47  ;;  %6400 = vmatmul.msk.f32.gmra.mxu0 %vm612_vm2, %v7432_v57  ;;  %6442 = vmatmul.msk.f32.gmra.mxu2 %vm612_vm2, %v7392_v53  ;;  %v7706_v47 = vld [vmem:[%s7321_s29 + $0x88] sm:$0xff] }
  0xd7   : > { %12241 = vst [vmem:[#allocation35_spill] sm:$0xff] %v7495_v42 }
  0xdb   : > { %1592 = vperm.xlu2 %6761, %v7102_v10   ;;  %v7501_v48 = vpop.permute.xlu2 %1214  ;;  %v7521_v39 = vpop.f32.mrf.mxu3 }
  0xdc   : > { %12242 = vst [vmem:[#allocation36_spill] sm:$0xff] %v7501_v48  ;;  %1588 = vperm.xlu1 %6762, %v7088_v7   ;;  %v7504_v5 = vpop.permute.xlu1 %1174  ;;  %6336 = vmatmul.msk.f32.gmra.mxu1 %vm612_vm2, %v7498_v35  ;;  %v7518_v48 = vld [vmem:[%s7321_s29 + $0x50] sm:$0xff] }
  0xdd   : > { %12243 = vst [vmem:[#allocation37_spill] sm:$0xff] %v7504_v5  ;;  %809 = vperm.xlu0 %6775, %v7232_v41   ;;  %v7509_v37 = vpop.permute.xlu0 %2229  ;;  %6380 = vmatmul.msk.f32.gmra.mxu3 %vm612_vm2, %v7476_v27 }
  0xde   : > { %12244 = vst [vmem:[#allocation38_spill] sm:$0xff] %v7509_v37  ;;  %6401 = vmatmul.msk.f32.gmra.mxu0 %vm612_vm2, %v7453_v3  ;;  %6443 = vmatmul.msk.f32.gmra.mxu2 %vm612_vm2, %v7412_v13 }
  0xdf   : > { %12245 = vst [vmem:[#allocation39_spill] sm:$0xff] %v7521_v39  ;;  %v559_v39 = vpop.f32.mrf.mxu0 }
  0xe0   : > { %1921 = vmatpush.msra.mxu3 %v559_v39 }
  0xe3   : > { %1604 = vperm.xlu2 %6761, %v7129_v15   ;;  %v7557_v39 = vpop.f32.mrf.mxu3 }
  0xe4   : > { %1600 = vperm.xlu1 %6762, %v7108_v11   ;;  %v7524_v22 = vpop.permute.xlu1 %1186  ;;  %v7526_v26 = vpop.permute.xlu2 %1353  ;;  %6337 = vmatmul.msk.f32.gmra.mxu1 %vm612_vm2, %v7518_v48  ;;  %12252 = vst [vmem:[#allocation46_spill] sm:$0xff] %v7557_v39 }
  0xe5   : > { %12246 = vst [vmem:[#allocation40_spill] sm:$0xff] %v7524_v22  ;;  %824 = vperm.xlu0 %6775, %v7245_v45   ;;  %v7531_v5 = vpop.permute.xlu0 %2241  ;;  %6381 = vmatmul.msk.f32.gmra.mxu3 %vm612_vm2, %v7498_v35  ;;  %v7540_v22 = vld [vmem:[%s7321_s29 + $0x58] sm:$0xff] }
  0xe6   : > { %12247 = vst [vmem:[#allocation41_spill] sm:$0xff] %v7526_v26  ;;  %6402 = vmatmul.msk.f32.gmra.mxu0 %vm612_vm2, %v7476_v27  ;;  %6444 = vmatmul.msk.f32.gmra.mxu2 %vm612_vm2, %v7432_v57  ;;  %v7730_v26 = vld [vmem:[%s7611_s17 + $0x70] sm:$0xff] }
  0xe7   : > { %12248 = vst [vmem:[#allocation42_spill] sm:$0xff] %v7531_v5  ;;  %v562_v23 = vpop.f32.mrf.mxu0 }
  0xe8   : > { %2136 = vmatpush.msra.mxu0 %v562_v23 }
  0xeb   : > { %1616 = vperm.xlu2 %6761, %v7146_v19   ;;  %v7583_v23 = vpop.f32.mrf.mxu3 }
  0xec   : > { %1612 = vperm.xlu1 %6762, %v7135_v16   ;;  %v7544_v60 = vpop.permute.xlu1 %1198  ;;  %v7546_v5 = vpop.permute.xlu2 %1361  ;;  %6338 = vmatmul.msk.f32.gmra.mxu1 %vm612_vm2, %v7540_v22  ;;  %12256 = vst [vmem:[#allocation50_spill] sm:$0xff] %v7583_v23 }
  0xed   : > { %12249 = vst [vmem:[#allocation43_spill] sm:$0xff] %v7544_v60  ;;  %839 = vperm.xlu0 %6775, %v7261_v50   ;;  %v7551_v31 = vpop.permute.xlu0 %2253  ;;  %6382 = vmatmul.msk.f32.gmra.mxu3 %vm612_vm2, %v7518_v48  ;;  %v7561_v60 = vpop.f32.mrf.mxu2 }
  0xee   : > { %12250 = vst [vmem:[#allocation44_spill] sm:$0xff] %v7546_v5  ;;  %6403 = vmatmul.msk.f32.gmra.mxu0 %vm612_vm2, %v7498_v35  ;;  %6445 = vmatmul.msk.f32.gmra.mxu2 %vm612_vm2, %v7453_v3 }
  0xef   : > { %12251 = vst [vmem:[#allocation45_spill] sm:$0xff] %v7551_v31  ;;  %v565_v2 = vpop.f32.mrf.mxu0 }
  0xf0   : > { %2351 = vmatpush.msra.mxu1 %v565_v2  ;;  %v7616_v2 = vld [vmem:[%s7611_s17] sm:$0xff] }
  0xf3   : > { %1628 = vperm.xlu2 %6761, %v7164_v24  }
  0xf4   : > { %1624 = vperm.xlu1 %6762, %v7170_v25   ;;  %v7568_v31 = vpop.permute.xlu1 %1210  ;;  %v7570_v12 = vpop.permute.xlu2 %1373  ;;  %6339 = vmatmul.msk.f32.gmra.mxu1 %vm612_vm2, %v7564_v63 }
  0xf5   : > { %12253 = vst [vmem:[#allocation47_spill] sm:$0xff] %v7568_v31  ;;  %854 = vperm.xlu0 %6775, %v7276_v55   ;;  %v7575_v39 = vpop.permute.xlu0 %2265  ;;  %6383 = vmatmul.msk.f32.gmra.mxu3 %vm612_vm2, %v7540_v22  ;;  %v7585_v31 = vpop.f32.mrf.mxu2 }
  0xf6   : > { %12254 = vst [vmem:[#allocation48_spill] sm:$0xff] %v7570_v12  ;;  %6404 = vmatmul.msk.f32.gmra.mxu0 %vm612_vm2, %v7518_v48  ;;  %6446 = vmatmul.msk.f32.gmra.mxu2 %vm612_vm2, %v7476_v27  ;;  %v7588_v12 = vld [vmem:[%s7321_s29 + $0x68] sm:$0xff] }
  0xf7   : > { %12255 = vst [vmem:[#allocation49_spill] sm:$0xff] %v7575_v39 }
  0xfb   : > { %1640 = vperm.xlu2 %6761, %v7182_v28  }
  0xfc   : > { %1636 = vperm.xlu1 %6762, %v7187_v29   ;;  %v7593_v39 = vpop.permute.xlu2 %1385  ;;  %6340 = vmatmul.msk.f32.gmra.mxu1 %vm612_vm2, %v7588_v12 }
  0xfd   : > { %12257 = vst [vmem:[#allocation51_spill] sm:$0xff] %v7593_v39  ;;  %869 = vperm.xlu0 %6775, %v7291_v59   ;;  %v7596_v37 = vpop.permute.xlu1 %1349  ;;  %v7600_v56 = vpop.permute.xlu0 %2277  ;;  %6384 = vmatmul.msk.f32.gmra.mxu3 %vm612_vm2, %v7564_v63  ;;  %v12261_v39 = vmov 4  }
  0xfe   : > { %12258 = vst [vmem:[#allocation52_spill] sm:$0xff] %v7596_v37  ;;  %6405 = vmatmul.msk.f32.gmra.mxu0 %vm612_vm2, %v7540_v22  ;;  %6447 = vmatmul.msk.f32.gmra.mxu2 %vm612_vm2, %v7498_v35  ;;  %v7624_v52 = vpop.f32.mrf.mxu2 }
  0xff   : > { %12259 = vst [vmem:[#allocation53_spill] sm:$0xff] %v7600_v56  ;;  %v7618_v56 = vpop.f32.mrf.mxu3 }
 0x100   : > { %12260 = vst [vmem:[#allocation54_spill] sm:$0xff] %v7618_v56 }
 0x101   : > { %12262 = vst [vmem:[#allocation55_spill] sm:$0xff] %v7624_v52 }
 0x103   : > { %6764 = vset.pattern.permute.xlu2 %v12261_v39 }
 0x104   : > { %6763 = vset.pattern.permute.xlu1 %v12261_v39  ;;  %v7627_v5 = vpop.permute.xlu2 %1397  ;;  %1779 = vperm.xlu2 %6764, %v7199_v32   ;;  %v7648_v39 = vld [vmem:[%s7321_s29 + $0x78] sm:$0xff] }
 0x105   : > { %12263 = vst [vmem:[#allocation56_spill] sm:$0xff] %v7627_v5  ;;  %1775 = vperm.xlu1 %6763, %v7152_v20   ;;  %v7631_v33 = vpop.permute.xlu1 %1357  ;;  %2569 = vperm.xlu0 %6775, %v7616_v2   ;;  %v7645_v20 = vld [vmem:[%s7611_s17 + $0x28] sm:$0xff] }
 0x106   : > { %12264 = vst [vmem:[#allocation57_spill] sm:$0xff] %v7631_v33  ;;  %6341 = vmatmul.msk.f32.gmra.mxu1 %vm612_vm2, %v7622_v18  ;;  %6385 = vmatmul.msk.f32.gmra.mxu3 %vm612_vm2, %v7588_v12  ;;  %v7638_v49 = vpop.permute.xlu0 %2428 }
 0x107   : > { %12265 = vst [vmem:[#allocation58_spill] sm:$0xff] %v7638_v49  ;;  %6406 = vmatmul.msk.f32.gmra.mxu0 %vm612_vm2, %v7564_v63  ;;  %6448 = vmatmul.msk.f32.gmra.mxu2 %vm612_vm2, %v7518_v48  ;;  %v7653_v51 = vpop.f32.mrf.mxu3  ;;  %v7659_v49 = vpop.f32.mrf.mxu2 }
 0x108   : > { %12267 = vst [vmem:[#allocation60_spill] sm:$0xff] %v7653_v51 }
 0x109   : > { %12269 = vst [vmem:[#allocation62_spill] sm:$0xff] %v7659_v49  ;;  %v7703_v49 = vld [vmem:[%s7611_s17 + $0x58] sm:$0xff] }
 0x10c   : > { %v7650_v5 = vpop.permute.xlu2 %1409  ;;  %1791 = vperm.xlu2 %6764, %v7047_v0  }
 0x10d   : > { %12266 = vst [vmem:[#allocation59_spill] sm:$0xff] %v7650_v5  ;;  %1787 = vperm.xlu1 %6763, %v7093_v8   ;;  %v7656_v46 = vpop.permute.xlu1 %1369  ;;  %2594 = vperm.xlu0 %6775, %v7645_v20   ;;  %v7674_v5 = vld [vmem:[%s7611_s17 + $0x40] sm:$0xff] }
 0x10e   : > { %12268 = vst [vmem:[#allocation61_spill] sm:$0xff] %v7656_v46  ;;  %6342 = vmatmul.msk.f32.gmra.mxu1 %vm612_vm2, %v7648_v39  ;;  %6386 = vmatmul.msk.f32.gmra.mxu3 %vm612_vm2, %v7622_v18  ;;  %v7665_v33 = vpop.permute.xlu0 %2448  ;;  %v7677_v46 = vld [vmem:[%s7321_s29 + $0x80] sm:$0xff] }
 0x10f   : > { %12270 = vst [vmem:[#allocation63_spill] sm:$0xff] %v7665_v33  ;;  %6407 = vmatmul.msk.f32.gmra.mxu0 %vm612_vm2, %v7588_v12  ;;  %6449 = vmatmul.msk.f32.gmra.mxu2 %vm612_vm2, %v7540_v22  ;;  %v7692_v14 = vpop.f32.mrf.mxu3 }
 0x110   : > { %12274 = vst [vmem:[#allocation67_spill] sm:$0xff] %v7692_v14 }
 0x111   : > { %v7671_v51 = vpop.f32.mrf.mxu1 }
 0x114   : > { %v7679_v62 = vpop.permute.xlu2 %1421  ;;  %1799 = vperm.xlu2 %6764, %v7220_v38  }
 0x115   : > { %12271 = vst [vmem:[#allocation64_spill] sm:$0xff] %v7679_v62  ;;  %1795 = vperm.xlu1 %6763, %v7082_v6   ;;  %v7683_v33 = vpop.permute.xlu1 %1381  ;;  %2609 = vperm.xlu0 %6775, %v7674_v5   ;;  %v7698_v6 = vpop.f32.mrf.mxu2 }
 0x116   : > { %12272 = vst [vmem:[#allocation65_spill] sm:$0xff] %v7683_v33  ;;  %6343 = vmatmul.msk.f32.gmra.mxu1 %vm612_vm2, %v7677_v46  ;;  %6387 = vmatmul.msk.f32.gmra.mxu3 %vm612_vm2, %v7648_v39  ;;  %v7690_v23 = vpop.permute.xlu0 %2460 }
 0x117   : > { %12273 = vst [vmem:[#allocation66_spill] sm:$0xff] %v7690_v23  ;;  %6408 = vmatmul.msk.f32.gmra.mxu0 %vm612_vm2, %v7622_v18  ;;  %6450 = vmatmul.msk.f32.gmra.mxu2 %vm612_vm2, %v7564_v63 }
 0x118   : > { %12275 = vst [vmem:[#allocation68_spill] sm:$0xff] %v7698_v6 }
 0x119   : > { %v7700_v33 = vpop.f32.mrf.mxu1 }
 0x11c   : > { %1811 = vperm.xlu2 %6764, %v7232_v41  }
 0x11d   : > { %1807 = vperm.xlu1 %6763, %v7102_v10   ;;  %v7710_v14 = vpop.permute.xlu1 %1393  ;;  %2624 = vperm.xlu0 %6775, %v7703_v49   ;;  %v7713_v23 = vpop.permute.xlu2 %1560 }
 0x11e   : > { %12276 = vst [vmem:[#allocation69_spill] sm:$0xff] %v7710_v14  ;;  %6344 = vmatmul.msk.f32.gmra.mxu1 %vm612_vm2, %v7706_v47  ;;  %6388 = vmatmul.msk.f32.gmra.mxu3 %vm612_vm2, %v7677_v46  ;;  %v7719_v6 = vpop.permute.xlu0 %2472  ;;  %v1063_v10 = vpop.f32.mrf.mxu3 }
 0x11f   : > { %12277 = vst [vmem:[#allocation70_spill] sm:$0xff] %v7713_v23  ;;  %6409 = vmatmul.msk.f32.gmra.mxu0 %vm612_vm2, %v7648_v39  ;;  %6451 = vmatmul.msk.f32.gmra.mxu2 %vm612_vm2, %v7588_v12  ;;  %v7725_v14 = vpop.f32.mrf.mxu2 }
 0x120   : > { %12278 = vst [vmem:[#allocation71_spill] sm:$0xff] %v7719_v6 }
 0x121   : > { %12279 = vst [vmem:[#allocation72_spill] sm:$0xff] %v7725_v14  ;;  %v7727_v4 = vpop.f32.mrf.mxu1 }
 0x122   : > { %12280 = vst [vmem:[#allocation73_spill] sm:$0xff] %v7727_v4  ;;  %v7814_v62 = vpop.f32.mrf.mxu0 }
 0x124   : > { %1823 = vperm.xlu2 %6764, %v7245_v45  }
 0x125   : > { %1819 = vperm.xlu1 %6763, %v7129_v15   ;;  %v7737_v6 = vpop.permute.xlu1 %1405  ;;  %2639 = vperm.xlu0 %6775, %v7730_v26   ;;  %v7740_v42 = vpop.permute.xlu2 %1572 }
 0x126   : > { %12281 = vst [vmem:[#allocation74_spill] sm:$0xff] %v7737_v6  ;;  %6345 = vmatmul.msk.f32.gmra.mxu1 %vm612_vm2, %v7733_v9  ;;  %6389 = vmatmul.msk.f32.gmra.mxu3 %vm612_vm2, %v7706_v47  ;;  %v7746_v14 = vpop.permute.xlu0 %2484  ;;  %v1066_v15 = vpop.f32.mrf.mxu3 }
 0x127   : > { %12282 = vst [vmem:[#allocation75_spill] sm:$0xff] %v7740_v42  ;;  %6410 = vmatmul.msk.f32.gmra.mxu0 %vm612_vm2, %v7677_v46  ;;  %6452 = vmatmul.msk.f32.gmra.mxu2 %vm612_vm2, %v7622_v18  ;;  %v7757_v42 = vpop.f32.mrf.mxu2 }
 0x128   : > { %12283 = vst [vmem:[#allocation76_spill] sm:$0xff] %v7746_v14  ;;  %v12286_v14 = vmov 1  }
 0x129   : > { %v7752_v6 = vpop.f32.mrf.mxu1 }
 0x12a   : > { %12284 = vst [vmem:[#allocation77_spill] sm:$0xff] %v7752_v6 }
 0x12c   : > { %1835 = vperm.xlu2 %6764, %v7261_v50  }
 0x12d   : > { %1831 = vperm.xlu1 %6763, %v7146_v19   ;;  %v7761_v52 = vpop.permute.xlu1 %1417  ;;  %6778 = vset.pattern.permute.xlu0 %v12286_v14  ;;  %v7764_v21 = vpop.permute.xlu2 %1580 }
 0x12e   : > { %12285 = vst [vmem:[#allocation78_spill] sm:$0xff] %v7761_v52  ;;  %6346 = vmatmul.msk.f32.gmra.mxu1 %vm612_vm2, %v7755_v43  ;;  %6390 = vmatmul.msk.f32.gmra.mxu3 %vm612_vm2, %v7733_v9  ;;  %v7770_v6 = vpop.permute.xlu0 %2496  ;;  %v7777_v19 = vpop.f32.mrf.mxu3 }
 0x12f   : > { %12287 = vst [vmem:[#allocation79_spill] sm:$0xff] %v7764_v21  ;;  %6411 = vmatmul.msk.f32.gmra.mxu0 %vm612_vm2, %v7706_v47  ;;  %6453 = vmatmul.msk.f32.gmra.mxu2 %vm612_vm2, %v7648_v39  ;;  %v7782_v21 = vld [vmem:[%s7321_s29 + $0xa0] sm:$0xff] }
 0x130   : > { %12288 = vst [vmem:[#allocation80_spill] sm:$0xff] %v7770_v6  ;;  %1138 = vperm.xlu0 %6778, %v7052_v1  }
 0x131   : > { %12289 = vst [vmem:[#allocation81_spill] sm:$0xff] %v7777_v19  ;;  %v7779_v52 = vpop.f32.mrf.mxu1  ;;  %v7794_v19 = vpop.f32.mrf.mxu2 }
 0x132   : > { %12290 = vst [vmem:[#allocation82_spill] sm:$0xff] %v7779_v52 }
 0x133   : > { %12293 = vst [vmem:[#allocation85_spill] sm:$0xff] %v7794_v19  ;;  %v7809_v19 = vld [vmem:[%s7321_s29 + $0xa8] sm:$0xff] }
 0x134   : > { %1847 = vperm.xlu2 %6764, %v7276_v55  }
 0x135   : > { %1843 = vperm.xlu1 %6763, %v7164_v24   ;;  %v7786_v6 = vpop.permute.xlu1 %1429  ;;  %v7788_v61 = vpop.permute.xlu2 %1592 }
 0x136   : > { %12291 = vst [vmem:[#allocation83_spill] sm:$0xff] %v7786_v6  ;;  %6347 = vmatmul.msk.f32.gmra.mxu1 %vm612_vm2, %v7782_v21  ;;  %6391 = vmatmul.msk.f32.gmra.mxu3 %vm612_vm2, %v7755_v43  ;;  %v7802_v6 = vpop.f32.mrf.mxu3 }
 0x137   : > { %12292 = vst [vmem:[#allocation84_spill] sm:$0xff] %v7788_v61  ;;  %6412 = vmatmul.msk.f32.gmra.mxu0 %vm612_vm2, %v7733_v9  ;;  %6454 = vmatmul.msk.f32.gmra.mxu2 %vm612_vm2, %v7677_v46  ;;  %v765_v52 = vpop.permute.xlu0 %764  ;;  %v1217_v61 = vmul.f32 %v7418_v34, %v1063_v10 }
 0x138   : > { %1158 = vperm.xlu0 %6778, %v7088_v7   ;;  %v872_v24 = vmul.f32 %v765_v52, %v7671_v51  ;;  %v1218_v52 = vmul.f32 %v7361_v40, %v1066_v15 }
 0x139   : > { %v7806_v23 = vpop.f32.mrf.mxu1 }
 0x13a   : > { %v981_v4 = vadd.f32 %v7561_v60, %v872_v24  ;;  %12294 = vst [vmem:[#allocation86_spill] sm:$0xff] %v7806_v23 }
 0x13c   : > { %1859 = vperm.xlu2 %6764, %v7291_v59   ;;  %v7812_v37 = vadd.f32 %v1217_v61, %v981_v4  ;;  %v7833_v4 = vpop.f32.mrf.mxu2 }
 0x13d   : > { %1855 = vperm.xlu1 %6763, %v7182_v28   ;;  %v7817_v56 = vpop.permute.xlu2 %1604  ;;  %12296 = vst [vmem:[#allocation88_spill] sm:$0xff] %v7833_v4 }
 0x13e   : > { %12295 = vst [vmem:[#allocation87_spill] sm:$0xff] %v7817_v56  ;;  %6348 = vmatmul.msk.f32.gmra.mxu1 %vm612_vm2, %v7809_v19  ;;  %6392 = vmatmul.msk.f32.gmra.mxu3 %vm612_vm2, %v7782_v21  ;;  %v7823_v51 = vpop.permute.xlu1 %1568  ;;  %v7831_v61 = vpop.f32.mrf.mxu3  ;;  %v12297_v56 = vmov 5  }
 0x13f   : > { %6413 = vmatmul.msk.f32.gmra.mxu0 %vm612_vm2, %v7755_v43  ;;  %6455 = vmatmul.msk.f32.gmra.mxu2 %vm612_vm2, %v7706_v47  ;;  %v770_v60 = vpop.permute.xlu0 %769 }
 0x140   : > { %1170 = vperm.xlu0 %6778, %v7108_v11   ;;  %v873_v28 = vmul.f32 %v770_v60, %v7700_v33 }
 0x141   : > { %v714_v10 = vpop.f32.mrf.mxu1 }
 0x142   : > { %v984_v34 = vadd.f32 %v7585_v31, %v873_v28  ;;  %v7850_v31 = vpop.f32.mrf.mxu0 }
 0x144   : > { %v7837_v24 = vadd.f32 %v1218_v52, %v984_v34  ;;  %6768 = vset.pattern.permute.xlu2 %v12297_v56  ;;  %v7862_v60 = vpop.f32.mrf.mxu2 }
 0x145   : > { %6767 = vset.pattern.permute.xlu1 %v12297_v56  ;;  %1998 = vperm.xlu2 %6768, %v7052_v1   ;;  %v7842_v23 = vpop.permute.xlu2 %1616  ;;  %12301 = vst [vmem:[#allocation92_spill] sm:$0xff] %v7862_v60 }
 0x146   : > { %12298 = vst [vmem:[#allocation89_spill] sm:$0xff] %v7842_v23  ;;  %6393 = vmatmul.msk.f32.gmra.mxu3 %vm612_vm2, %v7809_v19  ;;  %6416 = vmatmul.msk.f32.vlgmr.msrb.gmra.mxu1 %vm612_vm2, %v7327_v17  ;;  %v7848_v33 = vpop.permute.xlu1 %1576 }
 0x147   : > { %12299 = vst [vmem:[#allocation90_spill] sm:$0xff] %v7848_v33  ;;  %6414 = vmatmul.msk.f32.gmra.mxu0 %vm612_vm2, %v7782_v21  ;;  %6456 = vmatmul.msk.f32.gmra.mxu2 %vm612_vm2, %v7733_v9  ;;  %v795_v40 = vpop.permute.xlu0 %794 }
 0x148   : > { %1994 = vperm.xlu1 %6767, %v7199_v32   ;;  %1182 = vperm.xlu0 %6778, %v7135_v16   ;;  %v7858_v1 = vpop.f32.mrf.mxu3  ;;  %v878_v28 = vmul.f32 %v795_v40, %v714_v10 }
 0x149   : > { %v7860_v15 = vpop.f32.mrf.mxu1 }
 0x14a   : > { %12300 = vst [vmem:[#allocation91_spill] sm:$0xff] %v7860_v15  ;;  %v7882_v10 = vpop.f32.mrf.mxu0 }
 0x14c   : > { %v7889_v60 = vpop.f32.mrf.mxu2 }
 0x14d   : > { %2006 = vperm.xlu2 %6768, %v7047_v0   ;;  %v7865_v52 = vpop.permute.xlu2 %1628  ;;  %v999_v0 = vadd.f32 %v7757_v42, %v878_v28  ;;  %12307 = vst [vmem:[#allocation98_spill] sm:$0xff] %v7889_v60  ;;  %v12328_v60 = vmov 6  }
 0x14e   : > { %12302 = vst [vmem:[#allocation93_spill] sm:$0xff] %v7865_v52  ;;  %6417 = vmatmul.msk.f32.gmra.mxu1 %vm612_vm2, %v7342_v30  ;;  %6460 = vmatmul.msk.f32.vlgmr.msra.gmra.mxu3 %vm612_vm2, %v7327_v17  ;;  %v7871_v32 = vpop.permute.xlu1 %1588 }
 0x14f   : > { %12303 = vst [vmem:[#allocation94_spill] sm:$0xff] %v7871_v32  ;;  %6415 = vmatmul.msk.f32.gmra.mxu0 %vm612_vm2, %v7809_v19  ;;  %6457 = vmatmul.msk.f32.gmra.mxu2 %vm612_vm2, %v7755_v43  ;;  %v7877_v34 = vpop.permute.xlu0 %809  ;;  %v12337_v32 = vmov 2  }
 0x150   : > { %12304 = vst [vmem:[#allocation95_spill] sm:$0xff] %v7877_v34  ;;  %2002 = vperm.xlu1 %6767, %v7093_v8   ;;  %1194 = vperm.xlu0 %6778, %v7170_v25   ;;  %v1081_v40 = vpop.f32.mrf.mxu3 }
 0x151   : > { %v1223_v56 = vmul.f32 %v7397_v58, %v1081_v40  ;;  %v7885_v52 = vpop.f32.mrf.mxu1  ;;  %v7914_v58 = vld [vmem:[%s7611_s17 + $0x8] sm:$0xff] }
 0x152   : > { %12305 = vst [vmem:[#allocation96_spill] sm:$0xff] %v7885_v52 }
 0x153   : > { %v7887_v23 = vadd.f32 %v1223_v56, %v999_v0  ;;  %v7910_v56 = vpop.f32.mrf.mxu0 }
 0x154   : > { %v7924_v28 = vpop.f32.mrf.mxu2 }
 0x155   : > { %12306 = vst [vmem:[#allocation97_spill] sm:$0xff] %v7887_v23  ;;  %2018 = vperm.xlu2 %6768, %v7088_v7   ;;  %v7892_v34 = vpop.permute.xlu2 %1640 }
 0x156   : > { %12308 = vst [vmem:[#allocation99_spill] sm:$0xff] %v7892_v34  ;;  %6418 = vmatmul.msk.f32.gmra.mxu1 %vm612_vm2, %v7356_v36  ;;  %6461 = vmatmul.msk.f32.gmra.mxu3 %vm612_vm2, %v7342_v30  ;;  %v7898_v8 = vpop.permute.xlu1 %1600  ;;  %v7940_v34 = vld [vmem:[%s7611_s17 + $0x30] sm:$0xff] }
 0x157   : > { %12309 = vst [vmem:[#allocation100_spill] sm:$0xff] %v7898_v8  ;;  %6458 = vmatmul.msk.f32.gmra.mxu2 %vm612_vm2, %v7782_v21  ;;  %6482 = vmatmul.msk.f32.vlgmr.msra.gmra.mxu0 %vm612_vm2, %v7327_v17  ;;  %v7904_v42 = vpop.permute.xlu0 %824  ;;  %v7982_v8 = vld [vmem:[%s7611_s17 + $0x60] sm:$0xff] }
 0x158   : > { %12310 = vst [vmem:[#allocation101_spill] sm:$0xff] %v7904_v42  ;;  %2014 = vperm.xlu1 %6767, %v7220_v38   ;;  %1206 = vperm.xlu0 %6778, %v7187_v29   ;;  %v7960_v42 = vld [vmem:[%s7611_s17 + $0x48] sm:$0xff] }
 0x159   : > { %v7908_v7 = vpop.f32.mrf.mxu1  ;;  %12313 = vst [vmem:[#allocation104_spill] sm:$0xff] %v7924_v28 }
 0x15a   : > { %12311 = vst [vmem:[#allocation102_spill] sm:$0xff] %v7908_v7 }
 0x15b   : > { %v7936_v40 = vpop.f32.mrf.mxu0 }
 0x15c   : > { %12315 = vst [vmem:[#allocation106_spill] sm:$0xff] %v7936_v40 }
 0x15d   : > { %2030 = vperm.xlu2 %6768, %v7108_v11  }
 0x15e   : > { %6419 = vmatmul.msk.f32.gmra.mxu1 %vm612_vm2, %v7374_v44  ;;  %6462 = vmatmul.msk.f32.gmra.mxu3 %vm612_vm2, %v7356_v36  ;;  %v7920_v17 = vpop.permute.xlu1 %1612  ;;  %v7922_v38 = vpop.permute.xlu2 %1779 }
 0x15f   : > { %12312 = vst [vmem:[#allocation103_spill] sm:$0xff] %v7920_v17  ;;  %6459 = vmatmul.msk.f32.gmra.mxu2 %vm612_vm2, %v7809_v19  ;;  %6483 = vmatmul.msk.f32.gmra.mxu0 %vm612_vm2, %v7342_v30  ;;  %v7930_v11 = vpop.permute.xlu0 %839 }
 0x160   : > { %2026 = vperm.xlu1 %6767, %v7232_v41   ;;  %2751 = vperm.xlu0 %6778, %v7914_v58  }
 0x161   : > { %v7934_v0 = vpop.f32.mrf.mxu1 }
 0x162   : > { %12314 = vst [vmem:[#allocation105_spill] sm:$0xff] %v7934_v0 }
 0x163   : > { %v7974_v28 = vpop.f32.mrf.mxu0 }
 0x164   : > { %12321 = vst [vmem:[#allocation112_spill] sm:$0xff] %v7974_v28  ;;  %v8429_v28 = vld [vmem:[%s7611_s17 + $0x20] sm:$0xff] }
 0x165   : > { %2042 = vperm.xlu2 %6768, %v7135_v16   ;;  %12404 = vst [vmem:[#allocation190_spill] sm:$0xff] %v8429_v28 }
 0x166   : > { %6420 = vmatmul.msk.f32.gmra.mxu1 %vm612_vm2, %v7392_v53  ;;  %6463 = vmatmul.msk.f32.gmra.mxu3 %vm612_vm2, %v7374_v44  ;;  %v7946_v30 = vpop.permute.xlu1 %1624  ;;  %v7948_v41 = vpop.permute.xlu2 %1791 }
 0x167   : > { %12316 = vst [vmem:[#allocation107_spill] sm:$0xff] %v7946_v30  ;;  %6484 = vmatmul.msk.f32.gmra.mxu0 %vm612_vm2, %v7356_v36  ;;  %v7952_v17 = vpop.permute.xlu0 %854 }
 0x168   : > { %12317 = vst [vmem:[#allocation108_spill] sm:$0xff] %v7948_v41  ;;  %2038 = vperm.xlu1 %6767, %v7245_v45   ;;  %2771 = vperm.xlu0 %6778, %v7940_v34  }
 0x169   : > { %v7956_v16 = vpop.f32.mrf.mxu1 }
 0x16a   : > { %12318 = vst [vmem:[#allocation109_spill] sm:$0xff] %v7956_v16  ;;  %v8002_v16 = vpop.f32.mrf.mxu3 }
 0x16b   : > { %12327 = vst [vmem:[#allocation118_spill] sm:$0xff] %v8002_v16 }
 0x16d   : > { %2054 = vperm.xlu2 %6768, %v7170_v25  }
 0x16e   : > { %6421 = vmatmul.msk.f32.gmra.mxu1 %vm612_vm2, %v7412_v13  ;;  %6464 = vmatmul.msk.f32.gmra.mxu3 %vm612_vm2, %v7392_v53  ;;  %v7966_v36 = vpop.permute.xlu1 %1636  ;;  %v7968_v30 = vpop.permute.xlu2 %1799 }
 0x16f   : > { %12319 = vst [vmem:[#allocation110_spill] sm:$0xff] %v7968_v30  ;;  %6485 = vmatmul.msk.f32.gmra.mxu0 %vm612_vm2, %v7374_v44  ;;  %v7972_v45 = vpop.permute.xlu0 %869 }
 0x170   : > { %12320 = vst [vmem:[#allocation111_spill] sm:$0xff] %v7972_v45  ;;  %2050 = vperm.xlu1 %6767, %v7261_v50   ;;  %2783 = vperm.xlu0 %6778, %v7960_v42  }
 0x171   : > { %v7978_v25 = vpop.f32.mrf.mxu1 }
 0x172   : > { %12322 = vst [vmem:[#allocation113_spill] sm:$0xff] %v7978_v25 }
 0x175   : > { %2066 = vperm.xlu2 %6768, %v7187_v29   ;;  %v7998_v29 = vpop.f32.mrf.mxu0 }
 0x176   : > { %6422 = vmatmul.msk.f32.gmra.mxu1 %vm612_vm2, %v7432_v57  ;;  %6465 = vmatmul.msk.f32.gmra.mxu3 %vm612_vm2, %v7412_v13  ;;  %v7988_v44 = vpop.permute.xlu2 %1811  ;;  %12325 = vst [vmem:[#allocation116_spill] sm:$0xff] %v7998_v29 }
 0x177   : > { %12323 = vst [vmem:[#allocation114_spill] sm:$0xff] %v7988_v44  ;;  %6486 = vmatmul.msk.f32.gmra.mxu0 %vm612_vm2, %v7392_v53  ;;  %v7992_v50 = vpop.permute.xlu1 %1775  ;;  %v7994_v45 = vpop.permute.xlu0 %2569  ;;  %v8006_v44 = vld [vmem:[%s7611_s17 + $0x78] sm:$0xff] }
 0x178   : > { %12324 = vst [vmem:[#allocation115_spill] sm:$0xff] %v7994_v45  ;;  %2062 = vperm.xlu1 %6767, %v7276_v55   ;;  %2795 = vperm.xlu0 %6778, %v7982_v8   ;;  %v8019_v55 = vld [vmem:[%s12114_s6] sm:$0xff] }
 0x179   : > { %v8000_v25 = vpop.f32.mrf.mxu1 }
 0x17a   : > { %12326 = vst [vmem:[#allocation117_spill] sm:$0xff] %v8000_v25 }
 0x17d   : > { %6769 = vset.pattern.permute.xlu2 %v12328_v60 }
 0x17e   : > { %6423 = vmatmul.msk.f32.gmra.mxu1 %vm612_vm2, %v7453_v3  ;;  %6466 = vmatmul.msk.f32.gmra.mxu3 %vm612_vm2, %v7432_v57  ;;  %v8012_v53 = vpop.permute.xlu2 %1823 }
 0x17f   : > { %12329 = vst [vmem:[#allocation119_spill] sm:$0xff] %v8012_v53  ;;  %6487 = vmatmul.msk.f32.gmra.mxu0 %vm612_vm2, %v7412_v13  ;;  %2205 = vperm.xlu2 %6769, %v8019_v55   ;;  %v8022_v45 = vpop.permute.xlu1 %1787  ;;  %v8024_v25 = vpop.permute.xlu0 %2594 }
 0x180   : > { %12330 = vst [vmem:[#allocation120_spill] sm:$0xff] %v8024_v25  ;;  %2074 = vperm.xlu1 %6767, %v7291_v59   ;;  %2807 = vperm.xlu0 %6778, %v8006_v44   ;;  %v8030_v53 = vpop.f32.mrf.mxu0  ;;  %v8032_v13 = vpop.f32.mrf.mxu3  ;;  %v8045_v59 = vld [vmem:[%s12114_s6 + $0x18] sm:$0xff] }
 0x181   : > { %12332 = vst [vmem:[#allocation122_spill] sm:$0xff] %v8030_v53 }
 0x182   : > { %12333 = vst [vmem:[#allocation123_spill] sm:$0xff] %v8032_v13 }
 0x183   : > { %v8028_v0 = vpop.f32.mrf.mxu1 }
 0x184   : > { %12331 = vst [vmem:[#allocation121_spill] sm:$0xff] %v8028_v0 }
 0x186   : > { %6424 = vmatmul.msk.f32.gmra.mxu1 %vm612_vm2, %v7476_v27  ;;  %6467 = vmatmul.msk.f32.gmra.mxu3 %vm612_vm2, %v7453_v3  ;;  %v8038_v7 = vpop.permute.xlu2 %1835 }
 0x187   : > { %12334 = vst [vmem:[#allocation124_spill] sm:$0xff] %v8038_v7  ;;  %6488 = vmatmul.msk.f32.gmra.mxu0 %vm612_vm2, %v7432_v57  ;;  %2217 = vperm.xlu2 %6769, %v8045_v59   ;;  %v8048_v25 = vpop.permute.xlu1 %1795  ;;  %v8050_v0 = vpop.permute.xlu0 %2609  ;;  %v6831_v7 = vld [vmem:[%s12114_s6 + $0x10] sm:$0xff] }
 0x188   : > { %12335 = vst [vmem:[#allocation125_spill] sm:$0xff] %v8048_v25  ;;  %6771 = vset.pattern.permute.xlu1 %v12328_v60  ;;  %6781 = vset.pattern.permute.xlu0 %v12337_v32  ;;  %v8060_v53 = vpop.f32.mrf.mxu0  ;;  %v8080_v4 = vpop.f32.mrf.mxu3  ;;  %v6841_v25 = vld [vmem:[%s12114_s6 + $0x80] sm:$0xff] }
 0x189   : > { %12336 = vst [vmem:[#allocation126_spill] sm:$0xff] %v8050_v0  ;;  %2213 = vperm.xlu1 %6771, %v6831_v7   ;;  %1345 = vperm.xlu0 %6781, %v8019_v55   ;;  %v8073_v7 = vld [vmem:[%s12114_s6 + $0x28] sm:$0xff] }
 0x18a   : > { %12338 = vst [vmem:[#allocation127_spill] sm:$0xff] %v8060_v53 }
 0x18b   : > { %v8058_v57 = vpop.f32.mrf.mxu1  ;;  %12342 = vst [vmem:[#allocation131_spill] sm:$0xff] %v8080_v4 }
 0x18e   : > { %6425 = vmatmul.msk.f32.gmra.mxu1 %vm612_vm2, %v7498_v35  ;;  %6468 = vmatmul.msk.f32.gmra.mxu3 %vm612_vm2, %v7476_v27  ;;  %v8066_v0 = vpop.permute.xlu2 %1847 }
 0x18f   : > { %12339 = vst [vmem:[#allocation128_spill] sm:$0xff] %v8066_v0  ;;  %6489 = vmatmul.msk.f32.gmra.mxu0 %vm612_vm2, %v7453_v3  ;;  %2225 = vperm.xlu2 %6769, %v8073_v7   ;;  %v8076_v60 = vpop.permute.xlu1 %1807  ;;  %v8078_v53 = vpop.permute.xlu0 %2624  ;;  %v8085_v0 = vld [vmem:[%s12114_s6 + $0x20] sm:$0xff] }
 0x190   : > { %12340 = vst [vmem:[#allocation129_spill] sm:$0xff] %v8076_v60  ;;  %v8102_v60 = vld [vmem:[%s12114_s6 + $0x40] sm:$0xff]  ;;  %v8109_v13 = vpop.f32.mrf.mxu0 }
 0x191   : > { %12341 = vst [vmem:[#allocation130_spill] sm:$0xff] %v8078_v53  ;;  %2221 = vperm.xlu1 %6771, %v8085_v0   ;;  %1365 = vperm.xlu0 %6781, %v8073_v7  }
 0x192   : > { %12347 = vst [vmem:[#allocation136_spill] sm:$0xff] %v8109_v13 }
 0x193   : > { %v8089_v3 = vpop.f32.mrf.mxu1 }
 0x194   : > { %12343 = vst [vmem:[#allocation132_spill] sm:$0xff] %v8089_v3 }
 0x196   : > { %6426 = vmatmul.msk.f32.gmra.mxu1 %vm612_vm2, %v7518_v48  ;;  %6469 = vmatmul.msk.f32.gmra.mxu3 %vm612_vm2, %v7498_v35  ;;  %v8095_v53 = vpop.permute.xlu2 %1859 }
 0x197   : > { %12344 = vst [vmem:[#allocation133_spill] sm:$0xff] %v8095_v53  ;;  %6490 = vmatmul.msk.f32.gmra.mxu0 %vm612_vm2, %v7476_v27  ;;  %2237 = vperm.xlu2 %6769, %v8102_v60   ;;  %v8105_v4 = vpop.permute.xlu1 %1819  ;;  %v8107_v3 = vpop.permute.xlu0 %2639  ;;  %v6835_v53 = vld [vmem:[%s12114_s6 + $0x38] sm:$0xff] }
 0x198   : > { %12345 = vst [vmem:[#allocation134_spill] sm:$0xff] %v8105_v4  ;;  %v8115_v27 = vpop.f32.mrf.mxu3 }
 0x199   : > { %12346 = vst [vmem:[#allocation135_spill] sm:$0xff] %v8107_v3  ;;  %2233 = vperm.xlu1 %6771, %v6835_v53   ;;  %1377 = vperm.xlu0 %6781, %v8102_v60   ;;  %v8128_v3 = vld [vmem:[%s12114_s6 + $0x58] sm:$0xff] }
 0x19a   : > { %12348 = vst [vmem:[#allocation137_spill] sm:$0xff] %v8115_v27 }
 0x19b   : > { %v8117_v52 = vpop.f32.mrf.mxu1 }
 0x19c   : > { %12349 = vst [vmem:[#allocation138_spill] sm:$0xff] %v8117_v52  ;;  %v6837_v52 = vld [vmem:[%s12114_s6 + $0x50] sm:$0xff] }
 0x19e   : > { %6427 = vmatmul.msk.f32.gmra.mxu1 %vm612_vm2, %v7540_v22  ;;  %6470 = vmatmul.msk.f32.gmra.mxu3 %vm612_vm2, %v7518_v48 }
 0x19f   : > { %6491 = vmatmul.msk.f32.gmra.mxu0 %vm612_vm2, %v7498_v35  ;;  %2249 = vperm.xlu2 %6769, %v8128_v3   ;;  %v8131_v53 = vpop.permute.xlu1 %1831  ;;  %v8133_v4 = vpop.permute.xlu2 %1998 }
 0x1a0   : > { %12350 = vst [vmem:[#allocation139_spill] sm:$0xff] %v8131_v53  ;;  %v8141_v35 = vpop.f32.mrf.mxu0  ;;  %v8145_v16 = vpop.f32.mrf.mxu3 }
 0x1a1   : > { %2245 = vperm.xlu1 %6771, %v6837_v52   ;;  %1389 = vperm.xlu0 %6781, %v8128_v3   ;;  %12351 = vst [vmem:[#allocation140_spill] sm:$0xff] %v8141_v35  ;;  %v8156_v52 = vld [vmem:[%s12114_s6 + $0x70] sm:$0xff] }
 0x1a2   : > { %v8139_v27 = vpop.permute.xlu0 %1138  ;;  %12352 = vst [vmem:[#allocation141_spill] sm:$0xff] %v8145_v16  ;;  %v6839_v16 = vld [vmem:[%s12114_s6 + $0x68] sm:$0xff] }
 0x1a3   : > { %v8143_v13 = vpop.f32.mrf.mxu1 }
 0x1a6   : > { %6428 = vmatmul.msk.f32.gmra.mxu1 %vm612_vm2, %v7564_v63  ;;  %6471 = vmatmul.msk.f32.gmra.mxu3 %vm612_vm2, %v7540_v22 }
 0x1a7   : > { %6492 = vmatmul.msk.f32.gmra.mxu0 %vm612_vm2, %v7518_v48  ;;  %2261 = vperm.xlu2 %6769, %v8156_v52   ;;  %v8159_v53 = vpop.permute.xlu1 %1843  ;;  %v8161_v35 = vpop.permute.xlu2 %2006 }
 0x1a8   : > { %12353 = vst [vmem:[#allocation142_spill] sm:$0xff] %v8159_v53  ;;  %v8171_v30 = vpop.f32.mrf.mxu0  ;;  %v8177_v53 = vpop.f32.mrf.mxu3 }
 0x1a9   : > { %12354 = vst [vmem:[#allocation143_spill] sm:$0xff] %v8161_v35  ;;  %2257 = vperm.xlu1 %6771, %v6839_v16   ;;  %1401 = vperm.xlu0 %6781, %v8156_v52   ;;  %v8184_v16 = vld [vmem:[%s12114_s6 + $0x88] sm:$0xff] }
 0x1aa   : > { %v8167_v15 = vpop.permute.xlu0 %1158  ;;  %12356 = vst [vmem:[#allocation145_spill] sm:$0xff] %v8171_v30 }
 0x1ab   : > { %12355 = vst [vmem:[#allocation144_spill] sm:$0xff] %v8167_v15  ;;  %v8169_v48 = vpop.f32.mrf.mxu1 }
 0x1ac   : > { %12357 = vst [vmem:[#allocation146_spill] sm:$0xff] %v8177_v53 }
 0x1ae   : > { %6429 = vmatmul.msk.f32.gmra.mxu1 %vm612_vm2, %v7588_v12  ;;  %6472 = vmatmul.msk.f32.gmra.mxu3 %vm612_vm2, %v7564_v63 }
 0x1af   : > { %6493 = vmatmul.msk.f32.gmra.mxu0 %vm612_vm2, %v7540_v22  ;;  %2273 = vperm.xlu2 %6769, %v8184_v16   ;;  %v8187_v15 = vpop.permute.xlu2 %2018  ;;  %v8189_v30 = vpop.permute.xlu1 %1855 }
 0x1b0   : > { %12358 = vst [vmem:[#allocation147_spill] sm:$0xff] %v8187_v15  ;;  %v8203_v15 = vpop.f32.mrf.mxu0 }
 0x1b1   : > { %12359 = vst [vmem:[#allocation148_spill] sm:$0xff] %v8189_v30  ;;  %2269 = vperm.xlu1 %6771, %v6841_v25   ;;  %1413 = vperm.xlu0 %6781, %v8184_v16   ;;  %v8210_v25 = vld [vmem:[%s12114_s6 + $0xa0] sm:$0xff] }
 0x1b2   : > { %v8195_v53 = vpop.permute.xlu0 %1170  ;;  %12362 = vst [vmem:[#allocation151_spill] sm:$0xff] %v8203_v15 }
 0x1b3   : > { %12360 = vst [vmem:[#allocation149_spill] sm:$0xff] %v8195_v53  ;;  %v8197_v22 = vpop.f32.mrf.mxu1  ;;  %v6843_v53 = vld [vmem:[%s12114_s6 + $0x98] sm:$0xff] }
 0x1b4   : > { %12361 = vst [vmem:[#allocation150_spill] sm:$0xff] %v8197_v22  ;;  %v8215_v22 = vpop.f32.mrf.mxu3 }
 0x1b5   : > { %12364 = vst [vmem:[#allocation153_spill] sm:$0xff] %v8215_v22  ;;  %v12367_v22 = vmov 7  }
 0x1b6   : > { %6430 = vmatmul.msk.f32.gmra.mxu1 %vm612_vm2, %v7622_v18  ;;  %6473 = vmatmul.msk.f32.gmra.mxu3 %vm612_vm2, %v7588_v12 }
 0x1b7   : > { %6494 = vmatmul.msk.f32.gmra.mxu0 %vm612_vm2, %v7564_v63  ;;  %2285 = vperm.xlu2 %6769, %v8210_v25   ;;  %v8213_v30 = vpop.permute.xlu2 %2030 }
 0x1b8   : > { %12363 = vst [vmem:[#allocation152_spill] sm:$0xff] %v8213_v30  ;;  %v8239_v30 = vld [vmem:[%s12114_s6 + $0x8] sm:$0xff] }
 0x1b9   : > { %2281 = vperm.xlu1 %6771, %v6843_v53   ;;  %1425 = vperm.xlu0 %6781, %v8210_v25  }
 0x1ba   : > { %v8221_v15 = vpop.permute.xlu1 %1994  ;;  %v8223_v63 = vpop.permute.xlu0 %1182 }
 0x1bb   : > { %12365 = vst [vmem:[#allocation154_spill] sm:$0xff] %v8223_v63  ;;  %v8225_v35 = vpop.f32.mrf.mxu1 }
 0x1bc   : > { %12366 = vst [vmem:[#allocation155_spill] sm:$0xff] %v8225_v35  ;;  %v8242_v35 = vpop.f32.mrf.mxu0 }
 0x1bd   : > { %12369 = vst [vmem:[#allocation157_spill] sm:$0xff] %v8242_v35 }
 0x1be   : > { %6431 = vmatmul.msk.f32.gmra.mxu1 %vm612_vm2, %v7648_v39  ;;  %6474 = vmatmul.msk.f32.gmra.mxu3 %vm612_vm2, %v7622_v18 }
 0x1bf   : > { %6495 = vmatmul.msk.f32.gmra.mxu0 %vm612_vm2, %v7588_v12  ;;  %6773 = vset.pattern.permute.xlu2 %v12367_v22  ;;  %v8234_v53 = vpop.permute.xlu2 %2042 }
 0x1c0   : > { %12368 = vst [vmem:[#allocation156_spill] sm:$0xff] %v8234_v53  ;;  %2424 = vperm.xlu2 %6773, %v8239_v30   ;;  %v8251_v53 = vpop.f32.mrf.mxu3 }
 0x1c1   : > { %6772 = vset.pattern.permute.xlu1 %v12367_v22  ;;  %2911 = vperm.xlu0 %6781, %v7914_v58   ;;  %12371 = vst [vmem:[#allocation159_spill] sm:$0xff] %v8251_v53 }
 0x1c2   : > { %2420 = vperm.xlu1 %6772, %v8019_v55   ;;  %v8247_v12 = vpop.permute.xlu1 %2002  ;;  %v8249_v63 = vpop.permute.xlu0 %1194 }
 0x1c3   : > { %12370 = vst [vmem:[#allocation158_spill] sm:$0xff] %v8249_v63  ;;  %v8253_v41 = vpop.f32.mrf.mxu1 }
 0x1c4   : > { %v8272_v35 = vpop.f32.mrf.mxu0 }
 0x1c5   : > { %12374 = vst [vmem:[#allocation162_spill] sm:$0xff] %v8272_v35 }
 0x1c6   : > { %6432 = vmatmul.msk.f32.gmra.mxu1 %vm612_vm2, %v7677_v46  ;;  %6475 = vmatmul.msk.f32.gmra.mxu3 %vm612_vm2, %v7648_v39 }
 0x1c7   : > { %6496 = vmatmul.msk.f32.gmra.mxu0 %vm612_vm2, %v7622_v18  ;;  %v8261_v22 = vpop.permute.xlu2 %2054 }
 0x1c8   : > { %12372 = vst [vmem:[#allocation160_spill] sm:$0xff] %v8261_v22  ;;  %2436 = vperm.xlu2 %6773, %v8085_v0   ;;  %v8274_v23 = vpop.f32.mrf.mxu3  ;;  %v6845_v0 = vld [vmem:[%s12114_s6 + $0x30] sm:$0xff] }
 0x1c9   : > { %2931 = vperm.xlu0 %6781, %v7940_v34  }
 0x1ca   : > { %2432 = vperm.xlu1 %6772, %v8045_v59   ;;  %v8266_v55 = vpop.permute.xlu1 %2014  ;;  %v8268_v63 = vpop.permute.xlu0 %1206 }
 0x1cb   : > { %12373 = vst [vmem:[#allocation161_spill] sm:$0xff] %v8266_v55  ;;  %v8270_v53 = vpop.f32.mrf.mxu1 }
 0x1cc   : > { %v8295_v55 = vpop.f32.mrf.mxu0 }
 0x1ce   : > { %6433 = vmatmul.msk.f32.gmra.mxu1 %vm612_vm2, %v7706_v47  ;;  %6476 = vmatmul.msk.f32.gmra.mxu3 %vm612_vm2, %v7677_v46 }
 0x1cf   : > { %6497 = vmatmul.msk.f32.gmra.mxu0 %vm612_vm2, %v7648_v39  ;;  %v8282_v18 = vpop.permute.xlu2 %2066 }
 0x1d0   : > { %12375 = vst [vmem:[#allocation163_spill] sm:$0xff] %v8282_v18  ;;  %2444 = vperm.xlu2 %6773, %v6845_v0   ;;  %v8301_v39 = vpop.f32.mrf.mxu3 }
 0x1d1   : > { %2943 = vperm.xlu0 %6781, %v7960_v42   ;;  %12378 = vst [vmem:[#allocation166_spill] sm:$0xff] %v8301_v39 }
 0x1d2   : > { %2440 = vperm.xlu1 %6772, %v8073_v7   ;;  %v8289_v59 = vpop.permute.xlu1 %2026  ;;  %v8291_v22 = vpop.permute.xlu0 %2751  ;;  %v6846_v7 = vld [vmem:[%s12114_s6 + $0x48] sm:$0xff] }
 0x1d3   : > { %12376 = vst [vmem:[#allocation164_spill] sm:$0xff] %v8289_v59  ;;  %v8293_v35 = vpop.f32.mrf.mxu1 }
 0x1d4   : > { %12377 = vst [vmem:[#allocation165_spill] sm:$0xff] %v8291_v22 }
 0x1d6   : > { %6434 = vmatmul.msk.f32.gmra.mxu1 %vm612_vm2, %v7733_v9  ;;  %6477 = vmatmul.msk.f32.gmra.mxu3 %vm612_vm2, %v7706_v47 }
 0x1d7   : > { %6498 = vmatmul.msk.f32.gmra.mxu0 %vm612_vm2, %v7677_v46  ;;  %v8324_v46 = vpop.f32.mrf.mxu0 }
 0x1d8   : > { %2456 = vperm.xlu2 %6773, %v6846_v7   ;;  %12381 = vst [vmem:[#allocation169_spill] sm:$0xff] %v8324_v46  ;;  %v8329_v39 = vpop.f32.mrf.mxu3  ;;  %v6848_v46 = vld [vmem:[%s12114_s6 + $0x78] sm:$0xff] }
 0x1d9   : > { %2955 = vperm.xlu0 %6781, %v7982_v8   ;;  %v8309_v18 = vpop.permute.xlu2 %2205  ;;  %12382 = vst [vmem:[#allocation170_spill] sm:$0xff] %v8329_v39 }
 0x1da   : > { %2452 = vperm.xlu1 %6772, %v8102_v60   ;;  %v8312_v59 = vpop.permute.xlu1 %2038  ;;  %v8314_v29 = vpop.permute.xlu0 %2771  ;;  %v6847_v60 = vld [vmem:[%s12114_s6 + $0x60] sm:$0xff] }
 0x1db   : > { %12379 = vst [vmem:[#allocation167_spill] sm:$0xff] %v8312_v59  ;;  %v8316_v22 = vpop.f32.mrf.mxu1 }
 0x1dc   : > { %12380 = vst [vmem:[#allocation168_spill] sm:$0xff] %v8314_v29 }
 0x1de   : > { %6435 = vmatmul.msk.f32.gmra.mxu1 %vm612_vm2, %v7755_v43  ;;  %6478 = vmatmul.msk.f32.gmra.mxu3 %vm612_vm2, %v7733_v9 }
 0x1df   : > { %6499 = vmatmul.msk.f32.gmra.mxu0 %vm612_vm2, %v7706_v47 }
 0x1e0   : > { %2468 = vperm.xlu2 %6773, %v6847_v60   ;;  %v8363_v40 = vpop.f32.mrf.mxu3 }
 0x1e1   : > { %2967 = vperm.xlu0 %6781, %v8006_v44   ;;  %v8332_v59 = vpop.permute.xlu2 %2217 }
 0x1e2   : > { %12383 = vst [vmem:[#allocation171_spill] sm:$0xff] %v8332_v59  ;;  %2464 = vperm.xlu1 %6772, %v8128_v3   ;;  %v8335_v29 = vpop.permute.xlu1 %2050  ;;  %v8337_v33 = vpop.permute.xlu0 %2783  ;;  %v12387_v3 = vmov 3  }
 0x1e3   : > { %12384 = vst [vmem:[#allocation172_spill] sm:$0xff] %v8335_v29  ;;  %v8339_v47 = vpop.f32.mrf.mxu1 }
 0x1e4   : > { %12385 = vst [vmem:[#allocation173_spill] sm:$0xff] %v8337_v33 }
 0x1e5   : > { %12386 = vst [vmem:[#allocation174_spill] sm:$0xff] %v8339_v47  ;;  %v8359_v47 = vpop.f32.mrf.mxu0 }
 0x1e6   : > { %6436 = vmatmul.msk.f32.gmra.mxu1 %vm612_vm2, %v7782_v21  ;;  %6479 = vmatmul.msk.f32.gmra.mxu3 %vm612_vm2, %v7755_v43  ;;  %12391 = vst [vmem:[#allocation178_spill] sm:$0xff] %v8359_v47 }
 0x1e7   : > { %6500 = vmatmul.msk.f32.gmra.mxu0 %vm612_vm2, %v7733_v9 }
 0x1e8   : > { %2480 = vperm.xlu2 %6773, %v6848_v46  }
 0x1e9   : > { %6784 = vset.pattern.permute.xlu0 %v12387_v3  ;;  %v8351_v39 = vpop.permute.xlu2 %2225 }
 0x1ea   : > { %12388 = vst [vmem:[#allocation175_spill] sm:$0xff] %v8351_v39  ;;  %2476 = vperm.xlu1 %6772, %v8156_v52   ;;  %v8354_v29 = vpop.permute.xlu1 %2062  ;;  %1564 = vperm.xlu0 %6784, %v8239_v30   ;;  %v8357_v33 = vpop.permute.xlu0 %2795  ;;  %v6849_v30 = vld [vmem:[%s12114_s6 + $0x90] sm:$0xff] }
 0x1eb   : > { %12389 = vst [vmem:[#allocation176_spill] sm:$0xff] %v8354_v29  ;;  %v8361_v9 = vpop.f32.mrf.mxu1 }
 0x1ec   : > { %12390 = vst [vmem:[#allocation177_spill] sm:$0xff] %v8357_v33 }
 0x1ed   : > { %12392 = vst [vmem:[#allocation179_spill] sm:$0xff] %v8361_v9  ;;  %v8383_v39 = vpop.f32.mrf.mxu0  ;;  %v6850_v9 = vld [vmem:[%s7321_s29] sm:$0xff] }
 0x1ee   : > { %6437 = vmatmul.msk.f32.gmra.mxu1 %vm612_vm2, %v7809_v19  ;;  %6480 = vmatmul.msk.f32.gmra.mxu3 %vm612_vm2, %v7782_v21 }
 0x1ef   : > { %6501 = vmatmul.msk.f32.gmra.mxu0 %vm612_vm2, %v7755_v43  ;;  %v8385_v43 = vpop.f32.mrf.mxu3 }
 0x1f0   : > { %2492 = vperm.xlu2 %6773, %v6849_v30  }
 0x1f1   : > { %v8374_v52 = vpop.permute.xlu2 %2237 }
 0x1f2   : > { %12393 = vst [vmem:[#allocation180_spill] sm:$0xff] %v8374_v52  ;;  %2488 = vperm.xlu1 %6772, %v8184_v16   ;;  %v8377_v29 = vpop.permute.xlu1 %2074  ;;  %1584 = vperm.xlu0 %6784, %v6845_v0   ;;  %v8379_v47 = vpop.permute.xlu0 %2807  ;;  %v6851_v16 = vld [vmem:[%s12114_s6 + $0xa8] sm:$0xff] }
 0x1f3   : > { %12394 = vst [vmem:[#allocation181_spill] sm:$0xff] %v8377_v29  ;;  %v8381_v33 = vpop.f32.mrf.mxu1 }
 0x1f4   : > { %12395 = vst [vmem:[#allocation182_spill] sm:$0xff] %v8379_v47 }
 0x1f5   : > { %12396 = vst [vmem:[#allocation183_spill] sm:$0xff] %v8381_v33  ;;  %v8410_v33 = vpop.f32.mrf.mxu0 }
 0x1f6   : > { %6481 = vmatmul.msk.f32.gmra.mxu3 %vm612_vm2, %v7809_v19  ;;  %6504 = vmatmul.msk.f32.vlgmr.msra.gmra.mxu1 %vm612_vm2, %v6850_v9  ;;  %v6852_v9 = vld [vmem:[%s7321_s29 + $0x8] sm:$0xff] }
 0x1f7   : > { %6502 = vmatmul.msk.f32.gmra.mxu0 %vm612_vm2, %v7782_v21  ;;  %v8408_v21 = vld [vmem:[%s7611_s17 + $0x10] sm:$0xff] }
 0x1f8   : > { %2504 = vperm.xlu2 %6773, %v6851_v16  }
 0x1f9   : > { %v8396_v0 = vpop.permute.xlu2 %2249 }
 0x1fa   : > { %12397 = vst [vmem:[#allocation184_spill] sm:$0xff] %v8396_v0  ;;  %2500 = vperm.xlu1 %6772, %v8210_v25   ;;  %1596 = vperm.xlu0 %6784, %v6846_v7   ;;  %v12399_v25 = vmov 0  }
 0x1fb   : > { %v8399_v29 = vpop.permute.xlu1 %2213  ;;  %v8401_v47 = vpop.permute.xlu0 %1345 }
 0x1fc   : > { %v8403_v52 = vpop.f32.mrf.mxu1 }
 0x1fd   : > { %12398 = vst [vmem:[#allocation185_spill] sm:$0xff] %v8403_v52 }
 0x1fe   : > { %6505 = vmatmul.msk.f32.gmra.mxu1 %vm612_vm2, %v6852_v9 }
 0x1ff   : > { %6503 = vmatmul.msk.f32.gmra.mxu0 %vm612_vm2, %v7809_v19  ;;  %v6853_v19 = vld [vmem:[%s7321_s29 + $0x10] sm:$0xff] }
 0x200   : > { %6777 = vset.pattern.permute.xlu2 %v12399_v25 }
 0x201   : > { %v8415_v7 = vpop.permute.xlu2 %2261  ;;  %2579 = vperm.xlu2 %6777, %v8408_v21  }
 0x202   : > { %12400 = vst [vmem:[#allocation186_spill] sm:$0xff] %v8415_v7  ;;  %6776 = vset.pattern.permute.xlu1 %v12399_v25  ;;  %1608 = vperm.xlu0 %6784, %v6847_v60   ;;  %v8432_v7 = vld [vmem:[%s7611_s17 + $0x18] sm:$0xff] }
 0x203   : > { %v8419_v0 = vpop.permute.xlu1 %2221  ;;  %2574 = vperm.xlu1 %6776, %v7914_v58   ;;  %v8422_v9 = vpop.permute.xlu0 %1365  ;;  %12405 = vst [vmem:[#allocation191_spill] sm:$0xff] %v8432_v7 }
 0x204   : > { %12401 = vst [vmem:[#allocation187_spill] sm:$0xff] %v8419_v0  ;;  %v8424_v52 = vpop.f32.mrf.mxu1  ;;  %v8447_v0 = vld [vmem:[%s7611_s17 + $0x38] sm:$0xff] }
 0x205   : > { %12402 = vst [vmem:[#allocation188_spill] sm:$0xff] %v8422_v9 }
 0x206   : > { %12403 = vst [vmem:[#allocation189_spill] sm:$0xff] %v8424_v52  ;;  %6506 = vmatmul.msk.f32.gmra.mxu1 %vm612_vm2, %v6853_v19  ;;  %v6854_v19 = vld [vmem:[%s7321_s29 + $0x18] sm:$0xff] }
 0x207   : > { %12410 = vst [vmem:[#allocation196_spill] sm:$0xff] %v8447_v0 }
 0x209   : > { %v8434_v59 = vpop.permute.xlu2 %2273  ;;  %2589 = vperm.xlu2 %6777, %v8429_v28  }
 0x20a   : > { %12406 = vst [vmem:[#allocation192_spill] sm:$0xff] %v8434_v59  ;;  %1620 = vperm.xlu0 %6784, %v6848_v46  }
 0x20b   : > { %v8437_v60 = vpop.permute.xlu1 %2233  ;;  %2584 = vperm.xlu1 %6776, %v8432_v7   ;;  %v8440_v25 = vpop.permute.xlu0 %1377 }
 0x20c   : > { %12407 = vst [vmem:[#allocation193_spill] sm:$0xff] %v8437_v60  ;;  %v8442_v52 = vpop.f32.mrf.mxu1 }
 0x20d   : > { %12408 = vst [vmem:[#allocation194_spill] sm:$0xff] %v8440_v25 }
 0x20e   : > { %12409 = vst [vmem:[#allocation195_spill] sm:$0xff] %v8442_v52  ;;  %6507 = vmatmul.msk.f32.gmra.mxu1 %vm612_vm2, %v6854_v19  ;;  %v6855_v52 = vld [vmem:[%s7321_s29 + $0x20] sm:$0xff]  ;;  %v8462_v19 = vld [vmem:[%s7611_s17 + $0x50] sm:$0xff] }
 0x211   : > { %v8449_v9 = vpop.permute.xlu2 %2285  ;;  %2604 = vperm.xlu2 %6777, %v8447_v0  }
 0x212   : > { %12411 = vst [vmem:[#allocation197_spill] sm:$0xff] %v8449_v9  ;;  %1632 = vperm.xlu0 %6784, %v6849_v30  }
 0x213   : > { %v8452_v46 = vpop.permute.xlu1 %2245  ;;  %2599 = vperm.xlu1 %6776, %v7940_v34   ;;  %v8455_v59 = vpop.permute.xlu0 %1389 }
 0x214   : > { %12412 = vst [vmem:[#allocation198_spill] sm:$0xff] %v8452_v46  ;;  %v8457_v60 = vpop.f32.mrf.mxu1 }
 0x215   : > { %12413 = vst [vmem:[#allocation199_spill] sm:$0xff] %v8455_v59  ;;  %v6856_v59 = vld [vmem:[%s7321_s29 + $0x28] sm:$0xff] }
 0x216   : > { %12414 = vst [vmem:[#allocation200_spill] sm:$0xff] %v8457_v60  ;;  %6508 = vmatmul.msk.f32.gmra.mxu1 %vm612_vm2, %v6855_v52  ;;  %v8477_v52 = vld [vmem:[%s7611_s17 + $0x68] sm:$0xff] }
 0x219   : > { %2619 = vperm.xlu2 %6777, %v8462_v19  }
 0x21a   : > { %1644 = vperm.xlu0 %6784, %v6851_v16   ;;  %v8465_v9 = vpop.permute.xlu2 %2424 }
 0x21b   : > { %v8467_v30 = vpop.permute.xlu1 %2257  ;;  %2614 = vperm.xlu1 %6776, %v7960_v42   ;;  %v8470_v34 = vpop.permute.xlu0 %1401 }
 0x21c   : > { %12415 = vst [vmem:[#allocation201_spill] sm:$0xff] %v8467_v30  ;;  %v8472_v46 = vpop.f32.mrf.mxu1 }
 0x21d   : > { %12416 = vst [vmem:[#allocation202_spill] sm:$0xff] %v8470_v34  ;;  %v6857_v34 = vld [vmem:[%s7321_s29 + $0x30] sm:$0xff] }
 0x21e   : > { %12417 = vst [vmem:[#allocation203_spill] sm:$0xff] %v8472_v46  ;;  %6509 = vmatmul.msk.f32.gmra.mxu1 %vm612_vm2, %v6856_v59 }
 0x221   : > { %2634 = vperm.xlu2 %6777, %v8477_v52  }
 0x222   : > { %v8480_v16 = vpop.permute.xlu2 %2436  ;;  %3090 = vperm.xlu0 %6784, %v7914_v58  }
 0x223   : > { %12418 = vst [vmem:[#allocation204_spill] sm:$0xff] %v8480_v16  ;;  %v8483_v60 = vpop.permute.xlu1 %2269  ;;  %2629 = vperm.xlu1 %6776, %v7982_v8   ;;  %v8486_v42 = vpop.permute.xlu0 %1413 }
 0x224   : > { %12419 = vst [vmem:[#allocation205_spill] sm:$0xff] %v8483_v60  ;;  %v8488_v30 = vpop.f32.mrf.mxu1  ;;  %v6858_v60 = vld [vmem:[%s7321_s29 + $0x38] sm:$0xff] }
 0x225   : > { %12420 = vst [vmem:[#allocation206_spill] sm:$0xff] %v8486_v42 }
 0x226   : > { %12421 = vst [vmem:[#allocation207_spill] sm:$0xff] %v8488_v30  ;;  %6510 = vmatmul.msk.f32.gmra.mxu1 %vm612_vm2, %v6857_v34  ;;  %v6860_v30 = vld [vmem:[%s7321_s29 + $0x48] sm:$0xff] }
 0x229   : > { %6779 = vset.pattern.permute.xlu2 %v12286_v14 }
 0x22a   : > { %v8493_v59 = vpop.permute.xlu2 %2444  ;;  %2747 = vperm.xlu2 %6779, %v7616_v2  }
 0x22b   : > { %12422 = vst [vmem:[#allocation208_spill] sm:$0xff] %v8493_v59  ;;  %v8496_v46 = vpop.permute.xlu1 %2281  ;;  %2644 = vperm.xlu1 %6776, %v8006_v44   ;;  %v8499_v58 = vpop.permute.xlu0 %1425 }
 0x22c   : > { %12423 = vst [vmem:[#allocation209_spill] sm:$0xff] %v8496_v46  ;;  %v8501_v8 = vpop.f32.mrf.mxu1 }
 0x22d   : > { %12424 = vst [vmem:[#allocation210_spill] sm:$0xff] %v8499_v58  ;;  %v6859_v58 = vld [vmem:[%s7321_s29 + $0x40] sm:$0xff] }
 0x22e   : > { %12425 = vst [vmem:[#allocation211_spill] sm:$0xff] %v8501_v8  ;;  %6511 = vmatmul.msk.f32.gmra.mxu1 %vm612_vm2, %v6858_v60 }
 0x232   : > { %v8505_v42 = vpop.permute.xlu2 %2456  ;;  %2759 = vperm.xlu2 %6779, %v8432_v7  }
 0x233   : > { %12426 = vst [vmem:[#allocation212_spill] sm:$0xff] %v8505_v42  ;;  %6780 = vset.pattern.permute.xlu1 %v12286_v14  ;;  %v8509_v34 = vpop.permute.xlu0 %2911  ;;  %v8528_v14 = vpop.f32.mrf.mxu2 }
 0x234   : > { %12427 = vst [vmem:[#allocation213_spill] sm:$0xff] %v8509_v34  ;;  %v8511_v2 = vpop.permute.xlu1 %2420  ;;  %2755 = vperm.xlu1 %6780, %v8408_v21   ;;  %v8514_v44 = vpop.f32.mrf.mxu1 }
 0x235   : > { %12428 = vst [vmem:[#allocation214_spill] sm:$0xff] %v8514_v44  ;;  %v8532_v44 = vpop.f32.mrf.mxu3 }
 0x236   : > { %6512 = vmatmul.msk.f32.gmra.mxu1 %vm612_vm2, %v6859_v58  ;;  %12431 = vst [vmem:[#allocation217_spill] sm:$0xff] %v8528_v14  ;;  %v6861_v14 = vld [vmem:[%s7321_s29 + $0x50] sm:$0xff] }
 0x237   : > { %12432 = vst [vmem:[#allocation218_spill] sm:$0xff] %v8532_v44 }
 0x23a   : > { %v8518_v46 = vpop.permute.xlu2 %2468  ;;  %2767 = vperm.xlu2 %6779, %v7645_v20   ;;  %v8537_v20 = vpop.f32.mrf.mxu0 }
 0x23b   : > { %12429 = vst [vmem:[#allocation215_spill] sm:$0xff] %v8518_v46  ;;  %v8521_v60 = vpop.permute.xlu0 %2931 }
 0x23c   : > { %12430 = vst [vmem:[#allocation216_spill] sm:$0xff] %v8521_v60  ;;  %v8523_v8 = vpop.permute.xlu1 %2432  ;;  %2763 = vperm.xlu1 %6780, %v8429_v28   ;;  %v8526_v34 = vpop.f32.mrf.mxu1 }
 0x23d   : > { %12434 = vst [vmem:[#allocation220_spill] sm:$0xff] %v8537_v20  ;;  %v8550_v44 = vpop.f32.mrf.mxu3 }
 0x23e   : > { %6513 = vmatmul.msk.f32.gmra.mxu1 %vm612_vm2, %v6860_v30  ;;  %v8548_v30 = vpop.f32.mrf.mxu2  ;;  %12439 = vst [vmem:[#allocation225_spill] sm:$0xff] %v8550_v44 }
 0x23f   : > { %12438 = vst [vmem:[#allocation224_spill] sm:$0xff] %v8548_v30 }
 0x242   : > { %v8534_v58 = vpop.permute.xlu2 %2480  ;;  %2779 = vperm.xlu2 %6779, %v7674_v5  }
 0x243   : > { %12433 = vst [vmem:[#allocation219_spill] sm:$0xff] %v8534_v58  ;;  %v8539_v60 = vpop.permute.xlu0 %2943 }
 0x244   : > { %12435 = vst [vmem:[#allocation221_spill] sm:$0xff] %v8539_v60  ;;  %v8541_v46 = vpop.permute.xlu1 %2440  ;;  %2775 = vperm.xlu1 %6780, %v8447_v0   ;;  %v8544_v42 = vpop.f32.mrf.mxu1 }
 0x245   : > { %12436 = vst [vmem:[#allocation222_spill] sm:$0xff] %v8541_v46 }
 0x246   : > { %12437 = vst [vmem:[#allocation223_spill] sm:$0xff] %v8544_v42  ;;  %6514 = vmatmul.msk.f32.gmra.mxu1 %vm612_vm2, %v6861_v14  ;;  %v8562_v42 = vpop.f32.mrf.mxu0  ;;  %v6862_v14 = vld [vmem:[%s7321_s29 + $0x58] sm:$0xff]  ;;  %v1708_v30 = vpop.f32.mrf.mxu2 }
 0x247   : > { %12444 = vst [vmem:[#allocation230_spill] sm:$0xff] %v8562_v42 }
 0x24a   : > { %v8552_v58 = vpop.permute.xlu2 %2492  ;;  %2791 = vperm.xlu2 %6779, %v7703_v49   ;;  %v8569_v49 = vpop.f32.mrf.mxu3 }
 0x24b   : > { %12440 = vst [vmem:[#allocation226_spill] sm:$0xff] %v8552_v58  ;;  %v8555_v5 = vpop.permute.xlu0 %2955  ;;  %v891_v58 = vmul.f32 %v7394_v54, %v8169_v48  ;;  %v8591_v48 = vld [vmem:[%s7611_s17] sm:$0xff] }
 0x24c   : > { %12441 = vst [vmem:[#allocation227_spill] sm:$0xff] %v8555_v5  ;;  %v8557_v60 = vpop.permute.xlu1 %2452  ;;  %2787 = vperm.xlu1 %6780, %v8462_v19   ;;  %v8560_v20 = vpop.f32.mrf.mxu1 }
 0x24d   : > { %12442 = vst [vmem:[#allocation228_spill] sm:$0xff] %v8557_v60 }
 0x24e   : > { %12443 = vst [vmem:[#allocation229_spill] sm:$0xff] %v8560_v20  ;;  %6515 = vmatmul.msk.f32.gmra.mxu1 %vm612_vm2, %v6862_v14  ;;  %v1236_v14 = vmul.f32 %v8268_v63, %v8385_v43  ;;  %v12448_v20 = vld [vmem:[#allocation54_spill] sm:$0xff]  ;;  %v1711_v59 = vpop.f32.mrf.mxu2 }
 0x24f   : > { %v1038_v25 = vadd.f32 %v12448_v20, %v891_v58 }
 0x252   : > { %v8566_v44 = vpop.permute.xlu2 %2504  ;;  %2803 = vperm.xlu2 %6779, %v7730_v26   ;;  %v8584_v26 = vpop.f32.mrf.mxu0 }
 0x253   : > { %12445 = vst [vmem:[#allocation231_spill] sm:$0xff] %v8566_v44  ;;  %v8571_v5 = vpop.permute.xlu0 %2967  ;;  %v6863_v44 = vld [vmem:[%s7321_s29 + $0x60] sm:$0xff] }
 0x254   : > { %12446 = vst [vmem:[#allocation232_spill] sm:$0xff] %v8571_v5  ;;  %v8575_v60 = vpop.permute.xlu1 %2464  ;;  %2799 = vperm.xlu1 %6780, %v8477_v52   ;;  %v8578_v42 = vpop.f32.mrf.mxu1  ;;  %v1258_v5 = vadd.f32 %v1236_v14, %v1038_v25 }
 0x255   : > { %12447 = vst [vmem:[#allocation233_spill] sm:$0xff] %v8575_v60  ;;  %v12450_v60 = vld [vmem:[#allocation64_spill] sm:$0xff]  ;;  %v1926_v25 = vpop.f32.mrf.mxu3 }
 0x256   : > { %6516 = vmatmul.msk.f32.gmra.mxu1 %vm612_vm2, %v6863_v44  ;;  %v1451_v63 = vmul.f32 %v12450_v60, %v8410_v33 }
 0x258   : > { %v1473_v20 = vadd.f32 %v1451_v63, %v1258_v5  ;;  %v8619_v5 = vpop.f32.mrf.mxu2  ;;  %v1432_v63 = vmul.f32 %v8401_v47, %v7814_v62  ;;  %v12462_v62 = vld [vmem:[#allocation52_spill] sm:$0xff] }
 0x259   : > { %v1433_v47 = vmul.f32 %v12462_v62, %v7850_v31 }
 0x25a   : > { %6782 = vset.pattern.permute.xlu2 %v12337_v32  ;;  %v8605_v33 = vpop.f32.mrf.mxu0 }
 0x25b   : > { %v8588_v54 = vpop.permute.xlu2 %2579  ;;  %2907 = vperm.xlu2 %6782, %v8591_v48  }
 0x25c   : > { %12449 = vst [vmem:[#allocation54_spill] sm:$0xff] %v8588_v54  ;;  %v8596_v43 = vpop.permute.xlu1 %2476  ;;  %6783 = vset.pattern.permute.xlu1 %v12337_v32  ;;  %v1565_v44 = vpop.permute.xlu0 %1564  ;;  %v6865_v54 = vld [vmem:[%s7321_s29 + $0x68] sm:$0xff] }
 0x25d   : > { %12451 = vst [vmem:[#allocation64_spill] sm:$0xff] %v8596_v43  ;;  %v1550_v58 = vpop.f32.mrf.mxu1  ;;  %2915 = vperm.xlu1 %6783, %v8408_v21  }
 0x25e   : > { %v1666_v14 = vmul.f32 %v7966_v36, %v1550_v58  ;;  %6517 = vmatmul.msk.f32.gmra.mxu1 %vm612_vm2, %v6865_v54  ;;  %v6866_v36 = vld [vmem:[%s7321_s29 + $0x70] sm:$0xff]  ;;  %v8621_v54 = vpop.f32.mrf.mxu3 }
 0x260   : > { %v8603_v46 = vadd.f32 %v1666_v14, %v1473_v20  ;;  %v8630_v14 = vld [vmem:[%s7611_s17 + $0x28] sm:$0xff] }
 0x261   : > { %12458 = vst [vmem:[#allocation240_spill] sm:$0xff] %v8630_v14 }
 0x262   : > { %12452 = vst [vmem:[#allocation234_spill] sm:$0xff] %v8603_v46  ;;  %v8625_v58 = vpop.f32.mrf.mxu0 }
 0x263   : > { %v8607_v60 = vpop.permute.xlu2 %2589  ;;  %2919 = vperm.xlu2 %6782, %v8432_v7   ;;  %v1648_v7 = vmul.f32 %v1565_v44, %v8270_v53  ;;  %v8659_v53 = vld [vmem:[%s7611_s17 + $0x40] sm:$0xff] }
 0x264   : > { %12453 = vst [vmem:[#allocation235_spill] sm:$0xff] %v8607_v60  ;;  %v8610_v32 = vpop.permute.xlu1 %2488  ;;  %v8612_v43 = vpop.permute.xlu0 %1584  ;;  %v1454_v60 = vadd.f32 %v1432_v63, %v7812_v37  ;;  %v1455_v63 = vadd.f32 %v1433_v47, %v7837_v24  ;;  %v1863_v24 = vmul.f32 %v7922_v38, %v1711_v59 }
 0x265   : > { %12454 = vst [vmem:[#allocation236_spill] sm:$0xff] %v8610_v32  ;;  %v8614_v16 = vpop.f32.mrf.mxu1  ;;  %2923 = vperm.xlu1 %6783, %v8429_v28  }
 0x266   : > { %12455 = vst [vmem:[#allocation237_spill] sm:$0xff] %v8612_v43  ;;  %6518 = vmatmul.msk.f32.gmra.mxu1 %vm612_vm2, %v6866_v36  ;;  %v8654_v43 = vpop.f32.mrf.mxu3  ;;  %v1670_v31 = vadd.f32 %v1648_v7, %v1455_v63 }
 0x267   : > { %12456 = vst [vmem:[#allocation238_spill] sm:$0xff] %v8614_v16 }
 0x268   : > { %v1885_v59 = vadd.f32 %v1863_v24, %v1670_v31  ;;  %v12476_v31 = vld [vmem:[#allocation74_spill] sm:$0xff] }
 0x269   : > { %v1447_v24 = vmul.f32 %v12476_v31, %v8295_v55  ;;  %v12485_v31 = vld [vmem:[#allocation57_spill] sm:$0xff] }
 0x26a   : > { %v8675_v38 = vpop.f32.mrf.mxu0 }
 0x26b   : > { %v8627_v20 = vpop.permute.xlu2 %2604  ;;  %2927 = vperm.xlu2 %6782, %v8630_v14   ;;  %v6868_v14 = vld [vmem:[%s7321_s29 + $0x78] sm:$0xff] }
 0x26c   : > { %12457 = vst [vmem:[#allocation239_spill] sm:$0xff] %v8627_v20  ;;  %v8634_v16 = vpop.permute.xlu1 %2500  ;;  %v8636_v36 = vpop.permute.xlu0 %1596  ;;  %v12463_v20 = vld [vmem:[#allocation70_spill] sm:$0xff] }
 0x26d   : > { %12459 = vst [vmem:[#allocation241_spill] sm:$0xff] %v8634_v16  ;;  %v8638_v46 = vpop.f32.mrf.mxu1  ;;  %2935 = vperm.xlu1 %6783, %v8447_v0   ;;  %v1647_v32 = vmul.f32 %v12463_v20, %v8253_v41  ;;  %v8649_v16 = vpop.f32.mrf.mxu2  ;;  %v1862_v0 = vmul.f32 %v7992_v50, %v1708_v30  ;;  %v887_v41 = vmul.f32 %v7930_v11, %v8058_v57  ;;  %v12467_v50 = vld [vmem:[#allocation28_spill] sm:$0xff]  ;;  %v12469_v11 = vld [vmem:[#allocation55_spill] sm:$0xff] }
 0x26e   : > { %12460 = vst [vmem:[#allocation242_spill] sm:$0xff] %v8636_v36  ;;  %6519 = vmatmul.msk.f32.gmra.mxu1 %vm612_vm2, %v6868_v14  ;;  %v12464_v36 = vld [vmem:[#allocation73_spill] sm:$0xff]  ;;  %v1232_v30 = vmul.f32 %v12467_v50, %v8274_v23  ;;  %v12470_v14 = vld [vmem:[#allocation18_spill] sm:$0xff]  ;;  %v12472_v23 = vld [vmem:[#allocation35_spill] sm:$0xff] }
 0x26f   : > { %12461 = vst [vmem:[#allocation243_spill] sm:$0xff] %v8638_v46  ;;  %v1669_v37 = vadd.f32 %v1647_v32, %v1454_v60  ;;  %v12465_v46 = vld [vmem:[#allocation6_spill] sm:$0xff]  ;;  %v12466_v32 = vld [vmem:[#allocation81_spill] sm:$0xff]  ;;  %v1026_v62 = vadd.f32 %v12472_v23, %v887_v41  ;;  %v2292_v41 = vmul.f32 %v8309_v18, %v8584_v26  ;;  %v8706_v18 = vpop.f32.mrf.mxu3 }
 0x270   : > { %v874_v28 = vmul.f32 %v12465_v46, %v12464_v36  ;;  %v1219_v44 = vmul.f32 %v8139_v27, %v12466_v32  ;;  %v2077_v36 = vmul.f32 %v12470_v14, %v8569_v49  ;;  %v12473_v32 = vld [vmem:[#allocation77_spill] sm:$0xff] }
 0x271   : > { %v1884_v60 = vadd.f32 %v1862_v0, %v1669_v37  ;;  %v6870_v0 = vld [vmem:[%s7321_s29 + $0x80] sm:$0xff]  ;;  %v2078_v37 = vmul.f32 %v8221_v15, %v1926_v25  ;;  %v12475_v49 = vld [vmem:[#allocation41_spill] sm:$0xff]  ;;  %v1254_v14 = vadd.f32 %v1232_v30, %v1026_v62 }
 0x272   : > { %v987_v57 = vadd.f32 %v12469_v11, %v874_v28  ;;  %v12474_v28 = vld [vmem:[#allocation9_spill] sm:$0xff]  ;;  %v1434_v11 = vmul.f32 %v12475_v49, %v7882_v10  ;;  %v12477_v10 = vld [vmem:[#allocation26_spill] sm:$0xff]  ;;  %v12484_v49 = vld [vmem:[#allocation7_spill] sm:$0xff] }
 0x273   : > { %2939 = vperm.xlu2 %6782, %v8659_v53   ;;  %v8669_v20 = vpop.permute.xlu2 %2619  ;;  %v2099_v63 = vadd.f32 %v2077_v36, %v1884_v60  ;;  %v875_v50 = vmul.f32 %v12474_v28, %v12473_v32  ;;  %v2100_v15 = vadd.f32 %v2078_v37, %v1885_v59  ;;  %v890_v60 = vmul.f32 %v7952_v17, %v8143_v13  ;;  %v12480_v17 = vld [vmem:[#allocation32_spill] sm:$0xff]  ;;  %v12482_v32 = vld [vmem:[#allocation50_spill] sm:$0xff] }
 0x274   : > { %v8665_v46 = vpop.permute.xlu0 %1608  ;;  %12468 = vst [vmem:[#allocation52_spill] sm:$0xff] %v8669_v20  ;;  %v1241_v47 = vadd.f32 %v1219_v44, %v987_v57  ;;  %v1649_v20 = vmul.f32 %v7823_v51, %v8293_v35  ;;  %v8699_v57 = vld [vmem:[%s7611_s17 + $0x58] sm:$0xff]  ;;  %v1220_v55 = vmul.f32 %v12477_v10, %v7802_v6  ;;  %v12478_v51 = vld [vmem:[#allocation34_spill] sm:$0xff]  ;;  %v1469_v59 = vadd.f32 %v1447_v24, %v1254_v14 }
 0x275   : > { %v2353_v7 = vpop.f32.mrf.mxu1  ;;  %2947 = vperm.xlu1 %6783, %v8462_v19   ;;  %v8677_v27 = vpop.permute.xlu1 %2574  ;;  %v2293_v35 = vmul.f32 %v12478_v51, %v8605_v33  ;;  %v1235_v13 = vmul.f32 %v12480_v17, %v8363_v40  ;;  %v1035_v28 = vadd.f32 %v12482_v32, %v890_v60  ;;  %v1435_v24 = vmul.f32 %v12485_v31, %v7910_v56  ;;  %v12497_v31 = vld [vmem:[#allocation29_spill] sm:$0xff] }
 0x276   : > { %12471 = vst [vmem:[#allocation70_spill] sm:$0xff] %v8677_v27  ;;  %6520 = vmatmul.msk.f32.gmra.mxu1 %vm612_vm2, %v6870_v0  ;;  %v2507_v44 = vmul.f32 %v8511_v2, %v2353_v7  ;;  %v8694_v25 = vpop.f32.mrf.mxu2  ;;  %v1456_v30 = vadd.f32 %v1434_v11, %v1241_v47  ;;  %v2314_v2 = vadd.f32 %v2292_v41, %v2099_v63  ;;  %v12479_v7 = vld [vmem:[#allocation62_spill] sm:$0xff]  ;;  %v6872_v63 = vld [vmem:[%s7321_s29 + $0x88] sm:$0xff]  ;;  %v12713_v27 = vld [vmem:[#allocation160_spill] sm:$0xff] }
 0x277   : > { %v990_v36 = vadd.f32 %v12479_v7, %v875_v50  ;;  %v2315_v47 = vadd.f32 %v2293_v35, %v2100_v15  ;;  %v2079_v11 = vmul.f32 %v8133_v4, %v8621_v54  ;;  %v1257_v41 = vadd.f32 %v1235_v13, %v1035_v28  ;;  %v12487_v4 = vld [vmem:[#allocation75_spill] sm:$0xff]  ;;  %v6874_v13 = vld [vmem:[%s7321_s29 + $0x90] sm:$0xff] }
 0x278   : > { %v1671_v6 = vadd.f32 %v1649_v20, %v1456_v30  ;;  %v2529_v62 = vadd.f32 %v2507_v44, %v2314_v2  ;;  %v1864_v20 = vmul.f32 %v12484_v49, %v8619_v5  ;;  %v12486_v44 = vld [vmem:[#allocation78_spill] sm:$0xff]  ;;  %v2294_v10 = vmul.f32 %v8399_v29, %v8625_v58  ;;  %v8741_v30 = vld [vmem:[%s7611_s17 + $0x70] sm:$0xff]  ;;  %v12494_v49 = vld [vmem:[#allocation3_spill] sm:$0xff] }
 0x279   : > { %v1450_v15 = vmul.f32 %v12486_v44, %v8383_v39  ;;  %v1650_v54 = vmul.f32 %v12487_v4, %v8316_v22  ;;  %v8751_v22 = vpop.f32.mrf.mxu3  ;;  %v12498_v44 = vld [vmem:[#allocation171_spill] sm:$0xff] }
 0x27a   : > { %v1886_v60 = vadd.f32 %v1864_v20, %v1671_v6  ;;  %v2665_v5 = vrot.slane %v2529_v62, 7  ;;  %v2080_v62 = vmul.f32 %v8247_v12, %v8654_v43 }
 0x27b   : > { %2951 = vperm.xlu2 %6782, %v8699_v57   ;;  %v8721_v40 = vpop.permute.xlu2 %2634  ;;  %v1472_v29 = vadd.f32 %v1450_v15, %v1257_v41  ;;  %v2295_v15 = vmul.f32 %v12498_v44, %v8675_v38 }
 0x27c   : > { %v1621_v26 = vpop.permute.xlu0 %1620  ;;  %12483 = vst [vmem:[#allocation6_spill] sm:$0xff] %v8721_v40  ;;  %v2101_v56 = vadd.f32 %v2079_v11, %v1886_v60 }
 0x27d   : > { %v1662_v0 = vmul.f32 %v1621_v26, %v8526_v34  ;;  %v2356_v23 = vpop.f32.mrf.mxu1  ;;  %2959 = vperm.xlu1 %6783, %v8477_v52   ;;  %v8714_v37 = vpop.permute.xlu1 %2584  ;;  %v1242_v34 = vadd.f32 %v1220_v55, %v990_v36  ;;  %v12489_v36 = vld [vmem:[#allocation58_spill] sm:$0xff] }
 0x27e   : > { %v2508_v33 = vmul.f32 %v8465_v9, %v2356_v23  ;;  %12481 = vst [vmem:[#allocation73_spill] sm:$0xff] %v8714_v37  ;;  %6521 = vmatmul.msk.f32.gmra.mxu1 %vm612_vm2, %v6872_v63  ;;  %v8727_v9 = vpop.f32.mrf.mxu0  ;;  %v8747_v2 = vpop.f32.mrf.mxu2  ;;  %v2316_v7 = vadd.f32 %v2294_v10, %v2101_v56  ;;  %v12492_v63 = vld [vmem:[#allocation2_spill] sm:$0xff]  ;;  %v12499_v10 = vld [vmem:[#allocation68_spill] sm:$0xff] }
 0x27f   : > { %v8719_v50 = vadd.f32 %v1662_v0, %v1469_v59  ;;  %v1457_v35 = vadd.f32 %v1435_v24, %v1242_v34  ;;  %v12493_v34 = vld [vmem:[#allocation86_spill] sm:$0xff]  ;;  %v1222_v24 = vmul.f32 %v12497_v31, %v7858_v1  ;;  %v12502_v56 = vld [vmem:[#allocation112_spill] sm:$0xff] }
 0x280   : > { %v8729_v14 = vadd.f32 %v2508_v33, %v2315_v47  ;;  %v12491_v33 = vld [vmem:[#allocation82_spill] sm:$0xff]  ;;  %v877_v20 = vmul.f32 %v12494_v49, %v12493_v34  ;;  %v12503_v1 = vld [vmem:[#allocation188_spill] sm:$0xff] }
 0x281   : > { %v1672_v0 = vadd.f32 %v1650_v54, %v1457_v35  ;;  %v876_v32 = vmul.f32 %v12492_v63, %v12491_v33  ;;  %v12509_v49 = vld [vmem:[#allocation116_spill] sm:$0xff] }
 0x282   : > { %v2666_v55 = vrot.slane %v8729_v14, 7 }
 0x283   : > { %2963 = vperm.xlu2 %6782, %v8741_v30  }
 0x284   : > { %v1633_v51 = vpop.permute.xlu0 %1632  ;;  %v8745_v39 = vsel %vm2664_vm3, %v2665_v5, %v2666_v55  ;;  %v2748_v47 = vpop.permute.xlu2 %2747  ;;  %v993_v5 = vadd.f32 %v12499_v10, %v876_v32 }
 0x285   : > { %12488 = vst [vmem:[#allocation81_spill] sm:$0xff] %v8745_v39  ;;  %v1665_v58 = vmul.f32 %v1633_v51, %v8578_v42  ;;  %v2359_v26 = vpop.f32.mrf.mxu1  ;;  %6786 = vset.pattern.permute.xlu1 %v12387_v3  ;;  %v8754_v17 = vpop.permute.xlu1 %2599  ;;  %v1865_v42 = vmul.f32 %v8022_v45, %v8649_v16  ;;  %v12495_v45 = vld [vmem:[#allocation20_spill] sm:$0xff]  ;;  %v2810_v12 = vmul.f32 %v2748_v47, %v8729_v14  ;;  %v12508_v47 = vld [vmem:[#allocation165_spill] sm:$0xff] }
 0x286   : > { %v2509_v59 = vmul.f32 %v12489_v36, %v2359_v26  ;;  %12490 = vst [vmem:[#allocation28_spill] sm:$0xff] %v8754_v17  ;;  %3094 = vperm.xlu1 %6786, %v8408_v21   ;;  %6522 = vmatmul.msk.f32.gmra.mxu1 %vm612_vm2, %v6874_v13  ;;  %v8769_v28 = vpop.f32.mrf.mxu0  ;;  %v1221_v16 = vmul.f32 %v12495_v45, %v7831_v61  ;;  %v1726_v54 = vpop.f32.mrf.mxu2  ;;  %v12701_v17 = vld [vmem:[#allocation43_spill] sm:$0xff]  ;;  %v12711_v39 = vld [vmem:[#allocation93_spill] sm:$0xff] }
 0x287   : > { %v8759_v23 = vadd.f32 %v1665_v58, %v1472_v29  ;;  %v1887_v11 = vadd.f32 %v1865_v42, %v1672_v0  ;;  %v1437_v51 = vmul.f32 %v12503_v1, %v12502_v56  ;;  %v12504_v29 = vld [vmem:[#allocation106_spill] sm:$0xff]  ;;  %v12505_v58 = vld [vmem:[#allocation44_spill] sm:$0xff] }
 0x288   : > { %v8761_v6 = vadd.f32 %v2509_v59, %v2316_v7  ;;  %v1243_v38 = vadd.f32 %v1221_v16, %v993_v5  ;;  %v1436_v26 = vmul.f32 %v12505_v58, %v12504_v29  ;;  %v1941_v7 = vpop.f32.mrf.mxu3  ;;  %v12506_v0 = vld [vmem:[#allocation174_spill] sm:$0xff]  ;;  %v12511_v16 = vld [vmem:[#allocation179_spill] sm:$0xff]  ;;  %v12517_v1 = vld [vmem:[#allocation108_spill] sm:$0xff] }
 0x289   : > { %v2102_v41 = vadd.f32 %v2080_v62, %v1887_v11  ;;  %v12507_v42 = vld [vmem:[#allocation90_spill] sm:$0xff]  ;;  %v12519_v58 = vld [vmem:[#allocation125_spill] sm:$0xff] }
 0x28a   : > { %v12147_v21 = vrot.slane %v8761_v6, 7  ;;  %v2973_v13 = vrot.slane %v8761_v6, 1  ;;  %v1651_v62 = vmul.f32 %v12507_v42, %v12506_v0  ;;  %v2811_v33 = vmul.f32 %v12508_v47, %v8761_v6 }
 0x28b   : > { %6785 = vset.pattern.permute.xlu2 %v12387_v3  ;;  %v2317_v59 = vadd.f32 %v2295_v15, %v2102_v41  ;;  %v1458_v34 = vadd.f32 %v1436_v26, %v1243_v38  ;;  %v12513_v15 = vld [vmem:[#allocation183_spill] sm:$0xff]  ;;  %v1867_v26 = vmul.f32 %v12519_v58, %v8747_v2  ;;  %v12523_v2 = vld [vmem:[#allocation21_spill] sm:$0xff]  ;;  %v12534_v58 = vld [vmem:[#allocation4_spill] sm:$0xff] }
 0x28c   : > { %3086 = vperm.xlu2 %6785, %v8591_v48   ;;  %v8782_v43 = vsel %vm2664_vm3, %v2666_v55, %v12147_v21  ;;  %v6875_v48 = vld [vmem:[%s7321_s29 + $0x98] sm:$0xff]  ;;  %v12501_v55 = vld [vmem:[#allocation72_spill] sm:$0xff]  ;;  %v12592_v21 = vld [vmem:[#allocation203_spill] sm:$0xff] }
 0x28d   : > { %12496 = vst [vmem:[#allocation55_spill] sm:$0xff] %v8782_v43  ;;  %v2362_v60 = vpop.f32.mrf.mxu1  ;;  %v8789_v61 = vpop.permute.xlu1 %2614  ;;  %v996_v4 = vadd.f32 %v12501_v55, %v877_v20  ;;  %v12510_v20 = vld [vmem:[#allocation61_spill] sm:$0xff]  ;;  %v1673_v44 = vadd.f32 %v1651_v62, %v1458_v34 }
 0x28e   : > { %12500 = vst [vmem:[#allocation18_spill] sm:$0xff] %v8789_v61  ;;  %2842 = vrot.lane.b32.xlu1 %v2810_v12, %s6950_s18  ;;  %6523 = vmatmul.msk.f32.gmra.mxu1 %vm612_vm2, %v6875_v48  ;;  %v2510_v35 = vmul.f32 %v8523_v8, %v2362_v60  ;;  %v2972_v8 = vrot.slane %v8729_v14, 1  ;;  %v1438_v11 = vmul.f32 %v12510_v20, %v12509_v49  ;;  %v2156_v45 = vpop.f32.mrf.mxu0  ;;  %v12512_v12 = vld [vmem:[#allocation79_spill] sm:$0xff]  ;;  %v12514_v60 = vld [vmem:[#allocation237_spill] sm:$0xff]  ;;  %v6876_v14 = vld [vmem:[%s7321_s29 + $0xa0] sm:$0xff]  ;;  %v8827_v29 = vpop.f32.mrf.mxu2 }
 0x28f   : > { %v1244_v36 = vadd.f32 %v1222_v24, %v996_v4  ;;  %v1652_v31 = vmul.f32 %v12512_v12, %v12511_v16  ;;  %v1653_v10 = vmul.f32 %v12514_v60, %v12513_v15  ;;  %v12516_v4 = vld [vmem:[#allocation97_spill] sm:$0xff]  ;;  %v2082_v49 = vmul.f32 %v12523_v2, %v8751_v22  ;;  %v12529_v22 = vld [vmem:[#allocation175_spill] sm:$0xff] }
 0x290   : > { %v8805_v32 = vadd.f32 %v2510_v35, %v2317_v59  ;;  %v2974_v41 = vsel %vm2971_vm4, %v2972_v8, %v2973_v13  ;;  %v1460_v56 = vadd.f32 %v1438_v11, %v12516_v4  ;;  %v12518_v35 = vld [vmem:[#allocation143_spill] sm:$0xff]  ;;  %v8833_v42 = vpop.f32.mrf.mxu3  ;;  %v12522_v8 = vld [vmem:[#allocation204_spill] sm:$0xff]  ;;  %v12528_v15 = vld [vmem:[#allocation161_spill] sm:$0xff] }
 0x291   : > { %v1459_v63 = vadd.f32 %v1437_v51, %v1244_v36  ;;  %v1866_v51 = vmul.f32 %v12517_v1, %v8694_v25  ;;  %v2081_v38 = vmul.f32 %v12518_v35, %v8706_v18  ;;  %v12520_v59 = vld [vmem:[#allocation187_spill] sm:$0xff]  ;;  %v2083_v60 = vmul.f32 %v12528_v15, %v1941_v7  ;;  %v12532_v1 = vld [vmem:[#allocation144_spill] sm:$0xff]  ;;  %v12536_v7 = vld [vmem:[#allocation38_spill] sm:$0xff] }
 0x292   : > { %v2975_v55 = vrot.slane %v8805_v32, 1  ;;  %v2296_v0 = vmul.f32 %v12520_v59, %v8727_v9  ;;  %v1675_v62 = vadd.f32 %v1653_v10, %v1460_v56  ;;  %v12531_v56 = vld [vmem:[#allocation118_spill] sm:$0xff]  ;;  %v2760_v59 = vpop.permute.xlu2 %2759 }
 0x293   : > { %v1674_v48 = vadd.f32 %v1652_v31, %v1459_v63  ;;  %v1888_v36 = vadd.f32 %v1866_v51, %v1673_v44  ;;  %v12525_v31 = vld [vmem:[#allocation190_spill] sm:$0xff]  ;;  %v1224_v51 = vmul.f32 %v12532_v1, %v12531_v56 }
 0x294   : > { %2844 = vrot.lane.b32.xlu2 %v2811_v33, %s6950_s18  ;;  %v2976_v25 = vsel %vm2971_vm4, %v2973_v13, %v2975_v55  ;;  %v12521_v33 = vld [vmem:[#allocation110_spill] sm:$0xff]  ;;  %v6877_v13 = vld [vmem:[%s7321_s29 + $0xa8] sm:$0xff]  ;;  %s6952_s29 = smov 122  }
 0x295   : > { %v2365_v24 = vpop.f32.mrf.mxu1  ;;  %v8816_v5 = vpop.permute.xlu1 %2629  ;;  %v1889_v47 = vadd.f32 %v1867_v26, %v1674_v48  ;;  %v1868_v18 = vmul.f32 %v12521_v33, %v1726_v54  ;;  %v2103_v63 = vadd.f32 %v2081_v38, %v1888_v36  ;;  %v12530_v48 = vld [vmem:[#allocation222_spill] sm:$0xff]  ;;  %v12533_v38 = vld [vmem:[#allocation96_spill] sm:$0xff] }
 0x296   : > { %12515 = vst [vmem:[#allocation35_spill] sm:$0xff] %v8816_v5  ;;  %3005 = vrot.lane.b32.xlu1 %v2974_v41, %s6951_s19  ;;  %6524 = vmatmul.msk.f32.gmra.mxu1 %vm612_vm2, %v6876_v14  ;;  %v2511_v34 = vmul.f32 %v12522_v8, %v2365_v24  ;;  %v8843_v11 = vpop.f32.mrf.mxu0  ;;  %v12526_v41 = vld [vmem:[#allocation91_spill] sm:$0xff]  ;;  %v12527_v24 = vld [vmem:[#allocation12_spill] sm:$0xff]  ;;  %v2297_v14 = vmul.f32 %v12529_v22, %v8769_v28  ;;  %v1732_v36 = vpop.f32.mrf.mxu2  ;;  %v12539_v8 = vld [vmem:[#allocation33_spill] sm:$0xff] }
 0x297   : > { %v2318_v20 = vadd.f32 %v2296_v0, %v2103_v63  ;;  %v1890_v16 = vadd.f32 %v1868_v18, %v1675_v62  ;;  %v2104_v54 = vadd.f32 %v2082_v49, %v1889_v47  ;;  %v879_v44 = vmul.f32 %v12527_v24, %v12526_v41  ;;  %v12535_v62 = vld [vmem:[#allocation85_spill] sm:$0xff]  ;;  %v12537_v28 = vld [vmem:[#allocation191_spill] sm:$0xff]  ;;  %v12543_v24 = vld [vmem:[#allocation194_spill] sm:$0xff] }
 0x298   : > { %v880_v26 = vmul.f32 %v12534_v58, %v12533_v38  ;;  %v1947_v33 = vpop.f32.mrf.mxu3  ;;  %v12538_v63 = vld [vmem:[#allocation123_spill] sm:$0xff]  ;;  %v12545_v22 = vld [vmem:[#allocation48_spill] sm:$0xff] }
 0x299   : > { %v8853_v10 = vadd.f32 %v2511_v34, %v2318_v20  ;;  %v2105_v35 = vadd.f32 %v2083_v60, %v1890_v16  ;;  %v2319_v0 = vadd.f32 %v2297_v14, %v2104_v54  ;;  %v1002_v47 = vadd.f32 %v12535_v62, %v879_v44  ;;  %v12540_v16 = vld [vmem:[#allocation208_spill] sm:$0xff]  ;;  %v12542_v41 = vld [vmem:[#allocation127_spill] sm:$0xff]  ;;  %v12544_v60 = vld [vmem:[#allocation122_spill] sm:$0xff] }
 0x29a   : > { %v1225_v34 = vmul.f32 %v12539_v8, %v12538_v63  ;;  %v12541_v54 = vld [vmem:[#allocation88_spill] sm:$0xff]  ;;  %v1440_v44 = vmul.f32 %v12543_v24, %v12542_v41  ;;  %v1439_v14 = vmul.f32 %v12545_v22, %v12544_v60  ;;  %v12550_v8 = vld [vmem:[#allocation189_spill] sm:$0xff]  ;;  %v12555_v22 = vld [vmem:[#allocation131_spill] sm:$0xff] }
 0x29b   : > { %v2813_v18 = vmul.f32 %v2760_v59, %v8853_v10  ;;  %v2977_v62 = vrot.slane %v8853_v10, 1  ;;  %v12691_v5 = vld [vmem:[#allocation132_spill] sm:$0xff] }
 0x29c   : > { %3007 = vrot.lane.b32.xlu2 %v2976_v25, %s6951_s19  ;;  %v2298_v25 = vmul.f32 %v12536_v7, %v2156_v45  ;;  %v1005_v45 = vadd.f32 %v12541_v54, %v880_v26  ;;  %v12549_v7 = vld [vmem:[#allocation95_spill] sm:$0xff] }
 0x29d   : > { %v2368_v9 = vpop.f32.mrf.mxu1  ;;  %v8845_v12 = vpop.permute.xlu1 %2644 }
 0x29e   : > { %12524 = vst [vmem:[#allocation77_spill] sm:$0xff] %v8845_v12  ;;  %3102 = vperm.xlu1 %6786, %v12525_v31   ;;  %6525 = vmatmul.msk.f32.gmra.mxu1 %vm612_vm2, %v6877_v13  ;;  %v2512_v4 = vmul.f32 %v12530_v48, %v2368_v9  ;;  %v1246_v9 = vadd.f32 %v1224_v51, %v1002_v47  ;;  %v12546_v48 = vld [vmem:[#allocation185_spill] sm:$0xff]  ;;  %v2162_v1 = vpop.f32.mrf.mxu0  ;;  %v12548_v47 = vld [vmem:[#allocation102_spill] sm:$0xff]  ;;  %v1735_v63 = vpop.f32.mrf.mxu2 }
 0x29f   : > { %v2320_v20 = vadd.f32 %v2298_v25, %v2105_v35  ;;  %v1247_v35 = vadd.f32 %v1225_v34, %v1005_v45  ;;  %v881_v25 = vmul.f32 %v12549_v7, %v12548_v47  ;;  %v12551_v34 = vld [vmem:[#allocation84_spill] sm:$0xff] }
 0x2a0   : > { %v8868_v2 = vadd.f32 %v2512_v4, %v2319_v0  ;;  %v12547_v4 = vld [vmem:[#allocation94_spill] sm:$0xff]  ;;  %v1461_v58 = vadd.f32 %v1439_v14, %v1246_v9  ;;  %v1950_v45 = vpop.f32.mrf.mxu3  ;;  %v12556_v14 = vld [vmem:[#allocation23_spill] sm:$0xff] }
 0x2a1   : > { %v1654_v56 = vmul.f32 %v12547_v4, %v12546_v48  ;;  %v1462_v0 = vadd.f32 %v1440_v44, %v1247_v35  ;;  %v1226_v48 = vmul.f32 %v12556_v14, %v12555_v22  ;;  %v12565_v22 = vld [vmem:[#allocation196_spill] sm:$0xff] }
 0x2a2   : > { %v2979_v38 = vrot.slane %v8868_v2, 1  ;;  %v12145_v26 = vrot.slane %v8868_v2, 7  ;;  %v12566_v14 = vld [vmem:[#allocation180_spill] sm:$0xff] }
 0x2a4   : > { %3098 = vperm.xlu2 %6785, %v12537_v28  }
 0x2a5   : > { %v2371_v49 = vpop.f32.mrf.mxu1 }
 0x2a6   : > { %v2513_v31 = vmul.f32 %v12540_v16, %v2371_v49  ;;  %v2756_v13 = vpop.permute.xlu1 %2755  ;;  %2848 = vrot.lane.b32.xlu1 %v2813_v18, %s6950_s18  ;;  %v1676_v18 = vadd.f32 %v1654_v56, %v1461_v58  ;;  %v1655_v49 = vmul.f32 %v12551_v34, %v12550_v8  ;;  %v12552_v16 = vld [vmem:[#allocation10_spill] sm:$0xff]  ;;  %v12558_v58 = vld [vmem:[#allocation193_spill] sm:$0xff]  ;;  %v2165_v47 = vpop.f32.mrf.mxu0  ;;  %v12560_v34 = vld [vmem:[#allocation136_spill] sm:$0xff] }
 0x2a7   : > { %v2812_v15 = vmul.f32 %v2756_v13, %v8805_v32  ;;  %v12553_v13 = vld [vmem:[#allocation147_spill] sm:$0xff] }
 0x2a8   : > { %v8880_v51 = vadd.f32 %v2513_v31, %v2320_v20  ;;  %v8899_v20 = vsel %vm2971_vm4, %v2977_v62, %v2979_v38  ;;  %v1869_v31 = vmul.f32 %v12552_v16, %v8827_v29  ;;  %v2084_v54 = vmul.f32 %v12553_v13, %v8833_v42  ;;  %v12557_v42 = vld [vmem:[#allocation129_spill] sm:$0xff] }
 0x2a9   : > { %2846 = vrot.lane.b32.xlu0 %v2812_v15, %s6950_s18  ;;  %v1677_v24 = vadd.f32 %v1655_v49, %v1462_v0  ;;  %v12554_v15 = vld [vmem:[#allocation92_spill] sm:$0xff]  ;;  %v8914_v29 = vsel %vm2971_vm4, %v2975_v55, %v2977_v62  ;;  %v1870_v56 = vmul.f32 %v12557_v42, %v1732_v36  ;;  %v2299_v0 = vmul.f32 %v12558_v58, %v8843_v11  ;;  %v12561_v49 = vld [vmem:[#allocation65_spill] sm:$0xff]  ;;  %v12562_v62 = vld [vmem:[#allocation63_spill] sm:$0xff]  ;;  %v1738_v11 = vpop.f32.mrf.mxu2 }
 0x2aa   : > { %v12146_v59 = vrot.slane %v8880_v51, 7  ;;  %v1008_v60 = vadd.f32 %v12554_v15, %v881_v25  ;;  %v1891_v4 = vadd.f32 %v1869_v31, %v1676_v18  ;;  %v12559_v25 = vld [vmem:[#allocation22_spill] sm:$0xff]  ;;  %v1441_v55 = vmul.f32 %v12561_v49, %v12560_v34  ;;  %v2768_v15 = vpop.permute.xlu2 %2767 }
 0x2ab   : > { %v1892_v7 = vadd.f32 %v1870_v56, %v1677_v24  ;;  %v2085_v18 = vmul.f32 %v12559_v25, %v1947_v33  ;;  %v12148_v36 = vrot.slane %v8880_v51, 1  ;;  %v2300_v33 = vmul.f32 %v12566_v14, %v2162_v1  ;;  %v1953_v56 = vpop.f32.mrf.mxu3  ;;  %v12570_v1 = vld [vmem:[#allocation137_spill] sm:$0xff]  ;;  %v12572_v49 = vld [vmem:[#allocation98_spill] sm:$0xff] }
 0x2ac   : > { %v8894_v28 = vsel %vm2664_vm3, %v12145_v26, %v12146_v59  ;;  %v2106_v35 = vadd.f32 %v2084_v54, %v1891_v4  ;;  %v1248_v8 = vadd.f32 %v1226_v48, %v1008_v60  ;;  %v2815_v60 = vmul.f32 %v2768_v15, %v8880_v51  ;;  %v12567_v48 = vld [vmem:[#allocation105_spill] sm:$0xff]  ;;  %v12568_v4 = vld [vmem:[#allocation15_spill] sm:$0xff]  ;;  %v12591_v26 = vld [vmem:[#allocation212_spill] sm:$0xff] }
 0x2ad   : > { %v2374_v9 = vpop.f32.mrf.mxu1  ;;  %v2107_v24 = vadd.f32 %v2085_v18, %v1892_v7  ;;  %v882_v42 = vmul.f32 %v12568_v4, %v12567_v48  ;;  %v12571_v7 = vld [vmem:[#allocation149_spill] sm:$0xff]  ;;  %v12579_v4 = vld [vmem:[#allocation200_spill] sm:$0xff] }
 0x2ae   : > { %v2764_v41 = vpop.permute.xlu1 %2763  ;;  %3011 = vrot.lane.b32.xlu1 %v8899_v20, %s6951_s19  ;;  %v2514_v16 = vmul.f32 %v12562_v62, %v2374_v9  ;;  %v2321_v13 = vadd.f32 %v2299_v0, %v2106_v35  ;;  %v1463_v9 = vadd.f32 %v1441_v55, %v1248_v8  ;;  %v8939_v35 = vsel %vm2971_vm4, %v2979_v38, %v12148_v36  ;;  %v12569_v0 = vld [vmem:[#allocation228_spill] sm:$0xff]  ;;  %v12573_v62 = vld [vmem:[#allocation114_spill] sm:$0xff]  ;;  %v12575_v14 = vld [vmem:[#allocation109_spill] sm:$0xff] }
 0x2af   : > { %v2814_v44 = vmul.f32 %v2764_v41, %v8868_v2  ;;  %v12563_v41 = vld [vmem:[#allocation195_spill] sm:$0xff]  ;;  %v1227_v18 = vmul.f32 %v12571_v7, %v12570_v1  ;;  %v2322_v8 = vadd.f32 %v2300_v33, %v2107_v24  ;;  %v1011_v55 = vadd.f32 %v12572_v49, %v882_v42  ;;  %v12574_v38 = vld [vmem:[#allocation168_spill] sm:$0xff]  ;;  %v12582_v1 = vld [vmem:[#allocation141_spill] sm:$0xff] }
 0x2b0   : > { %v8934_v58 = vadd.f32 %v2514_v16, %v2321_v13  ;;  %v1871_v16 = vmul.f32 %v12573_v62, %v1735_v63  ;;  %v2168_v13 = vpop.f32.mrf.mxu0  ;;  %v12577_v24 = vld [vmem:[#allocation140_spill] sm:$0xff]  ;;  %v12578_v33 = vld [vmem:[#allocation51_spill] sm:$0xff]  ;;  %v12583_v7 = vld [vmem:[#allocation37_spill] sm:$0xff] }
 0x2b1   : > { %3009 = vrot.lane.b32.xlu0 %v8914_v29, %s6951_s19  ;;  %2850 = vrot.lane.b32.xlu2 %v2814_v44, %s6950_s18  ;;  %v12564_v44 = vld [vmem:[#allocation242_spill] sm:$0xff]  ;;  %v1249_v15 = vadd.f32 %v1227_v18, %v1011_v55  ;;  %v1442_v48 = vmul.f32 %v12578_v33, %v12577_v24  ;;  %v12580_v42 = vld [vmem:[#allocation100_spill] sm:$0xff]  ;;  %v12588_v24 = vld [vmem:[#allocation145_spill] sm:$0xff] }
 0x2b2   : > { %v1656_v54 = vmul.f32 %v12564_v44, %v12563_v41  ;;  %v2816_v41 = vmul.f32 %v12574_v38, %v8934_v58  ;;  %v1657_v63 = vmul.f32 %v12580_v42, %v12579_v4  ;;  %v8964_v49 = vld [vmem:[%s7611_s17 + $0x30] sm:$0xff]  ;;  %v12589_v33 = vld [vmem:[#allocation199_spill] sm:$0xff]  ;;  %v2983_v42 = vrot.slane %v8934_v58, 1 }
 0x2b3   : > { %v12584_v18 = vld [vmem:[#allocation240_spill] sm:$0xff]  ;;  %v1464_v55 = vadd.f32 %v1442_v48, %v1249_v15  ;;  %v1956_v62 = vpop.f32.mrf.mxu3  ;;  %v1443_v4 = vmul.f32 %v12589_v33, %v12588_v24  ;;  %v12593_v15 = vld [vmem:[#allocation87_spill] sm:$0xff] }
 0x2b4   : > { %v1678_v34 = vadd.f32 %v1656_v54, %v1463_v9  ;;  %v12581_v9 = vld [vmem:[#allocation164_spill] sm:$0xff]  ;;  %v1658_v48 = vmul.f32 %v12593_v15, %v12592_v21  ;;  %v12597_v21 = vld [vmem:[#allocation146_spill] sm:$0xff] }
 0x2b5   : > { %v2377_v31 = vpop.f32.mrf.mxu1  ;;  %v12585_v38 = vld [vmem:[#allocation104_spill] sm:$0xff] }
 0x2b6   : > { %3114 = vperm.xlu1 %6786, %v12565_v22   ;;  %v2515_v25 = vmul.f32 %v12569_v0, %v2377_v31  ;;  %v1893_v22 = vadd.f32 %v1871_v16, %v1678_v34  ;;  %v2086_v0 = vmul.f32 %v12581_v9, %v1950_v45  ;;  %v1679_v9 = vadd.f32 %v1657_v63, %v1464_v55  ;;  %v2776_v33 = vpop.permute.xlu1 %2775 }
 0x2b8   : > { %v8951_v31 = vadd.f32 %v2515_v25, %v2322_v8  ;;  %v1228_v25 = vmul.f32 %v12583_v7, %v12582_v1  ;;  %v1741_v8 = vpop.f32.mrf.mxu2  ;;  %v2108_v16 = vadd.f32 %v2086_v0, %v1893_v22  ;;  %v12590_v1 = vld [vmem:[#allocation42_spill] sm:$0xff]  ;;  %v12594_v0 = vld [vmem:[#allocation13_spill] sm:$0xff]  ;;  %v2171_v24 = vpop.f32.mrf.mxu0 }
 0x2b9   : > { %2852 = vrot.lane.b32.xlu0 %v2815_v60, %s6950_s18  ;;  %3013 = vrot.lane.b32.xlu2 %v8939_v35, %s6951_s19  ;;  %v12576_v60 = vld [vmem:[#allocation5_spill] sm:$0xff]  ;;  %v2301_v7 = vmul.f32 %v12590_v1, %v2165_v47 }
 0x2ba   : > { %v883_v54 = vmul.f32 %v12576_v60, %v12575_v14  ;;  %v2985_v34 = vrot.slane %v8951_v31, 1  ;;  %v12586_v14 = vld [vmem:[#allocation113_spill] sm:$0xff]  ;;  %v2817_v63 = vmul.f32 %v2776_v33, %v8951_v31 }
 0x2bb   : > { %v12587_v60 = vld [vmem:[#allocation101_spill] sm:$0xff]  ;;  %v2323_v36 = vadd.f32 %v2301_v7, %v2108_v16  ;;  %v12601_v7 = vld [vmem:[#allocation134_spill] sm:$0xff] }
 0x2bc   : > { %v884_v45 = vmul.f32 %v12587_v60, %v12586_v14  ;;  %v12595_v14 = vld [vmem:[#allocation152_spill] sm:$0xff]  ;;  %v12596_v47 = vld [vmem:[#allocation217_spill] sm:$0xff]  ;;  %v1873_v15 = vmul.f32 %v12601_v7, %v1741_v8 }
 0x2bd   : > { %v2380_v44 = vpop.f32.mrf.mxu1  ;;  %v2087_v60 = vmul.f32 %v12595_v14, %v1953_v56  ;;  %v12604_v14 = vld [vmem:[#allocation69_spill] sm:$0xff] }
 0x2be   : > { %2854 = vrot.lane.b32.xlu1 %v2816_v41, %s6950_s18  ;;  %v1014_v41 = vadd.f32 %v12585_v38, %v883_v54  ;;  %v8980_v54 = vsel %vm2971_vm4, %v2983_v42, %v2985_v34  ;;  %v1872_v38 = vmul.f32 %v12594_v0, %v1738_v11  ;;  %v12599_v11 = vrot.slane %v8880_v51, 1 }
 0x2c0   : > { %v1250_v59 = vadd.f32 %v1228_v25, %v1014_v41  ;;  %v12598_v25 = vld [vmem:[#allocation25_spill] sm:$0xff]  ;;  %v1894_v41 = vadd.f32 %v1872_v38, %v1679_v9  ;;  %v8995_v56 = vsel %vm2971_vm4, %v12599_v11, %v2983_v42  ;;  %v1744_v0 = vpop.f32.mrf.mxu2  ;;  %v12602_v9 = vld [vmem:[#allocation24_spill] sm:$0xff]  ;;  %v12603_v38 = vld [vmem:[#allocation151_spill] sm:$0xff]  ;;  %v1959_v42 = vpop.f32.mrf.mxu3 }
 0x2c1   : > { %3110 = vperm.xlu0 %6784, %v8964_v49   ;;  %3106 = vperm.xlu2 %6785, %v12584_v18   ;;  %v2516_v18 = vmul.f32 %v12591_v26, %v2380_v44  ;;  %v1017_v26 = vadd.f32 %v12596_v47, %v884_v45  ;;  %v1229_v55 = vmul.f32 %v12598_v25, %v12597_v21  ;;  %v12600_v45 = vld [vmem:[#allocation198_spill] sm:$0xff]  ;;  %v12608_v11 = vld [vmem:[#allocation117_spill] sm:$0xff] }
 0x2c2   : > { %v1465_v44 = vadd.f32 %v1443_v4, %v1250_v59  ;;  %v2109_v59 = vadd.f32 %v2087_v60, %v1894_v41  ;;  %v2302_v4 = vmul.f32 %v12600_v45, %v2168_v13  ;;  %v1444_v33 = vmul.f32 %v12604_v14, %v12603_v38  ;;  %v12605_v47 = vld [vmem:[#allocation66_spill] sm:$0xff]  ;;  %v12606_v60 = vld [vmem:[#allocation207_spill] sm:$0xff]  ;;  %v2780_v41 = vpop.permute.xlu2 %2779  ;;  %v12609_v45 = vld [vmem:[#allocation17_spill] sm:$0xff] }
 0x2c3   : > { %v8990_v1 = vadd.f32 %v2516_v18, %v2323_v36  ;;  %v2088_v36 = vmul.f32 %v12602_v9, %v1956_v62  ;;  %v1251_v18 = vadd.f32 %v1229_v55, %v1017_v26  ;;  %v1659_v13 = vmul.f32 %v8665_v46, %v12606_v60  ;;  %v12607_v62 = vld [vmem:[#allocation184_spill] sm:$0xff]  ;;  %v2174_v9 = vpop.f32.mrf.mxu0  ;;  %v12610_v46 = vld [vmem:[#allocation233_spill] sm:$0xff] }
 0x2c4   : > { %v1680_v16 = vadd.f32 %v1658_v48, %v1465_v44  ;;  %v2303_v26 = vmul.f32 %v12607_v62, %v2171_v24  ;;  %v885_v7 = vmul.f32 %v12609_v45, %v12608_v11  ;;  %v12612_v24 = vld [vmem:[#allocation154_spill] sm:$0xff]  ;;  %v12619_v11 = vld [vmem:[#allocation56_spill] sm:$0xff] }
 0x2c5   : > { %v2383_v22 = vpop.f32.mrf.mxu1  ;;  %v12149_v44 = vrot.slane %v8990_v1, 1  ;;  %v2818_v55 = vmul.f32 %v2780_v41, %v8990_v1 }
 0x2c6   : > { %3017 = vrot.lane.b32.xlu1 %v8980_v54, %s6951_s19  ;;  %v2517_v48 = vmul.f32 %v12605_v47, %v2383_v22  ;;  %v1895_v21 = vadd.f32 %v1873_v15, %v1680_v16  ;;  %v1466_v22 = vadd.f32 %v1444_v33, %v1251_v18  ;;  %v12613_v18 = vld [vmem:[#allocation224_spill] sm:$0xff]  ;;  %v12614_v33 = vld [vmem:[#allocation119_spill] sm:$0xff] }
 0x2c7   : > { %v9019_v16 = vsel %vm2971_vm4, %v2985_v34, %v12149_v44  ;;  %v1020_v14 = vadd.f32 %v12613_v18, %v885_v7  ;;  %v1874_v47 = vmul.f32 %v12614_v33, %v1744_v0  ;;  %v12615_v34 = vld [vmem:[#allocation173_spill] sm:$0xff]  ;;  %v12620_v7 = vld [vmem:[#allocation211_spill] sm:$0xff] }
 0x2c8   : > { %v2110_v8 = vadd.f32 %v2088_v36, %v1895_v21  ;;  %v1681_v15 = vadd.f32 %v1659_v13, %v1466_v22  ;;  %v1747_v21 = vpop.f32.mrf.mxu2  ;;  %v1962_v41 = vpop.f32.mrf.mxu3  ;;  %v12617_v13 = vld [vmem:[#allocation8_spill] sm:$0xff]  ;;  %v12621_v0 = vld [vmem:[#allocation103_spill] sm:$0xff]  ;;  %v12631_v44 = vld [vmem:[#allocation89_spill] sm:$0xff] }
 0x2c9   : > { %3015 = vrot.lane.b32.xlu0 %v8995_v56, %s6951_s19  ;;  %2856 = vrot.lane.b32.xlu2 %v2817_v63, %s6950_s18  ;;  %v2324_v63 = vadd.f32 %v2302_v4, %v2109_v59  ;;  %v1660_v22 = vmul.f32 %v12621_v0, %v12620_v7  ;;  %v9044_v18 = vld [vmem:[%s7611_s17 + $0x48] sm:$0xff]  ;;  %v12628_v7 = vld [vmem:[#allocation45_spill] sm:$0xff] }
 0x2ca   : > { %v2325_v36 = vadd.f32 %v2303_v26, %v2110_v8  ;;  %v1896_v62 = vadd.f32 %v1874_v47, %v1681_v15  ;;  %v12618_v26 = vld [vmem:[#allocation157_spill] sm:$0xff]  ;;  %v2792_v33 = vpop.permute.xlu2 %2791  ;;  %v2304_v0 = vmul.f32 %v12628_v7, %v2174_v9 }
 0x2cb   : > { %v9014_v38 = vadd.f32 %v2517_v48, %v2324_v63  ;;  %v1445_v45 = vmul.f32 %v12619_v11, %v12618_v26 }
 0x2cd   : > { %v2386_v25 = vpop.f32.mrf.mxu1  ;;  %v2819_v48 = vmul.f32 %v12615_v34, %v9014_v38  ;;  %v12625_v34 = vld [vmem:[#allocation31_spill] sm:$0xff]  ;;  %v2989_v26 = vrot.slane %v9014_v38, 1 }
 0x2ce   : > { %3126 = vperm.xlu1 %6786, %v8462_v19   ;;  %v2518_v59 = vmul.f32 %v12610_v46, %v2386_v25  ;;  %v12611_v19 = vld [vmem:[#allocation153_spill] sm:$0xff]  ;;  %v12622_v46 = vld [vmem:[#allocation167_spill] sm:$0xff] }
 0x2cf   : > { %v1230_v4 = vmul.f32 %v12612_v24, %v12611_v19  ;;  %v2089_v19 = vmul.f32 %v12622_v46, %v1959_v42  ;;  %v12623_v24 = vld [vmem:[#allocation159_spill] sm:$0xff] }
 0x2d0   : > { %v9031_v25 = vadd.f32 %v2518_v59, %v2325_v36  ;;  %v12624_v59 = vld [vmem:[#allocation40_spill] sm:$0xff]  ;;  %v12629_v46 = vld [vmem:[#allocation215_spill] sm:$0xff]  ;;  %v1750_v9 = vpop.f32.mrf.mxu2 }
 0x2d1   : > { %2858 = vrot.lane.b32.xlu0 %v2818_v55, %s6950_s18  ;;  %3019 = vrot.lane.b32.xlu2 %v9019_v16, %s6951_s19  ;;  %v1252_v60 = vadd.f32 %v1230_v4, %v1020_v14  ;;  %v12616_v55 = vld [vmem:[#allocation121_spill] sm:$0xff]  ;;  %v1231_v36 = vmul.f32 %v12624_v59, %v12623_v24  ;;  %v2177_v14 = vpop.f32.mrf.mxu0  ;;  %v2111_v47 = vadd.f32 %v2089_v19, %v1896_v62  ;;  %v12632_v62 = vld [vmem:[#allocation16_spill] sm:$0xff] }
 0x2d2   : > { %v886_v8 = vmul.f32 %v12617_v13, %v12616_v55  ;;  %v2991_v4 = vrot.slane %v9031_v25, 1  ;;  %v12626_v55 = vld [vmem:[#allocation162_spill] sm:$0xff]  ;;  %v12633_v19 = vld [vmem:[#allocation156_spill] sm:$0xff] }
 0x2d3   : > { %v1467_v15 = vadd.f32 %v1445_v45, %v1252_v60  ;;  %v12627_v13 = vld [vmem:[#allocation202_spill] sm:$0xff] }
 0x2d4   : > { %v1446_v42 = vmul.f32 %v12627_v13, %v12626_v55  ;;  %v9058_v45 = vsel %vm2971_vm4, %v2989_v26, %v2991_v4  ;;  %v2788_v55 = vpop.permute.xlu1 %2787  ;;  %v2326_v13 = vadd.f32 %v2304_v0, %v2111_v47  ;;  %v12635_v47 = vld [vmem:[#allocation201_spill] sm:$0xff]  ;;  %v12636_v0 = vld [vmem:[#allocation139_spill] sm:$0xff] }
 0x2d5   : > { %v2389_v63 = vpop.f32.mrf.mxu1  ;;  %v1682_v11 = vadd.f32 %v1660_v22, %v1467_v15  ;;  %v1965_v15 = vpop.f32.mrf.mxu3 }
 0x2d6   : > { %2860 = vrot.lane.b32.xlu1 %v2819_v48, %s6950_s18  ;;  %v1023_v48 = vadd.f32 %v12625_v34, %v886_v8  ;;  %v2519_v24 = vmul.f32 %v12629_v46, %v2389_v63  ;;  %v1875_v8 = vmul.f32 %v12632_v62, %v1747_v21  ;;  %v2090_v34 = vmul.f32 %v12633_v19, %v1962_v41  ;;  %v12638_v62 = vld [vmem:[#allocation71_spill] sm:$0xff] }
 0x2d7   : > { %v2820_v63 = vmul.f32 %v2788_v55, %v9031_v25  ;;  %v1876_v46 = vmul.f32 %v12636_v0, %v1750_v9 }
 0x2d8   : > { %v1253_v59 = vadd.f32 %v1231_v36, %v1023_v48  ;;  %v1897_v36 = vadd.f32 %v1875_v8, %v1682_v11  ;;  %v12634_v48 = vrot.slane %v8990_v1, 1  ;;  %v12637_v11 = vld [vmem:[#allocation27_spill] sm:$0xff] }
 0x2d9   : > { %3122 = vperm.xlu0 %6784, %v9044_v18   ;;  %3118 = vperm.xlu2 %6785, %v8659_v53   ;;  %v12630_v53 = vld [vmem:[#allocation214_spill] sm:$0xff] }
 0x2da   : > { %v1661_v3 = vmul.f32 %v12631_v44, %v12630_v53  ;;  %v1468_v22 = vadd.f32 %v1446_v42, %v1253_v59  ;;  %v9065_v44 = vadd.f32 %v2519_v24, %v2326_v13  ;;  %v9070_v7 = vsel %vm2971_vm4, %v12634_v48, %v2989_v26  ;;  %v2180_v24 = vpop.f32.mrf.mxu0  ;;  %v2804_v53 = vpop.permute.xlu2 %2803  ;;  %v12641_v48 = vld [vmem:[#allocation124_spill] sm:$0xff] }
 0x2db   : > { %v2112_v41 = vadd.f32 %v2090_v34, %v1897_v36  ;;  %v2305_v42 = vmul.f32 %v12635_v47, %v2177_v14  ;;  %v2091_v59 = vmul.f32 %v12637_v11, %v1965_v15  ;;  %v1753_v36 = vpop.f32.mrf.mxu2  ;;  %v12640_v15 = vld [vmem:[#allocation64_spill] sm:$0xff] }
 0x2dc   : > { %v1683_v21 = vadd.f32 %v1661_v3, %v1468_v22  ;;  %v2993_v26 = vrot.slane %v9065_v44, 1  ;;  %v12639_v22 = vld [vmem:[#allocation186_spill] sm:$0xff]  ;;  %v2821_v14 = vmul.f32 %v2792_v33, %v9065_v44  ;;  %v12643_v33 = vld [vmem:[#allocation177_spill] sm:$0xff]  ;;  %v12645_v11 = vld [vmem:[#allocation172_spill] sm:$0xff] }
 0x2dd   : > { %v2392_v60 = vpop.f32.mrf.mxu1  ;;  %v2327_v3 = vadd.f32 %v2305_v42, %v2112_v41  ;;  %v2306_v34 = vmul.f32 %v12639_v22, %v2180_v24  ;;  %v1968_v42 = vpop.f32.mrf.mxu3  ;;  %v12647_v22 = vld [vmem:[#allocation219_spill] sm:$0xff] }
 0x2de   : > { %3023 = vrot.lane.b32.xlu1 %v9058_v45, %s6951_s19  ;;  %v2520_v8 = vmul.f32 %v12638_v62, %v2392_v60  ;;  %v1898_v19 = vadd.f32 %v1876_v46, %v1683_v21  ;;  %v9086_v9 = vsel %vm2971_vm4, %v2991_v4, %v2993_v26  ;;  %v1877_v21 = vmul.f32 %v12641_v48, %v1753_v36 }
 0x2df   : > { %v12644_v46 = vmov 4  }
 0x2e0   : > { %v2113_v13 = vadd.f32 %v2091_v59, %v1898_v19  ;;  %v1899_v0 = vadd.f32 %v1877_v21, %v8719_v50  ;;  %v2092_v59 = vmul.f32 %v12645_v11, %v1968_v42  ;;  %v12646_v50 = vld [vmem:[#allocation49_spill] sm:$0xff]  ;;  %v2670_v21 = vrot.slane %v8805_v32, 7 }
 0x2e1   : > { %3021 = vrot.lane.b32.xlu0 %v9070_v7, %s6951_s19  ;;  %2862 = vrot.lane.b32.xlu2 %v2820_v63, %s6950_s18  ;;  %v9083_v63 = vadd.f32 %v2520_v8, %v2327_v3  ;;  %v9104_v8 = vld [vmem:[%s7611_s17 + $0x60] sm:$0xff] }
 0x2e2   : > { %v9093_v41 = vpop.permute.xlu2 %2907  ;;  %v2183_v24 = vpop.f32.mrf.mxu0  ;;  %v2114_v3 = vadd.f32 %v2092_v59, %v1899_v0 }
 0x2e3   : > { %12642 = vst [vmem:[#allocation9_spill] sm:$0xff] %v9093_v41  ;;  %v2822_v47 = vmul.f32 %v12643_v33, %v9083_v63  ;;  %v12704_v41 = vld [vmem:[#allocation206_spill] sm:$0xff] }
 0x2e5   : > { %v2395_v55 = vpop.f32.mrf.mxu1 }
 0x2e6   : > { %3138 = vperm.xlu1 %6786, %v8477_v52   ;;  %v2521_v60 = vmul.f32 %v12640_v15, %v2395_v55  ;;  %v2328_v52 = vadd.f32 %v2306_v34, %v2113_v13  ;;  %v2995_v55 = vrot.slane %v9083_v63, 1  ;;  %v2307_v13 = vmul.f32 %v12646_v50, %v2183_v24  ;;  %v2800_v15 = vpop.permute.xlu1 %2799 }
 0x2e7   : > { %v2672_v24 = vrot.slane %v8853_v10, 7  ;;  %v12658_v50 = vrot.slane %v8880_v51, 7 }
 0x2e8   : > { %v9097_v4 = vadd.f32 %v2521_v60, %v2328_v52  ;;  %v2329_v60 = vadd.f32 %v2307_v13, %v2114_v3  ;;  %v9123_v48 = vsel %vm2971_vm4, %v2993_v26, %v2995_v55 }
 0x2e9   : > { %2864 = vrot.lane.b32.xlu0 %v2821_v14, %s6950_s18  ;;  %3025 = vrot.lane.b32.xlu2 %v9086_v9, %s6951_s19  ;;  %12649 = vst [vmem:[#allocation74_spill] sm:$0xff] %v9123_v48 }
 0x2ea   : > { %v2997_v19 = vrot.slane %v9097_v4, 1  ;;  %v9115_v36 = vpop.permute.xlu2 %2919 }
 0x2eb   : > { %12648 = vst [vmem:[#allocation41_spill] sm:$0xff] %v9115_v36  ;;  %v12694_v36 = vld [vmem:[#allocation166_spill] sm:$0xff] }
 0x2ec   : > { %v9113_v14 = vsel %vm2971_vm4, %v2995_v55, %v2997_v19  ;;  %v12151_v55 = vrot.slane %v8934_v58, 7 }
 0x2ed   : > { %v2398_v62 = vpop.f32.mrf.mxu1 }
 0x2ee   : > { %2866 = vrot.lane.b32.xlu1 %v2822_v47, %s6950_s18  ;;  %v2522_v34 = vmul.f32 %v12647_v22, %v2398_v62  ;;  %v12650_v47 = vrot.slane %v8761_v6, 7  ;;  %v9149_v6 = vld [vmem:[%s7611_s17 + $0x78] sm:$0xff]  ;;  %v9159_v62 = vsel %vm2664_vm3, %v2670_v21, %v2672_v24  ;;  %v9178_v13 = vsel %vm2664_vm3, %v12658_v50, %v12151_v55 }
 0x2ef   : > { %6789 = vset.pattern.permute.xlu1 %v12644_v46  ;;  %12655 = vst [vmem:[#allocation50_spill] sm:$0xff] %v9159_v62  ;;  %v6883_v22 = vld [vmem:[%s12114_s6 + $0x98] sm:$0xff]  ;;  %v12157_v50 = vrot.slane %v9083_v63, 7 }
 0x2f0   : > { %v9120_v52 = vadd.f32 %v2522_v34, %v2329_v60  ;;  %v9133_v42 = vsel %vm2664_vm3, %v12650_v47, %v2670_v21  ;;  %v12661_v47 = vrot.slane %v8868_v2, 7 }
 0x2f1   : > { %3134 = vperm.xlu0 %6784, %v9104_v8   ;;  %3130 = vperm.xlu2 %6785, %v8699_v57   ;;  %v2823_v57 = vmul.f32 %v2800_v15, %v9097_v4  ;;  %12651 = vst [vmem:[#allocation26_spill] sm:$0xff] %v9133_v42  ;;  %v12153_v15 = vrot.slane %v9014_v38, 7 }
 0x2f2   : > { %v12154_v33 = vrot.slane %v9120_v52, 1  ;;  %v2824_v26 = vmul.f32 %v2804_v53, %v9120_v52  ;;  %v9138_v0 = vpop.permute.xlu2 %2927  ;;  %v9155_v53 = vpop.permute.xlu0 %1644 }
 0x2f3   : > { %12652 = vst [vmem:[#allocation34_spill] sm:$0xff] %v9138_v0 }
 0x2f4   : > { %v9143_v11 = vsel %vm2971_vm4, %v2997_v19, %v12154_v33  ;;  %12654 = vst [vmem:[#allocation32_spill] sm:$0xff] %v9155_v53  ;;  %v6882_v19 = vld [vmem:[%s12114_s6 + $0x80] sm:$0xff] }
 0x2f5   : > { %v12714_v53 = vld [vmem:[#allocation142_spill] sm:$0xff] }
 0x2f6   : > { %3029 = vrot.lane.b32.xlu1 %v9113_v14, %s6951_s19 }
 0x2f9   : > { %3027 = vrot.lane.b32.xlu0 %v9123_v48, %s6951_s19  ;;  %2868 = vrot.lane.b32.xlu2 %v2823_v57, %s6950_s18  ;;  %v12152_v57 = vrot.slane %v8990_v1, 7 }
 0x2fa   : > { %v9153_v59 = vpop.permute.xlu2 %2939 }
 0x2fb   : > { %12653 = vst [vmem:[#allocation62_spill] sm:$0xff] %v9153_v59  ;;  %v9196_v21 = vsel %vm2664_vm3, %v12152_v57, %v12153_v15  ;;  %v9226_v15 = vpop.permute.xlu1 %2915 }
 0x2fc   : > { %12668 = vst [vmem:[#allocation29_spill] sm:$0xff] %v9226_v15 }
 0x2fe   : > { %3154 = vrot.lane.b32.xlu1 %v9133_v42, %s6952_s29  ;;  %v12709_v42 = vld [vmem:[#allocation107_spill] sm:$0xff] }
 0x301   : > { %2870 = vrot.lane.b32.xlu0 %v2824_v26, %s6950_s18  ;;  %3031 = vrot.lane.b32.xlu2 %v9143_v11, %s6951_s19  ;;  %v9201_v26 = vsel %vm2664_vm3, %v2672_v24, %v12661_v47 }
 0x302   : > { %v9170_v3 = vpop.permute.xlu2 %2951  ;;  %12662 = vst [vmem:[#allocation58_spill] sm:$0xff] %v9201_v26 }
 0x303   : > { %12657 = vst [vmem:[#allocation57_spill] sm:$0xff] %v9170_v3  ;;  %v9234_v12 = vpop.permute.xlu1 %2923 }
 0x304   : > { %12672 = vst [vmem:[#allocation112_spill] sm:$0xff] %v9234_v12  ;;  %v2186_v12 = vpop.f32.mrf.mxu0 }
 0x309   : > { %3146 = vperm.xlu0 %6784, %v9149_v6   ;;  %3142 = vperm.xlu2 %6785, %v8741_v30   ;;  %v9168_v30 = vpop.permute.xlu0 %3090 }
 0x30a   : > { %12656 = vst [vmem:[#allocation7_spill] sm:$0xff] %v9168_v30  ;;  %v9188_v60 = vpop.permute.xlu2 %2963 }
 0x30b   : > { %12660 = vst [vmem:[#allocation75_spill] sm:$0xff] %v9188_v60 }
 0x311   : > { %6787 = vset.pattern.permute.xlu0 %v12644_v46  ;;  %3156 = vrot.lane.b32.xlu2 %v9159_v62, %s6952_s29 }
 0x312   : > { %1839 = vperm.xlu0 %6787, %v6882_v19   ;;  %6788 = vset.pattern.permute.xlu2 %v12644_v46  ;;  %v9211_v55 = vpop.permute.xlu2 %3086 }
 0x313   : > { %12664 = vst [vmem:[#allocation2_spill] sm:$0xff] %v9211_v55 }
 0x319   : > { %3162 = vrot.lane.b32.xlu2 %v9178_v13, %s6952_s29 }
 0x31a   : > { %1851 = vperm.xlu0 %6787, %v6883_v22   ;;  %v12156_v22 = vrot.slane %v9065_v44, 7  ;;  %v9224_v57 = vpop.permute.xlu2 %2844 }
 0x31b   : > { %v9185_v34 = vpop.permute.xlu0 %2846  ;;  %12667 = vst [vmem:[#allocation20_spill] sm:$0xff] %v9224_v57 }
 0x31c   : > { %12659 = vst [vmem:[#allocation78_spill] sm:$0xff] %v9185_v34  ;;  %v9218_v24 = vsel %vm2664_vm3, %v12156_v22, %v12157_v50  ;;  %v9240_v50 = vpop.permute.xlu1 %2935 }
 0x31d   : > { %12665 = vst [vmem:[#allocation86_spill] sm:$0xff] %v9218_v24 }
 0x31e   : > { %12675 = vst [vmem:[#allocation44_spill] sm:$0xff] %v9240_v50 }
 0x321   : > { %3168 = vrot.lane.b32.xlu2 %v9196_v21, %s6952_s29 }
 0x322   : > { %3158 = vrot.lane.b32.xlu0 %v9201_v26, %s6952_s29  ;;  %v9232_v60 = vpop.permute.xlu2 %3007 }
 0x323   : > { %v9207_v19 = vpop.permute.xlu0 %3009  ;;  %12671 = vst [vmem:[#allocation72_spill] sm:$0xff] %v9232_v60  ;;  %v12708_v60 = vld [vmem:[#allocation223_spill] sm:$0xff] }
 0x324   : > { %12663 = vst [vmem:[#allocation82_spill] sm:$0xff] %v9207_v19 }
 0x329   : > { %3174 = vrot.lane.b32.xlu2 %v9218_v24, %s6952_s29 }
 0x32a   : > { %v9238_v22 = vpop.permute.xlu2 %3098 }
 0x32b   : > { %v9222_v47 = vpop.permute.xlu0 %2852  ;;  %12674 = vst [vmem:[#allocation106_spill] sm:$0xff] %v9238_v22 }
 0x32c   : > { %12666 = vst [vmem:[#allocation3_spill] sm:$0xff] %v9222_v47  ;;  %v9246_v47 = vpop.permute.xlu1 %2947 }
 0x32d   : > { %12678 = vst [vmem:[#allocation165_spill] sm:$0xff] %v9246_v47 }
 0x332   : > { %v9244_v59 = vpop.permute.xlu2 %2850 }
 0x333   : > { %v9228_v33 = vpop.permute.xlu0 %3110  ;;  %12677 = vst [vmem:[#allocation90_spill] sm:$0xff] %v9244_v59 }
 0x334   : > { %12669 = vst [vmem:[#allocation171_spill] sm:$0xff] %v9228_v33 }
 0x33a   : > { %v9250_v33 = vpop.permute.xlu2 %3013 }
 0x33b   : > { %v9230_v46 = vpop.permute.xlu0 %3015  ;;  %12680 = vst [vmem:[#allocation61_spill] sm:$0xff] %v9250_v33 }
 0x33c   : > { %12670 = vst [vmem:[#allocation68_spill] sm:$0xff] %v9230_v46  ;;  %v9252_v46 = vpop.permute.xlu1 %2959 }
 0x33d   : > { %12681 = vst [vmem:[#allocation179_spill] sm:$0xff] %v9252_v46  ;;  %v12692_v46 = vld [vmem:[#allocation19_spill] sm:$0xff] }
 0x33e   : > { %v888_v40 = vmul.f32 %v12692_v46, %v12691_v5  ;;  %v12702_v5 = vld [vmem:[#allocation46_spill] sm:$0xff] }
 0x342   : > { %v9256_v15 = vpop.permute.xlu2 %3106 }
 0x343   : > { %v9236_v3 = vpop.permute.xlu0 %2858  ;;  %12683 = vst [vmem:[#allocation183_spill] sm:$0xff] %v9256_v15  ;;  %v1756_v15 = vpop.f32.mrf.mxu2 }
 0x344   : > { %12673 = vst [vmem:[#allocation188_spill] sm:$0xff] %v9236_v3  ;;  %v9260_v22 = vpop.permute.xlu1 %3094 }
 0x345   : > { %12685 = vst [vmem:[#allocation97_spill] sm:$0xff] %v9260_v22  ;;  %v1971_v22 = vpop.f32.mrf.mxu3 }
 0x34b   : > { %v9242_v55 = vpop.permute.xlu0 %3122 }
 0x34c   : > { %12676 = vst [vmem:[#allocation174_spill] sm:$0xff] %v9242_v55  ;;  %v9264_v55 = vpop.permute.xlu2 %2856  ;;  %v9266_v34 = vpop.permute.xlu1 %2842 }
 0x34d   : > { %12687 = vst [vmem:[#allocation143_spill] sm:$0xff] %v9264_v55  ;;  %v12698_v55 = vld [vmem:[#allocation11_spill] sm:$0xff] }
 0x34e   : > { %12688 = vst [vmem:[#allocation125_spill] sm:$0xff] %v9266_v34  ;;  %v12699_v34 = vld [vmem:[#allocation39_spill] sm:$0xff] }
 0x34f   : > { %v1029_v57 = vadd.f32 %v12699_v34, %v888_v40  ;;  %v12710_v34 = vld [vmem:[#allocation229_spill] sm:$0xff] }
 0x353   : > { %v9248_v0 = vpop.permute.xlu0 %3021 }
 0x354   : > { %12679 = vst [vmem:[#allocation116_spill] sm:$0xff] %v9248_v0  ;;  %v9270_v0 = vpop.permute.xlu2 %3019 }
 0x355   : > { %12690 = vst [vmem:[#allocation110_spill] sm:$0xff] %v9270_v0 }
 0x35b   : > { %v9254_v19 = vpop.permute.xlu0 %2864 }
 0x35c   : > { %12682 = vst [vmem:[#allocation79_spill] sm:$0xff] %v9254_v19  ;;  %v9274_v19 = vpop.permute.xlu1 %3005  ;;  %v9288_v37 = vpop.permute.xlu2 %3118 }
 0x35d   : > { %12693 = vst [vmem:[#allocation204_spill] sm:$0xff] %v9274_v19  ;;  %v12703_v19 = vld [vmem:[#allocation178_spill] sm:$0xff] }
 0x35e   : > { %v1449_v62 = vmul.f32 %v12704_v41, %v12703_v19  ;;  %12705 = vst [vmem:[#allocation190_spill] sm:$0xff] %v9288_v37  ;;  %v1974_v19 = vpop.f32.mrf.mxu3 }
 0x363   : > { %v9258_v3 = vpop.permute.xlu0 %3134 }
 0x364   : > { %12684 = vst [vmem:[#allocation237_spill] sm:$0xff] %v9258_v3  ;;  %v12695_v3 = vld [vmem:[#allocation158_spill] sm:$0xff] }
 0x365   : > { %v1233_v59 = vmul.f32 %v12695_v3, %v12694_v36  ;;  %v12706_v36 = vld [vmem:[#allocation169_spill] sm:$0xff]  ;;  %v12707_v3 = vld [vmem:[#allocation59_spill] sm:$0xff] }
 0x367   : > { %v1255_v33 = vadd.f32 %v1233_v59, %v1029_v57  ;;  %v9296_v57 = vpop.permute.xlu1 %3102 }
 0x368   : > { %12712 = vst [vmem:[#allocation91_spill] sm:$0xff] %v9296_v57  ;;  %v12740_v57 = vrot.slane %v9065_v44, 7 }
 0x36b   : > { %v9262_v50 = vpop.permute.xlu0 %3027 }
 0x36c   : > { %12686 = vst [vmem:[#allocation108_spill] sm:$0xff] %v9262_v50  ;;  %v12697_v50 = vld [vmem:[#allocation138_spill] sm:$0xff] }
 0x36d   : > { %v889_v61 = vmul.f32 %v12698_v55, %v12697_v50  ;;  %v1663_v55 = vmul.f32 %v12709_v42, %v12708_v60  ;;  %v2401_v50 = vpop.f32.mrf.mxu1  ;;  %v12715_v60 = vld [vmem:[#allocation30_spill] sm:$0xff] }
 0x36f   : > { %v1032_v46 = vadd.f32 %v12702_v5, %v889_v61  ;;  %v1759_v5 = vpop.f32.mrf.mxu2 }
 0x370   : > { %v1879_v42 = vmul.f32 %v12714_v53, %v1759_v5  ;;  %v12721_v53 = vld [vmem:[#allocation236_spill] sm:$0xff] }
 0x373   : > { %v9268_v47 = vpop.permute.xlu0 %2870 }
 0x374   : > { %12689 = vst [vmem:[#allocation187_spill] sm:$0xff] %v9268_v47  ;;  %v12700_v47 = vld [vmem:[#allocation170_spill] sm:$0xff] }
 0x375   : > { %v1234_v0 = vmul.f32 %v12701_v17, %v12700_v47  ;;  %v1664_v17 = vmul.f32 %v12711_v39, %v12710_v34  ;;  %v2189_v39 = vpop.f32.mrf.mxu0  ;;  %v9302_v34 = vpop.permute.xlu2 %2862 }
 0x376   : > { %12717 = vst [vmem:[#allocation12_spill] sm:$0xff] %v9302_v34 }
 0x377   : > { %v1256_v40 = vadd.f32 %v1234_v0, %v1032_v46  ;;  %v2094_v0 = vmul.f32 %v12715_v60, %v1974_v19  ;;  %v12716_v46 = vld [vmem:[#allocation205_spill] sm:$0xff]  ;;  %v2680_v60 = vrot.slane %v8951_v31, 7 }
 0x378   : > { %v2308_v24 = vmul.f32 %v12716_v46, %v2186_v12  ;;  %v2694_v12 = vrot.slane %v9120_v52, 7 }
 0x379   : > { %v1471_v61 = vadd.f32 %v1449_v62, %v1256_v40  ;;  %v12718_v62 = vld [vmem:[#allocation76_spill] sm:$0xff] }
 0x37a   : > { %v2523_v40 = vmul.f32 %v12718_v62, %v2401_v50  ;;  %v9352_v62 = vld [vmem:[%s7611_s17] sm:$0xff] }
 0x37b   : > { %v9278_v30 = vpop.permute.xlu0 %3146  ;;  %v1686_v43 = vadd.f32 %v1664_v17, %v1471_v61  ;;  %v12719_v17 = vld [vmem:[#allocation192_spill] sm:$0xff] }
 0x37c   : > { %12696 = vst [vmem:[#allocation21_spill] sm:$0xff] %v9278_v30  ;;  %v1448_v30 = vmul.f32 %v12707_v3, %v12706_v36  ;;  %v2093_v36 = vmul.f32 %v12713_v27, %v1971_v22  ;;  %v2309_v61 = vmul.f32 %v12719_v17, %v2189_v39  ;;  %v9306_v27 = vpop.permute.xlu1 %2848 }
 0x37d   : > { %12720 = vst [vmem:[#allocation161_spill] sm:$0xff] %v9306_v27 }
 0x37e   : > { %v1470_v59 = vadd.f32 %v1448_v30, %v1255_v33  ;;  %v1901_v30 = vadd.f32 %v1879_v42, %v1686_v43  ;;  %v9331_v42 = vpop.permute.xlu2 %3025 }
 0x37f   : > { %12726 = vst [vmem:[#allocation118_spill] sm:$0xff] %v9331_v42  ;;  %v2192_v42 = vpop.f32.mrf.mxu0 }
 0x380   : > { %v1685_v41 = vadd.f32 %v1663_v55, %v1470_v59  ;;  %v2404_v55 = vpop.f32.mrf.mxu1 }
 0x381   : > { %v2524_v22 = vmul.f32 %v12721_v53, %v2404_v55  ;;  %v2692_v53 = vrot.slane %v9097_v4, 7 }
 0x384   : > { %v1840_v47 = vpop.permute.xlu0 %1839  ;;  %v9335_v46 = vpop.permute.xlu1 %3011 }
 0x385   : > { %v1878_v37 = vmul.f32 %v1840_v47, %v1756_v15  ;;  %v2116_v15 = vadd.f32 %v2094_v0, %v1901_v30  ;;  %v12722_v47 = vld [vmem:[#allocation182_spill] sm:$0xff]  ;;  %12727 = vst [vmem:[#allocation144_spill] sm:$0xff] %v9335_v46 }
 0x386   : > { %v9356_v55 = vpop.permute.xlu2 %3130 }
 0x387   : > { %v1900_v3 = vadd.f32 %v1878_v37, %v1685_v41  ;;  %v12723_v41 = vrot.slane %v9120_v52, 1  ;;  %12730 = vst [vmem:[#allocation4_spill] sm:$0xff] %v9356_v55 }
 0x388   : > { %v2407_v27 = vpop.f32.mrf.mxu1 }
 0x389   : > { %v2115_v33 = vadd.f32 %v2093_v36, %v1900_v3 }
 0x38b   : > { %v2330_v59 = vadd.f32 %v2308_v24, %v2115_v33  ;;  %v2331_v24 = vadd.f32 %v2309_v61, %v2116_v15  ;;  %v12728_v33 = vrot.slane %v8934_v58, 7  ;;  %v12732_v15 = vrot.slane %v9014_v38, 7  ;;  %v9370_v61 = vld [vmem:[%s7611_s17 + $0x18] sm:$0xff] }
 0x38d   : > { %v9308_v37 = vadd.f32 %v2523_v40, %v2330_v59  ;;  %v9325_v3 = vadd.f32 %v2524_v22, %v2331_v24  ;;  %v9345_v30 = vsel %vm2664_vm3, %v12728_v33, %v2680_v60  ;;  %v2686_v40 = vrot.slane %v9031_v25, 7  ;;  %v9358_v59 = vpop.permute.xlu1 %3114  ;;  %v9391_v33 = vld [vmem:[%s7611_s17 + $0x28] sm:$0xff] }
 0x38e   : > { %12729 = vst [vmem:[#allocation96_spill] sm:$0xff] %v9345_v30  ;;  %v12733_v22 = vrot.slane %v8990_v1, 7  ;;  %v12736_v24 = vrot.slane %v9083_v63, 7 }
 0x38f   : > { %v2825_v43 = vmul.f32 %v12722_v47, %v9308_v37  ;;  %v3001_v5 = vrot.slane %v9308_v37, 1  ;;  %v2696_v50 = vrot.slane %v9308_v37, 7  ;;  %v12162_v0 = vrot.slane %v9325_v3, 1  ;;  %12731 = vst [vmem:[#allocation85_spill] sm:$0xff] %v9358_v59  ;;  %v12739_v59 = vld [vmem:[#allocation176_spill] sm:$0xff] }
 0x390   : > { %v9363_v17 = vsel %vm2664_vm3, %v12732_v15, %v2686_v40  ;;  %v9377_v47 = vsel %vm2664_vm3, %v2680_v60, %v12733_v22  ;;  %v12738_v15 = vld [vmem:[#allocation128_spill] sm:$0xff]  ;;  %v9403_v34 = vsel %vm2664_vm3, %v2686_v40, %v12740_v57  ;;  %v12744_v57 = vld [vmem:[#allocation53_spill] sm:$0xff] }
 0x391   : > { %2872 = vrot.lane.b32.xlu1 %v2825_v43, %s6950_s18  ;;  %v9320_v19 = vsel %vm2971_vm4, %v12723_v41, %v3001_v5  ;;  %v9323_v36 = vsel %vm2664_vm3, %v2694_v12, %v2696_v50  ;;  %v9340_v39 = vsel %vm2971_vm4, %v3001_v5, %v12162_v0  ;;  %12734 = vst [vmem:[#allocation38_spill] sm:$0xff] %v9377_v47  ;;  %v9379_v43 = vpop.permute.xlu2 %2868  ;;  %v1762_v5 = vpop.f32.mrf.mxu2  ;;  %s6315_s18 = sshll.u32 %s13371_s30, 4 }
 0x392   : > { %12724 = vst [vmem:[#allocation175_spill] sm:$0xff] %v9320_v19  ;;  %3033 = vrot.lane.b32.xlu0 %v9320_v19, %s6951_s19  ;;  %3180 = vrot.lane.b32.xlu2 %v9323_v36, %s6952_s29  ;;  %v9384_v41 = vsel %vm2664_vm3, %v12736_v24, %v2692_v53  ;;  %v1880_v22 = vmul.f32 %v12738_v15, %v1762_v5  ;;  %v1977_v0 = vpop.f32.mrf.mxu3  ;;  %v3150_v24 = vrot.slane %v9325_v3, 7 }
 0x393   : > { %12725 = vst [vmem:[#allocation222_spill] sm:$0xff] %v9323_v36  ;;  %v2310_v40 = vmul.f32 %v12744_v57, %v2192_v42  ;;  %v9434_v42 = vld [vmem:[%s7611_s17 + $0x58] sm:$0xff] }
 0x394   : > { %12735 = vst [vmem:[#allocation191_spill] sm:$0xff] %v9379_v43  ;;  %v1902_v55 = vadd.f32 %v1880_v22, %v8759_v23  ;;  %v2095_v43 = vmul.f32 %v12739_v59, %v1977_v0  ;;  %v9408_v5 = vsel %vm2664_vm3, %v2696_v50, %v3150_v24  ;;  %v9415_v0 = vld [vmem:[%s7611_s17 + $0x40] sm:$0xff] }
 0x395   : > { %v9394_v60 = vpop.permute.xlu1 %2854  ;;  %12741 = vst [vmem:[#allocation33_spill] sm:$0xff] %v9403_v34  ;;  %v12745_v59 = vld [vmem:[#allocation226_spill] sm:$0xff] }
 0x396   : > { %12737 = vst [vmem:[#allocation123_spill] sm:$0xff] %v9394_v60  ;;  %v2117_v23 = vadd.f32 %v2095_v43, %v1902_v55  ;;  %v2525_v22 = vmul.f32 %v12745_v59, %v2407_v27  ;;  %v9425_v55 = vsel %vm2664_vm3, %v2692_v53, %v2694_v12  ;;  %v9430_v43 = vld [vmem:[%s7611_s17 + $0x8] sm:$0xff]  ;;  %v9451_v53 = vld [vmem:[%s7611_s17 + $0x70] sm:$0xff] }
 0x397   : > { %12742 = vst [vmem:[#allocation208_spill] sm:$0xff] %v9408_v5  ;;  %v9459_v59 = vld [vmem:[%s7611_s17 + $0x10] sm:$0xff] }
 0x398   : > { %v2332_v46 = vadd.f32 %v2310_v40, %v2117_v23  ;;  %12747 = vst [vmem:[#allocation194_spill] sm:$0xff] %v9425_v55 }
 0x399   : > { %3035 = vrot.lane.b32.xlu1 %v9340_v39, %s6951_s19  ;;  %v9410_v15 = vpop.permute.xlu2 %3031 }
 0x39a   : > { %3164 = vrot.lane.b32.xlu0 %v9345_v30, %s6952_s29  ;;  %3235 = vperm.xlu2 %6788, %v9352_v62   ;;  %12743 = vst [vmem:[#allocation88_spill] sm:$0xff] %v9410_v15  ;;  %v9422_v50 = vadd.f32 %v2525_v22, %v2332_v46 }
 0x39c   : > { %v12163_v46 = vrot.slane %v9422_v50, 7 }
 0x39d   : > { %v9420_v60 = vpop.permute.xlu1 %3017 }
 0x39e   : > { %12746 = vst [vmem:[#allocation127_spill] sm:$0xff] %v9420_v60  ;;  %v9445_v12 = vsel %vm2664_vm3, %v3150_v24, %v12163_v46  ;;  %v12753_v24 = vmov 5   ;;  %v9467_v46 = vld [vmem:[%s7611_s17 + $0x20] sm:$0xff] }
 0x39f   : > { %12750 = vst [vmem:[#allocation185_spill] sm:$0xff] %v9445_v12 }
 0x3a1   : > { %3160 = vrot.lane.b32.xlu1 %v8894_v28, %s6952_s29  ;;  %v9437_v27 = vpop.permute.xlu2 %3142 }
 0x3a2   : > { %3170 = vrot.lane.b32.xlu0 %v9363_v17, %s6952_s29  ;;  %3247 = vperm.xlu2 %6788, %v9370_v61   ;;  %12748 = vst [vmem:[#allocation122_spill] sm:$0xff] %v9437_v27 }
 0x3a5   : > { %v9440_v23 = vpop.permute.xlu1 %3126 }
 0x3a6   : > { %12749 = vst [vmem:[#allocation48_spill] sm:$0xff] %v9440_v23  ;;  %v9474_v23 = vld [vmem:[%s7611_s17 + $0x38] sm:$0xff] }
 0x3a9   : > { %3166 = vrot.lane.b32.xlu1 %v9377_v47, %s6952_s29  ;;  %v9454_v57 = vpop.permute.xlu2 %3156 }
 0x3aa   : > { %3176 = vrot.lane.b32.xlu0 %v9384_v41, %s6952_s29  ;;  %3255 = vperm.xlu2 %6788, %v9391_v33   ;;  %12751 = vst [vmem:[#allocation94_spill] sm:$0xff] %v9454_v57 }
 0x3ad   : > { %v9456_v40 = vpop.permute.xlu1 %2860 }
 0x3ae   : > { %12752 = vst [vmem:[#allocation102_spill] sm:$0xff] %v9456_v40 }
 0x3b1   : > { %3172 = vrot.lane.b32.xlu1 %v9403_v34, %s6952_s29  ;;  %v9464_v22 = vpop.permute.xlu2 %3162 }
 0x3b2   : > { %3182 = vrot.lane.b32.xlu0 %v9408_v5, %s6952_s29  ;;  %3267 = vperm.xlu2 %6788, %v9415_v0   ;;  %12754 = vst [vmem:[#allocation95_spill] sm:$0xff] %v9464_v22  ;;  %v9483_v22 = vld [vmem:[%s7611_s17 + $0x50] sm:$0xff] }
 0x3b5   : > { %v9471_v27 = vpop.permute.xlu1 %3023 }
 0x3b6   : > { %12755 = vst [vmem:[#allocation189_spill] sm:$0xff] %v9471_v27  ;;  %v6895_v27 = vld [vmem:[%s12114_s6 + $0xa0] sm:$0xff] }
 0x3b9   : > { %3178 = vrot.lane.b32.xlu1 %v9425_v55, %s6952_s29  ;;  %v9477_v15 = vpop.permute.xlu2 %3168  ;;  %v9503_v55 = vpop.permute.xlu0 %1851 }
 0x3ba   : > { %3239 = vperm.xlu0 %6787, %v9430_v43   ;;  %3279 = vperm.xlu2 %6788, %v9434_v42   ;;  %12756 = vst [vmem:[#allocation84_spill] sm:$0xff] %v9477_v15  ;;  %v9495_v15 = vld [vmem:[%s7611_s17 + $0x68] sm:$0xff] }
 0x3bd   : > { %v9480_v40 = vpop.permute.xlu1 %3138 }
 0x3be   : > { %12757 = vst [vmem:[#allocation10_spill] sm:$0xff] %v9480_v40 }
 0x3c1   : > { %3184 = vrot.lane.b32.xlu1 %v9445_v12, %s6952_s29  ;;  %v9490_v60 = vpop.permute.xlu2 %3174  ;;  %s6955_s29 = smov 116  }
 0x3c2   : > { %3259 = vperm.xlu0 %6787, %v8964_v49   ;;  %3291 = vperm.xlu2 %6788, %v9451_v53   ;;  %12758 = vst [vmem:[#allocation147_spill] sm:$0xff] %v9490_v60  ;;  %v9509_v60 = vpop.permute.xlu0 %3158 }
 0x3c3   : > { %12763 = vst [vmem:[#allocation193_spill] sm:$0xff] %v9509_v60 }
 0x3c5   : > { %v9492_v57 = vpop.permute.xlu1 %2866 }
 0x3c6   : > { %12759 = vst [vmem:[#allocation92_spill] sm:$0xff] %v9492_v57 }
 0x3c9   : > { %3243 = vperm.xlu1 %6789, %v9459_v59  }
 0x3ca   : > { %3271 = vperm.xlu0 %6787, %v9044_v18   ;;  %6791 = vset.pattern.permute.xlu2 %v12753_v24 }
 0x3cd   : > { %v9500_v12 = vpop.permute.xlu1 %3029 }
 0x3ce   : > { %12761 = vst [vmem:[#allocation23_spill] sm:$0xff] %v9500_v12 }
 0x3d1   : > { %3251 = vperm.xlu1 %6789, %v9467_v46  }
 0x3d2   : > { %3283 = vperm.xlu0 %6787, %v9104_v8  }
 0x3d9   : > { %3263 = vperm.xlu1 %6789, %v9474_v23  }
 0x3da   : > { %3295 = vperm.xlu0 %6787, %v9149_v6  }
 0x3e1   : > { %3275 = vperm.xlu1 %6789, %v9483_v22  }
 0x3e2   : > { %6790 = vset.pattern.permute.xlu0 %v12753_v24 }
 0x3e3   : > { %2070 = vperm.xlu0 %6790, %v6895_v27   ;;  %v9507_v27 = vpop.permute.xlu1 %3154 }
 0x3e4   : > { %12762 = vst [vmem:[#allocation129_spill] sm:$0xff] %v9507_v27 }
 0x3e9   : > { %3287 = vperm.xlu1 %6789, %v9495_v15  }
 0x3ec   : > { %v9498_v40 = vpop.permute.xlu2 %3180 }
 0x3ed   : > { %12760 = vst [vmem:[#allocation131_spill] sm:$0xff] %v9498_v40 }
 0x3f1   : > { %6792 = vset.pattern.permute.xlu1 %v12753_v24 }
 0x3f4   : > { %v3236_v36 = vpop.permute.xlu2 %3235 }
 0x3f5   : > { %v3298_v34 = vmul.f32 %v3236_v36, %v8805_v32 }
 0x3f7   : > { %3330 = vrot.lane.b32.xlu1 %v3298_v34, %s6953_s28 }
 0x3fc   : > { %v3248_v57 = vpop.permute.xlu2 %3247 }
 0x3fd   : > { %v3301_v5 = vmul.f32 %v3248_v57, %v8880_v51 }
 0x3ff   : > { %3336 = vrot.lane.b32.xlu1 %v3301_v5, %s6953_s28 }
 0x403   : > { %v9513_v40 = vpop.permute.xlu1 %2872 }
 0x404   : > { %12764 = vst [vmem:[#allocation22_spill] sm:$0xff] %v9513_v40  ;;  %v9515_v24 = vpop.permute.xlu0 %3033 }
 0x405   : > { %12765 = vst [vmem:[#allocation136_spill] sm:$0xff] %v9515_v24 }
 0x40b   : > { %v9517_v12 = vpop.permute.xlu1 %3035 }
 0x40c   : > { %12766 = vst [vmem:[#allocation65_spill] sm:$0xff] %v9517_v12  ;;  %v9519_v47 = vpop.permute.xlu0 %3164 }
 0x40d   : > { %12767 = vst [vmem:[#allocation63_spill] sm:$0xff] %v9519_v47 }
 0x413   : > { %v9521_v32 = vpop.permute.xlu1 %3160 }
 0x414   : > { %12768 = vst [vmem:[#allocation195_spill] sm:$0xff] %v9521_v32  ;;  %v9523_v34 = vpop.permute.xlu0 %3170 }
 0x415   : > { %12769 = vst [vmem:[#allocation242_spill] sm:$0xff] %v9523_v34 }
 0x41b   : > { %v9525_v36 = vpop.permute.xlu1 %3166 }
 0x41c   : > { %12770 = vst [vmem:[#allocation196_spill] sm:$0xff] %v9525_v36  ;;  %v9527_v27 = vpop.permute.xlu0 %3176  ;;  %v3256_v36 = vpop.permute.xlu2 %3255 }
 0x41d   : > { %12771 = vst [vmem:[#allocation180_spill] sm:$0xff] %v9527_v27 }
 0x423   : > { %v9529_v60 = vpop.permute.xlu1 %3172 }
 0x424   : > { %12772 = vst [vmem:[#allocation105_spill] sm:$0xff] %v9529_v60  ;;  %v9531_v57 = vpop.permute.xlu0 %3182 }
 0x425   : > { %12773 = vst [vmem:[#allocation15_spill] sm:$0xff] %v9531_v57 }
 0x42b   : > { %v9533_v5 = vpop.permute.xlu1 %3178 }
 0x42c   : > { %12774 = vst [vmem:[#allocation228_spill] sm:$0xff] %v9533_v5  ;;  %v3240_v40 = vpop.permute.xlu0 %3239 }
 0x42d   : > { %v3299_v24 = vmul.f32 %v3240_v40, %v8853_v10  ;;  %v3303_v40 = vmul.f32 %v3256_v36, %v8951_v31 }
 0x42f   : > { %3332 = vrot.lane.b32.xlu2 %v3299_v24, %s6953_s28 }
 0x433   : > { %v9537_v12 = vpop.permute.xlu1 %3184 }
 0x434   : > { %12775 = vst [vmem:[#allocation137_spill] sm:$0xff] %v9537_v12  ;;  %v3260_v32 = vpop.permute.xlu0 %3259 }
 0x435   : > { %v3304_v34 = vmul.f32 %v3260_v32, %v8990_v1  ;;  %v3268_v32 = vpop.permute.xlu2 %3267 }
 0x437   : > { %3342 = vrot.lane.b32.xlu1 %v3304_v34, %s6953_s28 }
 0x43b   : > { %v3244_v27 = vpop.permute.xlu1 %3243 }
 0x43c   : > { %v3300_v60 = vmul.f32 %v3244_v27, %v8868_v2  ;;  %v3272_v47 = vpop.permute.xlu0 %3271 }
 0x43d   : > { %v3307_v57 = vmul.f32 %v3272_v47, %v9065_v44 }
 0x43e   : > { %3334 = vrot.lane.b32.xlu0 %v3300_v60, %s6953_s28  ;;  %v3306_v60 = vmul.f32 %v3268_v32, %v9031_v25 }
 0x43f   : > { %3348 = vrot.lane.b32.xlu1 %v3307_v57, %s6953_s28 }
 0x443   : > { %v3252_v10 = vpop.permute.xlu1 %3251 }
 0x444   : > { %v3302_v24 = vmul.f32 %v3252_v10, %v8934_v58  ;;  %v3284_v12 = vpop.permute.xlu0 %3283  ;;  %v3280_v10 = vpop.permute.xlu2 %3279 }
 0x445   : > { %v3310_v34 = vmul.f32 %v3284_v12, %v9120_v52 }
 0x446   : > { %3340 = vrot.lane.b32.xlu0 %v3303_v40, %s6953_s28  ;;  %3338 = vrot.lane.b32.xlu2 %v3302_v24, %s6953_s28  ;;  %v3309_v40 = vmul.f32 %v3280_v10, %v9097_v4  ;;  %v1980_v10 = vpop.f32.mrf.mxu3 }
 0x447   : > { %3354 = vrot.lane.b32.xlu1 %v3310_v34, %s6953_s28 }
 0x44b   : > { %v3264_v47 = vpop.permute.xlu1 %3263 }
 0x44c   : > { %v3305_v27 = vmul.f32 %v3264_v47, %v9014_v38  ;;  %v3296_v57 = vpop.permute.xlu0 %3295  ;;  %v3292_v32 = vpop.permute.xlu2 %3291 }
 0x44d   : > { %v3313_v36 = vmul.f32 %v3296_v57, %v9422_v50  ;;  %v3312_v47 = vmul.f32 %v3292_v32, %v9325_v3  ;;  %v1765_v57 = vpop.f32.mrf.mxu2 }
 0x44e   : > { %3346 = vrot.lane.b32.xlu0 %v3306_v60, %s6953_s28  ;;  %3344 = vrot.lane.b32.xlu2 %v3305_v27, %s6953_s28  ;;  %v12776_v27 = vmov 6  }
 0x44f   : > { %3360 = vrot.lane.b32.xlu1 %v3313_v36, %s6953_s28  ;;  %v1881_v36 = vmul.f32 %v9503_v55, %v1765_v57 }
 0x453   : > { %v3276_v12 = vpop.permute.xlu1 %3275 }
 0x454   : > { %v3308_v24 = vmul.f32 %v3276_v12, %v9083_v63  ;;  %v12777_v12 = vld [vmem:[#allocation234_spill] sm:$0xff] }
 0x456   : > { %3352 = vrot.lane.b32.xlu0 %v3309_v40, %s6953_s28  ;;  %3350 = vrot.lane.b32.xlu2 %v3308_v24, %s6953_s28  ;;  %v1903_v40 = vadd.f32 %v1881_v36, %v12777_v12  ;;  %v12778_v24 = vld [vmem:[#allocation163_spill] sm:$0xff]  ;;  %v2410_v36 = vpop.f32.mrf.mxu1  ;;  %v12782_v12 = vld [vmem:[#allocation80_spill] sm:$0xff] }
 0x457   : > { %3403 = vperm.xlu1 %6792, %v9459_v59   ;;  %v2096_v32 = vmul.f32 %v12778_v24, %v1980_v10 }
 0x45b   : > { %v3288_v34 = vpop.permute.xlu1 %3287 }
 0x45c   : > { %v3311_v60 = vmul.f32 %v3288_v34, %v9308_v37  ;;  %v2195_v34 = vpop.f32.mrf.mxu0 }
 0x45e   : > { %3358 = vrot.lane.b32.xlu0 %v3312_v47, %s6953_s28  ;;  %3356 = vrot.lane.b32.xlu2 %v3311_v60, %s6953_s28  ;;  %v2118_v47 = vadd.f32 %v2096_v32, %v1903_v40  ;;  %v12780_v60 = vld [vmem:[#allocation209_spill] sm:$0xff]  ;;  %v2526_v40 = vmul.f32 %v12782_v12, %v2410_v36 }
 0x45f   : > { %3411 = vperm.xlu1 %6792, %v9467_v46   ;;  %v2311_v57 = vmul.f32 %v12780_v60, %v2195_v34 }
 0x461   : > { %v2333_v10 = vadd.f32 %v2311_v57, %v2118_v47  ;;  %v3459_v47 = vrot.slane %v9422_v50, 1  ;;  %v9633_v57 = vpop.permute.xlu0 %2070 }
 0x463   : > { %v9608_v24 = vadd.f32 %v2526_v40, %v2333_v10 }
 0x465   : > { %v12175_v34 = vrot.slane %v9608_v24, 1 }
 0x466   : > { %3399 = vperm.xlu0 %6790, %v9430_v43   ;;  %3395 = vperm.xlu2 %6791, %v9352_v62  }
 0x467   : > { %3423 = vperm.xlu1 %6792, %v9474_v23   ;;  %v9627_v60 = vsel %vm2971_vm4, %v3459_v47, %v12175_v34 }
 0x468   : > { %12785 = vst [vmem:[#allocation109_spill] sm:$0xff] %v9627_v60 }
 0x469   : > { %v9597_v55 = vpop.permute.xlu1 %3330 }
 0x46a   : > { %12779 = vst [vmem:[#allocation149_spill] sm:$0xff] %v9597_v55 }
 0x46e   : > { %3419 = vperm.xlu0 %6790, %v8964_v49   ;;  %3407 = vperm.xlu2 %6791, %v9370_v61  }
 0x46f   : > { %3435 = vperm.xlu1 %6792, %v9483_v22  }
 0x471   : > { %v9618_v32 = vpop.permute.xlu1 %3336 }
 0x472   : > { %12784 = vst [vmem:[#allocation168_spill] sm:$0xff] %v9618_v32 }
 0x476   : > { %3431 = vperm.xlu0 %6790, %v9044_v18   ;;  %3415 = vperm.xlu2 %6791, %v9391_v33  }
 0x477   : > { %3447 = vperm.xlu1 %6792, %v9495_v15  }
 0x47e   : > { %3443 = vperm.xlu0 %6790, %v9104_v8   ;;  %3427 = vperm.xlu2 %6791, %v9415_v0  }
 0x47f   : > { %3463 = vrot.lane.b32.xlu1 %v8914_v29, %s6954_s23  ;;  %v6897_v29 = vld [vmem:[%s12114_s6 + $0xa8] sm:$0xff] }
 0x480   : > { %6795 = vset.pattern.permute.xlu1 %v12776_v27 }
 0x486   : > { %3455 = vperm.xlu0 %6790, %v9149_v6   ;;  %3439 = vperm.xlu2 %6791, %v9434_v42  }
 0x487   : > { %3469 = vrot.lane.b32.xlu1 %v8995_v56, %s6954_s23 }
 0x48e   : > { %6793 = vset.pattern.permute.xlu0 %v12776_v27  ;;  %3451 = vperm.xlu2 %6791, %v9451_v53  }
 0x48f   : > { %3475 = vrot.lane.b32.xlu1 %v9070_v7, %s6954_s23  ;;  %2289 = vperm.xlu0 %6793, %v6897_v29   ;;  %v9604_v29 = vpop.permute.xlu2 %3332 }
 0x490   : > { %12781 = vst [vmem:[#allocation98_spill] sm:$0xff] %v9604_v29 }
 0x496   : > { %3465 = vrot.lane.b32.xlu2 %v8899_v20, %s6954_s23 }
 0x497   : > { %3481 = vrot.lane.b32.xlu1 %v9123_v48, %s6954_s23  ;;  %3467 = vrot.lane.b32.xlu0 %v8939_v35, %s6954_s23  ;;  %v1768_v48 = vpop.f32.mrf.mxu2 }
 0x498   : > { %6794 = vset.pattern.permute.xlu2 %v12776_v27  ;;  %v12791_v27 = vrot.slane %v9325_v3, 1 }
 0x49a   : > { %v9655_v5 = vsel %vm2971_vm4, %v12791_v27, %v3459_v47 }
 0x49b   : > { %12792 = vst [vmem:[#allocation164_spill] sm:$0xff] %v9655_v5 }
 0x49e   : > { %3471 = vrot.lane.b32.xlu2 %v8980_v54, %s6954_s23 }
 0x49f   : > { %3487 = vrot.lane.b32.xlu1 %v9320_v19, %s6954_s23  ;;  %3473 = vrot.lane.b32.xlu0 %v9019_v16, %s6954_s23  ;;  %v12820_v19 = vld [vmem:[#allocation99_spill] sm:$0xff] }
 0x4a0   : > { %v9616_v20 = vpop.permute.xlu2 %3338 }
 0x4a1   : > { %12783 = vst [vmem:[#allocation114_spill] sm:$0xff] %v9616_v20  ;;  %v12812_v20 = vld [vmem:[#allocation47_spill] sm:$0xff] }
 0x4a6   : > { %3477 = vrot.lane.b32.xlu2 %v9058_v45, %s6954_s23 }
 0x4a7   : > { %3493 = vrot.lane.b32.xlu1 %v9627_v60, %s6954_s23  ;;  %3479 = vrot.lane.b32.xlu0 %v9086_v9, %s6954_s23  ;;  %v12819_v60 = vld [vmem:[#allocation238_spill] sm:$0xff] }
 0x4a8   : > { %v9635_v36 = vpop.permute.xlu2 %3344 }
 0x4a9   : > { %12786 = vst [vmem:[#allocation5_spill] sm:$0xff] %v9635_v36  ;;  %v9637_v10 = vpop.permute.xlu1 %3342 }
 0x4aa   : > { %12787 = vst [vmem:[#allocation140_spill] sm:$0xff] %v9637_v10 }
 0x4ae   : > { %3483 = vrot.lane.b32.xlu2 %v9113_v14, %s6954_s23 }
 0x4af   : > { %3552 = vperm.xlu1 %6795, %v9459_v59   ;;  %3485 = vrot.lane.b32.xlu0 %v9143_v11, %s6954_s23 }
 0x4b0   : > { %v9644_v12 = vpop.permute.xlu0 %3334  ;;  %v9646_v40 = vpop.permute.xlu2 %3350 }
 0x4b1   : > { %12788 = vst [vmem:[#allocation51_spill] sm:$0xff] %v9644_v12  ;;  %v9648_v34 = vpop.permute.xlu1 %3348 }
 0x4b2   : > { %12789 = vst [vmem:[#allocation200_spill] sm:$0xff] %v9646_v40 }
 0x4b3   : > { %12790 = vst [vmem:[#allocation100_spill] sm:$0xff] %v9648_v34 }
 0x4b6   : > { %3489 = vrot.lane.b32.xlu2 %v9340_v39, %s6954_s23 }
 0x4b7   : > { %3560 = vperm.xlu1 %6795, %v9467_v46   ;;  %3491 = vrot.lane.b32.xlu0 %v9655_v5, %s6954_s23  ;;  %s436_s23 = scalar_lea.vmem %s12109_s1, %s6307_s27 }
 0x4b8   : > { %v9660_v10 = vpop.permute.xlu0 %3340  ;;  %v9662_v32 = vpop.permute.xlu2 %3356 }
 0x4b9   : > { %12793 = vst [vmem:[#allocation141_spill] sm:$0xff] %v9660_v10  ;;  %v9664_v40 = vpop.permute.xlu1 %3354 }
 0x4ba   : > { %12794 = vst [vmem:[#allocation37_spill] sm:$0xff] %v9662_v32 }
 0x4bb   : > { %12795 = vst [vmem:[#allocation240_spill] sm:$0xff] %v9664_v40 }
 0x4be   : > { %3544 = vperm.xlu2 %6794, %v9352_v62  }
 0x4bf   : > { %3572 = vperm.xlu1 %6795, %v9474_v23   ;;  %3548 = vperm.xlu0 %6793, %v9430_v43  }
 0x4c0   : > { %v9669_v34 = vpop.permute.xlu0 %3346  ;;  %v9671_v27 = vpop.permute.xlu2 %3395 }
 0x4c1   : > { %12796 = vst [vmem:[#allocation104_spill] sm:$0xff] %v9669_v34  ;;  %v9673_v47 = vpop.permute.xlu1 %3360 }
 0x4c2   : > { %12797 = vst [vmem:[#allocation113_spill] sm:$0xff] %v9671_v27  ;;  %v12811_v27 = vld [vmem:[#allocation218_spill] sm:$0xff] }
 0x4c3   : > { %12798 = vst [vmem:[#allocation101_spill] sm:$0xff] %v9673_v47 }
 0x4c6   : > { %3556 = vperm.xlu2 %6794, %v9370_v61  }
 0x4c7   : > { %3584 = vperm.xlu1 %6795, %v9483_v22   ;;  %3568 = vperm.xlu0 %6793, %v8964_v49  }
 0x4c8   : > { %v9678_v32 = vpop.permute.xlu0 %3352  ;;  %v9680_v40 = vpop.permute.xlu2 %3407 }
 0x4c9   : > { %12799 = vst [vmem:[#allocation145_spill] sm:$0xff] %v9678_v32  ;;  %v9682_v10 = vpop.permute.xlu1 %3403 }
 0x4ca   : > { %12800 = vst [vmem:[#allocation199_spill] sm:$0xff] %v9680_v40  ;;  %v12807_v40 = vmov 7  }
 0x4cb   : > { %12801 = vst [vmem:[#allocation42_spill] sm:$0xff] %v9682_v10 }
 0x4ce   : > { %3564 = vperm.xlu2 %6794, %v9391_v33  }
 0x4cf   : > { %3596 = vperm.xlu1 %6795, %v9495_v15   ;;  %3580 = vperm.xlu0 %6793, %v9044_v18  }
 0x4d0   : > { %v9687_v34 = vpop.permute.xlu0 %3358  ;;  %v9689_v47 = vpop.permute.xlu2 %3415 }
 0x4d1   : > { %12802 = vst [vmem:[#allocation212_spill] sm:$0xff] %v9687_v34  ;;  %v9691_v36 = vpop.permute.xlu1 %3411  ;;  %v12809_v34 = vld [vmem:[#allocation150_spill] sm:$0xff] }
 0x4d2   : > { %12803 = vst [vmem:[#allocation203_spill] sm:$0xff] %v9689_v47  ;;  %v12810_v47 = vld [vmem:[#allocation14_spill] sm:$0xff] }
 0x4d3   : > { %12804 = vst [vmem:[#allocation87_spill] sm:$0xff] %v9691_v36  ;;  %v892_v55 = vmul.f32 %v12810_v47, %v12809_v34  ;;  %v1237_v36 = vmul.f32 %v12812_v20, %v12811_v27  ;;  %v12818_v34 = vld [vmem:[#allocation210_spill] sm:$0xff] }
 0x4d6   : > { %3576 = vperm.xlu2 %6794, %v9415_v0  }
 0x4d7   : > { %3612 = vrot.lane.b32.xlu1 %v9201_v26, %s6955_s29  ;;  %3592 = vperm.xlu0 %6793, %v9104_v8  }
 0x4d8   : > { %v9697_v49 = vpop.permute.xlu0 %3399  ;;  %v9699_v32 = vpop.permute.xlu2 %3427  ;;  %6798 = vset.pattern.permute.xlu1 %v12807_v40 }
 0x4d9   : > { %12805 = vst [vmem:[#allocation13_spill] sm:$0xff] %v9697_v49  ;;  %v9702_v18 = vpop.permute.xlu1 %3423  ;;  %v12817_v49 = vld [vmem:[#allocation220_spill] sm:$0xff] }
 0x4da   : > { %12806 = vst [vmem:[#allocation152_spill] sm:$0xff] %v9699_v32  ;;  %v1452_v47 = vmul.f32 %v12818_v34, %v12817_v49 }
 0x4db   : > { %12808 = vst [vmem:[#allocation217_spill] sm:$0xff] %v9702_v18  ;;  %v12816_v18 = vld [vmem:[#allocation60_spill] sm:$0xff] }
 0x4dc   : > { %v1041_v29 = vadd.f32 %v12816_v18, %v892_v55  ;;  %v2198_v18 = vpop.f32.mrf.mxu0 }
 0x4de   : > { %3588 = vperm.xlu2 %6794, %v9434_v42   ;;  %v1259_v26 = vadd.f32 %v1237_v36, %v1041_v29  ;;  %v1983_v29 = vpop.f32.mrf.mxu3 }
 0x4df   : > { %3618 = vrot.lane.b32.xlu1 %v9345_v30, %s6955_s29  ;;  %3604 = vperm.xlu0 %6793, %v9149_v6   ;;  %v1667_v30 = vmul.f32 %v12820_v19, %v12819_v60  ;;  %v2097_v60 = vmul.f32 %v9633_v57, %v1983_v29  ;;  %v12828_v29 = vld [vmem:[#allocation241_spill] sm:$0xff] }
 0x4e0   : > { %v9712_v12 = vpop.permute.xlu0 %3419  ;;  %v9714_v32 = vpop.permute.xlu2 %3439  ;;  %v1474_v5 = vadd.f32 %v1452_v47, %v1259_v26  ;;  %v12824_v26 = vld [vmem:[#allocation148_spill] sm:$0xff] }
 0x4e1   : > { %12813 = vst [vmem:[#allocation146_spill] sm:$0xff] %v9712_v12  ;;  %v9716_v10 = vpop.permute.xlu1 %3435  ;;  %v1882_v19 = vmul.f32 %v12824_v26, %v1768_v48  ;;  %v2413_v48 = vpop.f32.mrf.mxu1 }
 0x4e2   : > { %12814 = vst [vmem:[#allocation25_spill] sm:$0xff] %v9714_v32  ;;  %v1689_v20 = vadd.f32 %v1667_v30, %v1474_v5  ;;  %v12825_v30 = vld [vmem:[#allocation197_spill] sm:$0xff]  ;;  %v2527_v26 = vmul.f32 %v12828_v29, %v2413_v48  ;;  %v12836_v29 = vld [vmem:[#allocation222_spill] sm:$0xff] }
 0x4e3   : > { %12815 = vst [vmem:[#allocation198_spill] sm:$0xff] %v9716_v10  ;;  %v2312_v5 = vmul.f32 %v12825_v30, %v2198_v18  ;;  %v12831_v18 = vld [vmem:[#allocation86_spill] sm:$0xff]  ;;  %v12835_v48 = vld [vmem:[#allocation33_spill] sm:$0xff] }
 0x4e4   : > { %v1904_v49 = vadd.f32 %v1882_v19, %v1689_v20  ;;  %v12839_v32 = vld [vmem:[#allocation194_spill] sm:$0xff] }
 0x4e6   : > { %3600 = vperm.xlu2 %6794, %v9451_v53   ;;  %v2119_v34 = vadd.f32 %v2097_v60, %v1904_v49  ;;  %v12829_v60 = vld [vmem:[#allocation38_spill] sm:$0xff]  ;;  %v12830_v49 = vld [vmem:[#allocation208_spill] sm:$0xff] }
 0x4e7   : > { %3624 = vrot.lane.b32.xlu1 %v9363_v17, %s6955_s29  ;;  %3616 = vrot.lane.b32.xlu0 %v9178_v13, %s6955_s29 }
 0x4e8   : > { %v9728_v27 = vpop.permute.xlu0 %3431  ;;  %v9730_v55 = vpop.permute.xlu2 %3451  ;;  %6797 = vset.pattern.permute.xlu0 %v12807_v40  ;;  %v2334_v20 = vadd.f32 %v2312_v5, %v2119_v34  ;;  %v3608_v5 = vrot.slane %v9608_v24, 7 }
 0x4e9   : > { %12821 = vst [vmem:[#allocation134_spill] sm:$0xff] %v9728_v27  ;;  %v9733_v36 = vpop.permute.xlu1 %3447  ;;  %v12840_v27 = vrot.slane %v9422_v50, 7 }
 0x4ea   : > { %12822 = vst [vmem:[#allocation24_spill] sm:$0xff] %v9730_v55  ;;  %v9752_v19 = vadd.f32 %v2527_v26, %v2334_v20 }
 0x4eb   : > { %12823 = vst [vmem:[#allocation151_spill] sm:$0xff] %v9733_v36  ;;  %v3609_v36 = vsel %vm2664_vm3, %v12840_v27, %v3608_v5 }
 0x4ec   : > { %v3610_v34 = vrot.slane %v9752_v19, 7 }
 0x4ee   : > { %3614 = vrot.lane.b32.xlu2 %v8894_v28, %s6955_s29  ;;  %v3611_v20 = vsel %vm2664_vm3, %v3608_v5, %v3610_v34 }
 0x4ef   : > { %3630 = vrot.lane.b32.xlu1 %v9384_v41, %s6955_s29  ;;  %3622 = vrot.lane.b32.xlu0 %v9196_v21, %s6955_s29 }
 0x4f0   : > { %v9744_v47 = vpop.permute.xlu0 %3443  ;;  %v9746_v55 = vpop.permute.xlu2 %3465  ;;  %6796 = vset.pattern.permute.xlu2 %v12807_v40 }
 0x4f1   : > { %12826 = vst [vmem:[#allocation69_spill] sm:$0xff] %v9744_v47  ;;  %v9749_v57 = vpop.permute.xlu1 %3463 }
 0x4f2   : > { %12827 = vst [vmem:[#allocation66_spill] sm:$0xff] %v9749_v57 }
 0x4f6   : > { %3620 = vrot.lane.b32.xlu2 %v12829_v60, %s6955_s29 }
 0x4f7   : > { %3636 = vrot.lane.b32.xlu1 %v12830_v49, %s6955_s29  ;;  %3628 = vrot.lane.b32.xlu0 %v12831_v18, %s6955_s29 }
 0x4f8   : > { %v9760_v30 = vpop.permute.xlu0 %3455  ;;  %v9762_v40 = vpop.permute.xlu2 %3471 }
 0x4f9   : > { %12832 = vst [vmem:[#allocation207_spill] sm:$0xff] %v9760_v30  ;;  %v9764_v47 = vpop.permute.xlu1 %3469 }
 0x4fa   : > { %12833 = vst [vmem:[#allocation184_spill] sm:$0xff] %v9762_v40 }
 0x4fb   : > { %12834 = vst [vmem:[#allocation117_spill] sm:$0xff] %v9764_v47 }
 0x4fe   : > { %3626 = vrot.lane.b32.xlu2 %v12835_v48, %s6955_s29 }
 0x4ff   : > { %3642 = vrot.lane.b32.xlu1 %v3611_v20, %s6955_s29  ;;  %3634 = vrot.lane.b32.xlu0 %v12836_v29, %s6955_s29 }
 0x500   : > { %v9774_v26 = vpop.permute.xlu2 %3477 }
 0x501   : > { %12837 = vst [vmem:[#allocation17_spill] sm:$0xff] %v9774_v26  ;;  %v9776_v49 = vpop.permute.xlu0 %2289  ;;  %v9778_v30 = vpop.permute.xlu1 %3475 }
 0x502   : > { %12838 = vst [vmem:[#allocation233_spill] sm:$0xff] %v9778_v30  ;;  %v12844_v30 = vld [vmem:[#allocation185_spill] sm:$0xff] }
 0x506   : > { %3632 = vrot.lane.b32.xlu2 %v12839_v32, %s6955_s29 }
 0x507   : > { %3701 = vperm.xlu1 %6798, %v9459_v59   ;;  %3640 = vrot.lane.b32.xlu0 %v3609_v36, %s6955_s29  ;;  %v9806_v36 = vld [vmem:[%s7611_s17 + $0x30] sm:$0xff] }
 0x508   : > { %v9787_v34 = vpop.permute.xlu2 %3483 }
 0x509   : > { %12841 = vst [vmem:[#allocation153_spill] sm:$0xff] %v9787_v34  ;;  %v9789_v20 = vpop.permute.xlu0 %3467  ;;  %v9791_v12 = vpop.permute.xlu1 %3481 }
 0x50a   : > { %12842 = vst [vmem:[#allocation154_spill] sm:$0xff] %v9789_v20 }
 0x50b   : > { %12843 = vst [vmem:[#allocation224_spill] sm:$0xff] %v9791_v12 }
 0x50e   : > { %3638 = vrot.lane.b32.xlu2 %v12844_v30, %s6955_s29 }
 0x50f   : > { %3709 = vperm.xlu1 %6798, %v9467_v46   ;;  %3697 = vperm.xlu0 %6797, %v9430_v43  }
 0x510   : > { %v9797_v10 = vpop.permute.xlu2 %3489 }
 0x511   : > { %12845 = vst [vmem:[#allocation119_spill] sm:$0xff] %v9797_v10  ;;  %v9799_v27 = vpop.permute.xlu0 %3473  ;;  %v9801_v5 = vpop.permute.xlu1 %3487  ;;  %v9818_v10 = vld [vmem:[%s7611_s17 + $0x48] sm:$0xff] }
 0x512   : > { %12846 = vst [vmem:[#allocation173_spill] sm:$0xff] %v9799_v27 }
 0x513   : > { %12847 = vst [vmem:[#allocation121_spill] sm:$0xff] %v9801_v5 }
 0x516   : > { %3693 = vperm.xlu2 %6796, %v9352_v62  }
 0x517   : > { %3721 = vperm.xlu1 %6798, %v9474_v23   ;;  %3717 = vperm.xlu0 %6797, %v9806_v36  }
 0x518   : > { %v9809_v12 = vpop.permute.xlu2 %3544 }
 0x519   : > { %12848 = vst [vmem:[#allocation8_spill] sm:$0xff] %v9809_v12  ;;  %v9811_v30 = vpop.permute.xlu0 %3479  ;;  %v9813_v34 = vpop.permute.xlu1 %3493 }
 0x51a   : > { %12849 = vst [vmem:[#allocation157_spill] sm:$0xff] %v9811_v30 }
 0x51b   : > { %12850 = vst [vmem:[#allocation56_spill] sm:$0xff] %v9813_v34 }
 0x51e   : > { %3705 = vperm.xlu2 %6796, %v9370_v61  }
 0x51f   : > { %3733 = vperm.xlu1 %6798, %v9483_v22   ;;  %3729 = vperm.xlu0 %6797, %v9818_v10  }
 0x520   : > { %v9821_v5 = vpop.permute.xlu2 %3556 }
 0x521   : > { %12851 = vst [vmem:[#allocation211_spill] sm:$0xff] %v9821_v5  ;;  %v9823_v27 = vpop.permute.xlu0 %3485  ;;  %v9825_v47 = vpop.permute.xlu1 %3552 }
 0x522   : > { %12852 = vst [vmem:[#allocation103_spill] sm:$0xff] %v9823_v27 }
 0x523   : > { %12853 = vst [vmem:[#allocation167_spill] sm:$0xff] %v9825_v47 }
 0x526   : > { %3713 = vperm.xlu2 %6796, %v9391_v33  }
 0x527   : > { %3745 = vperm.xlu1 %6798, %v9495_v15   ;;  %3741 = vperm.xlu0 %6797, %v9104_v8  }
 0x528   : > { %v9830_v34 = vpop.permute.xlu2 %3564 }
 0x529   : > { %12854 = vst [vmem:[#allocation159_spill] sm:$0xff] %v9830_v34  ;;  %v9832_v30 = vpop.permute.xlu0 %3491  ;;  %v9834_v29 = vpop.permute.xlu1 %3560 }
 0x52a   : > { %12855 = vst [vmem:[#allocation40_spill] sm:$0xff] %v9832_v30 }
 0x52b   : > { %12856 = vst [vmem:[#allocation31_spill] sm:$0xff] %v9834_v29 }
 0x52e   : > { %3725 = vperm.xlu2 %6796, %v9415_v0  }
 0x52f   : > { %3753 = vperm.xlu0 %6797, %v9149_v6  }
 0x530   : > { %v9838_v5 = vpop.permute.xlu2 %3576 }
 0x531   : > { %12857 = vst [vmem:[#allocation162_spill] sm:$0xff] %v9838_v5  ;;  %v9840_v27 = vpop.permute.xlu0 %3548  ;;  %v9842_v12 = vpop.permute.xlu1 %3572 }
 0x532   : > { %12858 = vst [vmem:[#allocation202_spill] sm:$0xff] %v9842_v12 }
 0x536   : > { %3737 = vperm.xlu2 %6796, %v9434_v42  }
 0x538   : > { %v9845_v26 = vpop.permute.xlu2 %3588 }
 0x539   : > { %12859 = vst [vmem:[#allocation45_spill] sm:$0xff] %v9845_v26  ;;  %v9847_v8 = vpop.permute.xlu0 %3568  ;;  %v9849_v34 = vpop.permute.xlu1 %3584 }
 0x53a   : > { %12860 = vst [vmem:[#allocation215_spill] sm:$0xff] %v9847_v8 }
 0x53b   : > { %12861 = vst [vmem:[#allocation214_spill] sm:$0xff] %v9849_v34 }
 0x53e   : > { %3749 = vperm.xlu2 %6796, %v9451_v53  }
 0x540   : > { %v9852_v30 = vpop.permute.xlu2 %3600 }
 0x541   : > { %12862 = vst [vmem:[#allocation89_spill] sm:$0xff] %v9852_v30  ;;  %v9854_v57 = vpop.permute.xlu0 %3580  ;;  %v9856_v6 = vpop.permute.xlu1 %3596 }
 0x542   : > { %12863 = vst [vmem:[#allocation16_spill] sm:$0xff] %v9854_v57 }
 0x543   : > { %12864 = vst [vmem:[#allocation156_spill] sm:$0xff] %v9856_v6 }
 0x548   : > { %v9858_v5 = vpop.permute.xlu2 %3614 }
 0x549   : > { %v9860_v29 = vpop.permute.xlu0 %3592  ;;  %v9862_v12 = vpop.permute.xlu1 %3612 }
 0x54a   : > { %12865 = vst [vmem:[#allocation201_spill] sm:$0xff] %v9860_v29 }
 0x54b   : > { %12866 = vst [vmem:[#allocation139_spill] sm:$0xff] %v9862_v12 }
 0x550   : > { %v9864_v47 = vpop.permute.xlu2 %3620 }
 0x551   : > { %12867 = vst [vmem:[#allocation27_spill] sm:$0xff] %v9864_v47  ;;  %v9866_v26 = vpop.permute.xlu0 %3604  ;;  %v9868_v8 = vpop.permute.xlu1 %3618 }
 0x552   : > { %12868 = vst [vmem:[#allocation71_spill] sm:$0xff] %v9866_v26 }
 0x553   : > { %12869 = vst [vmem:[#allocation186_spill] sm:$0xff] %v9868_v8 }
 0x558   : > { %v9870_v34 = vpop.permute.xlu2 %3626 }
 0x559   : > { %12870 = vst [vmem:[#allocation64_spill] sm:$0xff] %v9870_v34  ;;  %v9872_v40 = vpop.permute.xlu0 %3616  ;;  %v9874_v30 = vpop.permute.xlu1 %3624 }
 0x55a   : > { %12871 = vst [vmem:[#allocation124_spill] sm:$0xff] %v9872_v40 }
 0x55b   : > { %12872 = vst [vmem:[#allocation177_spill] sm:$0xff] %v9874_v30 }
 0x560   : > { %v9876_v57 = vpop.permute.xlu2 %3632 }
 0x561   : > { %v9878_v6 = vpop.permute.xlu0 %3622  ;;  %v9880_v20 = vpop.permute.xlu1 %3630 }
 0x562   : > { %12873 = vst [vmem:[#allocation172_spill] sm:$0xff] %v9878_v6 }
 0x563   : > { %12874 = vst [vmem:[#allocation49_spill] sm:$0xff] %v9880_v20 }
 0x568   : > { %v9882_v29 = vpop.permute.xlu2 %3638 }
 0x569   : > { %12875 = vst [vmem:[#allocation219_spill] sm:$0xff] %v9882_v29  ;;  %v9884_v12 = vpop.permute.xlu0 %3628  ;;  %v9886_v47 = vpop.permute.xlu1 %3636 }
 0x56a   : > { %12876 = vst [vmem:[#allocation132_spill] sm:$0xff] %v9884_v12 }
 0x56b   : > { %12877 = vst [vmem:[#allocation19_spill] sm:$0xff] %v9886_v47 }
 0x570   : > { %v3694_v26 = vpop.permute.xlu2 %3693 }
 0x571   : > { %v3756_v8 = vmul.f32 %v3694_v26, %v8868_v2  ;;  %v9889_v34 = vpop.permute.xlu0 %3634  ;;  %v9891_v40 = vpop.permute.xlu1 %3642 }
 0x572   : > { %12878 = vst [vmem:[#allocation166_spill] sm:$0xff] %v9889_v34 }
 0x573   : > { %12879 = vst [vmem:[#allocation158_spill] sm:$0xff] %v9891_v40  ;;  %3788 = vrot.lane.b32.xlu1 %v3756_v8, %s6956_s20  ;;  %v6957_v8 = vmov 8  }
 0x574   : > { %6800 = vset.pattern.permute.xlu0 %v6957_v8  ;;  %6801 = vset.pattern.permute.xlu1 %v6957_v8 }
 0x575   : > { %6799 = vset.pattern.permute.xlu2 %v6957_v8 }
 0x578   : > { %v3706_v30 = vpop.permute.xlu2 %3705 }
 0x579   : > { %v3759_v6 = vmul.f32 %v3706_v30, %v8951_v31  ;;  %v9895_v20 = vpop.permute.xlu0 %3640  ;;  %v3702_v29 = vpop.permute.xlu1 %3701 }
 0x57a   : > { %12880 = vst [vmem:[#allocation138_spill] sm:$0xff] %v9895_v20  ;;  %v3758_v12 = vmul.f32 %v3702_v29, %v8934_v58  ;;  %v12935_v20 = vld [vmem:[#allocation52_spill] sm:$0xff] }
 0x57b   : > { %3794 = vrot.lane.b32.xlu1 %v3759_v6, %s6956_s20 }
 0x57c   : > { %3792 = vrot.lane.b32.xlu0 %v3758_v12, %s6956_s20 }
 0x580   : > { %v3714_v2 = vpop.permute.xlu2 %3713 }
 0x581   : > { %v3761_v26 = vmul.f32 %v3714_v2, %v9014_v38  ;;  %v3698_v47 = vpop.permute.xlu0 %3697  ;;  %v3710_v34 = vpop.permute.xlu1 %3709 }
 0x582   : > { %v3757_v40 = vmul.f32 %v3698_v47, %v8880_v51  ;;  %v3760_v38 = vmul.f32 %v3710_v34, %v8990_v1 }
 0x584   : > { %3790 = vrot.lane.b32.xlu2 %v3757_v40, %s6956_s20  ;;  %3798 = vrot.lane.b32.xlu0 %v3761_v26, %s6956_s20 }
 0x588   : > { %v3726_v58 = vpop.permute.xlu2 %3725 }
 0x589   : > { %v3764_v31 = vmul.f32 %v3726_v58, %v9083_v63  ;;  %v3718_v29 = vpop.permute.xlu0 %3717  ;;  %v3722_v30 = vpop.permute.xlu1 %3721 }
 0x58a   : > { %v3762_v12 = vmul.f32 %v3718_v29, %v9031_v25  ;;  %v3763_v63 = vmul.f32 %v3722_v30, %v9065_v44  ;;  %v2201_v30 = vpop.f32.mrf.mxu0 }
 0x58c   : > { %3800 = vrot.lane.b32.xlu1 %v3762_v12, %s6956_s20  ;;  %3804 = vrot.lane.b32.xlu0 %v3764_v31, %s6956_s20  ;;  %v3917_v12 = vrot.slane %v9752_v19, 1 }
 0x58d   : > { %3796 = vrot.lane.b32.xlu2 %v3760_v38, %s6956_s20  ;;  %v1986_v38 = vpop.f32.mrf.mxu3 }
 0x590   : > { %v3738_v51 = vpop.permute.xlu2 %3737 }
 0x591   : > { %v3767_v40 = vmul.f32 %v3738_v51, %v9308_v37  ;;  %v3730_v47 = vpop.permute.xlu0 %3729  ;;  %v3734_v1 = vpop.permute.xlu1 %3733 }
 0x592   : > { %v3765_v6 = vmul.f32 %v3730_v47, %v9097_v4  ;;  %v3766_v37 = vmul.f32 %v3734_v1, %v9120_v52  ;;  %v6900_v52 = vld [vmem:[%s7611_s17 + $0x60] sm:$0xff]  ;;  %v2416_v1 = vpop.f32.mrf.mxu1 }
 0x594   : > { %3806 = vrot.lane.b32.xlu1 %v3765_v6, %s6956_s20  ;;  %3810 = vrot.lane.b32.xlu0 %v3767_v40, %s6956_s20  ;;  %v12892_v40 = vld [vmem:[#allocation181_spill] sm:$0xff]  ;;  %v12893_v6 = vrot.slane %v9608_v24, 1 }
 0x595   : > { %3802 = vrot.lane.b32.xlu2 %v3763_v63, %s6956_s20  ;;  %v2098_v47 = vmul.f32 %v12892_v40, %v1986_v38  ;;  %v12908_v38 = vld [vmem:[#allocation115_spill] sm:$0xff]  ;;  %v12910_v40 = vld [vmem:[#allocation54_spill] sm:$0xff] }
 0x598   : > { %v3750_v25 = vpop.permute.xlu2 %3749 }
 0x599   : > { %v3770_v34 = vmul.f32 %v3750_v25, %v9608_v24  ;;  %v3742_v2 = vpop.permute.xlu0 %3741  ;;  %v3746_v44 = vpop.permute.xlu1 %3745  ;;  %v12895_v24 = vld [vmem:[#allocation231_spill] sm:$0xff] }
 0x59a   : > { %v3768_v26 = vmul.f32 %v3742_v2, %v9325_v3  ;;  %v3769_v58 = vmul.f32 %v3746_v44, %v9422_v50  ;;  %v6901_v3 = vld [vmem:[%s7611_s17 + $0x78] sm:$0xff]  ;;  %v12885_v50 = vld [vmem:[#allocation36_spill] sm:$0xff]  ;;  %v2528_v2 = vmul.f32 %v12895_v24, %v2416_v1  ;;  %v12915_v1 = vld [vmem:[#allocation58_spill] sm:$0xff] }
 0x59b   : > { %v12916_v24 = vld [vmem:[#allocation73_spill] sm:$0xff] }
 0x59c   : > { %3812 = vrot.lane.b32.xlu1 %v3768_v26, %s6956_s20  ;;  %3816 = vrot.lane.b32.xlu0 %v3770_v34, %s6956_s20 }
 0x59d   : > { %3808 = vrot.lane.b32.xlu2 %v3766_v37, %s6956_s20  ;;  %v12896_v37 = vld [vmem:[#allocation164_spill] sm:$0xff] }
 0x5a1   : > { %v3754_v4 = vpop.permute.xlu0 %3753 }
 0x5a2   : > { %v3771_v8 = vmul.f32 %v3754_v4, %v9752_v19  ;;  %v12894_v19 = vld [vmem:[#allocation74_spill] sm:$0xff] }
 0x5a4   : > { %3818 = vrot.lane.b32.xlu1 %v3771_v8, %s6956_s20  ;;  %3857 = vperm.xlu0 %6800, %v9430_v43  }
 0x5a5   : > { %3814 = vrot.lane.b32.xlu2 %v3769_v58, %s6956_s20 }
 0x5ac   : > { %3861 = vperm.xlu1 %6801, %v9459_v59   ;;  %3877 = vperm.xlu0 %6800, %v9806_v36   ;;  %v12889_v59 = vld [vmem:[#allocation243_spill] sm:$0xff]  ;;  %v1771_v36 = vpop.f32.mrf.mxu2 }
 0x5ad   : > { %3853 = vperm.xlu2 %6799, %v9352_v62   ;;  %v12881_v62 = vmov 1  }
 0x5b4   : > { %3869 = vperm.xlu1 %6801, %v9467_v46   ;;  %3889 = vperm.xlu0 %6800, %v9818_v10   ;;  %v12887_v46 = vld [vmem:[#allocation230_spill] sm:$0xff] }
 0x5b5   : > { %3865 = vperm.xlu2 %6799, %v9370_v61   ;;  %v12882_v61 = vld [vmem:[#allocation155_spill] sm:$0xff] }
 0x5bc   : > { %3881 = vperm.xlu1 %6801, %v9474_v23   ;;  %3901 = vperm.xlu0 %6800, %v6900_v52   ;;  %v12888_v23 = vld [vmem:[#allocation83_spill] sm:$0xff] }
 0x5bd   : > { %3873 = vperm.xlu2 %6799, %v9391_v33   ;;  %v12883_v33 = vld [vmem:[#allocation111_spill] sm:$0xff] }
 0x5c4   : > { %3893 = vperm.xlu1 %6801, %v9483_v22   ;;  %3913 = vperm.xlu0 %6800, %v6901_v3   ;;  %v12890_v22 = vld [vmem:[#allocation32_spill] sm:$0xff]  ;;  %v12898_v3 = vld [vmem:[#allocation109_spill] sm:$0xff] }
 0x5c5   : > { %3885 = vperm.xlu2 %6799, %v9415_v0   ;;  %v12884_v0 = vld [vmem:[#allocation225_spill] sm:$0xff]  ;;  %v1668_v10 = vmul.f32 %v12890_v22, %v12889_v59 }
 0x5cc   : > { %3905 = vperm.xlu1 %6801, %v9495_v15   ;;  %3925 = vrot.lane.b32.xlu0 %v8980_v54, %s6958_s21  ;;  %v893_v15 = vmul.f32 %v12883_v33, %v12882_v61  ;;  %v1238_v54 = vmul.f32 %v12885_v50, %v12884_v0 }
 0x5cd   : > { %3897 = vperm.xlu2 %6799, %v9434_v42   ;;  %6803 = vset.pattern.permute.xlu0 %v12881_v62 }
 0x5d4   : > { %3921 = vrot.lane.b32.xlu1 %v8939_v35, %s6958_s21  ;;  %3931 = vrot.lane.b32.xlu0 %v9058_v45, %s6958_s21  ;;  %v12886_v35 = vld [vmem:[#allocation67_spill] sm:$0xff] }
 0x5d5   : > { %3909 = vperm.xlu2 %6799, %v9451_v53   ;;  %6804 = vset.pattern.permute.xlu1 %v12881_v62  ;;  %v1044_v43 = vadd.f32 %v12886_v35, %v893_v15  ;;  %v1453_v53 = vmul.f32 %v12888_v23, %v12887_v46 }
 0x5d7   : > { %v1260_v42 = vadd.f32 %v1238_v54, %v1044_v43 }
 0x5dc   : > { %3927 = vrot.lane.b32.xlu1 %v9019_v16, %s6958_s21  ;;  %3937 = vrot.lane.b32.xlu0 %v9113_v14, %s6958_s21  ;;  %v1475_v16 = vadd.f32 %v1453_v53, %v1260_v42  ;;  %v12891_v14 = vld [vmem:[#allocation133_spill] sm:$0xff] }
 0x5dd   : > { %3923 = vrot.lane.b32.xlu2 %v8995_v56, %s6958_s21  ;;  %v1883_v31 = vmul.f32 %v12891_v14, %v1771_v36  ;;  %v12906_v14 = vld [vmem:[#allocation70_spill] sm:$0xff] }
 0x5de   : > { %v9961_v45 = vpop.permute.xlu2 %3790  ;;  %6802 = vset.pattern.permute.xlu2 %v12881_v62  ;;  %v1690_v56 = vadd.f32 %v1668_v10, %v1475_v16  ;;  %v12925_v62 = vld [vmem:[#allocation28_spill] sm:$0xff] }
 0x5e0   : > { %v1905_v51 = vadd.f32 %v1883_v31, %v1690_v56  ;;  %v12907_v31 = vld [vmem:[#allocation55_spill] sm:$0xff] }
 0x5e4   : > { %3933 = vrot.lane.b32.xlu1 %v9086_v9, %s6958_s21  ;;  %3943 = vrot.lane.b32.xlu0 %v9340_v39, %s6958_s21  ;;  %v2313_v9 = vmul.f32 %v9776_v49, %v2201_v30  ;;  %v3918_v39 = vsel %vm2971_vm4, %v12893_v6, %v3917_v12  ;;  %v12909_v30 = vld [vmem:[#allocation81_spill] sm:$0xff] }
 0x5e5   : > { %3929 = vrot.lane.b32.xlu2 %v9070_v7, %s6958_s21  ;;  %v9983_v63 = vpop.permute.xlu1 %3788  ;;  %v2120_v7 = vadd.f32 %v2098_v47, %v1905_v51  ;;  %v2714_v51 = vmul.f32 %v12909_v30, %v12908_v38  ;;  %v12911_v47 = vld [vmem:[#allocation26_spill] sm:$0xff]  ;;  %v12912_v6 = vld [vmem:[#allocation213_spill] sm:$0xff]  ;;  %v12923_v30 = vld [vmem:[#allocation239_spill] sm:$0xff] }
 0x5e7   : > { %v9975_v29 = vpop.permute.xlu2 %3796  ;;  %v2335_v34 = vadd.f32 %v2313_v9, %v2120_v7  ;;  %v2716_v9 = vmul.f32 %v12911_v47, %v12910_v40  ;;  %v12924_v40 = vld [vmem:[#allocation96_spill] sm:$0xff] }
 0x5e8   : > { %v2721_v47 = vmul.f32 %v12924_v40, %v12923_v30  ;;  %v12934_v30 = vld [vmem:[#allocation144_spill] sm:$0xff] }
 0x5e9   : > { %v2550_v26 = vadd.f32 %v2528_v2, %v2335_v34  ;;  %v12917_v2 = vld [vmem:[#allocation50_spill] sm:$0xff] }
 0x5eb   : > { %v3919_v8 = vrot.slane %v2550_v26, 1  ;;  %v2717_v26 = vmul.f32 %v12917_v2, %v12916_v24  ;;  %v12928_v2 = vld [vmem:[#allocation18_spill] sm:$0xff] }
 0x5ec   : > { %3939 = vrot.lane.b32.xlu1 %v9143_v11, %s6958_s21  ;;  %3949 = vrot.lane.b32.xlu0 %v3918_v39, %s6958_s21  ;;  %v12897_v11 = vld [vmem:[#allocation175_spill] sm:$0xff]  ;;  %v12913_v39 = vld [vmem:[#allocation72_spill] sm:$0xff] }
 0x5ed   : > { %3935 = vrot.lane.b32.xlu2 %v12894_v19, %s6958_s21  ;;  %v9999_v44 = vpop.permute.xlu1 %3794  ;;  %v3920_v52 = vsel %vm2971_vm4, %v3917_v12, %v3919_v8  ;;  %v2715_v12 = vmul.f32 %v12907_v31, %v12906_v14  ;;  %v3054_v7 = vmul.f32 %v12913_v39, %v12912_v6  ;;  %v12914_v19 = vld [vmem:[#allocation235_spill] sm:$0xff]  ;;  %v12919_v8 = vld [vmem:[#allocation9_spill] sm:$0xff]  ;;  %v12921_v14 = vld [vmem:[#allocation112_spill] sm:$0xff]  ;;  %v2720_v6 = vmul.f32 %v9178_v13, %v12925_v62 }
 0x5ee   : > { %v9990_v25 = vpop.permute.xlu0 %3792  ;;  %v2718_v34 = vmul.f32 %v12915_v1, %v12914_v19  ;;  %v12922_v31 = vld [vmem:[#allocation61_spill] sm:$0xff]  ;;  %v12926_v39 = vld [vmem:[#allocation20_spill] sm:$0xff]  ;;  %v12927_v1 = vld [vmem:[#allocation126_spill] sm:$0xff]  ;;  %v2724_v13 = vmul.f32 %v9363_v17, %v12935_v20 }
 0x5ef   : > { %v9992_v49 = vpop.permute.xlu2 %3802  ;;  %v3057_v38 = vmul.f32 %v12922_v31, %v12921_v14  ;;  %v2891_v19 = vadd.f32 %v12926_v39, %v2715_v12  ;;  %v2722_v24 = vmul.f32 %v12829_v60, %v12927_v1  ;;  %v12932_v14 = vld [vmem:[#allocation90_spill] sm:$0xff]  ;;  %v12938_v1 = vld [vmem:[#allocation35_spill] sm:$0xff] }
 0x5f0   : > { %v2894_v31 = vadd.f32 %v12932_v14, %v2718_v34  ;;  %v12936_v12 = vld [vmem:[#allocation6_spill] sm:$0xff]  ;;  %v12941_v17 = vld [vmem:[#allocation135_spill] sm:$0xff] }
 0x5f1   : > { %v3070_v62 = vadd.f32 %v3054_v7, %v2891_v19  ;;  %v2727_v60 = vmul.f32 %v9384_v41, %v12936_v12  ;;  %v12937_v39 = vld [vmem:[#allocation130_spill] sm:$0xff]  ;;  %v10095_v20 = vmul.f32 %v12839_v32, %v12941_v17  ;;  %v12944_v19 = vld [vmem:[#allocation29_spill] sm:$0xff]  ;;  %v12952_v17 = vld [vmem:[#allocation68_spill] sm:$0xff] }
 0x5f2   : > { %v12943_v7 = vld [vmem:[#allocation78_spill] sm:$0xff]  ;;  %v12946_v12 = vld [vmem:[#allocation13_spill] sm:$0xff] }
 0x5f3   : > { %v12945_v14 = vld [vmem:[#allocation82_spill] sm:$0xff] }
 0x5f4   : > { %3945 = vrot.lane.b32.xlu1 %v12896_v37, %s6958_s21  ;;  %v12918_v37 = vld [vmem:[#allocation120_spill] sm:$0xff] }
 0x5f5   : > { %3941 = vrot.lane.b32.xlu2 %v12897_v11, %s6958_s21  ;;  %v2719_v11 = vmul.f32 %v8894_v28, %v12918_v37  ;;  %v2723_v28 = vmul.f32 %v9196_v21, %v12928_v2  ;;  %v12929_v37 = vld [vmem:[#allocation7_spill] sm:$0xff]  ;;  %v2725_v21 = vmul.f32 %v12835_v48, %v12937_v39  ;;  %v2892_v48 = vadd.f32 %v12943_v7, %v2716_v9  ;;  %v12954_v9 = vld [vmem:[#allocation118_spill] sm:$0xff] }
 0x5f6   : > { %v10001_v4 = vpop.permute.xlu0 %3798  ;;  %v3512_v39 = vmul.f32 %v9746_v55, %v12946_v12  ;;  %v12959_v12 = vld [vmem:[#allocation3_spill] sm:$0xff] }
 0x5f7   : > { %v10003_v58 = vpop.permute.xlu2 %3808 }
 0x5fc   : > { %3951 = vrot.lane.b32.xlu1 %v3920_v52, %s6958_s21  ;;  %v12920_v52 = vld [vmem:[#allocation204_spill] sm:$0xff] }
 0x5fd   : > { %3947 = vrot.lane.b32.xlu2 %v12898_v3, %s6958_s21  ;;  %v3053_v3 = vmul.f32 %v12920_v52, %v12919_v8  ;;  %v12931_v52 = vld [vmem:[#allocation125_spill] sm:$0xff] }
 0x5fe   : > { %v10009_v61 = vpop.permute.xlu0 %3804  ;;  %v10011_v33 = vpop.permute.xlu1 %3800 }
 0x5ff   : > { %v10013_v15 = vpop.permute.xlu2 %3814 }
 0x606   : > { %v10015_v0 = vpop.permute.xlu0 %3810  ;;  %v10017_v50 = vpop.permute.xlu1 %3806 }
 0x607   : > { %12899 = vst [vmem:[#allocation11_spill] sm:$0xff] %v10015_v0  ;;  %v10019_v54 = vpop.permute.xlu2 %3853  ;;  %v12955_v0 = vld [vmem:[#allocation221_spill] sm:$0xff] }
 0x608   : > { %12900 = vst [vmem:[#allocation39_spill] sm:$0xff] %v10017_v50 }
 0x60e   : > { %v10021_v35 = vpop.permute.xlu0 %3816  ;;  %v10023_v43 = vpop.permute.xlu1 %3812 }
 0x60f   : > { %12901 = vst [vmem:[#allocation170_spill] sm:$0xff] %v10021_v35  ;;  %v10025_v42 = vpop.permute.xlu2 %3865  ;;  %v2890_v35 = vadd.f32 %v12931_v52, %v2714_v51 }
 0x610   : > { %12902 = vst [vmem:[#allocation43_spill] sm:$0xff] %v10023_v43  ;;  %v12933_v43 = vld [vmem:[#allocation41_spill] sm:$0xff] }
 0x611   : > { %v3056_v40 = vmul.f32 %v12934_v30, %v12933_v43  ;;  %v10090_v34 = vadd.f32 %v3053_v3, %v2890_v35  ;;  %v3073_v43 = vadd.f32 %v3057_v38, %v2894_v31  ;;  %v12947_v3 = vld [vmem:[#allocation44_spill] sm:$0xff]  ;;  %v12948_v38 = vld [vmem:[#allocation110_spill] sm:$0xff] }
 0x612   : > { %v12949_v31 = vld [vmem:[#allocation216_spill] sm:$0xff] }
 0x616   : > { %v10027_v46 = vpop.permute.xlu0 %3857  ;;  %v10029_v23 = vpop.permute.xlu1 %3818 }
 0x617   : > { %12903 = vst [vmem:[#allocation46_spill] sm:$0xff] %v10029_v23  ;;  %v10031_v53 = vpop.permute.xlu2 %3873  ;;  %v12930_v23 = vld [vmem:[#allocation94_spill] sm:$0xff] }
 0x618   : > { %v3203_v8 = vmul.f32 %v12930_v23, %v12929_v37  ;;  %v2726_v23 = vmul.f32 %v12831_v18, %v12938_v1  ;;  %v12940_v37 = vld [vmem:[#allocation161_spill] sm:$0xff]  ;;  %v3055_v18 = vmul.f32 %v12945_v14, %v12944_v19  ;;  %v12950_v1 = vld [vmem:[#allocation127_spill] sm:$0xff] }
 0x619   : > { %v2893_v52 = vadd.f32 %v12940_v37, %v2717_v26  ;;  %v3060_v26 = vmul.f32 %v12948_v38, %v12947_v3  ;;  %v3059_v32 = vmul.f32 %v12950_v1, %v12949_v31  ;;  %v12951_v37 = vld [vmem:[#allocation34_spill] sm:$0xff]  ;;  %v12956_v19 = vld [vmem:[#allocation189_spill] sm:$0xff]  ;;  %v2895_v3 = vadd.f32 %v12959_v12, %v2719_v11  ;;  %v12960_v38 = vld [vmem:[#allocation123_spill] sm:$0xff] }
 0x61a   : > { %v3219_v30 = vadd.f32 %v3203_v8, %v3070_v62  ;;  %v3062_v8 = vmul.f32 %v12956_v19, %v12955_v0  ;;  %v12957_v62 = vld [vmem:[#allocation98_spill] sm:$0xff]  ;;  %v2896_v31 = vadd.f32 %v12960_v38, %v2720_v6  ;;  %v12961_v1 = vld [vmem:[#allocation97_spill] sm:$0xff]  ;;  %v12967_v11 = vld [vmem:[#allocation188_spill] sm:$0xff] }
 0x61b   : > { %v10104_v35 = vadd.f32 %v3056_v40, %v2893_v52  ;;  %v3661_v40 = vmul.f32 %v9858_v5, %v9840_v27  ;;  %v12958_v52 = vld [vmem:[#allocation143_spill] sm:$0xff]  ;;  %v2898_v6 = vadd.f32 %v12967_v11, %v2722_v24  ;;  %v12973_v12 = vld [vmem:[#allocation42_spill] sm:$0xff]  ;;  %v12981_v11 = vld [vmem:[#allocation184_spill] sm:$0xff] }
 0x61c   : > { %v3379_v55 = vadd.f32 %v12957_v62, %v3219_v30  ;;  %v2897_v14 = vadd.f32 %v12958_v52, %v2721_v47  ;;  %v10126_v30 = vadd.f32 %v3059_v32, %v2896_v31  ;;  %v12965_v27 = vld [vmem:[#allocation91_spill] sm:$0xff]  ;;  %v12978_v31 = vld [vmem:[#allocation129_spill] sm:$0xff] }
 0x61d   : > { %v12966_v5 = vld [vmem:[#allocation95_spill] sm:$0xff] }
 0x61e   : > { %v10033_v59 = vpop.permute.xlu0 %3877  ;;  %v10035_v22 = vpop.permute.xlu1 %3861  ;;  %v3528_v0 = vadd.f32 %v3512_v39, %v3379_v55  ;;  %v3076_v19 = vadd.f32 %v3060_v26, %v2897_v14  ;;  %v3206_v47 = vmul.f32 %v12966_v5, %v12965_v27  ;;  %v12970_v39 = vld [vmem:[#allocation116_spill] sm:$0xff]  ;;  %v12971_v32 = vld [vmem:[#allocation179_spill] sm:$0xff] }
 0x61f   : > { %v10037_v10 = vpop.permute.xlu2 %3885  ;;  %v12972_v55 = vld [vmem:[#allocation88_spill] sm:$0xff]  ;;  %v12975_v38 = vld [vmem:[#allocation227_spill] sm:$0xff] }
 0x620   : > { %v3066_v52 = vmul.f32 %v12972_v55, %v12971_v32  ;;  %v12980_v5 = vld [vmem:[#allocation87_spill] sm:$0xff] }
 0x621   : > { %v4002_v32 = vld [vmem:[%s10137_s24 + $0x8] sm:$0xff] }
 0x622   : > { %v12984_v55 = vld [vmem:[#allocation191_spill] sm:$0xff] }
 0x626   : > { %v10039_v16 = vpop.permute.xlu0 %3889  ;;  %v10041_v36 = vpop.permute.xlu1 %3869 }
 0x627   : > { %12904 = vst [vmem:[#allocation178_spill] sm:$0xff] %v10039_v16  ;;  %v10043_v56 = vpop.permute.xlu2 %3897  ;;  %v12964_v16 = vld [vmem:[#allocation102_spill] sm:$0xff] }
 0x628   : > { %12905 = vst [vmem:[#allocation206_spill] sm:$0xff] %v10043_v56  ;;  %v3071_v56 = vadd.f32 %v3055_v18, %v2892_v48  ;;  %v2899_v50 = vadd.f32 %v12964_v16, %v2723_v28  ;;  %v3677_v28 = vadd.f32 %v3661_v40, %v3528_v0  ;;  %v12969_v18 = vld [vmem:[#allocation62_spill] sm:$0xff]  ;;  %v12979_v0 = vld [vmem:[#allocation51_spill] sm:$0xff] }
 0x629   : > { %v3061_v26 = vmul.f32 %v12970_v39, %v12969_v18  ;;  %v12977_v40 = vld [vmem:[#allocation2_spill] sm:$0xff]  ;;  %v12983_v18 = vld [vmem:[#allocation124_spill] sm:$0xff] }
 0x62a   : > { %v10142_v16 = vadd.f32 %v3062_v8, %v2899_v50  ;;  %v12976_v50 = vld [vmem:[#allocation23_spill] sm:$0xff] }
 0x62b   : > { %v3065_v8 = vmul.f32 %v12976_v50, %v12975_v38  ;;  %v12986_v50 = vld [vmem:[#allocation85_spill] sm:$0xff] }
 0x62e   : > { %v10086_v2 = vpop.permute.xlu0 %3901  ;;  %v10088_v51 = vpop.permute.xlu1 %3881 }
 0x62f   : > { %12939 = vst [vmem:[#allocation169_spill] sm:$0xff] %v10086_v2  ;;  %v10097_v41 = vpop.permute.xlu2 %3909  ;;  %v12953_v2 = vld [vmem:[#allocation165_spill] sm:$0xff] }
 0x630   : > { %12942 = vst [vmem:[#allocation59_spill] sm:$0xff] %v10097_v41  ;;  %v3058_v41 = vmul.f32 %v12952_v17, %v12951_v37  ;;  %v3063_v7 = vmul.f32 %v12954_v9, %v12953_v2  ;;  %v12962_v37 = vld [vmem:[#allocation193_spill] sm:$0xff]  ;;  %v12963_v2 = vld [vmem:[#allocation12_spill] sm:$0xff] }
 0x631   : > { %v3204_v17 = vmul.f32 %v12962_v37, %v12961_v1  ;;  %v2900_v9 = vadd.f32 %v12963_v2, %v2724_v13  ;;  %v3202_v1 = vmul.f32 %v12978_v31, %v12977_v40  ;;  %v3837_v37 = vadd.f32 %v9961_v45, %v3677_v28  ;;  %v12987_v40 = vld [vmem:[#allocation84_spill] sm:$0xff] }
 0x632   : > { %v10128_v62 = vadd.f32 %v3058_v41, %v2895_v3  ;;  %v12974_v3 = vld [vmem:[#allocation154_spill] sm:$0xff]  ;;  %v3209_v31 = vmul.f32 %v12987_v40, %v12986_v50  ;;  %v3077_v28 = vadd.f32 %v3061_v26, %v2898_v6 }
 0x633   : > { %v10140_v13 = vadd.f32 %v3063_v7, %v2900_v9  ;;  %v3220_v14 = vadd.f32 %v3204_v17, %v3071_v56  ;;  %v3513_v24 = vmul.f32 %v12974_v3, %v12973_v12  ;;  %v3222_v9 = vadd.f32 %v3206_v47, %v3073_v43  ;;  %v12982_v17 = vld [vmem:[#allocation167_spill] sm:$0xff]  ;;  %v12985_v3 = vld [vmem:[#allocation92_spill] sm:$0xff] }
 0x634   : > { %v3515_v56 = vmul.f32 %v12981_v11, %v12980_v5  ;;  %v3662_v39 = vmul.f32 %v12983_v18, %v12982_v17  ;;  %v2903_v12 = vadd.f32 %v12984_v55, %v2727_v60  ;;  %v2902_v38 = vadd.f32 %v12985_v3, %v2726_v23  ;;  %v12991_v5 = vld [vmem:[#allocation79_spill] sm:$0xff]  ;;  %v12992_v60 = vld [vmem:[#allocation57_spill] sm:$0xff]  ;;  %v12993_v23 = vld [vmem:[#allocation108_spill] sm:$0xff] }
 0x635   : > { %v3380_v27 = vadd.f32 %v12979_v0, %v3220_v14  ;;  %v12989_v14 = vld [vmem:[#allocation31_spill] sm:$0xff]  ;;  %v2901_v11 = vadd.f32 %v12991_v5, %v2725_v21  ;;  %v3064_v55 = vmul.f32 %v12993_v23, %v12992_v60  ;;  %v3218_v3 = vadd.f32 %v3202_v1, %v10090_v34  ;;  %v13004_v60 = vld [vmem:[#allocation149_spill] sm:$0xff]  ;;  %v13005_v23 = vld [vmem:[#allocation8_spill] sm:$0xff] }
 0x636   : > { %v10144_v48 = vpop.permute.xlu0 %3913  ;;  %v10146_v41 = vpop.permute.xlu1 %3893  ;;  %v10174_v17 = vadd.f32 %v3065_v8, %v2902_v38  ;;  %v3225_v21 = vadd.f32 %v3209_v31, %v3076_v19  ;;  %v12999_v38 = vld [vmem:[#allocation66_spill] sm:$0xff]  ;;  %v4003_v31 = vld [vmem:[%s10137_s24 + $0x10] sm:$0xff] }
 0x637   : > { %12968 = vst [vmem:[#allocation223_spill] sm:$0xff] %v10144_v48  ;;  %v3924_v7 = vpop.permute.xlu2 %3923  ;;  %v3529_v47 = vadd.f32 %v3513_v24, %v3380_v27  ;;  %v3082_v48 = vadd.f32 %v3066_v52, %v2903_v12  ;;  %v12995_v24 = vld [vmem:[#allocation147_spill] sm:$0xff]  ;;  %v12998_v12 = vld [vmem:[#allocation113_spill] sm:$0xff] }
 0x638   : > { %v3970_v2 = vmul.f32 %v3924_v7, %v10027_v46  ;;  %v12988_v46 = vld [vmem:[#allocation114_spill] sm:$0xff]  ;;  %v12990_v7 = vld [vmem:[#allocation27_spill] sm:$0xff]  ;;  %v3511_v40 = vmul.f32 %v12999_v38, %v12998_v12  ;;  %v13011_v38 = vld [vmem:[#allocation64_spill] sm:$0xff] }
 0x639   : > { %v3382_v43 = vadd.f32 %v12988_v46, %v3222_v9  ;;  %v3664_v0 = vmul.f32 %v12990_v7, %v12989_v14  ;;  %v3678_v26 = vadd.f32 %v3662_v39, %v3529_v47  ;;  %v12996_v9 = vld [vmem:[#allocation10_spill] sm:$0xff]  ;;  %v12997_v27 = vld [vmem:[#allocation131_spill] sm:$0xff]  ;;  %v13002_v47 = vld [vmem:[#allocation217_spill] sm:$0xff] }
 0x63a   : > { %v3986_v45 = vadd.f32 %v3970_v2, %v3837_v37  ;;  %v12994_v37 = vld [vmem:[#allocation48_spill] sm:$0xff]  ;;  %v3215_v50 = vmul.f32 %v12997_v27, %v12996_v9  ;;  %v13000_v39 = vld [vmem:[#allocation183_spill] sm:$0xff]  ;;  %v13003_v14 = vld [vmem:[#allocation17_spill] sm:$0xff] }
 0x63b   : > { %v3531_v6 = vadd.f32 %v3515_v56, %v3382_v43  ;;  %v3212_v2 = vmul.f32 %v12995_v24, %v12994_v37  ;;  %v3838_v34 = vadd.f32 %v9990_v25, %v3678_v26  ;;  %v13001_v46 = vld [vmem:[#allocation63_spill] sm:$0xff]  ;;  %v3518_v19 = vmul.f32 %v13003_v14, %v13002_v47  ;;  %v13007_v24 = vld [vmem:[#allocation106_spill] sm:$0xff] }
 0x63c   : > { %v10176_v18 = vadd.f32 %v4002_v32, %v3986_v45  ;;  %v3207_v43 = vmul.f32 %v13001_v46, %v13000_v39  ;;  %v13006_v25 = vld [vmem:[#allocation139_spill] sm:$0xff]  ;;  %v10206_v37 = vadd.f32 %v3064_v55, %v2901_v11  ;;  %v13010_v12 = vld [vmem:[#allocation202_spill] sm:$0xff]  ;;  %v13013_v11 = vld [vmem:[#allocation77_spill] sm:$0xff] }
 0x63d   : > { %v3680_v45 = vadd.f32 %v3664_v0, %v3531_v6  ;;  %v3378_v0 = vadd.f32 %v13004_v60, %v3218_v3  ;;  %v3660_v6 = vmul.f32 %v13006_v25, %v13005_v23  ;;  %v13008_v9 = vld [vmem:[#allocation195_spill] sm:$0xff]  ;;  %v13014_v55 = vld [vmem:[#allocation222_spill] sm:$0xff]  ;;  %v3228_v14 = vadd.f32 %v3212_v2, %v10140_v13 }
 0x63e   : > { %v4034_v52 = vfloor.f32 %v10176_v18  ;;  %v3926_v8 = vpop.permute.xlu0 %3925  ;;  %v10186_v32 = vpop.permute.xlu1 %3905  ;;  %v3205_v27 = vmul.f32 %v13008_v9, %v13007_v24  ;;  %v13012_v3 = vld [vmem:[#allocation187_spill] sm:$0xff]  ;;  %v4005_v23 = vld [vmem:[%s10137_s24 + $0x20] sm:$0xff]  ;;  %v3223_v25 = vadd.f32 %v3207_v43, %v10128_v62  ;;  %v3231_v24 = vadd.f32 %v3215_v50, %v3082_v48  ;;  %v13020_v9 = vld [vmem:[#allocation117_spill] sm:$0xff] }
 0x63f   : > { %v3971_v1 = vmul.f32 %v3926_v8, %v10035_v22  ;;  %v3930_v56 = vpop.permute.xlu2 %3929  ;;  %v3840_v22 = vadd.f32 %v9975_v29, %v3680_v45  ;;  %v13009_v8 = vld [vmem:[#allocation5_spill] sm:$0xff]  ;;  %v10216_v39 = vadd.f32 %v13012_v3, %v10095_v20  ;;  %v3527_v46 = vadd.f32 %v3511_v40, %v3378_v0  ;;  %v13018_v0 = vld [vmem:[#allocation196_spill] sm:$0xff] }
 0x640   : > { %v3973_v7 = vmul.f32 %v3930_v56, %v10041_v36  ;;  %v10200_v5 = vcvt.f32.s32 %v4034_v52  ;;  %v3385_v36 = vadd.f32 %v13009_v8, %v3225_v21  ;;  %v3667_v56 = vmul.f32 %v13011_v38, %v13010_v12 }
 0x641   : > { %v3987_v26 = vadd.f32 %v3971_v1, %v3838_v34  ;;  %v10222_v45 = vmul.f32 %v13014_v55, %v13013_v11  ;;  %v13015_v34 = vld [vmem:[#allocation190_spill] sm:$0xff]  ;;  %v3676_v20 = vadd.f32 %v3660_v6, %v3527_v46  ;;  %v13022_v6 = vld [vmem:[#allocation180_spill] sm:$0xff]  ;;  %v13026_v55 = vld [vmem:[#allocation211_spill] sm:$0xff] }
 0x642   : > { %4087 = vperm.xlu0 %6803, %v10200_v5   ;;  %v3989_v29 = vadd.f32 %v3973_v7, %v3840_v22  ;;  %v13016_v1 = vld [vmem:[#allocation242_spill] sm:$0xff]  ;;  %v3534_v60 = vadd.f32 %v3518_v19, %v3385_v36  ;;  %v3221_v22 = vadd.f32 %v3205_v27, %v10104_v35  ;;  %v13021_v19 = vld [vmem:[#allocation4_spill] sm:$0xff] }
 0x643   : > { %v10218_v47 = vadd.f32 %v4003_v31, %v3987_v26  ;;  %v3210_v21 = vmul.f32 %v13016_v1, %v13015_v34  ;;  %v13017_v31 = vld [vmem:[#allocation171_spill] sm:$0xff]  ;;  %v3836_v13 = vadd.f32 %v9983_v63, %v3676_v20  ;;  %v10245_v35 = vmul.f32 %v13022_v6, %v13021_v19  ;;  %v13023_v36 = vld [vmem:[#allocation198_spill] sm:$0xff] }
 0x644   : > { %v3208_v7 = vmul.f32 %v13018_v0, %v13017_v31  ;;  %v13019_v26 = vld [vmem:[#allocation199_spill] sm:$0xff]  ;;  %v3683_v12 = vadd.f32 %v3667_v56, %v3534_v60  ;;  %v10236_v2 = vadd.f32 %v4005_v23, %v3989_v29  ;;  %v13024_v56 = vld [vmem:[#allocation153_spill] sm:$0xff]  ;;  %v4001_v46 = vld [vmem:[%s10137_s24] sm:$0xff] }
 0x645   : > { %v4035_v40 = vfloor.f32 %v10218_v47  ;;  %v3514_v8 = vmul.f32 %v13020_v9, %v13019_v26  ;;  %v3226_v27 = vadd.f32 %v3210_v21, %v3077_v28  ;;  %v3521_v3 = vmul.f32 %v13024_v56, %v13023_v36  ;;  %v13025_v29 = vld [vmem:[#allocation168_spill] sm:$0xff]  ;;  %v13027_v34 = vld [vmem:[#allocation186_spill] sm:$0xff]  ;;  %v13029_v20 = vld [vmem:[#allocation203_spill] sm:$0xff] }
 0x646   : > { %v3922_v38 = vpop.permute.xlu1 %3921  ;;  %v3932_v62 = vpop.permute.xlu0 %3931  ;;  %v3381_v11 = vadd.f32 %v13025_v29, %v3221_v22  ;;  %v3843_v1 = vadd.f32 %v9992_v49, %v3683_v12  ;;  %v3224_v23 = vadd.f32 %v3208_v7, %v10126_v30  ;;  %v13028_v28 = vld [vmem:[#allocation200_spill] sm:$0xff]  ;;  %v13030_v31 = vld [vmem:[#allocation173_spill] sm:$0xff]  ;;  %v4037_v9 = vfloor.f32 %v10236_v2  ;;  %v13032_v49 = vld [vmem:[#allocation174_spill] sm:$0xff] }
 0x647   : > { %v3936_v48 = vpop.permute.xlu2 %3935  ;;  %v3969_v50 = vmul.f32 %v3922_v38, %v10019_v54  ;;  %v10241_v43 = vcvt.f32.s32 %v4035_v40  ;;  %v3663_v54 = vmul.f32 %v13027_v34, %v13026_v55  ;;  %v3388_v21 = vadd.f32 %v13028_v28, %v3228_v14  ;;  %v13033_v12 = vld [vmem:[#allocation105_spill] sm:$0xff]  ;;  %v13035_v7 = vld [vmem:[#allocation159_spill] sm:$0xff]  ;;  %v13036_v14 = vld [vmem:[#allocation172_spill] sm:$0xff] }
 0x648   : > { %v3976_v63 = vmul.f32 %v3936_v48, %v10088_v51  ;;  %v3516_v0 = vmul.f32 %v13030_v31, %v13029_v20  ;;  %v13031_v51 = vld [vmem:[#allocation214_spill] sm:$0xff]  ;;  %v3530_v22 = vadd.f32 %v3514_v8, %v3381_v11  ;;  %v3665_v6 = vmul.f32 %v13036_v14, %v13035_v7  ;;  %v4008_v36 = vld [vmem:[%s10137_s24 + $0x38] sm:$0xff]  ;;  %v13037_v56 = vld [vmem:[#allocation140_spill] sm:$0xff] }
 0x649   : > { %v3985_v60 = vadd.f32 %v3969_v50, %v3836_v13  ;;  %4090 = vperm.xlu1 %6804, %v10241_v43   ;;  %v3670_v26 = vmul.f32 %v9876_v57, %v13031_v51  ;;  %v3211_v13 = vmul.f32 %v13033_v12, %v13032_v49  ;;  %v13034_v50 = vld [vmem:[#allocation141_spill] sm:$0xff]  ;;  %v3537_v30 = vadd.f32 %v3521_v3, %v3388_v21  ;;  %v13038_v55 = vld [vmem:[#allocation146_spill] sm:$0xff]  ;;  %v13041_v34 = vld [vmem:[#allocation119_spill] sm:$0xff] }
 0x64a   : > { %v3992_v38 = vadd.f32 %v3976_v63, %v3843_v1  ;;  %v3383_v19 = vadd.f32 %v13034_v50, %v3223_v25  ;;  %v3384_v29 = vadd.f32 %v13037_v56, %v3224_v23  ;;  %v13039_v57 = vld [vmem:[#allocation233_spill] sm:$0xff]  ;;  %v3679_v11 = vadd.f32 %v3663_v54, %v3530_v22  ;;  %v13042_v28 = vld [vmem:[#allocation152_spill] sm:$0xff] }
 0x64b   : > { %v10263_v48 = vadd.f32 %v4001_v46, %v3985_v60  ;;  %v3517_v8 = vmul.f32 %v13039_v57, %v13038_v55  ;;  %v13040_v46 = vld [vmem:[#allocation151_spill] sm:$0xff]  ;;  %v13043_v25 = vld [vmem:[#allocation157_spill] sm:$0xff]  ;;  %v3686_v21 = vadd.f32 %v3670_v26, %v3537_v30  ;;  %v10285_v54 = vcvt.f32.s32 %v4037_v9  ;;  %v13050_v55 = vld [vmem:[#allocation162_spill] sm:$0xff] }
 0x64c   : > { %v3524_v1 = vmul.f32 %v13041_v34, %v13040_v46  ;;  %v3532_v60 = vadd.f32 %v3516_v0, %v3383_v19  ;;  %v3519_v3 = vmul.f32 %v13043_v25, %v13042_v28  ;;  %v3839_v31 = vadd.f32 %v9999_v44, %v3679_v11  ;;  %v4004_v50 = vld [vmem:[%s10137_s24 + $0x18] sm:$0xff]  ;;  %v13045_v19 = vld [vmem:[#allocation215_spill] sm:$0xff]  ;;  %v13051_v57 = vld [vmem:[#allocation132_spill] sm:$0xff] }
 0x64d   : > { %v4033_v63 = vfloor.f32 %v10263_v48  ;;  %v10280_v51 = vadd.f32 %v4008_v36, %v3992_v38  ;;  %v3974_v12 = vmul.f32 %v3932_v62, %v10031_v53  ;;  %v13044_v44 = vld [vmem:[#allocation37_spill] sm:$0xff]  ;;  %v13047_v53 = vld [vmem:[#allocation104_spill] sm:$0xff]  ;;  %v3668_v11 = vmul.f32 %v13051_v57, %v13050_v55  ;;  %v13052_v28 = vld [vmem:[#allocation75_spill] sm:$0xff] }
 0x64e   : > { %v3928_v20 = vpop.permute.xlu1 %3927  ;;  %v3681_v22 = vadd.f32 %v3665_v6, %v3532_v60  ;;  %v3391_v38 = vadd.f32 %v13044_v44, %v3231_v24  ;;  %v13046_v30 = vld [vmem:[#allocation177_spill] sm:$0xff]  ;;  %v3938_v14 = vpop.permute.xlu0 %3937  ;;  %v3386_v62 = vadd.f32 %v13047_v53, %v3226_v27  ;;  %v13049_v6 = vld [vmem:[#allocation219_spill] sm:$0xff]  ;;  %v3533_v46 = vadd.f32 %v3517_v8, %v3384_v29  ;;  %v13053_v25 = vld [vmem:[#allocation136_spill] sm:$0xff] }
 0x64f   : > { %v3942_v23 = vpop.permute.xlu2 %3941  ;;  %v3972_v49 = vmul.f32 %v3928_v20, %v10025_v42  ;;  %v10292_v26 = vcvt.f32.s32 %v4033_v63  ;;  %v3666_v7 = vmul.f32 %v13046_v30, %v13045_v19  ;;  %v3846_v42 = vadd.f32 %v10003_v58, %v3686_v21  ;;  %v4006_v29 = vld [vmem:[%s10137_s24 + $0x28] sm:$0xff]  ;;  %v13056_v19 = vld [vmem:[#allocation25_spill] sm:$0xff] }
 0x650   : > { %v3979_v0 = vmul.f32 %v3942_v23, %v10146_v41  ;;  %v13048_v41 = vld [vmem:[#allocation156_spill] sm:$0xff]  ;;  %v3841_v24 = vadd.f32 %v10001_v4, %v3681_v22  ;;  %v4040_v58 = vfloor.f32 %v10280_v51  ;;  %v3067_v27 = vmul.f32 %v13053_v25, %v13052_v28  ;;  %v13057_v30 = vld [vmem:[#allocation103_spill] sm:$0xff]  ;;  %v13060_v55 = vld [vmem:[#allocation49_spill] sm:$0xff] }
 0x651   : > { %v3988_v36 = vadd.f32 %v3972_v49, %v3839_v31  ;;  %4096 = vperm.xlu1 %6804, %v10285_v54   ;;  %v3673_v56 = vmul.f32 %v13049_v6, %v13048_v41  ;;  %4084 = vperm.xlu2 %6802, %v10292_v26   ;;  %v3540_v21 = vadd.f32 %v3524_v1, %v3391_v38  ;;  %v4011_v23 = vld [vmem:[%s10137_s24 + $0x50] sm:$0xff]  ;;  %v13065_v28 = vld [vmem:[#allocation166_spill] sm:$0xff] }
 0x652   : > { %v3995_v34 = vadd.f32 %v3979_v0, %v3846_v42  ;;  %v3535_v20 = vadd.f32 %v3519_v3, %v3386_v62  ;;  %v3990_v31 = vadd.f32 %v3974_v12, %v3841_v24  ;;  %v3227_v49 = vadd.f32 %v3211_v13, %v10142_v16  ;;  %v13054_v0 = vld [vmem:[#allocation134_spill] sm:$0xff]  ;;  %v4007_v62 = vld [vmem:[%s10137_s24 + $0x30] sm:$0xff]  ;;  %v13061_v24 = vld [vmem:[#allocation237_spill] sm:$0xff] }
 0x653   : > { %v10307_v60 = vadd.f32 %v4004_v50, %v3988_v36  ;;  %v3229_v4 = vadd.f32 %v10245_v35, %v10206_v37  ;;  %v3682_v22 = vadd.f32 %v3666_v7, %v3533_v46  ;;  %v13055_v50 = vld [vmem:[#allocation224_spill] sm:$0xff]  ;;  %v3522_v42 = vmul.f32 %v13057_v30, %v13056_v19  ;;  %v4014_v19 = vld [vmem:[%s10137_s24 + $0x68] sm:$0xff] }
 0x654   : > { %v3520_v44 = vmul.f32 %v13055_v50, %v13054_v0  ;;  %v3684_v1 = vadd.f32 %v3668_v11, %v3535_v20  ;;  %v3689_v3 = vadd.f32 %v3673_v56, %v3540_v21  ;;  %v10322_v16 = vadd.f32 %v4011_v23, %v3995_v34  ;;  %v13059_v56 = vld [vmem:[#allocation16_spill] sm:$0xff]  ;;  %v13064_v34 = vld [vmem:[#allocation45_spill] sm:$0xff] }
 0x655   : > { %v4036_v8 = vfloor.f32 %v10307_v60  ;;  %v3842_v38 = vadd.f32 %v10011_v33, %v3682_v22  ;;  %v10327_v35 = vcvt.f32.s32 %v4040_v58  ;;  %v10329_v7 = vadd.f32 %v4006_v29, %v3990_v31  ;;  %v13058_v33 = vld [vmem:[#allocation100_spill] sm:$0xff]  ;;  %v13066_v22 = vld [vmem:[#allocation22_spill] sm:$0xff] }
 0x656   : > { %v3934_v12 = vpop.permute.xlu1 %3933  ;;  %v3977_v36 = vmul.f32 %v3938_v14, %v10037_v10  ;;  %v3387_v6 = vadd.f32 %v13058_v33, %v3227_v49  ;;  %v3849_v57 = vadd.f32 %v10013_v15, %v3689_v3  ;;  %v13062_v10 = vld [vmem:[#allocation228_spill] sm:$0xff]  ;;  %v3671_v25 = vmul.f32 %v13065_v28, %v13064_v34  ;;  %v3944_v31 = vpop.permute.xlu0 %3943 }
 0x657   : > { %v3948_v13 = vpop.permute.xlu2 %3947  ;;  %v3975_v37 = vmul.f32 %v3934_v12, %v10033_v59  ;;  %v10336_v41 = vcvt.f32.s32 %v4036_v8  ;;  %v3669_v59 = vmul.f32 %v13060_v55, %v13059_v56  ;;  %v3214_v14 = vmul.f32 %v13062_v10, %v13061_v24  ;;  %v4009_v12 = vld [vmem:[%s10137_s24 + $0x40] sm:$0xff]  ;;  %v13073_v56 = vld [vmem:[#allocation39_spill] sm:$0xff] }
 0x658   : > { %v3982_v53 = vmul.f32 %v3948_v13, %v10186_v32  ;;  %v13063_v32 = vld [vmem:[#allocation145_spill] sm:$0xff]  ;;  %v3844_v21 = vadd.f32 %v10009_v61, %v3684_v1  ;;  %v3536_v20 = vadd.f32 %v3520_v44, %v3387_v6  ;;  %v4043_v15 = vfloor.f32 %v10322_v16  ;;  %v13067_v61 = vld [vmem:[#allocation122_spill] sm:$0xff]  ;;  %v13068_v1 = vld [vmem:[#allocation15_spill] sm:$0xff] }
 0x659   : > { %v3991_v11 = vadd.f32 %v3975_v37, %v3842_v38  ;;  %4105 = vperm.xlu1 %6804, %v10327_v35   ;;  %v3389_v46 = vadd.f32 %v13063_v32, %v3229_v4  ;;  %4093 = vperm.xlu2 %6802, %v10336_v41   ;;  %v2905_v29 = vadd.f32 %v13066_v22, %v10222_v45  ;;  %v4038_v4 = vfloor.f32 %v10329_v7  ;;  %v13069_v13 = vld [vmem:[#allocation232_spill] sm:$0xff]  ;;  %v13070_v37 = vld [vmem:[#allocation65_spill] sm:$0xff]  ;;  %v13074_v55 = vld [vmem:[#allocation178_spill] sm:$0xff] }
 0x65a   : > { %v3998_v23 = vadd.f32 %v3982_v53, %v3849_v57  ;;  %v3993_v50 = vadd.f32 %v3977_v36, %v3844_v21  ;;  %v3083_v30 = vadd.f32 %v3067_v27, %v10216_v39  ;;  %v3216_v44 = vmul.f32 %v13068_v1, %v13067_v61  ;;  %v13075_v24 = vld [vmem:[#allocation206_spill] sm:$0xff]  ;;  %v13078_v21 = vld [vmem:[#allocation19_spill] sm:$0xff]  ;;  %v13080_v22 = vld [vmem:[#allocation137_spill] sm:$0xff] }
 0x65b   : > { %v10351_v49 = vadd.f32 %v4007_v62, %v3991_v11  ;;  %v3538_v0 = vadd.f32 %v3522_v42, %v3389_v46  ;;  %v3685_v3 = vadd.f32 %v3669_v59, %v3536_v20  ;;  %v3068_v53 = vmul.f32 %v13070_v37, %v13069_v13  ;;  %v13071_v42 = vld [vmem:[#allocation69_spill] sm:$0xff]  ;;  %v13076_v46 = vld [vmem:[#allocation240_spill] sm:$0xff]  ;;  %v13083_v1 = vld [vmem:[#allocation11_spill] sm:$0xff] }
 0x65c   : > { %v3230_v45 = vadd.f32 %v3214_v14, %v10174_v17  ;;  %v13072_v62 = vld [vmem:[#allocation121_spill] sm:$0xff]  ;;  %v10368_v27 = vadd.f32 %v4014_v19, %v3998_v23  ;;  %v10373_v59 = vcvt.f32.s32 %v4043_v15  ;;  %v10375_v11 = vadd.f32 %v4009_v12, %v3993_v50  ;;  %v4010_v17 = vld [vmem:[%s10137_s24 + $0x48] sm:$0xff]  ;;  %v13081_v50 = vld [vmem:[#allocation24_spill] sm:$0xff] }
 0x65d   : > { %v4039_v38 = vfloor.f32 %v10351_v49  ;;  %v3523_v33 = vmul.f32 %v13072_v62, %v13071_v42  ;;  %v3687_v36 = vadd.f32 %v3671_v25, %v3538_v0  ;;  %v3845_v39 = vadd.f32 %v13073_v56, %v3685_v3  ;;  %v13077_v25 = vld [vmem:[#allocation201_spill] sm:$0xff]  ;;  %v13082_v19 = vld [vmem:[#allocation40_spill] sm:$0xff]  ;;  %v13086_v62 = vld [vmem:[#allocation138_spill] sm:$0xff] }
 0x65e   : > { %v3940_v6 = vpop.permute.xlu1 %3939  ;;  %v3980_v10 = vmul.f32 %v3944_v31, %v13075_v24  ;;  %v10385_v32 = vcvt.f32.s32 %v4038_v4  ;;  %v3390_v34 = vadd.f32 %v13076_v46, %v3230_v45  ;;  %v3232_v28 = vadd.f32 %v3216_v44, %v3083_v30  ;;  %v13079_v31 = vld [vmem:[#allocation21_spill] sm:$0xff]  ;;  %v13084_v37 = vld [vmem:[#allocation212_spill] sm:$0xff] }
 0x65f   : > { %v3978_v57 = vmul.f32 %v3940_v6, %v13074_v55  ;;  %v10381_v14 = vcvt.f32.s32 %v4039_v38  ;;  %v3672_v20 = vmul.f32 %v13078_v21, %v13077_v25  ;;  %v3217_v0 = vmul.f32 %v13080_v22, %v13079_v31  ;;  %v13085_v42 = vld [vmem:[#allocation89_spill] sm:$0xff]  ;;  %v13089_v25 = vld [vmem:[#allocation43_spill] sm:$0xff] }
 0x660   : > { %v3525_v61 = vmul.f32 %v13082_v19, %v13081_v50  ;;  %v3847_v3 = vadd.f32 %v13083_v1, %v3687_v36  ;;  %v3084_v30 = vadd.f32 %v3068_v53, %v2905_v29  ;;  %v3539_v44 = vadd.f32 %v3523_v33, %v3390_v34  ;;  %v4012_v55 = vld [vmem:[%s10137_s24 + $0x58] sm:$0xff]  ;;  %v13087_v53 = vld [vmem:[#allocation207_spill] sm:$0xff]  ;;  %v13088_v33 = vld [vmem:[#allocation56_spill] sm:$0xff] }
 0x661   : > { %v3994_v23 = vadd.f32 %v3978_v57, %v3845_v39  ;;  %4114 = vperm.xlu1 %6804, %v10373_v59   ;;  %4102 = vperm.xlu0 %6803, %v10381_v14   ;;  %v4046_v12 = vfloor.f32 %v10368_v27  ;;  %v3392_v45 = vadd.f32 %v13084_v37, %v3232_v28  ;;  %v3674_v6 = vmul.f32 %v13086_v62, %v13085_v42  ;;  %v3950_v57 = vpop.permute.xlu0 %3949  ;;  %v13090_v21 = vld [vmem:[#allocation169_spill] sm:$0xff]  ;;  %v13091_v50 = vld [vmem:[#allocation59_spill] sm:$0xff]  ;;  %v4013_v19 = vld [vmem:[%s10137_s24 + $0x60] sm:$0xff] }
 0x662   : > { %4099 = vperm.xlu2 %6802, %v10385_v32   ;;  %v4041_v56 = vfloor.f32 %v10375_v11  ;;  %v3996_v39 = vadd.f32 %v3980_v10, %v3847_v3  ;;  %v3688_v36 = vadd.f32 %v3672_v20, %v3539_v44  ;;  %v3233_v29 = vadd.f32 %v3217_v0, %v3084_v30  ;;  %v13092_v1 = vld [vmem:[#allocation101_spill] sm:$0xff]  ;;  %v13093_v30 = vld [vmem:[#allocation71_spill] sm:$0xff]  ;;  %v13094_v44 = vld [vmem:[#allocation158_spill] sm:$0xff] }
 0x663   : > { %v10399_v13 = vadd.f32 %v4010_v17, %v3994_v23  ;;  %v3526_v46 = vmul.f32 %v13088_v33, %v13087_v53  ;;  %v3541_v17 = vadd.f32 %v3525_v61, %v3392_v45  ;;  %v10413_v31 = vcvt.f32.s32 %v4046_v12  ;;  %v13095_v42 = vld [vmem:[#allocation170_spill] sm:$0xff]  ;;  %v4015_v53 = vld [vmem:[%s10137_s24 + $0x70] sm:$0xff] }
 0x664   : > { %v3848_v28 = vadd.f32 %v13089_v25, %v3688_v36  ;;  %v10417_v22 = vadd.f32 %v4012_v55, %v3996_v39  ;;  %v3983_v0 = vmul.f32 %v3950_v57, %v13091_v50  ;;  %v10423_v61 = vcvt.f32.s32 %v4041_v56  ;;  %v4016_v50 = vld [vmem:[%s10137_s24 + $0x78] sm:$0xff] }
 0x665   : > { %v4042_v24 = vfloor.f32 %v10399_v13  ;;  %v3690_v20 = vadd.f32 %v3674_v6, %v3541_v17  ;;  %v3393_v3 = vadd.f32 %v13092_v1, %v3233_v29  ;;  %v3675_v37 = vmul.f32 %v13094_v44, %v13093_v30 }
 0x666   : > { %v3946_v34 = vpop.permute.xlu1 %3945  ;;  %v10435_v39 = vsub.f32 %v10263_v48, %v4033_v63  ;;  %v4044_v55 = vfloor.f32 %v10417_v22 }
 0x667   : > { %v3981_v23 = vmul.f32 %v3946_v34, %v13090_v21  ;;  %v10415_v10 = vcvt.f32.s32 %v4042_v24  ;;  %v3850_v62 = vadd.f32 %v13095_v42, %v3690_v20  ;;  %v3542_v6 = vadd.f32 %v3526_v46, %v3393_v3  ;;  %v13096_v34 = vld [vmem:[#allocation46_spill] sm:$0xff] }
 0x668   : > { %v12200_v46 = vsub.f32 1.0, %v10435_v39  ;;  %v10445_v48 = vcvt.f32.s32 %v4044_v55 }
 0x669   : > { %v3997_v45 = vadd.f32 %v3981_v23, %v3848_v28  ;;  %4123 = vperm.xlu1 %6804, %v10413_v31   ;;  %4111 = vperm.xlu0 %6803, %v10415_v10   ;;  %v3999_v57 = vadd.f32 %v3983_v0, %v3850_v62  ;;  %v3691_v29 = vadd.f32 %v3675_v37, %v3542_v6  ;;  %v13097_v28 = vld [vmem:[#allocation223_spill] sm:$0xff] }
 0x66a   : > { %4108 = vperm.xlu2 %6802, %v10423_v61   ;;  %v10454_v0 = vsub.f32 %v10307_v60, %v4036_v8  ;;  %v10468_v60 = vsub.f32 %v10351_v49, %v4039_v38  ;;  %v10473_v8 = vsub.f32 %v10176_v18, %v4034_v52  ;;  %v10490_v18 = vsub.f32 %v10399_v13, %v4042_v24 }
 0x66b   : > { %v4029_v36 = vadd.f32 %v4013_v19, %v3997_v45  ;;  %v3851_v25 = vadd.f32 %v13096_v34, %v3691_v29  ;;  %v4031_v20 = vadd.f32 %v4015_v53, %v3999_v57  ;;  %v10478_v45 = vsub.f32 %v10218_v47, %v4035_v40 }
 0x66c   : > { %v12199_v44 = vsub.f32 1.0, %v10454_v0  ;;  %v12198_v42 = vsub.f32 1.0, %v10468_v60  ;;  %v12196_v6 = vsub.f32 1.0, %v10473_v8  ;;  %v10495_v52 = vsub.f32 %v10236_v2, %v4037_v9 }
 0x66d   : > { %v4045_v33 = vfloor.f32 %v4029_v36  ;;  %v4047_v1 = vfloor.f32 %v4031_v20  ;;  %v12191_v62 = vsub.f32 1.0, %v10478_v45  ;;  %v10500_v47 = vsub.f32 %v10329_v7, %v4038_v4 }
 0x66e   : > { %v3952_v17 = vpop.permute.xlu1 %3951  ;;  %v12197_v40 = vsub.f32 1.0, %v10490_v18  ;;  %v12194_v38 = vsub.f32 1.0, %v10495_v52  ;;  %v10516_v9 = vsub.f32 %v10280_v51, %v4040_v58  ;;  %v10521_v7 = vsub.f32 %v10375_v11, %v4041_v56 }
 0x66f   : > { %v3984_v21 = vmul.f32 %v3952_v17, %v13097_v28  ;;  %v10441_v23 = vcvt.f32.s32 %v4045_v33  ;;  %v10459_v37 = vcvt.f32.s32 %v4047_v1  ;;  %v12189_v49 = vsub.f32 1.0, %v10500_v47 }
 0x670   : > { %v10511_v2 = vsub.f32 %v4029_v36, %v4045_v33  ;;  %v12187_v13 = vsub.f32 1.0, %v10521_v7  ;;  %v12192_v24 = vsub.f32 1.0, %v10516_v9  ;;  %v10537_v58 = vsub.f32 %v10322_v16, %v4043_v15 }
 0x671   : > { %v4000_v63 = vadd.f32 %v3984_v21, %v3851_v25  ;;  %4165 = vperm.xlu1 %6804, %v12200_v46   ;;  %4120 = vperm.xlu0 %6803, %v10441_v23   ;;  %v10540_v11 = vsub.f32 %v10417_v22, %v4044_v55  ;;  %v10554_v16 = vsub.f32 %v10368_v27, %v4046_v12  ;;  %v10559_v22 = vadd.s32 1, %v10241_v43 }
 0x672   : > { %4117 = vperm.xlu2 %6802, %v10445_v48   ;;  %v12195_v4 = vsub.f32 1.0, %v10511_v2  ;;  %v12190_v57 = vsub.f32 1.0, %v10537_v58  ;;  %v10556_v15 = vsub.f32 %v4031_v20, %v4047_v1  ;;  %v10569_v27 = vadd.s32 1, %v10385_v32 }
 0x673   : > { %v4032_v19 = vadd.f32 %v4016_v50, %v4000_v63  ;;  %v12186_v36 = vsub.f32 1.0, %v10540_v11  ;;  %v12188_v29 = vsub.f32 1.0, %v10554_v16  ;;  %v10572_v12 = vadd.s32 1, %v10200_v5 }
 0x674   : > { %v12185_v55 = vsub.f32 1.0, %v10556_v15  ;;  %v10575_v53 = vadd.s32 1, %v10292_v26  ;;  %v10583_v17 = vadd.s32 1, %v10423_v61  ;;  %v10586_v34 = vadd.s32 1, %v10285_v54 }
 0x675   : > { %v4048_v3 = vfloor.f32 %v4032_v19  ;;  %v10589_v25 = vadd.s32 1, %v10336_v41  ;;  %v10597_v21 = vadd.s32 1, %v10445_v48  ;;  %v10600_v20 = vadd.s32 1, %v10327_v35 }
 0x676   : > { %v10603_v50 = vadd.s32 1, %v10381_v14  ;;  %v10613_v1 = vadd.s32 1, %v10459_v37  ;;  %v13105_v46 = vmov 0  }
 0x677   : > { %v10456_v30 = vcvt.f32.s32 %v4048_v3  ;;  %v10532_v51 = vsub.f32 %v4032_v19, %v4048_v3  ;;  %v10616_v3 = vadd.s32 1, %v10373_v59 }
 0x679   : > { %4180 = vperm.xlu1 %6804, %v12199_v44   ;;  %4129 = vperm.xlu0 %6803, %v10456_v30   ;;  %v12193_v56 = vsub.f32 1.0, %v10532_v51 }
 0x67a   : > { %4126 = vperm.xlu2 %6802, %v10459_v37  }
 0x681   : > { %4195 = vperm.xlu1 %6804, %v12198_v42   ;;  %4175 = vperm.xlu0 %6803, %v12191_v62  }
 0x682   : > { %4170 = vperm.xlu2 %6802, %v12196_v6  }
 0x689   : > { %4210 = vperm.xlu1 %6804, %v12197_v40   ;;  %4190 = vperm.xlu0 %6803, %v12189_v49   ;;  %v10632_v49 = vadd.s32 1, %v10441_v23 }
 0x68a   : > { %4185 = vperm.xlu2 %6802, %v12194_v38  }
 0x691   : > { %4225 = vperm.xlu1 %6804, %v12195_v4   ;;  %4205 = vperm.xlu0 %6803, %v12187_v13  }
 0x692   : > { %4200 = vperm.xlu2 %6802, %v12192_v24  }
 0x699   : > { %4240 = vperm.xlu1 %6804, %v12193_v56   ;;  %4220 = vperm.xlu0 %6803, %v12186_v36   ;;  %v10644_v56 = vadd.s32 1, %v10456_v30 }
 0x69a   : > { %4215 = vperm.xlu2 %6802, %v12190_v57  }
 0x6a1   : > { %4282 = vperm.xlu1 %6804, %v10559_v22   ;;  %4235 = vperm.xlu0 %6803, %v12185_v55   ;;  %v10619_v55 = vadd.s32 1, %v10415_v10 }
 0x6a2   : > { %4230 = vperm.xlu2 %6802, %v12188_v29   ;;  %v10629_v29 = vadd.s32 1, %v10413_v31 }
 0x6a9   : > { %4291 = vperm.xlu1 %6804, %v10569_v27   ;;  %4279 = vperm.xlu0 %6803, %v10572_v12  }
 0x6aa   : > { %4276 = vperm.xlu2 %6802, %v10575_v53  }
 0x6ab   : > { %v10580_v33 = vpop.permute.xlu2 %4084 }
 0x6b1   : > { %4300 = vperm.xlu1 %6804, %v10583_v17   ;;  %4288 = vperm.xlu0 %6803, %v10586_v34  }
 0x6b2   : > { %4285 = vperm.xlu2 %6802, %v10589_v25  }
 0x6b3   : > { %v10594_v28 = vpop.permute.xlu2 %4093 }
 0x6b4   : > { %v10639_v62 = vpop.permute.xlu0 %4087 }
 0x6b9   : > { %4309 = vperm.xlu1 %6804, %v10597_v21   ;;  %4297 = vperm.xlu0 %6803, %v10600_v20  }
 0x6ba   : > { %4294 = vperm.xlu2 %6802, %v10603_v50  }
 0x6bb   : > { %v10608_v63 = vpop.permute.xlu1 %4090 }
 0x6bc   : > { %v10610_v19 = vpop.permute.xlu2 %4099 }
 0x6c1   : > { %4318 = vperm.xlu1 %6804, %v10613_v1   ;;  %4306 = vperm.xlu0 %6803, %v10616_v3  }
 0x6c2   : > { %4303 = vperm.xlu2 %6802, %v10619_v55  }
 0x6c3   : > { %v10624_v36 = vpop.permute.xlu1 %4096 }
 0x6c4   : > { %v10626_v13 = vpop.permute.xlu2 %4108 }
 0x6c5   : > { %13098 = vst [vmem:[#allocation107_spill] sm:$0xff] %v10626_v13 }
 0x6c9   : > { %4346 = vperm.xlu1 %6804, %v10473_v8   ;;  %4315 = vperm.xlu0 %6803, %v10629_v29  }
 0x6ca   : > { %4312 = vperm.xlu2 %6802, %v10632_v49  }
 0x6cb   : > { %v10637_v57 = vpop.permute.xlu1 %4105 }
 0x6cc   : > { %13099 = vst [vmem:[#allocation229_spill] sm:$0xff] %v10637_v57  ;;  %v10641_v24 = vpop.permute.xlu2 %4117 }
 0x6cd   : > { %13100 = vst [vmem:[#allocation93_spill] sm:$0xff] %v10641_v24 }
 0x6d1   : > { %4361 = vperm.xlu1 %6804, %v10495_v52   ;;  %4341 = vperm.xlu0 %6803, %v10435_v39  }
 0x6d2   : > { %4321 = vperm.xlu2 %6802, %v10644_v56  }
 0x6d3   : > { %v10649_v38 = vpop.permute.xlu1 %4114  ;;  %v10651_v4 = vpop.permute.xlu0 %4102 }
 0x6d4   : > { %13101 = vst [vmem:[#allocation160_spill] sm:$0xff] %v10649_v38  ;;  %v10653_v6 = vpop.permute.xlu2 %4126 }
 0x6d5   : > { %13102 = vst [vmem:[#allocation142_spill] sm:$0xff] %v10653_v6 }
 0x6d9   : > { %4376 = vperm.xlu1 %6804, %v10516_v9   ;;  %4356 = vperm.xlu0 %6803, %v10454_v0  }
 0x6da   : > { %4351 = vperm.xlu2 %6802, %v10478_v45  }
 0x6db   : > { %v10658_v40 = vpop.permute.xlu1 %4123  ;;  %v10660_v42 = vpop.permute.xlu0 %4111 }
 0x6dc   : > { %13103 = vst [vmem:[#allocation30_spill] sm:$0xff] %v10658_v40  ;;  %v10662_v44 = vpop.permute.xlu2 %4170 }
 0x6dd   : > { %13104 = vst [vmem:[#allocation205_spill] sm:$0xff] %v10660_v42 }
 0x6e1   : > { %4391 = vperm.xlu1 %6804, %v10537_v58   ;;  %6807 = vset.pattern.permute.xlu0 %v13105_v46 }
 0x6e2   : > { %4366 = vperm.xlu2 %6802, %v10500_v47   ;;  %4458 = vperm.xlu0 %6807, %v10241_v43  }
 0x6e3   : > { %v10668_v6 = vpop.permute.xlu1 %4165  ;;  %v10670_v24 = vpop.permute.xlu0 %4120 }
 0x6e4   : > { %13106 = vst [vmem:[#allocation76_spill] sm:$0xff] %v10670_v24  ;;  %v10672_v38 = vpop.permute.xlu2 %4185 }
 0x6e9   : > { %4406 = vperm.xlu1 %6804, %v10554_v16  }
 0x6ea   : > { %4381 = vperm.xlu2 %6802, %v10521_v7   ;;  %4473 = vperm.xlu0 %6807, %v10327_v35  }
 0x6eb   : > { %v10677_v40 = vpop.permute.xlu1 %4180  ;;  %v10679_v42 = vpop.permute.xlu0 %4129 }
 0x6ec   : > { %13107 = vst [vmem:[#allocation192_spill] sm:$0xff] %v10679_v42  ;;  %v10681_v13 = vpop.permute.xlu2 %4200 }
 0x6ed   : > { %13108 = vst [vmem:[#allocation236_spill] sm:$0xff] %v10681_v13 }
 0x6f1   : > { %6805 = vset.pattern.permute.xlu1 %v13105_v46 }
 0x6f2   : > { %4396 = vperm.xlu2 %6802, %v10540_v11   ;;  %4452 = vperm.xlu1 %6805, %v10292_v26   ;;  %v13112_v26 = vsub.f32 1.0, %v10435_v39 }
 0x6f3   : > { %4482 = vperm.xlu0 %6807, %v10373_v59   ;;  %v10687_v43 = vpop.permute.xlu1 %4195  ;;  %v10689_v24 = vpop.permute.xlu0 %4175 }
 0x6f4   : > { %v10691_v57 = vpop.permute.xlu2 %4215 }
 0x6f5   : > { %13109 = vst [vmem:[#allocation182_spill] sm:$0xff] %v10691_v57  ;;  %v13115_v57 = vsub.f32 1.0, %v10454_v0 }
 0x6fa   : > { %4411 = vperm.xlu2 %6802, %v10556_v15   ;;  %4461 = vperm.xlu1 %6805, %v10336_v41  }
 0x6fb   : > { %4491 = vperm.xlu0 %6807, %v10413_v31   ;;  %v10696_v35 = vpop.permute.xlu1 %4210  ;;  %v10698_v42 = vpop.permute.xlu0 %4190 }
 0x6fc   : > { %13110 = vst [vmem:[#allocation128_spill] sm:$0xff] %v10696_v35  ;;  %v10700_v13 = vpop.permute.xlu2 %4230 }
 0x6fd   : > { %13111 = vst [vmem:[#allocation176_spill] sm:$0xff] %v10700_v13 }
 0x702   : > { %6806 = vset.pattern.permute.xlu2 %v13105_v46  ;;  %4467 = vperm.xlu1 %6805, %v10385_v32  }
 0x703   : > { %4516 = vperm.xlu0 %6807, %v13112_v26   ;;  %4455 = vperm.xlu2 %6806, %v10200_v5   ;;  %v10707_v59 = vpop.permute.xlu1 %4225  ;;  %v10709_v41 = vpop.permute.xlu0 %4205  ;;  %v13118_v5 = vsub.f32 1.0, %v10468_v60 }
 0x704   : > { %13113 = vst [vmem:[#allocation53_spill] sm:$0xff] %v10707_v59  ;;  %v4277_v31 = vpop.permute.xlu2 %4276 }
 0x705   : > { %13114 = vst [vmem:[#allocation226_spill] sm:$0xff] %v10709_v41 }
 0x70a   : > { %4476 = vperm.xlu1 %6805, %v10423_v61  }
 0x70b   : > { %4528 = vperm.xlu0 %6807, %v13115_v57   ;;  %4464 = vperm.xlu2 %6806, %v10285_v54   ;;  %v10715_v46 = vpop.permute.xlu1 %4240  ;;  %v10717_v32 = vpop.permute.xlu0 %4220  ;;  %v13120_v54 = vsub.f32 1.0, %v10490_v18 }
 0x70c   : > { %13116 = vst [vmem:[#allocation234_spill] sm:$0xff] %v10715_v46  ;;  %v10719_v26 = vpop.permute.xlu2 %4285 }
 0x70d   : > { %13117 = vst [vmem:[#allocation163_spill] sm:$0xff] %v10717_v32 }
 0x712   : > { %4485 = vperm.xlu1 %6805, %v10445_v48  }
 0x713   : > { %4540 = vperm.xlu0 %6807, %v13118_v5   ;;  %4470 = vperm.xlu2 %6806, %v10381_v14   ;;  %v10725_v61 = vpop.permute.xlu1 %4282  ;;  %v10727_v13 = vpop.permute.xlu0 %4235  ;;  %v13122_v14 = vsub.f32 1.0, %v10473_v8  ;;  %v13123_v5 = vsub.f32 1.0, %v10511_v2 }
 0x714   : > { %13119 = vst [vmem:[#allocation209_spill] sm:$0xff] %v10727_v13  ;;  %v10729_v57 = vpop.permute.xlu2 %4294  ;;  %v10754_v13 = vld [vmem:[%s436_s23] sm:$0xff] }
 0x715   : > { %4819 = vmatpush.msra.mxu2 %v10754_v13 }
 0x71a   : > { %4494 = vperm.xlu1 %6805, %v10459_v37  }
 0x71b   : > { %4552 = vperm.xlu0 %6807, %v13120_v54   ;;  %4479 = vperm.xlu2 %6806, %v10415_v10   ;;  %v10735_v46 = vpop.permute.xlu1 %4291  ;;  %v4280_v48 = vpop.permute.xlu0 %4279 }
 0x71c   : > { %v10737_v59 = vpop.permute.xlu2 %4303 }
 0x71d   : > { %13121 = vst [vmem:[#allocation80_spill] sm:$0xff] %v10737_v59  ;;  %v13132_v59 = vsub.f32 1.0, %v10478_v45 }
 0x722   : > { %4520 = vperm.xlu1 %6805, %v13122_v14   ;;  %v13126_v14 = vsub.f32 1.0, %v10495_v52 }
 0x723   : > { %4564 = vperm.xlu0 %6807, %v13123_v5   ;;  %4488 = vperm.xlu2 %6806, %v10441_v23   ;;  %v10745_v37 = vpop.permute.xlu1 %4300  ;;  %v10750_v10 = vpop.permute.xlu0 %4288  ;;  %v13127_v5 = vsub.f32 1.0, %v10532_v51 }
 0x724   : > { %13124 = vst [vmem:[#allocation150_spill] sm:$0xff] %v10745_v37  ;;  %v10752_v54 = vpop.permute.xlu2 %4312 }
 0x725   : > { %13125 = vst [vmem:[#allocation14_spill] sm:$0xff] %v10752_v54  ;;  %v13131_v54 = vsub.f32 1.0, %v10516_v9 }
 0x72a   : > { %4532 = vperm.xlu1 %6805, %v13126_v14  }
 0x72b   : > { %4576 = vperm.xlu0 %6807, %v13127_v5   ;;  %4497 = vperm.xlu2 %6806, %v10456_v30   ;;  %v10762_v23 = vpop.permute.xlu1 %4309  ;;  %v10764_v32 = vpop.permute.xlu0 %4297  ;;  %v13135_v30 = vsub.f32 1.0, %v10537_v58 }
 0x72c   : > { %13128 = vst [vmem:[#allocation218_spill] sm:$0xff] %v10762_v23  ;;  %v10766_v35 = vpop.permute.xlu2 %4321 }
 0x72d   : > { %13129 = vst [vmem:[#allocation47_spill] sm:$0xff] %v10764_v32 }
 0x72e   : > { %13130 = vst [vmem:[#allocation60_spill] sm:$0xff] %v10766_v35  ;;  %v13136_v35 = vsub.f32 1.0, %v10500_v47 }
 0x732   : > { %4544 = vperm.xlu1 %6805, %v13131_v54   ;;  %v4081_v54 = vlaneseq }
 0x733   : > { %4602 = vperm.xlu0 %6807, %v10559_v22   ;;  %4524 = vperm.xlu2 %6806, %v13132_v59   ;;  %v10773_v14 = vpop.permute.xlu1 %4318  ;;  %v10775_v41 = vpop.permute.xlu0 %4306 }
 0x734   : > { %13133 = vst [vmem:[#allocation220_spill] sm:$0xff] %v10773_v14  ;;  %v4352_v5 = vpop.permute.xlu2 %4351  ;;  %v10786_v59 = vand.u32 127, %v4081_v54  ;;  %v13138_v14 = vsub.f32 1.0, %v10554_v16 }
 0x735   : > { %13134 = vst [vmem:[#allocation210_spill] sm:$0xff] %v10775_v41 }
 0x736   : > { %vm4131_vm5 = vcmp.eq.s32.totalorder %v10786_v59, %v10580_v33  ;;  %vm4323_vm6 = vcmp.eq.s32.totalorder %v10786_v59, %v4277_v31  ;;  %vm4324_vm7 = vcmp.eq.s32.totalorder %v10786_v59, %v4280_v48  ;;  %v13141_v33 = vsub.f32 1.0, %v10540_v11 }
 0x737   : > { %v4243_v54 = vsel %vm4131_vm5, %v10668_v6, 0.0  ;;  %vm4132_vm8 = vcmp.eq.s32.totalorder %v10786_v59, %v10639_v62  ;;  %vm4325_vm9 = vcmp.eq.s32.totalorder %v10786_v59, %v10725_v61  ;;  %v13144_v62 = vsub.f32 1.0, %v10556_v15 }
 0x738   : > { %vm4133_vm10 = vcmp.eq.s32.totalorder %v10786_v59, %v10608_v63  ;;  %vm4326_vm11 = vcmp.eq.s32.totalorder %v10786_v59, %v10719_v26  ;;  %vm4134_vm12 = vcmp.eq.s32.totalorder %v10786_v59, %v10594_v28  ;;  %vm4327_vm13 = vcmp.eq.s32.totalorder %v10786_v59, %v10750_v10 }
 0x739   : > { %v4245_v48 = vsel %vm4133_vm10, %v10689_v24, 0.0  ;;  %v4246_v24 = vsel %vm4134_vm12, %v10677_v40, 0.0  ;;  %vm4135_vm14 = vcmp.eq.s32.totalorder %v10786_v59, %v10624_v36  ;;  %vm4328_vm15 = vcmp.eq.s32.totalorder %v10786_v59, %v10735_v46 }
 0x73a   : > { %4556 = vperm.xlu1 %6805, %v13135_v30   ;;  %v13139_v30 = vsub.f32 1.0, %v10521_v7  ;;  %vm4136_vm0 = vcmp.eq.s32.totalorder %v10786_v59, %v10610_v19 }
 0x73b   : > { %4611 = vperm.xlu0 %6807, %v10569_v27   ;;  %4536 = vperm.xlu2 %6806, %v13136_v35   ;;  %v4347_v23 = vpop.permute.xlu1 %4346  ;;  %v10782_v37 = vpop.permute.xlu0 %4315  ;;  %v4248_v36 = vsel %vm4136_vm0, %v10698_v42, 0.0 }
 0x73c   : > { %13137 = vst [vmem:[#allocation238_spill] sm:$0xff] %v10782_v37  ;;  %v10784_v22 = vpop.permute.xlu2 %4366 }
 0x742   : > { %4568 = vperm.xlu1 %6805, %v13138_v14   ;;  %v4244_v14 = vsel %vm4132_vm8, %v10662_v44, 0.0 }
 0x743   : > { %4620 = vperm.xlu0 %6807, %v10583_v17   ;;  %4548 = vperm.xlu2 %6806, %v13139_v30   ;;  %v4362_v27 = vpop.permute.xlu1 %4361  ;;  %v4342_v35 = vpop.permute.xlu0 %4341  ;;  %v4420_v17 = vsel %vm4324_vm7, %v4347_v23, 0.0 }
 0x744   : > { %v10796_v37 = vpop.permute.xlu2 %4381  ;;  %v4419_v41 = vsel %vm4323_vm6, %v4342_v35, 0.0  ;;  %v10815_v30 = vadd.f32 %v4420_v17, %v4244_v14 }
 0x745   : > { %13140 = vst [vmem:[#allocation99_spill] sm:$0xff] %v10796_v37  ;;  %v10799_v32 = vadd.f32 %v4419_v41, %v4243_v54 }
 0x747   : > { %6526 = vmatmul.msk.f32.vlgmr.msra.gmra.mxu2 %vm612_vm2, %v10799_v32 }
 0x74a   : > { %4596 = vperm.xlu1 %6805, %v10575_v53   ;;  %v4421_v53 = vsel %vm4325_vm9, %v4352_v5, 0.0 }
 0x74b   : > { %4629 = vperm.xlu0 %6807, %v10597_v21   ;;  %4560 = vperm.xlu2 %6806, %v13141_v33   ;;  %v10808_v31 = vpop.permute.xlu1 %4376  ;;  %v4357_v6 = vpop.permute.xlu0 %4356  ;;  %v10834_v61 = vadd.f32 %v4421_v53, %v4245_v48 }
 0x74c   : > { %13142 = vst [vmem:[#allocation148_spill] sm:$0xff] %v10808_v31  ;;  %v10812_v41 = vpop.permute.xlu2 %4396 }
 0x74d   : > { %13143 = vst [vmem:[#allocation197_spill] sm:$0xff] %v10812_v41 }
 0x74f   : > { %6527 = vmatmul.msk.f32.gmra.mxu2 %vm612_vm2, %v10815_v30 }
 0x752   : > { %4605 = vperm.xlu1 %6805, %v10589_v25   ;;  %v4422_v25 = vsel %vm4326_vm11, %v4357_v6, 0.0 }
 0x753   : > { %4638 = vperm.xlu0 %6807, %v10613_v1   ;;  %4572 = vperm.xlu2 %6806, %v13144_v62   ;;  %v10825_v21 = vpop.permute.xlu1 %4391  ;;  %v10852_v35 = vadd.f32 %v4422_v25, %v4246_v24 }
 0x754   : > { %13145 = vst [vmem:[#allocation241_spill] sm:$0xff] %v10825_v21  ;;  %v10829_v44 = vpop.permute.xlu2 %4411  ;;  %v10832_v23 = vpop.permute.xlu0 %4458 }
 0x755   : > { %13146 = vst [vmem:[#allocation38_spill] sm:$0xff] %v10829_v44  ;;  %vm4501_vm0 = vcmp.eq.s32.totalorder %v10786_v59, %v10832_v23 }
 0x756   : > { %13148 = vst [vmem:[#allocation86_spill] sm:$0xff] %v10852_v35 }
 0x757   : > { %6528 = vmatmul.msk.f32.gmra.mxu2 %vm612_vm2, %v10834_v61 }
 0x75a   : > { %4614 = vperm.xlu1 %6805, %v10603_v50  }
 0x75b   : > { %4664 = vperm.xlu0 %6807, %v10473_v8   ;;  %4599 = vperm.xlu2 %6806, %v10572_v12   ;;  %v10843_v63 = vpop.permute.xlu1 %4406  ;;  %v4423_v8 = vsel %vm4327_vm13, %v4362_v27, 0.0  ;;  %v4247_v12 = vsel %vm4135_vm14, %v10672_v38, 0.0 }
 0x75c   : > { %13147 = vst [vmem:[#allocation208_spill] sm:$0xff] %v10843_v63  ;;  %v10848_v1 = vpop.permute.xlu0 %4473  ;;  %v10870_v26 = vadd.f32 %v4423_v8, %v4247_v12 }
 0x75d   : > { %v10850_v5 = vpop.permute.xlu2 %4455  ;;  %vm4506_vm7 = vcmp.eq.s32.totalorder %v10786_v59, %v10848_v1 }
 0x75e   : > { %13149 = vst [vmem:[#allocation33_spill] sm:$0xff] %v10870_v26  ;;  %vm4500_vm3 = vcmp.eq.s32.totalorder %v10786_v59, %v10850_v5 }
 0x75f   : > { %6529 = vmatmul.msk.f32.gmra.mxu2 %vm612_vm2, %v10852_v35 }
 0x762   : > { %4623 = vperm.xlu1 %6805, %v10619_v55  }
 0x763   : > { %4676 = vperm.xlu0 %6807, %v10495_v52   ;;  %4608 = vperm.xlu2 %6806, %v10586_v34   ;;  %v4424_v52 = vsel %vm4328_vm15, %v10784_v22, 0.0 }
 0x764   : > { %v10863_v40 = vpop.permute.xlu1 %4452  ;;  %v10889_v46 = vadd.f32 %v4424_v52, %v4248_v36 }
 0x765   : > { %v10866_v28 = vpop.permute.xlu0 %4482  ;;  %v10868_v50 = vpop.permute.xlu2 %4464  ;;  %vm4499_vm8 = vcmp.eq.s32.totalorder %v10786_v59, %v10863_v40 }
 0x766   : > { %13150 = vst [vmem:[#allocation194_spill] sm:$0xff] %v10889_v46  ;;  %vm4503_vm5 = vcmp.eq.s32.totalorder %v10786_v59, %v10868_v50  ;;  %vm4509_vm11 = vcmp.eq.s32.totalorder %v10786_v59, %v10866_v28 }
 0x767   : > { %6530 = vmatmul.msk.f32.gmra.mxu2 %vm612_vm2, %v10870_v26 }
 0x76a   : > { %4632 = vperm.xlu1 %6805, %v10632_v49  }
 0x76b   : > { %4688 = vperm.xlu0 %6807, %v10516_v9   ;;  %4617 = vperm.xlu2 %6806, %v10600_v20  }
 0x76c   : > { %v10882_v38 = vpop.permute.xlu1 %4461 }
 0x76d   : > { %v10885_v55 = vpop.permute.xlu0 %4491  ;;  %v10887_v34 = vpop.permute.xlu2 %4470  ;;  %vm4502_vm12 = vcmp.eq.s32.totalorder %v10786_v59, %v10882_v38 }
 0x76e   : > { %vm4505_vm15 = vcmp.eq.s32.totalorder %v10786_v59, %v10887_v34 }
 0x76f   : > { %6531 = vmatmul.msk.f32.gmra.mxu2 %vm612_vm2, %v10889_v46 }
 0x772   : > { %4641 = vperm.xlu1 %6805, %v10644_v56  }
 0x773   : > { %4700 = vperm.xlu0 %6807, %v10537_v58   ;;  %4626 = vperm.xlu2 %6806, %v10616_v3  }
 0x774   : > { %v10896_v49 = vpop.permute.xlu1 %4467 }
 0x775   : > { %v10898_v9 = vpop.permute.xlu0 %4516  ;;  %v10900_v42 = vpop.permute.xlu2 %4479 }
 0x776   : > { %v4579_v50 = vsel %vm4499_vm8, %v10898_v9, 0.0 }
 0x77a   : > { %4668 = vperm.xlu1 %6805, %v10478_v45  }
 0x77b   : > { %4712 = vperm.xlu0 %6807, %v10554_v16   ;;  %4635 = vperm.xlu2 %6806, %v10629_v29  }
 0x77c   : > { %v10905_v20 = vpop.permute.xlu1 %4476 }
 0x77d   : > { %v10907_v19 = vpop.permute.xlu0 %4528  ;;  %v10909_v56 = vpop.permute.xlu2 %4488 }
 0x782   : > { %4680 = vperm.xlu1 %6805, %v10500_v47  }
 0x783   : > { %4660 = vperm.xlu2 %6806, %v10435_v39  }
 0x784   : > { %v10913_v58 = vpop.permute.xlu1 %4485 }
 0x785   : > { %v10915_v3 = vpop.permute.xlu0 %4540  ;;  %v10917_v10 = vpop.permute.xlu2 %4497 }
 0x78a   : > { %4692 = vperm.xlu1 %6805, %v10521_v7  }
 0x78b   : > { %4672 = vperm.xlu2 %6806, %v10454_v0  }
 0x78c   : > { %v10921_v45 = vpop.permute.xlu1 %4494 }
 0x78d   : > { %v10923_v16 = vpop.permute.xlu0 %4552  ;;  %v10925_v29 = vpop.permute.xlu2 %4524 }
 0x78e   : > { %v4581_v38 = vsel %vm4501_vm0, %v10925_v29, 0.0 }
 0x792   : > { %4704 = vperm.xlu1 %6805, %v10540_v11  }
 0x793   : > { %4684 = vperm.xlu2 %6806, %v10468_v60  }
 0x794   : > { %v4521_v39 = vpop.permute.xlu1 %4520 }
 0x795   : > { %v10929_v47 = vpop.permute.xlu0 %4564  ;;  %v10931_v22 = vpop.permute.xlu2 %4536  ;;  %v4580_v41 = vsel %vm4500_vm3, %v4521_v39, 0.0  ;;  %vm4512_vm3 = vcmp.eq.s32.totalorder %v10786_v59, %v10885_v55 }
 0x79a   : > { %4716 = vperm.xlu1 %6805, %v10556_v15  }
 0x79b   : > { %4696 = vperm.xlu2 %6806, %v10490_v18  }
 0x79c   : > { %v4533_v0 = vpop.permute.xlu1 %4532 }
 0x79d   : > { %v10935_v7 = vpop.permute.xlu0 %4576  ;;  %v10937_v27 = vpop.permute.xlu2 %4548  ;;  %v4583_v5 = vsel %vm4503_vm5, %v4533_v0, 0.0 }
 0x7a3   : > { %4708 = vperm.xlu2 %6806, %v10511_v2  }
 0x7a4   : > { %v4545_v54 = vpop.permute.xlu1 %4544 }
 0x7a5   : > { %v10940_v11 = vpop.permute.xlu0 %4602  ;;  %v10942_v17 = vpop.permute.xlu2 %4560 }
 0x7ab   : > { %4720 = vperm.xlu2 %6806, %v10532_v51  }
 0x7ac   : > { %v4557_v33 = vpop.permute.xlu1 %4556 }
 0x7ad   : > { %v10945_v6 = vpop.permute.xlu0 %4611  ;;  %v10947_v15 = vpop.permute.xlu2 %4572 }
 0x7ae   : > { %vm4648_vm8 = vcmp.eq.s32.totalorder %v10786_v59, %v10945_v6 }
 0x7b4   : > { %v10949_v14 = vpop.permute.xlu1 %4568 }
 0x7b5   : > { %v10951_v53 = vpop.permute.xlu0 %4620  ;;  %v4600_v62 = vpop.permute.xlu2 %4599  ;;  %v4592_v23 = vsel %vm4512_vm3, %v10949_v14, 0.0  ;;  %vm4514_vm3 = vcmp.eq.s32.totalorder %v10786_v59, %v10917_v10 }
 0x7b6   : > { %vm4644_vm4 = vcmp.eq.s32.totalorder %v10786_v59, %v4600_v62 }
 0x7bc   : > { %v4597_v48 = vpop.permute.xlu1 %4596 }
 0x7bd   : > { %v10953_v25 = vpop.permute.xlu0 %4629  ;;  %v4609_v24 = vpop.permute.xlu2 %4608  ;;  %vm4643_vm9 = vcmp.eq.s32.totalorder %v10786_v59, %v4597_v48  ;;  %v4589_v48 = vsel %vm4509_vm11, %v4557_v33, 0.0  ;;  %vm4507_vm11 = vcmp.eq.s32.totalorder %v10786_v59, %v10905_v20 }
 0x7be   : > { %vm4647_vm6 = vcmp.eq.s32.totalorder %v10786_v59, %v4609_v24  ;;  %vm4654_vm0 = vcmp.eq.s32.totalorder %v10786_v59, %v10953_v25 }
 0x7c4   : > { %v4606_v8 = vpop.permute.xlu1 %4605 }
 0x7c5   : > { %v10955_v12 = vpop.permute.xlu0 %4638  ;;  %v4618_v52 = vpop.permute.xlu2 %4617  ;;  %vm4646_vm13 = vcmp.eq.s32.totalorder %v10786_v59, %v4606_v8 }
 0x7c6   : > { %vm4650_vm10 = vcmp.eq.s32.totalorder %v10786_v59, %v4618_v52 }
 0x7cc   : > { %v10957_v36 = vpop.permute.xlu1 %4614 }
 0x7cd   : > { %v4665_v44 = vpop.permute.xlu0 %4664  ;;  %v4627_v63 = vpop.permute.xlu2 %4626  ;;  %vm4649_vm5 = vcmp.eq.s32.totalorder %v10786_v59, %v10957_v36 }
 0x7ce   : > { %v4724_v21 = vsel %vm4644_vm4, %v4665_v44, 0.0  ;;  %vm4653_vm14 = vcmp.eq.s32.totalorder %v10786_v59, %v4627_v63  ;;  %v4585_v63 = vsel %vm4505_vm15, %v10915_v3, 0.0  ;;  %vm4645_vm4 = vcmp.eq.s32.totalorder %v10786_v59, %v10940_v11 }
 0x7cf   : > { %v10962_v46 = vadd.f32 %v4724_v21, %v4580_v41  ;;  %vm4510_vm15 = vcmp.eq.s32.totalorder %v10786_v59, %v10913_v58 }
 0x7d1   : > { %4876 = vperm.xlu1 %6805, %v10962_v46  }
 0x7d4   : > { %v10965_v37 = vpop.permute.xlu1 %4623 }
 0x7d5   : > { %v4677_v26 = vpop.permute.xlu0 %4676  ;;  %v4636_v31 = vpop.permute.xlu2 %4635 }
 0x7d6   : > { %v4727_v35 = vsel %vm4647_vm6, %v4677_v26, 0.0  ;;  %vm4656_vm6 = vcmp.eq.s32.totalorder %v10786_v59, %v4636_v31 }
 0x7d7   : > { %v10970_v62 = vadd.f32 %v4727_v35, %v4583_v5  ;;  %v4586_v35 = vsel %vm4506_vm7, %v4545_v54, 0.0  ;;  %v4582_v54 = vsel %vm4502_vm12, %v10907_v19, 0.0  ;;  %vm4504_vm7 = vcmp.eq.s32.totalorder %v10786_v59, %v10896_v49 }
 0x7d8   : > { %v4584_v29 = vsel %vm4504_vm7, %v10931_v22, 0.0  ;;  %vm4651_vm12 = vcmp.eq.s32.totalorder %v10786_v59, %v10951_v53  ;;  %vm4137_vm7 = vcmp.eq.s32.totalorder %v10786_v59, %v10651_v4  ;;  %v13169_v4 = vld [vmem:[#allocation47_spill] sm:$0xff] }
 0x7d9   : > { %4891 = vperm.xlu1 %6805, %v10970_v62  }
 0x7dc   : > { %v10973_v44 = vpop.permute.xlu1 %4632 }
 0x7dd   : > { %v4689_v41 = vpop.permute.xlu0 %4688  ;;  %v4661_v21 = vpop.permute.xlu2 %4660 }
 0x7de   : > { %v4730_v26 = vsel %vm4650_vm10, %v4689_v41, 0.0  ;;  %v4723_v39 = vsel %vm4643_vm9, %v4661_v21, 0.0  ;;  %vm4508_vm9 = vcmp.eq.s32.totalorder %v10786_v59, %v10900_v42  ;;  %vm4652_vm10 = vcmp.eq.s32.totalorder %v10786_v59, %v10965_v37 }
 0x7df   : > { %v10982_v0 = vadd.f32 %v4730_v26, %v4586_v35  ;;  %v10984_v24 = vadd.f32 %v4723_v39, %v4579_v50  ;;  %v4588_v35 = vsel %vm4508_vm9, %v10923_v16, 0.0  ;;  %v13151_v42 = vmov 1  }
 0x7e0   : > { %v4587_v16 = vsel %vm4507_vm11, %v10937_v27, 0.0  ;;  %vm4330_vm9 = vcmp.eq.s32.totalorder %v10786_v59, %v13169_v4  ;;  %v13178_v4 = vld [vmem:[#allocation226_spill] sm:$0xff] }
 0x7e1   : > { %4906 = vperm.xlu1 %6805, %v10982_v0   ;;  %4871 = vperm.xlu0 %6807, %v10984_v24  }
 0x7e4   : > { %v10988_v1 = vpop.permute.xlu1 %4641 }
 0x7e5   : > { %v4701_v40 = vpop.permute.xlu0 %4700  ;;  %v4673_v9 = vpop.permute.xlu2 %4672 }
 0x7e6   : > { %v4733_v52 = vsel %vm4653_vm14, %v4701_v40, 0.0  ;;  %v4726_v5 = vsel %vm4646_vm13, %v4673_v9, 0.0  ;;  %vm4511_vm13 = vcmp.eq.s32.totalorder %v10786_v59, %v10909_v56  ;;  %vm4655_vm14 = vcmp.eq.s32.totalorder %v10786_v59, %v10973_v44 }
 0x7e7   : > { %v10997_v41 = vadd.f32 %v4733_v52, %v4589_v48  ;;  %v10999_v21 = vadd.f32 %v4726_v5, %v4582_v54  ;;  %v4591_v40 = vsel %vm4511_vm13, %v10929_v47, 0.0  ;;  %v4590_v47 = vsel %vm4510_vm15, %v10942_v17, 0.0 }
 0x7e8   : > { %v4594_v44 = vsel %vm4514_vm3, %v10935_v7, 0.0 }
 0x7e9   : > { %4921 = vperm.xlu1 %6805, %v10997_v41   ;;  %4886 = vperm.xlu0 %6807, %v10999_v21  }
 0x7ec   : > { %v4669_v28 = vpop.permute.xlu1 %4668 }
 0x7ed   : > { %v4713_v19 = vpop.permute.xlu0 %4712  ;;  %v4725_v34 = vsel %vm4645_vm4, %v4669_v28, 0.0  ;;  %v4685_v33 = vpop.permute.xlu2 %4684  ;;  %vm4658_vm4 = vcmp.eq.s32.totalorder %v10786_v59, %v10988_v1  ;;  %v13159_v28 = vmov 3  }
 0x7ee   : > { %v4736_v8 = vsel %vm4656_vm6, %v4713_v19, 0.0  ;;  %v11017_v55 = vadd.f32 %v4725_v34, %v4581_v38  ;;  %v4729_v3 = vsel %vm4649_vm5, %v4685_v33, 0.0  ;;  %vm4513_vm5 = vcmp.eq.s32.totalorder %v10786_v59, %v10921_v45 }
 0x7ef   : > { %v11019_v50 = vadd.f32 %v4736_v8, %v4592_v23  ;;  %v11021_v11 = vadd.f32 %v4729_v3, %v4585_v63  ;;  %vm4657_vm6 = vcmp.eq.s32.totalorder %v10786_v59, %v10955_v12  ;;  %v4593_v7 = vsel %vm4513_vm5, %v10947_v15, 0.0 }
 0x7f0   : > { %4881 = vperm.xlu2 %6806, %v11017_v55  }
 0x7f1   : > { %4936 = vperm.xlu1 %6805, %v11019_v50   ;;  %4901 = vperm.xlu0 %6807, %v11021_v11  }
 0x7f4   : > { %v4681_v31 = vpop.permute.xlu1 %4680 }
 0x7f5   : > { %v4728_v14 = vsel %vm4648_vm8, %v4681_v31, 0.0  ;;  %v4697_v36 = vpop.permute.xlu2 %4696  ;;  %vm4329_vm8 = vcmp.eq.s32.totalorder %v10786_v59, %v10729_v57  ;;  %v13170_v57 = vmov 4  }
 0x7f6   : > { %v11036_v26 = vadd.f32 %v4728_v14, %v4584_v29  ;;  %v4732_v39 = vsel %vm4652_vm10, %v4697_v36, 0.0 }
 0x7f7   : > { %v11038_v49 = vadd.f32 %v4732_v39, %v4588_v35 }
 0x7f8   : > { %4896 = vperm.xlu2 %6806, %v11036_v26  }
 0x7f9   : > { %4982 = vrot.lane.b32.xlu1 %v10754_v13, %s6951_s19  ;;  %4916 = vperm.xlu0 %6807, %v11038_v49   ;;  %s6959_s19 = smov 108  }
 0x7fa   : > { %6810 = vset.pattern.permute.xlu1 %v13151_v42 }
 0x7fc   : > { %v4693_v37 = vpop.permute.xlu1 %4692 }
 0x7fd   : > { %v4731_v22 = vsel %vm4651_vm12, %v4693_v37, 0.0  ;;  %v4709_v6 = vpop.permute.xlu2 %4708 }
 0x7fe   : > { %v11055_v9 = vadd.f32 %v4731_v22, %v4587_v16  ;;  %v4735_v54 = vsel %vm4655_vm14, %v4709_v6, 0.0  ;;  %v4249_v16 = vsel %vm4137_vm7, %v10687_v43, 0.0  ;;  %v13168_v6 = vld [vmem:[#allocation86_spill] sm:$0xff] }
 0x7ff   : > { %v11057_v20 = vadd.f32 %v4735_v54, %v4591_v40  ;;  %v13171_v54 = vld [vmem:[#allocation148_spill] sm:$0xff] }
 0x800   : > { %4911 = vperm.xlu2 %6806, %v11055_v9  }
 0x801   : > { %5059 = vperm.xlu1 %6810, %v11017_v55   ;;  %4931 = vperm.xlu0 %6807, %v11057_v20  }
 0x804   : > { %v4705_v56 = vpop.permute.xlu1 %4704 }
 0x805   : > { %v4734_v27 = vsel %vm4654_vm0, %v4705_v56, 0.0  ;;  %v4721_v53 = vpop.permute.xlu2 %4720  ;;  %v4426_v56 = vsel %vm4330_vm9, %v13171_v54, 0.0 }
 0x806   : > { %v11072_v48 = vadd.f32 %v4734_v27, %v4590_v47  ;;  %v4738_v52 = vsel %vm4658_vm4, %v4721_v53, 0.0  ;;  %v13172_v47 = vld [vmem:[#allocation229_spill] sm:$0xff] }
 0x807   : > { %v11074_v58 = vadd.f32 %v4738_v52, %v4594_v44  ;;  %vm4138_vm10 = vcmp.eq.s32.totalorder %v10786_v59, %v13172_v47  ;;  %v13173_v44 = vld [vmem:[#allocation236_spill] sm:$0xff] }
 0x808   : > { %4926 = vperm.xlu2 %6806, %v11072_v48   ;;  %v4250_v52 = vsel %vm4138_vm10, %v13173_v44, 0.0  ;;  %v13180_v44 = vld [vmem:[#allocation80_spill] sm:$0xff] }
 0x809   : > { %5067 = vperm.xlu1 %6810, %v10970_v62   ;;  %4946 = vperm.xlu0 %6807, %v11074_v58   ;;  %vm4332_vm13 = vcmp.eq.s32.totalorder %v10786_v59, %v13180_v44  ;;  %v13184_v44 = vld [vmem:[#allocation210_spill] sm:$0xff] }
 0x80a   : > { %vm4333_vm15 = vcmp.eq.s32.totalorder %v10786_v59, %v13184_v44 }
 0x80c   : > { %v4717_v10 = vpop.permute.xlu1 %4716 }
 0x80d   : > { %v4737_v17 = vsel %vm4657_vm6, %v4717_v10, 0.0  ;;  %v13174_v10 = vld [vmem:[#allocation33_spill] sm:$0xff] }
 0x80e   : > { %v11084_v25 = vadd.f32 %v4737_v17, %v4593_v7  ;;  %v11219_v7 = vadd.f32 %v4426_v56, %v4250_v52  ;;  %v13175_v17 = vld [vmem:[#allocation150_spill] sm:$0xff] }
 0x80f   : > { %vm4331_vm11 = vcmp.eq.s32.totalorder %v10786_v59, %v13175_v17  ;;  %v13179_v56 = vld [vmem:[#allocation194_spill] sm:$0xff] }
 0x810   : > { %13152 = vst [vmem:[#allocation185_spill] sm:$0xff] %v11084_v25  ;;  %4941 = vperm.xlu2 %6806, %v11084_v25  }
 0x811   : > { %5079 = vperm.xlu1 %6810, %v10982_v0   ;;  %6808 = vset.pattern.permute.xlu0 %v13151_v42 }
 0x812   : > { %4371 = vperm.xlu0 %6808, %v10468_v60   ;;  %v13153_v60 = vmov 2  }
 0x818   : > { %6809 = vset.pattern.permute.xlu2 %v13151_v42 }
 0x819   : > { %5091 = vperm.xlu1 %6810, %v10997_v41   ;;  %5051 = vperm.xlu2 %6809, %v10984_v24  }
 0x81a   : > { %4386 = vperm.xlu0 %6808, %v10490_v18  }
 0x821   : > { %5103 = vperm.xlu1 %6810, %v11019_v50   ;;  %5063 = vperm.xlu2 %6809, %v10999_v21  }
 0x822   : > { %4401 = vperm.xlu0 %6808, %v10511_v2  }
 0x829   : > { %5146 = vrot.lane.b32.xlu1 %v10754_v13, %s6953_s28  ;;  %5071 = vperm.xlu2 %6809, %v11036_v26   ;;  %s6960_s28 = smov 104  }
 0x82a   : > { %4416 = vperm.xlu0 %6808, %v10532_v51   ;;  %6813 = vset.pattern.permute.xlu1 %v13153_v60 }
 0x831   : > { %5223 = vperm.xlu1 %6813, %v11017_v55   ;;  %5083 = vperm.xlu2 %6809, %v11055_v9  }
 0x832   : > { %5055 = vperm.xlu0 %6808, %v10962_v46  }
 0x839   : > { %5231 = vperm.xlu1 %6813, %v10970_v62   ;;  %5095 = vperm.xlu2 %6809, %v11072_v48  }
 0x83a   : > { %5075 = vperm.xlu0 %6808, %v11021_v11  }
 0x841   : > { %5243 = vperm.xlu1 %6813, %v10982_v0   ;;  %5107 = vperm.xlu2 %6809, %v11084_v25  }
 0x842   : > { %5087 = vperm.xlu0 %6808, %v11038_v49  }
 0x843   : > { %v11111_v18 = vpop.permute.xlu1 %4876 }
 0x849   : > { %5255 = vperm.xlu1 %6813, %v10997_v41   ;;  %6811 = vset.pattern.permute.xlu2 %v13153_v60 }
 0x84a   : > { %5099 = vperm.xlu0 %6808, %v11057_v20   ;;  %5215 = vperm.xlu2 %6811, %v10984_v24   ;;  %v11117_v2 = vpop.permute.xlu2 %4881 }
 0x84b   : > { %13154 = vst [vmem:[#allocation155_spill] sm:$0xff] %v11117_v2  ;;  %v11119_v51 = vpop.permute.xlu1 %4891 }
 0x84c   : > { %13155 = vst [vmem:[#allocation111_spill] sm:$0xff] %v11119_v51  ;;  %v13195_v51 = vld [vmem:[#allocation163_spill] sm:$0xff] }
 0x851   : > { %5267 = vperm.xlu1 %6813, %v11019_v50  }
 0x852   : > { %5111 = vperm.xlu0 %6808, %v11074_v58   ;;  %5227 = vperm.xlu2 %6811, %v10999_v21   ;;  %v11124_v45 = vpop.permute.xlu2 %4896 }
 0x853   : > { %13156 = vst [vmem:[#allocation225_spill] sm:$0xff] %v11124_v45  ;;  %v11126_v15 = vpop.permute.xlu1 %4906  ;;  %v11128_v12 = vpop.permute.xlu0 %4871 }
 0x854   : > { %13157 = vst [vmem:[#allocation36_spill] sm:$0xff] %v11126_v15 }
 0x859   : > { %5310 = vrot.lane.b32.xlu1 %v10754_v13, %s6955_s29  ;;  %s6316_s29 = sshll.u32 %s13369_s10, 5 }
 0x85a   : > { %6812 = vset.pattern.permute.xlu0 %v13153_v60  ;;  %5235 = vperm.xlu2 %6811, %v11036_v26   ;;  %v11134_v1 = vpop.permute.xlu2 %4911  ;;  %v13176_v60 = vld [vmem:[#allocation99_spill] sm:$0xff]  ;;  %s463_s20 = sadd.s32 %s6316_s29, %s6315_s18 }
 0x85b   : > { %v11136_v5 = vpop.permute.xlu1 %4921  ;;  %v11138_v63 = vpop.permute.xlu0 %4886  ;;  %5219 = vperm.xlu0 %6812, %v10962_v46   ;;  %6816 = vset.pattern.permute.xlu1 %v13159_v28  ;;  %s6317_s30 = sshll.u32 %s463_s20, 3 }
 0x85c   : > { %13158 = vst [vmem:[#allocation67_spill] sm:$0xff] %v11138_v63  ;;  %v13206_v63 = vld [vmem:[#allocation176_spill] sm:$0xff]  ;;  %s11998_s17 = scalar_lea.vmem %s12117_s9, %s6317_s30 }
 0x861   : > { %5387 = vperm.xlu1 %6816, %v11017_v55  }
 0x862   : > { %5247 = vperm.xlu2 %6811, %v11055_v9   ;;  %v11144_v38 = vpop.permute.xlu2 %4926 }
 0x863   : > { %v11146_v19 = vpop.permute.xlu1 %4936  ;;  %v11148_v34 = vpop.permute.xlu0 %4901  ;;  %5239 = vperm.xlu0 %6812, %v11021_v11  }
 0x864   : > { %13160 = vst [vmem:[#allocation230_spill] sm:$0xff] %v11148_v34 }
 0x869   : > { %5395 = vperm.xlu1 %6816, %v10970_v62  }
 0x86a   : > { %5259 = vperm.xlu2 %6811, %v11072_v48   ;;  %v11153_v33 = vpop.permute.xlu2 %4941 }
 0x86b   : > { %13161 = vst [vmem:[#allocation83_spill] sm:$0xff] %v11153_v33  ;;  %v4983_v23 = vpop.permute.xlu1 %4982  ;;  %v11155_v8 = vpop.permute.xlu0 %4916  ;;  %5251 = vperm.xlu0 %6812, %v11038_v49  }
 0x86c   : > { %5000 = vmatpush.msrb.mxu3 %v4983_v23 }
 0x86d   : > { %6542 = vmatmul.msk.f32.vlgmr.msrb.gmra.mxu3 %vm612_vm2, %v10799_v32 }
 0x871   : > { %5407 = vperm.xlu1 %6816, %v10982_v0  }
 0x872   : > { %5271 = vperm.xlu2 %6811, %v11084_v25  }
 0x873   : > { %v11162_v3 = vpop.permute.xlu1 %5059  ;;  %v11164_v31 = vpop.permute.xlu0 %4931  ;;  %5263 = vperm.xlu0 %6812, %v11057_v20  }
 0x874   : > { %13162 = vst [vmem:[#allocation243_spill] sm:$0xff] %v11162_v3  ;;  %v11167_v29 = vpop.permute.xlu2 %5051 }
 0x875   : > { %6543 = vmatmul.msk.f32.gmra.mxu3 %vm612_vm2, %v10815_v30 }
 0x879   : > { %5419 = vperm.xlu1 %6816, %v10997_v41  }
 0x87a   : > { %6814 = vset.pattern.permute.xlu2 %v13159_v28 }
 0x87b   : > { %v11173_v14 = vpop.permute.xlu1 %5067  ;;  %5275 = vperm.xlu0 %6812, %v11074_v58   ;;  %v11176_v36 = vpop.permute.xlu0 %4946  ;;  %5379 = vperm.xlu2 %6814, %v10984_v24  }
 0x87c   : > { %13163 = vst [vmem:[#allocation32_spill] sm:$0xff] %v11173_v14  ;;  %v11179_v35 = vpop.permute.xlu2 %5063 }
 0x87d   : > { %13164 = vst [vmem:[#allocation133_spill] sm:$0xff] %v11176_v36  ;;  %6544 = vmatmul.msk.f32.gmra.mxu3 %vm612_vm2, %v10834_v61  ;;  %v13210_v36 = vld [vmem:[#allocation142_spill] sm:$0xff] }
 0x87e   : > { %13165 = vst [vmem:[#allocation181_spill] sm:$0xff] %v11179_v35  ;;  %vm4145_vm10 = vcmp.eq.s32.totalorder %v10786_v59, %v13210_v36  ;;  %v13214_v36 = vld [vmem:[#allocation60_spill] sm:$0xff] }
 0x881   : > { %5431 = vperm.xlu1 %6816, %v11019_v50  }
 0x883   : > { %v11184_v39 = vpop.permute.xlu1 %5079  ;;  %6815 = vset.pattern.permute.xlu0 %v13159_v28  ;;  %5391 = vperm.xlu2 %6814, %v10999_v21   ;;  %v4427_v28 = vsel %vm4331_vm11, %v13176_v60, 0.0  ;;  %v13181_v60 = vld [vmem:[#allocation205_spill] sm:$0xff]  ;;  %vm4338_vm11 = vcmp.eq.s32.totalorder %v10786_v59, %v13214_v36 }
 0x884   : > { %13166 = vst [vmem:[#allocation74_spill] sm:$0xff] %v11184_v39  ;;  %5383 = vperm.xlu0 %6815, %v10962_v46   ;;  %v4372_v42 = vpop.permute.xlu0 %4371  ;;  %v11193_v37 = vpop.permute.xlu2 %5071  ;;  %vm4140_vm14 = vcmp.eq.s32.totalorder %v10786_v59, %v13181_v60  ;;  %v13188_v39 = vld [vmem:[#allocation182_spill] sm:$0xff] }
 0x885   : > { %13167 = vst [vmem:[#allocation231_spill] sm:$0xff] %v11193_v37  ;;  %v4425_v22 = vsel %vm4329_vm8, %v4372_v42, 0.0  ;;  %6545 = vmatmul.msk.f32.gmra.mxu3 %vm612_vm2, %v13168_v6  ;;  %v13177_v42 = vld [vmem:[#allocation107_spill] sm:$0xff] }
 0x886   : > { %v11198_v40 = vadd.f32 %v4425_v22, %v4249_v16  ;;  %vm4139_vm12 = vcmp.eq.s32.totalorder %v10786_v59, %v13177_v42 }
 0x887   : > { %v4251_v54 = vsel %vm4139_vm12, %v13178_v4, 0.0  ;;  %v13183_v4 = vld [vmem:[#allocation128_spill] sm:$0xff] }
 0x888   : > { %6532 = vmatmul.msk.f32.gmra.mxu2 %vm612_vm2, %v11198_v40  ;;  %v11238_v47 = vadd.f32 %v4427_v28, %v4251_v54  ;;  %v4252_v54 = vsel %vm4140_vm14, %v13183_v4, 0.0  ;;  %v13187_v4 = vld [vmem:[#allocation160_spill] sm:$0xff] }
 0x889   : > { %5474 = vrot.lane.b32.xlu1 %v10754_v13, %s6958_s21  ;;  %vm4141_vm0 = vcmp.eq.s32.totalorder %v10786_v59, %v13187_v4  ;;  %v13190_v4 = vld [vmem:[#allocation197_spill] sm:$0xff] }
 0x88a   : > { %6819 = vset.pattern.permute.xlu1 %v13170_v57  ;;  %v4253_v34 = vsel %vm4141_vm0, %v13188_v39, 0.0  ;;  %v13192_v39 = vld [vmem:[#allocation93_spill] sm:$0xff] }
 0x88b   : > { %v11208_v43 = vpop.permute.xlu1 %5091  ;;  %5399 = vperm.xlu2 %6814, %v11036_v26   ;;  %vm4142_vm4 = vcmp.eq.s32.totalorder %v10786_v59, %v13192_v39  ;;  %v13198_v39 = vld [vmem:[#allocation76_spill] sm:$0xff] }
 0x88c   : > { %5403 = vperm.xlu0 %6815, %v11021_v11   ;;  %v4387_v27 = vpop.permute.xlu0 %4386  ;;  %v11214_v53 = vpop.permute.xlu2 %5083  ;;  %v4254_v14 = vsel %vm4142_vm4, %v13195_v51, 0.0  ;;  %vm4143_vm6 = vcmp.eq.s32.totalorder %v10786_v59, %v13198_v39  ;;  %v13202_v39 = vmov 5  }
 0x88d   : > { %6546 = vmatmul.msk.f32.gmra.mxu3 %vm612_vm2, %v13174_v10  ;;  %v4428_v52 = vsel %vm4332_vm13, %v4387_v27, 0.0 }
 0x88e   : > { %v11258_v27 = vadd.f32 %v4428_v52, %v4252_v54 }
 0x890   : > { %6533 = vmatmul.msk.f32.gmra.mxu2 %vm612_vm2, %v11219_v7 }
 0x891   : > { %5551 = vperm.xlu1 %6819, %v11017_v55  }
 0x893   : > { %v11227_v23 = vpop.permute.xlu1 %5103  ;;  %5411 = vperm.xlu2 %6814, %v11055_v9  }
 0x894   : > { %5415 = vperm.xlu0 %6815, %v11038_v49   ;;  %v4402_v16 = vpop.permute.xlu0 %4401  ;;  %v11233_v22 = vpop.permute.xlu2 %5095 }
 0x895   : > { %6547 = vmatmul.msk.f32.gmra.mxu3 %vm612_vm2, %v13179_v56 }
 0x898   : > { %6534 = vmatmul.msk.f32.gmra.mxu2 %vm612_vm2, %v11238_v47 }
 0x899   : > { %5559 = vperm.xlu1 %6819, %v10970_v62  }
 0x89b   : > { %v5147_v17 = vpop.permute.xlu1 %5146  ;;  %5423 = vperm.xlu2 %6814, %v11072_v48  }
 0x89c   : > { %5164 = vmatpush.msrb.mxu0 %v5147_v17  ;;  %5427 = vperm.xlu0 %6815, %v11057_v20   ;;  %v11249_v28 = vpop.permute.xlu0 %4416  ;;  %v11251_v42 = vpop.permute.xlu2 %5107  ;;  %v13185_v17 = vld [vmem:[#allocation241_spill] sm:$0xff] }
 0x89d   : > { %13182 = vst [vmem:[#allocation164_spill] sm:$0xff] %v11251_v42  ;;  %6548 = vmatmul.msk.f32.gmra.mxu3 %vm612_vm2, %v11198_v40  ;;  %6558 = vmatmul.msk.f32.vlgmr.msrb.gmra.mxu0 %vm612_vm2, %v10799_v32  ;;  %v4429_v60 = vsel %vm4333_vm15, %v13185_v17, 0.0  ;;  %v13189_v17 = vld [vmem:[#allocation218_spill] sm:$0xff] }
 0x89e   : > { %v11281_v44 = vadd.f32 %v4429_v60, %v4253_v34  ;;  %vm4334_vm3 = vcmp.eq.s32.totalorder %v10786_v59, %v13189_v17 }
 0x89f   : > { %v4430_v45 = vsel %vm4334_vm3, %v13190_v4, 0.0 }
 0x8a0   : > { %6535 = vmatmul.msk.f32.gmra.mxu2 %vm612_vm2, %v11258_v27  ;;  %v11304_v17 = vadd.f32 %v4430_v45, %v4254_v14  ;;  %v13200_v14 = vld [vmem:[#allocation53_spill] sm:$0xff] }
 0x8a1   : > { %5571 = vperm.xlu1 %6819, %v10982_v0  }
 0x8a3   : > { %v11266_v15 = vpop.permute.xlu1 %5223  ;;  %5435 = vperm.xlu2 %6814, %v11084_v25  }
 0x8a4   : > { %13186 = vst [vmem:[#allocation175_spill] sm:$0xff] %v11266_v15  ;;  %5439 = vperm.xlu0 %6815, %v11074_v58   ;;  %v11272_v52 = vpop.permute.xlu0 %5055  ;;  %v11274_v54 = vpop.permute.xlu2 %5215  ;;  %v13213_v15 = vld [vmem:[#allocation209_spill] sm:$0xff] }
 0x8a5   : > { %6549 = vmatmul.msk.f32.gmra.mxu3 %vm612_vm2, %v11219_v7  ;;  %6559 = vmatmul.msk.f32.gmra.mxu0 %vm612_vm2, %v10815_v30  ;;  %v4257_v2 = vsel %vm4145_vm10, %v13213_v15, 0.0  ;;  %v4434_v15 = vsel %vm4338_vm11, %v11249_v28, 0.0 }
 0x8a8   : > { %6536 = vmatmul.msk.f32.gmra.mxu2 %vm612_vm2, %v11281_v44 }
 0x8a9   : > { %5583 = vperm.xlu1 %6819, %v10997_v41  }
 0x8ab   : > { %v11289_v37 = vpop.permute.xlu1 %5231  ;;  %6817 = vset.pattern.permute.xlu2 %v13170_v57 }
 0x8ac   : > { %13191 = vst [vmem:[#allocation109_spill] sm:$0xff] %v11289_v37  ;;  %6818 = vset.pattern.permute.xlu0 %v13170_v57  ;;  %v11295_v34 = vpop.permute.xlu0 %5075  ;;  %5543 = vperm.xlu2 %6817, %v10984_v24   ;;  %v11298_v60 = vpop.permute.xlu2 %5227  ;;  %v13196_v57 = vld [vmem:[#allocation14_spill] sm:$0xff]  ;;  %v4255_v37 = vsel %vm4143_vm6, %v13200_v14, 0.0  ;;  %v13203_v14 = vld [vmem:[#allocation208_spill] sm:$0xff] }
 0x8ad   : > { %13193 = vst [vmem:[#allocation70_spill] sm:$0xff] %v11295_v34  ;;  %6560 = vmatmul.msk.f32.gmra.mxu0 %vm612_vm2, %v10834_v61  ;;  %5547 = vperm.xlu0 %6818, %v10962_v46   ;;  %vm4335_vm5 = vcmp.eq.s32.totalorder %v10786_v59, %v13196_v57 }
 0x8ae   : > { %13194 = vst [vmem:[#allocation55_spill] sm:$0xff] %v11298_v60  ;;  %6550 = vmatmul.msk.f32.gmra.mxu3 %vm612_vm2, %v11238_v47  ;;  %v4431_v4 = vsel %vm4335_vm5, %v4402_v16, 0.0  ;;  %v13201_v16 = vld [vmem:[#allocation238_spill] sm:$0xff] }
 0x8af   : > { %v11326_v57 = vadd.f32 %v4431_v4, %v4255_v37  ;;  %vm4336_vm7 = vcmp.eq.s32.totalorder %v10786_v59, %v13201_v16  ;;  %v13205_v37 = vld [vmem:[#allocation30_spill] sm:$0xff] }
 0x8b0   : > { %6537 = vmatmul.msk.f32.gmra.mxu2 %vm612_vm2, %v11304_v17  ;;  %vm4144_vm8 = vcmp.eq.s32.totalorder %v10786_v59, %v13205_v37  ;;  %v13208_v37 = vld [vmem:[#allocation38_spill] sm:$0xff] }
 0x8b1   : > { %5595 = vperm.xlu1 %6819, %v11019_v50   ;;  %v4256_v35 = vsel %vm4144_vm8, %v13206_v63, 0.0 }
 0x8b3   : > { %v11313_v51 = vpop.permute.xlu1 %5243 }
 0x8b4   : > { %13197 = vst [vmem:[#allocation115_spill] sm:$0xff] %v11313_v51  ;;  %v11317_v34 = vpop.permute.xlu0 %5087  ;;  %5555 = vperm.xlu2 %6817, %v10999_v21   ;;  %v11320_v45 = vpop.permute.xlu2 %5235  ;;  %v4432_v51 = vsel %vm4336_vm7, %v13203_v14, 0.0  ;;  %v13207_v14 = vld [vmem:[#allocation220_spill] sm:$0xff] }
 0x8b5   : > { %13199 = vst [vmem:[#allocation81_spill] sm:$0xff] %v11320_v45  ;;  %6561 = vmatmul.msk.f32.gmra.mxu0 %vm612_vm2, %v13168_v6  ;;  %5567 = vperm.xlu0 %6818, %v11021_v11   ;;  %v11350_v16 = vadd.f32 %v4432_v51, %v4256_v35  ;;  %vm4337_vm9 = vcmp.eq.s32.totalorder %v10786_v59, %v13207_v14 }
 0x8b6   : > { %6551 = vmatmul.msk.f32.gmra.mxu3 %vm612_vm2, %v11258_v27  ;;  %v4433_v63 = vsel %vm4337_vm9, %v13208_v37, 0.0 }
 0x8b7   : > { %v11373_v14 = vadd.f32 %v4433_v63, %v4257_v2  ;;  %v13217_v63 = vld [vmem:[#allocation234_spill] sm:$0xff] }
 0x8b8   : > { %6538 = vmatmul.msk.f32.gmra.mxu2 %vm612_vm2, %v11326_v57 }
 0x8b9   : > { %5638 = vrot.lane.b32.xlu1 %v10754_v13, %s6959_s19 }
 0x8ba   : > { %6820 = vset.pattern.permute.xlu1 %v13202_v39 }
 0x8bb   : > { %v11337_v45 = vpop.permute.xlu1 %5255 }
 0x8bc   : > { %13204 = vst [vmem:[#allocation54_spill] sm:$0xff] %v11337_v45  ;;  %v11341_v4 = vpop.permute.xlu0 %5099  ;;  %5563 = vperm.xlu2 %6817, %v11036_v26   ;;  %v11344_v60 = vpop.permute.xlu2 %5247 }
 0x8bd   : > { %6562 = vmatmul.msk.f32.gmra.mxu0 %vm612_vm2, %v13174_v10  ;;  %5579 = vperm.xlu0 %6818, %v11038_v49  }
 0x8be   : > { %6552 = vmatmul.msk.f32.gmra.mxu3 %vm612_vm2, %v11281_v44 }
 0x8c0   : > { %6539 = vmatmul.msk.f32.gmra.mxu2 %vm612_vm2, %v11350_v16 }
 0x8c1   : > { %5707 = vperm.xlu1 %6820, %v10984_v24  }
 0x8c3   : > { %v11360_v45 = vpop.permute.xlu1 %5267 }
 0x8c4   : > { %13209 = vst [vmem:[#allocation26_spill] sm:$0xff] %v11360_v45  ;;  %v11364_v35 = vpop.permute.xlu0 %5111  ;;  %5575 = vperm.xlu2 %6817, %v11055_v9   ;;  %v11367_v51 = vpop.permute.xlu2 %5259  ;;  %v13215_v45 = vld [vmem:[#allocation192_spill] sm:$0xff] }
 0x8c5   : > { %13211 = vst [vmem:[#allocation213_spill] sm:$0xff] %v11364_v35  ;;  %6563 = vmatmul.msk.f32.gmra.mxu0 %vm612_vm2, %v13179_v56  ;;  %5591 = vperm.xlu0 %6818, %v11057_v20   ;;  %vm4146_vm12 = vcmp.eq.s32.totalorder %v10786_v59, %v13215_v45  ;;  %v11398_v59 = vpop.f32.mrf.mxu2 }
 0x8c6   : > { %13212 = vst [vmem:[#allocation72_spill] sm:$0xff] %v11367_v51  ;;  %6553 = vmatmul.msk.f32.gmra.mxu3 %vm612_vm2, %v11304_v17  ;;  %v4258_v51 = vsel %vm4146_vm12, %v13217_v63, 0.0 }
 0x8c7   : > { %v11394_v36 = vadd.f32 %v4434_v15, %v4258_v51 }
 0x8c8   : > { %6540 = vmatmul.msk.f32.gmra.mxu2 %vm612_vm2, %v11373_v14 }
 0x8c9   : > { %5719 = vperm.xlu1 %6820, %v10999_v21  }
 0x8cb   : > { %v5311_v37 = vpop.permute.xlu1 %5310 }
 0x8cc   : > { %5328 = vmatpush.msrb.mxu2 %v5311_v37  ;;  %5587 = vperm.xlu2 %6817, %v11072_v48   ;;  %v11386_v2 = vpop.permute.xlu2 %5271 }
 0x8cd   : > { %13216 = vst [vmem:[#allocation235_spill] sm:$0xff] %v11386_v2  ;;  %5603 = vperm.xlu0 %6818, %v11074_v58   ;;  %6564 = vmatmul.msk.f32.gmra.mxu0 %vm612_vm2, %v11198_v40  ;;  %v11392_v35 = vpop.permute.xlu0 %5219  ;;  %v11419_v15 = vpop.f32.mrf.mxu2 }
 0x8ce   : > { %13218 = vst [vmem:[#allocation58_spill] sm:$0xff] %v11392_v35  ;;  %6554 = vmatmul.msk.f32.gmra.mxu3 %vm612_vm2, %v11326_v57 }
 0x8d0   : > { %6541 = vmatmul.msk.f32.gmra.mxu2 %vm612_vm2, %v11394_v36 }
 0x8d1   : > { %5727 = vperm.xlu1 %6820, %v11036_v26  }
 0x8d3   : > { %v11403_v28 = vpop.permute.xlu1 %5387 }
 0x8d4   : > { %13219 = vst [vmem:[#allocation73_spill] sm:$0xff] %v11403_v28  ;;  %5599 = vperm.xlu2 %6817, %v11084_v25  }
 0x8d5   : > { %5802 = vrot.lane.b32.xlu0 %v10754_v13, %s6960_s28  ;;  %6565 = vmatmul.msk.f32.gmra.mxu0 %vm612_vm2, %v11219_v7  ;;  %v11409_v45 = vpop.permute.xlu0 %5239  ;;  %v11411_v51 = vpop.permute.xlu2 %5379 }
 0x8d6   : > { %13220 = vst [vmem:[#allocation50_spill] sm:$0xff] %v11409_v45  ;;  %6555 = vmatmul.msk.f32.gmra.mxu3 %vm612_vm2, %v11350_v16  ;;  %6822 = vset.pattern.permute.xlu0 %v13202_v39  ;;  %v11439_v45 = vpop.f32.mrf.mxu2 }
 0x8d7   : > { %13225 = vst [vmem:[#allocation61_spill] sm:$0xff] %v11439_v45  ;;  %v13232_v45 = vmov 6  }
 0x8d8   : > { %6574 = vmatmul.msk.f32.vlgmr.msrb.gmra.mxu2 %vm612_vm2, %v10799_v32 }
 0x8d9   : > { %5739 = vperm.xlu1 %6820, %v11055_v9  }
 0x8db   : > { %v11421_v37 = vpop.permute.xlu1 %5395 }
 0x8dc   : > { %13221 = vst [vmem:[#allocation120_spill] sm:$0xff] %v11421_v37  ;;  %5966 = vrot.lane.b32.xlu2 %v10754_v13, %s6961_s16 }
 0x8dd   : > { %5715 = vperm.xlu0 %6822, %v11017_v55   ;;  %6566 = vmatmul.msk.f32.gmra.mxu0 %vm612_vm2, %v11238_v47  ;;  %v11427_v63 = vpop.permute.xlu0 %5251  ;;  %v11429_v2 = vpop.permute.xlu2 %5391 }
 0x8de   : > { %13222 = vst [vmem:[#allocation9_spill] sm:$0xff] %v11427_v63  ;;  %6556 = vmatmul.msk.f32.gmra.mxu3 %vm612_vm2, %v11373_v14  ;;  %6821 = vset.pattern.permute.xlu2 %v13202_v39 }
 0x8df   : > { %13223 = vst [vmem:[#allocation204_spill] sm:$0xff] %v11429_v2 }
 0x8e0   : > { %6575 = vmatmul.msk.f32.gmra.mxu2 %vm612_vm2, %v10815_v30 }
 0x8e1   : > { %5751 = vperm.xlu1 %6820, %v11072_v48  }
 0x8e3   : > { %v11437_v13 = vpop.permute.xlu1 %5407 }
 0x8e4   : > { %13224 = vst [vmem:[#allocation112_spill] sm:$0xff] %v11437_v13  ;;  %5711 = vperm.xlu2 %6821, %v10962_v46  }
 0x8e5   : > { %5735 = vperm.xlu0 %6822, %v10982_v0   ;;  %6567 = vmatmul.msk.f32.gmra.mxu0 %vm612_vm2, %v11258_v27  ;;  %v11445_v37 = vpop.permute.xlu0 %5263  ;;  %v11447_v2 = vpop.permute.xlu2 %5399 }
 0x8e6   : > { %13226 = vst [vmem:[#allocation239_spill] sm:$0xff] %v11445_v37  ;;  %6557 = vmatmul.msk.f32.gmra.mxu3 %vm612_vm2, %v11394_v36  ;;  %v11464_v37 = vpop.f32.mrf.mxu2 }
 0x8e7   : > { %13227 = vst [vmem:[#allocation96_spill] sm:$0xff] %v11447_v2 }
 0x8e8   : > { %6576 = vmatmul.msk.f32.gmra.mxu2 %vm612_vm2, %v10834_v61  ;;  %13231 = vst [vmem:[#allocation18_spill] sm:$0xff] %v11464_v37 }
 0x8e9   : > { %5763 = vperm.xlu1 %6820, %v11084_v25  }
 0x8eb   : > { %v11454_v39 = vpop.permute.xlu1 %5419 }
 0x8ec   : > { %13228 = vst [vmem:[#allocation28_spill] sm:$0xff] %v11454_v39  ;;  %5723 = vperm.xlu2 %6821, %v10970_v62  }
 0x8ed   : > { %5747 = vperm.xlu0 %6822, %v10997_v41   ;;  %6568 = vmatmul.msk.f32.gmra.mxu0 %vm612_vm2, %v11281_v44  ;;  %v11460_v13 = vpop.permute.xlu0 %5275  ;;  %v11462_v2 = vpop.permute.xlu2 %5411 }
 0x8ee   : > { %13229 = vst [vmem:[#allocation20_spill] sm:$0xff] %v11460_v13  ;;  %v11486_v3 = vpop.f32.mrf.mxu2 }
 0x8ef   : > { %13230 = vst [vmem:[#allocation126_spill] sm:$0xff] %v11462_v2 }
 0x8f0   : > { %v11466_v28 = vpop.f32.mrf.mxu3  ;;  %6577 = vmatmul.msk.f32.gmra.mxu2 %vm612_vm2, %v13168_v6  ;;  %13236 = vst [vmem:[#allocation90_spill] sm:$0xff] %v11486_v3 }
 0x8f1   : > { %6824 = vset.pattern.permute.xlu1 %v13232_v45 }
 0x8f2   : > { %5875 = vperm.xlu1 %6824, %v10962_v46  }
 0x8f3   : > { %v11472_v39 = vpop.permute.xlu1 %5431 }
 0x8f4   : > { %13233 = vst [vmem:[#allocation7_spill] sm:$0xff] %v11472_v39  ;;  %5731 = vperm.xlu2 %6821, %v11021_v11  }
 0x8f5   : > { %5759 = vperm.xlu0 %6822, %v11019_v50   ;;  %6569 = vmatmul.msk.f32.gmra.mxu0 %vm612_vm2, %v11304_v17  ;;  %v11478_v2 = vpop.permute.xlu2 %5423 }
 0x8f6   : > { %13234 = vst [vmem:[#allocation94_spill] sm:$0xff] %v11478_v2  ;;  %v11480_v13 = vpop.permute.xlu0 %5383 }
 0x8f7   : > { %13235 = vst [vmem:[#allocation125_spill] sm:$0xff] %v11480_v13 }
 0x8f8   : > { %v11482_v37 = vpop.f32.mrf.mxu3  ;;  %6578 = vmatmul.msk.f32.gmra.mxu2 %vm612_vm2, %v13174_v10 }
 0x8fa   : > { %5883 = vperm.xlu1 %6824, %v10999_v21  }
 0x8fb   : > { %v5475_v39 = vpop.permute.xlu1 %5474 }
 0x8fc   : > { %5492 = vmatpush.msra.mxu3 %v5475_v39  ;;  %5743 = vperm.xlu2 %6821, %v11038_v49   ;;  %v11505_v39 = vpop.f32.mrf.mxu2 }
 0x8fd   : > { %6823 = vset.pattern.permute.xlu0 %v13232_v45  ;;  %6570 = vmatmul.msk.f32.gmra.mxu0 %vm612_vm2, %v11326_v57  ;;  %v11493_v2 = vpop.permute.xlu2 %5435  ;;  %13240 = vst [vmem:[#allocation6_spill] sm:$0xff] %v11505_v39 }
 0x8fe   : > { %13237 = vst [vmem:[#allocation41_spill] sm:$0xff] %v11493_v2  ;;  %6590 = vmatmul.msk.f32.vlgmr.msra.gmra.mxu3 %vm612_vm2, %v10799_v32  ;;  %5871 = vperm.xlu0 %6823, %v10984_v24   ;;  %v11498_v13 = vpop.permute.xlu0 %5403 }
 0x8ff   : > { %13238 = vst [vmem:[#allocation144_spill] sm:$0xff] %v11498_v13 }
 0x900   : > { %v11500_v3 = vpop.f32.mrf.mxu3  ;;  %6579 = vmatmul.msk.f32.gmra.mxu2 %vm612_vm2, %v13179_v56 }
 0x901   : > { %13239 = vst [vmem:[#allocation52_spill] sm:$0xff] %v11500_v3 }
 0x902   : > { %5895 = vperm.xlu1 %6824, %v11021_v11  }
 0x903   : > { %v11507_v63 = vpop.permute.xlu1 %5551 }
 0x904   : > { %13241 = vst [vmem:[#allocation130_spill] sm:$0xff] %v11507_v63  ;;  %5755 = vperm.xlu2 %6821, %v11057_v20  }
 0x905   : > { %6571 = vmatmul.msk.f32.gmra.mxu0 %vm612_vm2, %v11350_v16 }
 0x906   : > { %6591 = vmatmul.msk.f32.gmra.mxu3 %vm612_vm2, %v10815_v30  ;;  %5891 = vperm.xlu0 %6823, %v11036_v26   ;;  %v11515_v2 = vpop.permute.xlu0 %5415  ;;  %v11517_v13 = vpop.permute.xlu2 %5543 }
 0x907   : > { %13242 = vst [vmem:[#allocation35_spill] sm:$0xff] %v11515_v2 }
 0x908   : > { %13243 = vst [vmem:[#allocation161_spill] sm:$0xff] %v11517_v13  ;;  %v11519_v3 = vpop.f32.mrf.mxu3  ;;  %6580 = vmatmul.msk.f32.gmra.mxu2 %vm612_vm2, %v11198_v40 }
 0x909   : > { %13244 = vst [vmem:[#allocation135_spill] sm:$0xff] %v11519_v3 }
 0x90a   : > { %5907 = vperm.xlu1 %6824, %v11038_v49  }
 0x90b   : > { %v11524_v63 = vpop.permute.xlu1 %5559  ;;  %v11526_v39 = vpop.f32.mrf.mxu2 }
 0x90c   : > { %13245 = vst [vmem:[#allocation78_spill] sm:$0xff] %v11524_v63  ;;  %5767 = vperm.xlu2 %6821, %v11074_v58  }
 0x90d   : > { %13246 = vst [vmem:[#allocation29_spill] sm:$0xff] %v11526_v39  ;;  %6572 = vmatmul.msk.f32.gmra.mxu0 %vm612_vm2, %v11373_v14 }
 0x90e   : > { %6592 = vmatmul.msk.f32.gmra.mxu3 %vm612_vm2, %v10834_v61  ;;  %5903 = vperm.xlu0 %6823, %v11055_v9   ;;  %v11534_v13 = vpop.permute.xlu0 %5427  ;;  %v11536_v2 = vpop.permute.xlu2 %5555 }
 0x90f   : > { %13247 = vst [vmem:[#allocation82_spill] sm:$0xff] %v11534_v13 }
 0x910   : > { %13248 = vst [vmem:[#allocation13_spill] sm:$0xff] %v11536_v2  ;;  %v11538_v3 = vpop.f32.mrf.mxu3  ;;  %6581 = vmatmul.msk.f32.gmra.mxu2 %vm612_vm2, %v11219_v7 }
 0x911   : > { %13249 = vst [vmem:[#allocation44_spill] sm:$0xff] %v11538_v3 }
 0x912   : > { %5919 = vperm.xlu1 %6824, %v11057_v20  }
 0x913   : > { %v11543_v63 = vpop.permute.xlu1 %5571  ;;  %v11545_v39 = vpop.f32.mrf.mxu2 }
 0x914   : > { %13250 = vst [vmem:[#allocation110_spill] sm:$0xff] %v11543_v63  ;;  %6825 = vset.pattern.permute.xlu2 %v13232_v45 }
 0x915   : > { %13251 = vst [vmem:[#allocation216_spill] sm:$0xff] %v11545_v39  ;;  %6573 = vmatmul.msk.f32.gmra.mxu0 %vm612_vm2, %v11394_v36  ;;  %5879 = vperm.xlu2 %6825, %v11017_v55  }
 0x916   : > { %6593 = vmatmul.msk.f32.gmra.mxu3 %vm612_vm2, %v13168_v6  ;;  %5915 = vperm.xlu0 %6823, %v11072_v48   ;;  %v11554_v2 = vpop.permute.xlu0 %5439  ;;  %v11556_v13 = vpop.permute.xlu2 %5563 }
 0x917   : > { %13252 = vst [vmem:[#allocation127_spill] sm:$0xff] %v11554_v2 }
 0x918   : > { %13253 = vst [vmem:[#allocation34_spill] sm:$0xff] %v11556_v13  ;;  %v11558_v3 = vpop.f32.mrf.mxu3  ;;  %6582 = vmatmul.msk.f32.gmra.mxu2 %vm612_vm2, %v11238_v47 }
 0x919   : > { %13254 = vst [vmem:[#allocation68_spill] sm:$0xff] %v11558_v3 }
 0x91a   : > { %v11562_v45 = vpop.f32.mrf.mxu0  ;;  %5931 = vperm.xlu1 %6824, %v11074_v58  }
 0x91b   : > { %v11565_v63 = vpop.permute.xlu1 %5583  ;;  %v4845_v39 = vpop.f32.mrf.mxu2 }
 0x91c   : > { %13255 = vst [vmem:[#allocation165_spill] sm:$0xff] %v11565_v63  ;;  %v13260_v63 = vmov 7  }
 0x91d   : > { %5887 = vperm.xlu2 %6825, %v10970_v62  }
 0x91e   : > { %6594 = vmatmul.msk.f32.gmra.mxu3 %vm612_vm2, %v13174_v10  ;;  %5927 = vperm.xlu0 %6823, %v11084_v25   ;;  %v11571_v13 = vpop.permute.xlu2 %5575 }
 0x91f   : > { %13256 = vst [vmem:[#allocation118_spill] sm:$0xff] %v11571_v13  ;;  %v11573_v2 = vpop.permute.xlu0 %5547 }
 0x920   : > { %13257 = vst [vmem:[#allocation221_spill] sm:$0xff] %v11573_v2  ;;  %v11575_v3 = vpop.f32.mrf.mxu3  ;;  %6583 = vmatmul.msk.f32.gmra.mxu2 %vm612_vm2, %v11258_v27 }
 0x921   : > { %13258 = vst [vmem:[#allocation189_spill] sm:$0xff] %v11575_v3 }
 0x922   : > { %v11579_v42 = vpop.f32.mrf.mxu0  ;;  %6828 = vset.pattern.permute.xlu1 %v13260_v63 }
 0x923   : > { %13259 = vst [vmem:[#allocation98_spill] sm:$0xff] %v11579_v42  ;;  %v11582_v33 = vpop.permute.xlu1 %5595  ;;  %6043 = vperm.xlu1 %6828, %v11017_v55   ;;  %v4848_v35 = vpop.f32.mrf.mxu2 }
 0x924   : > { %13261 = vst [vmem:[#allocation143_spill] sm:$0xff] %v11582_v33 }
 0x925   : > { %5899 = vperm.xlu2 %6825, %v10982_v0  }
 0x926   : > { %6595 = vmatmul.msk.f32.gmra.mxu3 %vm612_vm2, %v13179_v56  ;;  %6827 = vset.pattern.permute.xlu0 %v13260_v63  ;;  %v11589_v13 = vpop.permute.xlu2 %5587 }
 0x927   : > { %13262 = vst [vmem:[#allocation3_spill] sm:$0xff] %v11589_v13  ;;  %6039 = vperm.xlu0 %6827, %v10962_v46   ;;  %v11592_v2 = vpop.permute.xlu0 %5567 }
 0x928   : > { %13263 = vst [vmem:[#allocation123_spill] sm:$0xff] %v11592_v2  ;;  %v11594_v3 = vpop.f32.mrf.mxu3  ;;  %6584 = vmatmul.msk.f32.gmra.mxu2 %vm612_vm2, %v11281_v44 }
 0x929   : > { %13264 = vst [vmem:[#allocation97_spill] sm:$0xff] %v11594_v3 }
 0x92a   : > { %v11598_v55 = vpop.f32.mrf.mxu0 }
 0x92b   : > { %13265 = vst [vmem:[#allocation193_spill] sm:$0xff] %v11598_v55  ;;  %v5639_v33 = vpop.permute.xlu1 %5638  ;;  %6051 = vperm.xlu1 %6828, %v10970_v62   ;;  %v4851_v25 = vpop.f32.mrf.mxu2 }
 0x92c   : > { %5656 = vmatpush.msrb.mxu1 %v5639_v33  ;;  %v4957_v33 = vmul.f32 %v11134_v1, %v4845_v39 }
 0x92d   : > { %6606 = vmatmul.msk.f32.vlgmr.msrb.gmra.mxu1 %vm612_vm2, %v10799_v32  ;;  %5911 = vperm.xlu2 %6825, %v10997_v41  }
 0x92e   : > { %6596 = vmatmul.msk.f32.gmra.mxu3 %vm612_vm2, %v11198_v40  ;;  %v11606_v46 = vpop.permute.xlu2 %5599 }
 0x92f   : > { %13266 = vst [vmem:[#allocation12_spill] sm:$0xff] %v11606_v46  ;;  %6059 = vperm.xlu0 %6827, %v11021_v11   ;;  %v11609_v13 = vpop.permute.xlu0 %5579 }
 0x930   : > { %6585 = vmatmul.msk.f32.gmra.mxu2 %vm612_vm2, %v11304_v17 }
 0x931   : > { %v5026_v62 = vpop.f32.mrf.mxu3 }
 0x932   : > { %v5122_v2 = vmul.f32 %v11214_v53, %v5026_v62  ;;  %v11615_v3 = vpop.f32.mrf.mxu0  ;;  %v4958_v53 = vmul.f32 %v11155_v8, %v4848_v35  ;;  %v4959_v8 = vmul.f32 %v11136_v5, %v4851_v25 }
 0x933   : > { %6063 = vperm.xlu1 %6828, %v10982_v0   ;;  %v4854_v55 = vpop.f32.mrf.mxu2 }
 0x934   : > { %v11618_v42 = vadd.f32 %v5122_v2, %v4957_v33 }
 0x935   : > { %6607 = vmatmul.msk.f32.gmra.mxu1 %vm612_vm2, %v10815_v30  ;;  %5923 = vperm.xlu2 %6825, %v11019_v50  }
 0x936   : > { %6597 = vmatmul.msk.f32.gmra.mxu3 %vm612_vm2, %v11219_v7  ;;  %v5967_v11 = vpop.permute.xlu2 %5966 }
 0x937   : > { %6071 = vperm.xlu0 %6827, %v11038_v49   ;;  %v11626_v1 = vpop.permute.xlu0 %5591  ;;  %5984 = vmatpush.msra.mxu2 %v5967_v11 }
 0x938   : > { %6586 = vmatmul.msk.f32.gmra.mxu2 %vm612_vm2, %v11326_v57 }
 0x939   : > { %v5029_v0 = vpop.f32.mrf.mxu3 }
 0x93a   : > { %v5123_v2 = vmul.f32 %v11317_v34, %v5029_v0  ;;  %v11632_v39 = vpop.f32.mrf.mxu0 }
 0x93b   : > { %6075 = vperm.xlu1 %6828, %v10997_v41   ;;  %v4857_v62 = vpop.f32.mrf.mxu2 }
 0x93c   : > { %v11635_v33 = vadd.f32 %v5123_v2, %v4958_v53 }
 0x93d   : > { %6608 = vmatmul.msk.f32.gmra.mxu1 %vm612_vm2, %v10834_v61  ;;  %6826 = vset.pattern.permute.xlu2 %v13260_v63 }
 0x93e   : > { %6598 = vmatmul.msk.f32.gmra.mxu3 %vm612_vm2, %v11238_v47  ;;  %6035 = vperm.xlu2 %6826, %v10984_v24  }
 0x93f   : > { %6083 = vperm.xlu0 %6827, %v11057_v20   ;;  %v11644_v49 = vpop.permute.xlu0 %5603 }
 0x940   : > { %13267 = vst [vmem:[#allocation102_spill] sm:$0xff] %v11644_v49  ;;  %6587 = vmatmul.msk.f32.gmra.mxu2 %vm612_vm2, %v11350_v16  ;;  %v13334_v49 = vld [vmem:[#allocation161_spill] sm:$0xff] }
 0x941   : > { %v5032_v41 = vpop.f32.mrf.mxu3 }
 0x942   : > { %v5124_v34 = vmul.f32 %v11208_v43, %v5032_v41  ;;  %v11650_v35 = vpop.f32.mrf.mxu0 }
 0x943   : > { %6087 = vperm.xlu1 %6828, %v11019_v50   ;;  %v4860_v63 = vpop.f32.mrf.mxu2  ;;  %v4960_v50 = vmul.f32 %v11144_v38, %v4854_v55 }
 0x944   : > { %v11653_v11 = vadd.f32 %v5124_v34, %v4959_v8 }
 0x945   : > { %6609 = vmatmul.msk.f32.gmra.mxu1 %vm612_vm2, %v13168_v6 }
 0x946   : > { %6599 = vmatmul.msk.f32.gmra.mxu3 %vm612_vm2, %v11258_v27  ;;  %6047 = vperm.xlu2 %6826, %v10999_v21  }
 0x947   : > { %6095 = vperm.xlu0 %6827, %v11074_v58   ;;  %v5803_v24 = vpop.permute.xlu0 %5802  ;;  %v4961_v58 = vmul.f32 %v11164_v31, %v4857_v62  ;;  %v4949_v31 = vmul.f32 %v11128_v12, %v11398_v59 }
 0x948   : > { %6588 = vmatmul.msk.f32.gmra.mxu2 %vm612_vm2, %v11373_v14  ;;  %5820 = vmatpush.msra.mxu0 %v5803_v24  ;;  %v13271_v24 = vld [vmem:[#allocation164_spill] sm:$0xff] }
 0x949   : > { %v5035_v20 = vpop.f32.mrf.mxu3  ;;  %6622 = vmatmul.msk.f32.vlgmr.msra.gmra.mxu0 %vm612_vm2, %v10799_v32 }
 0x94a   : > { %v5125_v25 = vmul.f32 %v11233_v22, %v5035_v20  ;;  %v11667_v5 = vpop.f32.mrf.mxu0 }
 0x94b   : > { %v4863_v43 = vpop.f32.mrf.mxu2 }
 0x94c   : > { %v11669_v0 = vadd.f32 %v5125_v25, %v4960_v50 }
 0x94d   : > { %6610 = vmatmul.msk.f32.gmra.mxu1 %vm612_vm2, %v13174_v10 }
 0x94e   : > { %6600 = vmatmul.msk.f32.gmra.mxu3 %vm612_vm2, %v11281_v44  ;;  %6055 = vperm.xlu2 %6826, %v11036_v26   ;;  %v5114_v26 = vmul.f32 %v11167_v29, %v11466_v28  ;;  %v4962_v29 = vmul.f32 %v11146_v19, %v4860_v63  ;;  %v5115_v19 = vmul.f32 %v11272_v52, %v11482_v37  ;;  %v13270_v37 = vld [vmem:[#allocation83_spill] sm:$0xff] }
 0x94f   : > { %v4963_v63 = vmul.f32 %v13270_v37, %v4863_v43 }
 0x950   : > { %6589 = vmatmul.msk.f32.gmra.mxu2 %vm612_vm2, %v11394_v36  ;;  %v5130_v62 = vadd.f32 %v5114_v26, %v4949_v31  ;;  %v13274_v26 = vld [vmem:[#allocation52_spill] sm:$0xff]  ;;  %v13275_v31 = vld [vmem:[#allocation243_spill] sm:$0xff] }
 0x951   : > { %v5038_v21 = vpop.f32.mrf.mxu3  ;;  %6623 = vmatmul.msk.f32.gmra.mxu0 %vm612_vm2, %v10815_v30  ;;  %v5116_v43 = vmul.f32 %v13275_v31, %v13274_v26  ;;  %v13289_v26 = vld [vmem:[#allocation55_spill] sm:$0xff] }
 0x952   : > { %v5126_v38 = vmul.f32 %v11341_v4, %v5038_v21  ;;  %v11682_v22 = vpop.f32.mrf.mxu0  ;;  %v5278_v4 = vmul.f32 %v11274_v54, %v11562_v45  ;;  %v5281_v31 = vmul.f32 %v13289_v26, %v11615_v3  ;;  %v13292_v3 = vld [vmem:[#allocation44_spill] sm:$0xff] }
 0x953   : > { %v4866_v55 = vpop.f32.mrf.mxu2 }
 0x954   : > { %v11684_v53 = vadd.f32 %v5126_v38, %v4961_v58  ;;  %v5294_v12 = vadd.f32 %v5278_v4, %v5130_v62  ;;  %v13273_v58 = vld [vmem:[#allocation125_spill] sm:$0xff] }
 0x955   : > { %6611 = vmatmul.msk.f32.gmra.mxu1 %vm612_vm2, %v13179_v56  ;;  %v13277_v62 = vld [vmem:[#allocation61_spill] sm:$0xff] }
 0x956   : > { %6601 = vmatmul.msk.f32.gmra.mxu3 %vm612_vm2, %v11304_v17  ;;  %6067 = vperm.xlu2 %6826, %v11055_v9  }
 0x958   : > { %6638 = vmatmul.msk.f32.vlgmr.msra.gmra.mxu2 %vm612_vm2, %v10799_v32 }
 0x959   : > { %v5041_v2 = vpop.f32.mrf.mxu3  ;;  %6624 = vmatmul.msk.f32.gmra.mxu0 %vm612_vm2, %v10834_v61 }
 0x95a   : > { %v5127_v28 = vmul.f32 %v11227_v23, %v5041_v2  ;;  %v5190_v41 = vpop.f32.mrf.mxu0  ;;  %v4950_v23 = vmul.f32 %v11111_v18, %v11419_v15  ;;  %v13276_v2 = vld [vmem:[#allocation185_spill] sm:$0xff] }
 0x95b   : > { %v5286_v9 = vmul.f32 %v11344_v60, %v5190_v41  ;;  %v5330_v8 = vpop.f32.mrf.mxu2  ;;  %v13268_v60 = vld [vmem:[#allocation98_spill] sm:$0xff]  ;;  %v13279_v41 = vld [vmem:[#allocation193_spill] sm:$0xff] }
 0x95c   : > { %v11704_v59 = vadd.f32 %v5127_v28, %v4962_v29  ;;  %v5442_v54 = vmul.f32 %v11411_v51, %v5330_v8  ;;  %v13269_v51 = vld [vmem:[#allocation58_spill] sm:$0xff]  ;;  %v5131_v52 = vadd.f32 %v5115_v19, %v4950_v23  ;;  %v13278_v29 = vld [vmem:[#allocation155_spill] sm:$0xff]  ;;  %v13282_v23 = vld [vmem:[#allocation213_spill] sm:$0xff] }
 0x95d   : > { %v11708_v32 = vadd.f32 %v5286_v9, %v11618_v42  ;;  %6612 = vmatmul.msk.f32.gmra.mxu1 %vm612_vm2, %v11198_v40  ;;  %v5279_v42 = vmul.f32 %v13269_v51, %v13268_v60  ;;  %v4951_v28 = vmul.f32 %v13278_v29, %v13277_v62  ;;  %v13280_v9 = vld [vmem:[#allocation175_spill] sm:$0xff]  ;;  %v13290_v62 = vld [vmem:[#allocation72_spill] sm:$0xff] }
 0x95e   : > { %v11714_v45 = vadd.f32 %v5442_v54, %v5294_v12  ;;  %6602 = vmatmul.msk.f32.gmra.mxu3 %vm612_vm2, %v11326_v57  ;;  %6079 = vperm.xlu2 %6826, %v11072_v48   ;;  %v13272_v48 = vld [vmem:[#allocation9_spill] sm:$0xff] }
 0x95f   : > { %v5295_v18 = vadd.f32 %v5279_v42, %v5131_v52  ;;  %v5132_v12 = vadd.f32 %v5116_v43, %v4951_v28  ;;  %v13281_v54 = vld [vmem:[#allocation133_spill] sm:$0xff]  ;;  %v13283_v42 = vld [vmem:[#allocation54_spill] sm:$0xff] }
 0x960   : > { %6639 = vmatmul.msk.f32.gmra.mxu2 %vm612_vm2, %v10815_v30  ;;  %v4964_v19 = vmul.f32 %v13281_v54, %v4866_v55  ;;  %v13285_v55 = vld [vmem:[#allocation135_spill] sm:$0xff] }
 0x961   : > { %v5044_v34 = vpop.f32.mrf.mxu3  ;;  %6625 = vmatmul.msk.f32.gmra.mxu0 %vm612_vm2, %v13168_v6 }
 0x962   : > { %v5128_v20 = vmul.f32 %v13271_v24, %v5044_v34  ;;  %v5193_v50 = vpop.f32.mrf.mxu0 }
 0x963   : > { %v5287_v25 = vmul.f32 %v13272_v48, %v5193_v50  ;;  %v5333_v21 = vpop.f32.mrf.mxu2  ;;  %v13286_v48 = vld [vmem:[#allocation181_spill] sm:$0xff] }
 0x964   : > { %v11730_v15 = vadd.f32 %v5128_v20, %v4963_v63  ;;  %v5443_v38 = vmul.f32 %v13273_v58, %v5333_v21  ;;  %v11756_v63 = vpop.permute.xlu2 %5711  ;;  %v13284_v20 = vld [vmem:[#allocation73_spill] sm:$0xff]  ;;  %v13288_v58 = vld [vmem:[#allocation67_spill] sm:$0xff] }
 0x965   : > { %v11734_v30 = vadd.f32 %v5287_v25, %v11635_v33  ;;  %6613 = vmatmul.msk.f32.gmra.mxu1 %vm612_vm2, %v11219_v7  ;;  %v5280_v33 = vmul.f32 %v13280_v9, %v13279_v41  ;;  %v5117_v25 = vmul.f32 %v13286_v48, %v13285_v55  ;;  %v13291_v9 = vld [vmem:[#allocation204_spill] sm:$0xff] }
 0x966   : > { %v11740_v4 = vadd.f32 %v5443_v38, %v5295_v18  ;;  %6603 = vmatmul.msk.f32.gmra.mxu3 %vm612_vm2, %v11350_v16  ;;  %6091 = vperm.xlu2 %6826, %v13276_v2   ;;  %v13287_v18 = vld [vmem:[#allocation18_spill] sm:$0xff]  ;;  %v11780_v2 = vpop.permute.xlu1 %5707  ;;  %v13298_v48 = vld [vmem:[#allocation120_spill] sm:$0xff] }
 0x967   : > { %v5296_v37 = vadd.f32 %v5280_v33, %v5132_v12  ;;  %v4952_v38 = vmul.f32 %v13288_v58, %v13287_v18 }
 0x968   : > { %6640 = vmatmul.msk.f32.gmra.mxu2 %vm612_vm2, %v10834_v61 }
 0x969   : > { %v5047_v8 = vpop.f32.mrf.mxu3  ;;  %6626 = vmatmul.msk.f32.gmra.mxu0 %vm612_vm2, %v13174_v10 }
 0x96a   : > { %v5129_v60 = vmul.f32 %v13282_v23, %v5047_v8  ;;  %v5196_v51 = vpop.f32.mrf.mxu0  ;;  %v13294_v23 = vld [vmem:[#allocation90_spill] sm:$0xff] }
 0x96b   : > { %v5288_v34 = vmul.f32 %v13283_v42, %v5196_v51  ;;  %v5336_v52 = vpop.f32.mrf.mxu2  ;;  %v13296_v42 = vld [vmem:[#allocation109_spill] sm:$0xff] }
 0x96c   : > { %v11758_v24 = vadd.f32 %v5129_v60, %v4964_v19  ;;  %v5444_v61 = vmul.f32 %v13284_v20, %v5336_v52  ;;  %v11791_v54 = vpop.permute.xlu2 %5723  ;;  %v13295_v60 = vld [vmem:[#allocation111_spill] sm:$0xff] }
 0x96d   : > { %v11762_v50 = vadd.f32 %v5288_v34, %v11653_v11  ;;  %6614 = vmatmul.msk.f32.gmra.mxu1 %vm612_vm2, %v11238_v47  ;;  %v5133_v11 = vadd.f32 %v5117_v25, %v4952_v38  ;;  %v4953_v51 = vmul.f32 %v13295_v60, %v13294_v23 }
 0x96e   : > { %v11768_v21 = vadd.f32 %v5444_v61, %v5296_v37  ;;  %6604 = vmatmul.msk.f32.gmra.mxu3 %vm612_vm2, %v11373_v14  ;;  %v13297_v37 = vld [vmem:[#allocation239_spill] sm:$0xff]  ;;  %v11807_v18 = vpop.permute.xlu1 %5719 }
 0x96f   : > { %v5297_v41 = vadd.f32 %v5281_v31, %v5133_v11  ;;  %v13301_v31 = vld [vmem:[#allocation6_spill] sm:$0xff]  ;;  %v13302_v11 = vld [vmem:[#allocation225_spill] sm:$0xff] }
 0x970   : > { %6641 = vmatmul.msk.f32.gmra.mxu2 %vm612_vm2, %v13168_v6  ;;  %v13293_v6 = vld [vmem:[#allocation32_spill] sm:$0xff] }
 0x971   : > { %6627 = vmatmul.msk.f32.gmra.mxu0 %vm612_vm2, %v13179_v56  ;;  %v5118_v12 = vmul.f32 %v13293_v6, %v13292_v3 }
 0x972   : > { %v5199_v43 = vpop.f32.mrf.mxu0 }
 0x973   : > { %v5289_v29 = vmul.f32 %v13290_v62, %v5199_v43  ;;  %v5339_v28 = vpop.f32.mrf.mxu2  ;;  %v5134_v34 = vadd.f32 %v5118_v12, %v4953_v51  ;;  %v4954_v43 = vmul.f32 %v13302_v11, %v13301_v31  ;;  %v13303_v62 = vld [vmem:[#allocation81_spill] sm:$0xff]  ;;  %v13305_v12 = vld [vmem:[#allocation96_spill] sm:$0xff]  ;;  %v13307_v51 = vld [vmem:[#allocation70_spill] sm:$0xff] }
 0x974   : > { %v5445_v33 = vmul.f32 %v13291_v9, %v5339_v28  ;;  %v11822_v28 = vpop.permute.xlu2 %5731  ;;  %v13304_v9 = vld [vmem:[#allocation26_spill] sm:$0xff]  ;;  %v13312_v11 = vld [vmem:[#allocation144_spill] sm:$0xff] }
 0x975   : > { %v11785_v8 = vadd.f32 %v5289_v29, %v11669_v0  ;;  %6615 = vmatmul.msk.f32.gmra.mxu1 %vm612_vm2, %v11258_v27  ;;  %v5282_v0 = vmul.f32 %v13296_v42, %v11632_v39  ;;  %v13300_v39 = vld [vmem:[#allocation231_spill] sm:$0xff]  ;;  %v5283_v29 = vmul.f32 %v13303_v62, %v11650_v35  ;;  %v13306_v35 = vld [vmem:[#allocation189_spill] sm:$0xff]  ;;  %v13314_v62 = vld [vmem:[#allocation74_spill] sm:$0xff] }
 0x976   : > { %v11793_v19 = vadd.f32 %v5445_v33, %v5297_v41  ;;  %6605 = vmatmul.msk.f32.gmra.mxu3 %vm612_vm2, %v11394_v36 }
 0x977   : > { %v5298_v55 = vadd.f32 %v5282_v0, %v5134_v34  ;;  %v11839_v0 = vpop.permute.xlu1 %5727  ;;  %v13308_v34 = vld [vmem:[#allocation29_spill] sm:$0xff] }
 0x978   : > { %6642 = vmatmul.msk.f32.gmra.mxu2 %vm612_vm2, %v13174_v10  ;;  %v13299_v10 = vld [vmem:[#allocation68_spill] sm:$0xff] }
 0x979   : > { %6628 = vmatmul.msk.f32.gmra.mxu0 %vm612_vm2, %v11198_v40  ;;  %v5119_v38 = vmul.f32 %v13300_v39, %v13299_v10  ;;  %v13311_v10 = vld [vmem:[#allocation235_spill] sm:$0xff] }
 0x97a   : > { %v5202_v52 = vpop.f32.mrf.mxu0 }
 0x97b   : > { %v5290_v20 = vmul.f32 %v13297_v37, %v5202_v52  ;;  %v5342_v61 = vpop.f32.mrf.mxu2  ;;  %v13309_v52 = vld [vmem:[#allocation230_spill] sm:$0xff] }
 0x97c   : > { %v5446_v25 = vmul.f32 %v13298_v48, %v5342_v61  ;;  %v4955_v37 = vmul.f32 %v13309_v52, %v13308_v34  ;;  %v11851_v48 = vpop.permute.xlu2 %5743 }
 0x97d   : > { %v11810_v58 = vadd.f32 %v5290_v20, %v11684_v53  ;;  %6616 = vmatmul.msk.f32.gmra.mxu1 %vm612_vm2, %v11281_v44  ;;  %v5135_v53 = vadd.f32 %v5119_v38, %v4954_v43  ;;  %v13310_v20 = vld [vmem:[#allocation50_spill] sm:$0xff] }
 0x97e   : > { %v11816_v26 = vadd.f32 %v5446_v25, %v5298_v55  ;;  %v5284_v61 = vmul.f32 %v13310_v20, %v11667_v5  ;;  %v13319_v20 = vld [vmem:[#allocation112_spill] sm:$0xff] }
 0x97f   : > { %v5299_v6 = vadd.f32 %v5283_v29, %v5135_v53 }
 0x980   : > { %6643 = vmatmul.msk.f32.gmra.mxu2 %vm612_vm2, %v13179_v56  ;;  %v5120_v56 = vmul.f32 %v13307_v51, %v13306_v35  ;;  %v13318_v51 = vld [vmem:[#allocation20_spill] sm:$0xff] }
 0x981   : > { %6629 = vmatmul.msk.f32.gmra.mxu0 %vm612_vm2, %v11219_v7 }
 0x982   : > { %v5205_v41 = vpop.f32.mrf.mxu0  ;;  %v5136_v55 = vadd.f32 %v5120_v56, %v4955_v37 }
 0x983   : > { %v5291_v33 = vmul.f32 %v13304_v9, %v5205_v41  ;;  %v5345_v3 = vpop.f32.mrf.mxu2  ;;  %v13315_v41 = vld [vmem:[#allocation216_spill] sm:$0xff] }
 0x984   : > { %v5447_v23 = vmul.f32 %v13305_v12, %v5345_v3  ;;  %v5300_v31 = vadd.f32 %v5284_v61, %v5136_v55  ;;  %v13316_v9 = vld [vmem:[#allocation36_spill] sm:$0xff]  ;;  %v13317_v3 = vld [vmem:[#allocation115_spill] sm:$0xff]  ;;  %v11870_v12 = vpop.permute.xlu1 %5739  ;;  %v11877_v37 = vpop.permute.xlu2 %5755 }
 0x985   : > { %v11831_v60 = vadd.f32 %v5291_v33, %v11704_v59  ;;  %6617 = vmatmul.msk.f32.gmra.mxu1 %vm612_vm2, %v11304_v17  ;;  %v11847_v59 = vpop.permute.xlu0 %5715  ;;  %v4956_v33 = vmul.f32 %v13316_v9, %v13315_v41  ;;  %v13325_v41 = vld [vmem:[#allocation28_spill] sm:$0xff] }
 0x986   : > { %v11837_v42 = vadd.f32 %v5447_v23, %v5299_v6  ;;  %v5285_v6 = vmul.f32 %v13317_v3, %v11682_v22 }
 0x988   : > { %6644 = vmatmul.msk.f32.gmra.mxu2 %vm612_vm2, %v11198_v40  ;;  %v13313_v40 = vld [vmem:[#allocation97_spill] sm:$0xff] }
 0x989   : > { %6630 = vmatmul.msk.f32.gmra.mxu0 %vm612_vm2, %v11238_v47  ;;  %v5121_v29 = vmul.f32 %v13314_v62, %v13313_v40 }
 0x98a   : > { %v5208_v25 = vpop.f32.mrf.mxu0 }
 0x98b   : > { %v5292_v39 = vmul.f32 %v13311_v10, %v5208_v25  ;;  %v5348_v38 = vpop.f32.mrf.mxu2  ;;  %v13320_v10 = vld [vmem:[#allocation126_spill] sm:$0xff] }
 0x98c   : > { %v5448_v43 = vmul.f32 %v13312_v11, %v5348_v38  ;;  %v11891_v55 = vpop.permute.xlu1 %5751  ;;  %v13322_v11 = vld [vmem:[#allocation35_spill] sm:$0xff] }
 0x98d   : > { %v11856_v5 = vadd.f32 %v5292_v39, %v11730_v15  ;;  %6618 = vmatmul.msk.f32.gmra.mxu1 %vm612_vm2, %v11326_v57  ;;  %v5137_v15 = vadd.f32 %v5121_v29, %v4956_v33  ;;  %v11874_v35 = vpop.permute.xlu0 %5735 }
 0x98e   : > { %v11862_v53 = vadd.f32 %v5448_v43, %v5300_v31 }
 0x98f   : > { %v5301_v52 = vadd.f32 %v5285_v6, %v5137_v15 }
 0x990   : > { %6645 = vmatmul.msk.f32.gmra.mxu2 %vm612_vm2, %v11219_v7 }
 0x991   : > { %6631 = vmatmul.msk.f32.gmra.mxu0 %vm612_vm2, %v11258_v27 }
 0x992   : > { %v5211_v23 = vpop.f32.mrf.mxu0 }
 0x993   : > { %v5293_v56 = vmul.f32 %v13318_v51, %v5211_v23  ;;  %v5351_v34 = vpop.f32.mrf.mxu2  ;;  %v13326_v23 = vld [vmem:[#allocation94_spill] sm:$0xff] }
 0x994   : > { %v5449_v22 = vmul.f32 %v13319_v20, %v5351_v34  ;;  %v11908_v40 = vpop.permute.xlu1 %5763 }
 0x995   : > { %v11881_v61 = vadd.f32 %v5293_v56, %v11758_v24  ;;  %6619 = vmatmul.msk.f32.gmra.mxu1 %vm612_vm2, %v11350_v16  ;;  %v11894_v38 = vpop.permute.xlu0 %5747  ;;  %v11898_v24 = vpop.permute.xlu2 %5767  ;;  %13323 = vst [vmem:[#allocation95_spill] sm:$0xff] %v11908_v40 }
 0x996   : > { %v11885_v7 = vadd.f32 %v5449_v22, %v5301_v52  ;;  %13321 = vst [vmem:[#allocation91_spill] sm:$0xff] %v11898_v24  ;;  %v13327_v22 = vld [vmem:[#allocation82_spill] sm:$0xff] }
 0x998   : > { %6646 = vmatmul.msk.f32.gmra.mxu2 %vm612_vm2, %v11238_v47 }
 0x999   : > { %6632 = vmatmul.msk.f32.gmra.mxu0 %vm612_vm2, %v11281_v44 }
 0x99b   : > { %v5354_v25 = vpop.f32.mrf.mxu2 }
 0x99c   : > { %v5450_v39 = vmul.f32 %v13320_v10, %v5354_v25  ;;  %v11927_v3 = vpop.permute.xlu1 %5875 }
 0x99d   : > { %6620 = vmatmul.msk.f32.gmra.mxu1 %vm612_vm2, %v11373_v14  ;;  %v11915_v29 = vpop.permute.xlu0 %5759 }
 0x99e   : > { %v11901_v31 = vadd.f32 %v5450_v39, %v11708_v32  ;;  %13324 = vst [vmem:[#allocation188_spill] sm:$0xff] %v11915_v29  ;;  %v11917_v32 = vpop.permute.xlu2 %5879 }
 0x9a0   : > { %6647 = vmatmul.msk.f32.gmra.mxu2 %vm612_vm2, %v11258_v27 }
 0x9a1   : > { %6633 = vmatmul.msk.f32.gmra.mxu0 %vm612_vm2, %v11304_v17 }
 0x9a3   : > { %v5357_v47 = vpop.f32.mrf.mxu2 }
 0x9a4   : > { %v5451_v43 = vmul.f32 %v13322_v11, %v5357_v47  ;;  %v13329_v11 = vld [vmem:[#allocation7_spill] sm:$0xff] }
 0x9a5   : > { %6621 = vmatmul.msk.f32.gmra.mxu1 %vm612_vm2, %v11394_v36 }
 0x9a6   : > { %v11913_v62 = vadd.f32 %v5451_v43, %v11734_v30  ;;  %v5872_v30 = vpop.permute.xlu0 %5871  ;;  %v11933_v6 = vpop.permute.xlu2 %5887 }
 0x9a8   : > { %6648 = vmatmul.msk.f32.gmra.mxu2 %vm612_vm2, %v11281_v44  ;;  %v5494_v44 = vpop.f32.mrf.mxu3 }
 0x9a9   : > { %6634 = vmatmul.msk.f32.gmra.mxu0 %vm612_vm2, %v11326_v57 }
 0x9aa   : > { %v5658_v56 = vpop.f32.mrf.mxu1 }
 0x9ab   : > { %v5360_v27 = vpop.f32.mrf.mxu2 }
 0x9ac   : > { %v5452_v9 = vmul.f32 %v13325_v41, %v5360_v27 }
 0x9ae   : > { %v11925_v33 = vadd.f32 %v5452_v9, %v11762_v50  ;;  %v11941_v50 = vpop.permute.xlu1 %5883  ;;  %v11947_v20 = vpop.permute.xlu2 %5899 }
 0x9b0   : > { %6649 = vmatmul.msk.f32.gmra.mxu2 %vm612_vm2, %v11304_v17  ;;  %v11945_v17 = vpop.permute.xlu0 %5891  ;;  %v5497_v10 = vpop.f32.mrf.mxu3 }
 0x9b1   : > { %6635 = vmatmul.msk.f32.gmra.mxu0 %vm612_vm2, %v11350_v16 }
 0x9b3   : > { %v5363_v15 = vpop.f32.mrf.mxu2 }
 0x9b4   : > { %v5453_v51 = vmul.f32 %v13326_v23, %v5363_v15 }
 0x9b6   : > { %v11937_v34 = vadd.f32 %v5453_v51, %v11785_v8  ;;  %v5661_v8 = vpop.f32.mrf.mxu1  ;;  %v11962_v41 = vpop.permute.xlu2 %5911  ;;  %v13331_v51 = vld [vmem:[#allocation41_spill] sm:$0xff] }
 0x9b8   : > { %6650 = vmatmul.msk.f32.gmra.mxu2 %vm612_vm2, %v11326_v57  ;;  %v11957_v57 = vpop.permute.xlu1 %5895  ;;  %v11960_v27 = vpop.permute.xlu0 %5903 }
 0x9b9   : > { %6636 = vmatmul.msk.f32.gmra.mxu0 %vm612_vm2, %v11373_v14  ;;  %v5500_v15 = vpop.f32.mrf.mxu3 }
 0x9bb   : > { %v5366_v52 = vpop.f32.mrf.mxu2 }
 0x9bc   : > { %v5454_v25 = vmul.f32 %v13327_v22, %v5366_v52 }
 0x9be   : > { %v11951_v39 = vadd.f32 %v5454_v25, %v11810_v58 }
 0x9c0   : > { %13328 = vst [vmem:[#allocation62_spill] sm:$0xff] %v11951_v39  ;;  %6651 = vmatmul.msk.f32.gmra.mxu2 %vm612_vm2, %v11350_v16  ;;  %v5664_v16 = vpop.f32.mrf.mxu1  ;;  %v11970_v22 = vpop.permute.xlu1 %5907 }
 0x9c1   : > { %6637 = vmatmul.msk.f32.gmra.mxu0 %vm612_vm2, %v11394_v36 }
 0x9c3   : > { %v5369_v47 = vpop.f32.mrf.mxu2 }
 0x9c4   : > { %v5455_v43 = vmul.f32 %v13329_v11, %v5369_v47  ;;  %v11975_v11 = vpop.permute.xlu0 %5915 }
 0x9c6   : > { %v11965_v9 = vadd.f32 %v5455_v43, %v11831_v60  ;;  %v5822_v58 = vpop.f32.mrf.mxu0  ;;  %v11977_v60 = vpop.permute.xlu2 %5923 }
 0x9c7   : > { %13333 = vst [vmem:[#allocation88_spill] sm:$0xff] %v11977_v60  ;;  %v5503_v43 = vpop.f32.mrf.mxu3  ;;  %v5934_v60 = vmul.f32 %v5872_v30, %v5822_v58 }
 0x9c8   : > { %13330 = vst [vmem:[#allocation116_spill] sm:$0xff] %v11965_v9  ;;  %6652 = vmatmul.msk.f32.gmra.mxu2 %vm612_vm2, %v11373_v14  ;;  %v5667_v24 = vpop.f32.mrf.mxu1  ;;  %v11989_v46 = vpop.permute.xlu1 %5919 }
 0x9cb   : > { %v5372_v23 = vpop.f32.mrf.mxu2 }
 0x9cc   : > { %v5456_v52 = vmul.f32 %v13331_v51, %v5372_v23  ;;  %v5606_v23 = vmul.f32 %v13334_v49, %v5494_v44  ;;  %v13335_v51 = vld [vmem:[#allocation127_spill] sm:$0xff]  ;;  %v11992_v9 = vpop.permute.xlu0 %5927 }
 0x9ce   : > { %v11973_v25 = vadd.f32 %v5456_v52, %v11856_v5  ;;  %v5825_v47 = vpop.f32.mrf.mxu0  ;;  %v5770_v5 = vmul.f32 %v11780_v2, %v5658_v56  ;;  %v6036_v29 = vpop.permute.xlu2 %6035 }
 0x9cf   : > { %v5506_v49 = vpop.f32.mrf.mxu3 }
 0x9d0   : > { %13332 = vst [vmem:[#allocation179_spill] sm:$0xff] %v11973_v25  ;;  %6653 = vmatmul.msk.f32.gmra.mxu2 %vm612_vm2, %v11394_v36  ;;  %v5622_v36 = vadd.f32 %v5606_v23, %v11714_v45  ;;  %v5771_v45 = vmul.f32 %v11756_v63, %v5661_v8  ;;  %v5935_v23 = vmul.f32 %v11927_v3, %v5825_v47 }
 0x9d1   : > { %v5772_v63 = vmul.f32 %v11847_v59, %v5664_v16 }
 0x9d2   : > { %v5786_v39 = vadd.f32 %v5770_v5, %v5622_v36  ;;  %v13338_v5 = vld [vmem:[#allocation130_spill] sm:$0xff] }
 0x9d3   : > { %v5375_v14 = vpop.f32.mrf.mxu2  ;;  %v5608_v36 = vmul.f32 %v13338_v5, %v5500_v15 }
 0x9d4   : > { %v5457_v40 = vmul.f32 %v13335_v51, %v5375_v14  ;;  %v13337_v14 = vld [vmem:[#allocation221_spill] sm:$0xff]  ;;  %v5950_v2 = vadd.f32 %v5934_v60, %v5786_v39  ;;  %v6040_v39 = vpop.permute.xlu0 %6039 }
 0x9d5   : > { %v5607_v51 = vmul.f32 %v13337_v14, %v5497_v10  ;;  %v12005_v10 = vpop.permute.xlu1 %5931  ;;  %v5624_v3 = vadd.f32 %v5608_v36, %v11768_v21 }
 0x9d6   : > { %v11987_v52 = vadd.f32 %v5457_v40, %v11881_v61  ;;  %v5828_v25 = vpop.f32.mrf.mxu0  ;;  %v5670_v61 = vpop.f32.mrf.mxu1 }
 0x9d7   : > { %v5623_v58 = vadd.f32 %v5607_v51, %v11740_v4  ;;  %v5936_v47 = vmul.f32 %v11917_v32, %v5828_v25  ;;  %v5788_v51 = vadd.f32 %v5772_v63, %v5624_v3  ;;  %v6048_v5 = vpop.permute.xlu2 %6047 }
 0x9d8   : > { %13336 = vst [vmem:[#allocation42_spill] sm:$0xff] %v11987_v52  ;;  %v5509_v52 = vpop.f32.mrf.mxu3 }
 0x9db   : > { %v5986_v44 = vpop.f32.mrf.mxu2 }
 0x9dc   : > { %v6098_v56 = vmul.f32 %v6036_v29, %v5986_v44  ;;  %v5787_v29 = vadd.f32 %v5771_v45, %v5623_v58  ;;  %v5952_v58 = vadd.f32 %v5936_v47, %v5788_v51 }
 0x9de   : > { %v6114_v40 = vadd.f32 %v6098_v56, %v5950_v2  ;;  %v5831_v30 = vpop.f32.mrf.mxu0  ;;  %v5951_v44 = vadd.f32 %v5935_v23, %v5787_v29  ;;  %v5673_v4 = vpop.f32.mrf.mxu1  ;;  %v5773_v29 = vmul.f32 %v11807_v18, %v5667_v24  ;;  %v5774_v18 = vmul.f32 %v11791_v54, %v5670_v61 }
 0x9df   : > { %v6044_v56 = vpop.permute.xlu1 %6043  ;;  %v5937_v21 = vmul.f32 %v11941_v50, %v5831_v30  ;;  %v5775_v54 = vmul.f32 %v11839_v0, %v5673_v4 }
 0x9e0   : > { %6130 = vst.msk [vmem:[%s11998_s17] sm:$0xff] %vm498_vm1, %v6114_v40  ;;  %v13339_v40 = vld [vmem:[#allocation13_spill] sm:$0xff] }
 0x9e1   : > { %v5609_v15 = vmul.f32 %v13339_v40, %v5503_v43 }
 0x9e3   : > { %v5989_v60 = vpop.f32.mrf.mxu2 }
 0x9e4   : > { %v6099_v14 = vmul.f32 %v6040_v39, %v5989_v60  ;;  %v5512_v39 = vpop.f32.mrf.mxu3  ;;  %v5625_v60 = vadd.f32 %v5609_v15, %v11793_v19 }
 0x9e6   : > { %v6115_v8 = vadd.f32 %v6099_v14, %v5951_v44  ;;  %v5834_v2 = vpop.f32.mrf.mxu0  ;;  %v5676_v32 = vpop.f32.mrf.mxu1  ;;  %v5789_v25 = vadd.f32 %v5773_v29, %v5625_v60  ;;  %v13340_v44 = vld [vmem:[#allocation78_spill] sm:$0xff]  ;;  %v13342_v60 = vld [vmem:[#allocation123_spill] sm:$0xff] }
 0x9e7   : > { %v5610_v43 = vmul.f32 %v13340_v44, %v5506_v49  ;;  %v5938_v19 = vmul.f32 %v11933_v6, %v5834_v2  ;;  %v6052_v30 = vpop.permute.xlu1 %6051  ;;  %v6056_v2 = vpop.permute.xlu2 %6055  ;;  %v5776_v0 = vmul.f32 %v11822_v28, %v5676_v32 }
 0x9e8   : > { %6131 = vst.msk [vmem:[%s11998_s17 + $0x8] sm:$0xff] %vm498_vm1, %v6115_v8  ;;  %v5953_v14 = vadd.f32 %v5937_v21, %v5789_v25  ;;  %v5612_v21 = vmul.f32 %v13342_v60, %v5512_v39  ;;  %v6060_v44 = vpop.permute.xlu0 %6059 }
 0x9e9   : > { %v5626_v3 = vadd.f32 %v5610_v43, %v11816_v26 }
 0x9eb   : > { %v5992_v45 = vpop.f32.mrf.mxu2  ;;  %v5790_v47 = vadd.f32 %v5774_v18, %v5626_v3 }
 0x9ec   : > { %v6100_v23 = vmul.f32 %v6044_v56, %v5992_v45  ;;  %v5515_v50 = vpop.f32.mrf.mxu3  ;;  %v13341_v45 = vld [vmem:[#allocation34_spill] sm:$0xff] }
 0x9ed   : > { %v5611_v49 = vmul.f32 %v13341_v45, %v5509_v52  ;;  %v5954_v40 = vadd.f32 %v5938_v19, %v5790_v47 }
 0x9ee   : > { %v6116_v59 = vadd.f32 %v6100_v23, %v5952_v58  ;;  %v5837_v16 = vpop.f32.mrf.mxu0  ;;  %v5679_v51 = vpop.f32.mrf.mxu1 }
 0x9ef   : > { %v5627_v26 = vadd.f32 %v5611_v49, %v11837_v42  ;;  %v5939_v6 = vmul.f32 %v11945_v17, %v5837_v16  ;;  %v5628_v42 = vadd.f32 %v5612_v21, %v11862_v53  ;;  %v5777_v3 = vmul.f32 %v11874_v35, %v5679_v51 }
 0x9f0   : > { %6132 = vst.msk [vmem:[%s11998_s17 + $0x10] sm:$0xff] %vm498_vm1, %v6116_v59  ;;  %v6072_v60 = vpop.permute.xlu0 %6071 }
 0x9f1   : > { %v5791_v23 = vadd.f32 %v5775_v54, %v5627_v26  ;;  %v5792_v16 = vadd.f32 %v5776_v0, %v5628_v42  ;;  %v6068_v54 = vpop.permute.xlu2 %6067 }
 0x9f3   : > { %v5995_v36 = vpop.f32.mrf.mxu2  ;;  %v5955_v52 = vadd.f32 %v5939_v6, %v5791_v23 }
 0x9f4   : > { %v6101_v63 = vmul.f32 %v6048_v5, %v5995_v36  ;;  %v5518_v29 = vpop.f32.mrf.mxu3 }
 0x9f6   : > { %v6117_v24 = vadd.f32 %v6101_v63, %v5953_v14  ;;  %v5840_v8 = vpop.f32.mrf.mxu0  ;;  %v5682_v5 = vpop.f32.mrf.mxu1  ;;  %v13343_v14 = vld [vmem:[#allocation110_spill] sm:$0xff] }
 0x9f7   : > { %v5940_v17 = vmul.f32 %v11957_v57, %v5840_v8  ;;  %v5613_v63 = vmul.f32 %v13343_v14, %v5515_v50  ;;  %v13346_v14 = vld [vmem:[#allocation3_spill] sm:$0xff] }
 0x9f8   : > { %6133 = vst.msk [vmem:[%s11998_s17 + $0x18] sm:$0xff] %vm498_vm1, %v6117_v24 }
 0x9f9   : > { %v5956_v39 = vadd.f32 %v5940_v17, %v5792_v16  ;;  %v5629_v19 = vadd.f32 %v5613_v63, %v11885_v7 }
 0x9fb   : > { %v5998_v56 = vpop.f32.mrf.mxu2  ;;  %v5793_v8 = vadd.f32 %v5777_v3, %v5629_v19  ;;  %v6080_v19 = vpop.permute.xlu2 %6079 }
 0x9fc   : > { %v6102_v15 = vmul.f32 %v6052_v30, %v5998_v56  ;;  %v5521_v24 = vpop.f32.mrf.mxu3  ;;  %v6064_v30 = vpop.permute.xlu1 %6063  ;;  %v13344_v56 = vld [vmem:[#allocation118_spill] sm:$0xff] }
 0x9fd   : > { %v5614_v50 = vmul.f32 %v13344_v56, %v5518_v29  ;;  %v5615_v6 = vmul.f32 %v11609_v13, %v5521_v24 }
 0x9fe   : > { %v6118_v61 = vadd.f32 %v6102_v15, %v5954_v40  ;;  %v5843_v58 = vpop.f32.mrf.mxu0  ;;  %v5685_v32 = vpop.f32.mrf.mxu1  ;;  %v5778_v40 = vmul.f32 %v11870_v12, %v5682_v5  ;;  %v13345_v5 = vld [vmem:[#allocation165_spill] sm:$0xff] }
 0x9ff   : > { %v5941_v53 = vmul.f32 %v11947_v20, %v5843_v58  ;;  %v5630_v15 = vadd.f32 %v5614_v50, %v11901_v31  ;;  %v5779_v12 = vmul.f32 %v11851_v48, %v5685_v32 }
 0xa00   : > { %6134 = vst.msk [vmem:[%s11998_s17 + $0x20] sm:$0xff] %vm498_vm1, %v6118_v61 }
 0xa01   : > { %v5957_v45 = vadd.f32 %v5941_v53, %v5793_v8  ;;  %v5794_v61 = vadd.f32 %v5778_v40, %v5630_v15  ;;  %v13348_v15 = vld [vmem:[#allocation143_spill] sm:$0xff] }
 0xa03   : > { %v6001_v59 = vpop.f32.mrf.mxu2 }
 0xa04   : > { %v6103_v25 = vmul.f32 %v6056_v2, %v6001_v59  ;;  %v5524_v51 = vpop.f32.mrf.mxu3  ;;  %v5631_v59 = vadd.f32 %v5615_v6, %v11913_v62  ;;  %v6076_v17 = vpop.permute.xlu1 %6075 }
 0xa05   : > { %v5616_v0 = vmul.f32 %v13345_v5, %v5524_v51 }
 0xa06   : > { %v6119_v4 = vadd.f32 %v6103_v25, %v5955_v52  ;;  %v5846_v36 = vpop.f32.mrf.mxu0  ;;  %v5688_v20 = vpop.f32.mrf.mxu1  ;;  %v5795_v21 = vadd.f32 %v5779_v12, %v5631_v59 }
 0xa07   : > { %v5942_v7 = vmul.f32 %v11960_v27, %v5846_v36  ;;  %v5780_v48 = vmul.f32 %v11894_v38, %v5688_v20  ;;  %v5632_v62 = vadd.f32 %v5616_v0, %v11925_v33 }
 0xa08   : > { %6135 = vst.msk [vmem:[%s11998_s17 + $0x28] sm:$0xff] %vm498_vm1, %v6119_v4 }
 0xa09   : > { %v5958_v2 = vadd.f32 %v5942_v7, %v5794_v61  ;;  %v5796_v16 = vadd.f32 %v5780_v48, %v5632_v62 }
 0xa0b   : > { %v6004_v43 = vpop.f32.mrf.mxu2 }
 0xa0c   : > { %v6104_v18 = vmul.f32 %v6060_v44, %v6004_v43  ;;  %v5527_v27 = vpop.f32.mrf.mxu3  ;;  %v6088_v12 = vpop.permute.xlu1 %6087 }
 0xa0d   : > { %v5617_v63 = vmul.f32 %v13346_v14, %v5527_v27  ;;  %v13352_v27 = vld [vmem:[#allocation12_spill] sm:$0xff] }
 0xa0e   : > { %v6120_v28 = vadd.f32 %v6104_v18, %v5956_v39  ;;  %v5849_v57 = vpop.f32.mrf.mxu0  ;;  %v5691_v52 = vpop.f32.mrf.mxu1 }
 0xa0f   : > { %v5943_v31 = vmul.f32 %v11970_v22, %v5849_v57  ;;  %v5781_v3 = vmul.f32 %v11891_v55, %v5691_v52  ;;  %v5633_v33 = vadd.f32 %v5617_v63, %v11937_v34 }
 0xa10   : > { %6136 = vst.msk [vmem:[%s11998_s17 + $0x30] sm:$0xff] %vm498_vm1, %v6120_v28 }
 0xa11   : > { %v5959_v13 = vadd.f32 %v5943_v31, %v5795_v21  ;;  %v5797_v32 = vadd.f32 %v5781_v3, %v5633_v33  ;;  %v13357_v3 = vld [vmem:[#allocation42_spill] sm:$0xff] }
 0xa13   : > { %v6007_v47 = vpop.f32.mrf.mxu2 }
 0xa14   : > { %v6105_v49 = vmul.f32 %v6064_v30, %v6007_v47  ;;  %v5530_v44 = vpop.f32.mrf.mxu3 }
 0xa15   : > { %v5618_v57 = vmul.f32 %v11626_v1, %v5530_v44 }
 0xa16   : > { %v6121_v35 = vadd.f32 %v6105_v49, %v5957_v45  ;;  %v5852_v58 = vpop.f32.mrf.mxu0  ;;  %v5694_v24 = vpop.f32.mrf.mxu1  ;;  %v13347_v45 = vld [vmem:[#allocation62_spill] sm:$0xff] }
 0xa17   : > { %v5944_v22 = vmul.f32 %v11962_v41, %v5852_v58  ;;  %v5782_v56 = vmul.f32 %v11877_v37, %v5694_v24  ;;  %v5634_v49 = vadd.f32 %v5618_v57, %v13347_v45 }
 0xa18   : > { %6137 = vst.msk [vmem:[%s11998_s17 + $0x38] sm:$0xff] %vm498_vm1, %v6121_v35  ;;  %v6084_v35 = vpop.permute.xlu0 %6083 }
 0xa19   : > { %v5960_v39 = vadd.f32 %v5944_v22, %v5796_v16  ;;  %v5798_v40 = vadd.f32 %v5782_v56, %v5634_v49  ;;  %v13355_v16 = vld [vmem:[#allocation102_spill] sm:$0xff] }
 0xa1b   : > { %v6010_v26 = vpop.f32.mrf.mxu2 }
 0xa1c   : > { %v6106_v23 = vmul.f32 %v6068_v54, %v6010_v26  ;;  %v5533_v47 = vpop.f32.mrf.mxu3  ;;  %v13349_v54 = vld [vmem:[#allocation188_spill] sm:$0xff] }
 0xa1d   : > { %v5619_v1 = vmul.f32 %v13348_v15, %v5533_v47  ;;  %v13350_v26 = vld [vmem:[#allocation116_spill] sm:$0xff] }
 0xa1e   : > { %v6122_v29 = vadd.f32 %v6106_v23, %v5958_v2  ;;  %v5855_v36 = vpop.f32.mrf.mxu0  ;;  %v5697_v50 = vpop.f32.mrf.mxu1  ;;  %v13351_v2 = vld [vmem:[#allocation88_spill] sm:$0xff] }
 0xa1f   : > { %v5945_v41 = vmul.f32 %v11975_v11, %v5855_v36  ;;  %v5783_v61 = vmul.f32 %v13349_v54, %v5697_v50  ;;  %v5635_v6 = vadd.f32 %v5619_v1, %v13350_v26 }
 0xa20   : > { %6138 = vst.msk [vmem:[%s11998_s17 + $0x40] sm:$0xff] %vm498_vm1, %v6122_v29  ;;  %v6096_v33 = vpop.permute.xlu0 %6095 }
 0xa21   : > { %v5961_v8 = vadd.f32 %v5945_v41, %v5797_v32  ;;  %v5799_v29 = vadd.f32 %v5783_v61, %v5635_v6 }
 0xa23   : > { %v6013_v25 = vpop.f32.mrf.mxu2 }
 0xa24   : > { %v6107_v4 = vmul.f32 %v6072_v60, %v6013_v25  ;;  %v5536_v58 = vpop.f32.mrf.mxu3  ;;  %v13353_v25 = vld [vmem:[#allocation95_spill] sm:$0xff] }
 0xa25   : > { %v5620_v60 = vmul.f32 %v13352_v27, %v5536_v58 }
 0xa26   : > { %v6123_v42 = vadd.f32 %v6107_v4, %v5959_v13  ;;  %v5858_v28 = vpop.f32.mrf.mxu0  ;;  %v13354_v13 = vld [vmem:[#allocation179_spill] sm:$0xff] }
 0xa27   : > { %v5946_v34 = vmul.f32 %v11989_v46, %v5858_v28  ;;  %v5700_v46 = vpop.f32.mrf.mxu1  ;;  %v5636_v4 = vadd.f32 %v5620_v60, %v13354_v13 }
 0xa28   : > { %6139 = vst.msk [vmem:[%s11998_s17 + $0x48] sm:$0xff] %vm498_vm1, %v6123_v42  ;;  %v5784_v5 = vmul.f32 %v13353_v25, %v5700_v46  ;;  %v6092_v42 = vpop.permute.xlu2 %6091 }
 0xa29   : > { %v5962_v7 = vadd.f32 %v5946_v34, %v5798_v40 }
 0xa2a   : > { %v5800_v62 = vadd.f32 %v5784_v5, %v5636_v4 }
 0xa2b   : > { %v6016_v43 = vpop.f32.mrf.mxu2 }
 0xa2c   : > { %v6108_v18 = vmul.f32 %v6076_v17, %v6016_v43  ;;  %v5539_v48 = vpop.f32.mrf.mxu3 }
 0xa2d   : > { %v5621_v44 = vmul.f32 %v13355_v16, %v5539_v48 }
 0xa2e   : > { %v6124_v38 = vadd.f32 %v6108_v18, %v5960_v39  ;;  %v5861_v11 = vpop.f32.mrf.mxu0  ;;  %v13356_v39 = vld [vmem:[#allocation91_spill] sm:$0xff] }
 0xa2f   : > { %v5947_v23 = vmul.f32 %v13351_v2, %v5861_v11  ;;  %v5703_v22 = vpop.f32.mrf.mxu1 }
 0xa30   : > { %6140 = vst.msk [vmem:[%s11998_s17 + $0x50] sm:$0xff] %vm498_vm1, %v6124_v38  ;;  %v5785_v18 = vmul.f32 %v13356_v39, %v5703_v22  ;;  %v5637_v38 = vadd.f32 %v5621_v44, %v13357_v3 }
 0xa31   : > { %v5963_v21 = vadd.f32 %v5947_v23, %v5799_v29 }
 0xa32   : > { %v5801_v28 = vadd.f32 %v5785_v18, %v5637_v38 }
 0xa33   : > { %v6019_v53 = vpop.f32.mrf.mxu2 }
 0xa34   : > { %v6109_v30 = vmul.f32 %v6080_v19, %v6019_v53 }
 0xa36   : > { %v6125_v55 = vadd.f32 %v6109_v30, %v5961_v8  ;;  %v5864_v59 = vpop.f32.mrf.mxu0 }
 0xa37   : > { %v5948_v36 = vmul.f32 %v11992_v9, %v5864_v59 }
 0xa38   : > { %6141 = vst.msk [vmem:[%s11998_s17 + $0x58] sm:$0xff] %vm498_vm1, %v6125_v55 }
 0xa39   : > { %v5964_v43 = vadd.f32 %v5948_v36, %v5800_v62 }
 0xa3b   : > { %v6022_v51 = vpop.f32.mrf.mxu2 }
 0xa3c   : > { %v6110_v20 = vmul.f32 %v6084_v35, %v6022_v51 }
 0xa3e   : > { %v6126_v37 = vadd.f32 %v6110_v20, %v5962_v7  ;;  %v5867_v63 = vpop.f32.mrf.mxu0 }
 0xa3f   : > { %v5949_v9 = vmul.f32 %v12005_v10, %v5867_v63 }
 0xa40   : > { %6142 = vst.msk [vmem:[%s11998_s17 + $0x60] sm:$0xff] %vm498_vm1, %v6126_v37 }
 0xa41   : > { %v5965_v32 = vadd.f32 %v5949_v9, %v5801_v28 }
 0xa43   : > { %v6025_v31 = vpop.f32.mrf.mxu2 }
 0xa44   : > { %v6111_v52 = vmul.f32 %v6088_v12, %v6025_v31 }
 0xa46   : > { %v6127_v0 = vadd.f32 %v6111_v52, %v5963_v21 }
 0xa48   : > { %6143 = vst.msk [vmem:[%s11998_s17 + $0x68] sm:$0xff] %vm498_vm1, %v6127_v0 }
 0xa4b   : > { %v6028_v17 = vpop.f32.mrf.mxu2 }
 0xa4c   : > { %v6112_v14 = vmul.f32 %v6092_v42, %v6028_v17 }
 0xa4e   : > { %v6128_v24 = vadd.f32 %v6112_v14, %v5964_v43 }
 0xa50   : > { %6144 = vst.msk [vmem:[%s11998_s17 + $0x70] sm:$0xff] %vm498_vm1, %v6128_v24 }
 0xa53   : > { %v6031_v41 = vpop.f32.mrf.mxu2 }
 0xa54   : > { %v6113_v19 = vmul.f32 %v6096_v33, %v6031_v41 }
 0xa56   : > { %v6129_v53 = vadd.f32 %v6113_v19, %v5965_v32 }
 0xa58   : > { %6145 = vst.msk [vmem:[%s11998_s17 + $0x78] sm:$0xff] %vm498_vm1, %v6129_v53 }
 0xa59 PF: > { %s19_s13 = sadd.s32 1, %s6940_s13   ;;  %s13358_s30 = smov %s6932_s11 }
 0xa5a   : > { %p16_p7 = scmp.ge.s32.totalorder %s19_s13, 6   ;;  %s13359_s10 = smov %s6936_s12 }
 0xa5b   : > { %s13360_s11 = smov %s13363_s14  ;;  %s13361_s12 = smov %s13367_s15 }
 0xa5c   :  { %18 = sbr.rel (!%p16_p7) target bundleno = 3 (0x3), region = 101 }

</bundles_post_ra>
